<compile_context>
chip_gen: v7x
topology: tpu7x:2x2x1
jax: 0.10.0
libtpu: 0.0.40
codegen_flags: <defaults>
</compile_context>

<pallas_src>
import numpy as np

import jax
import jax.numpy as jnp
from jax.experimental import pallas as pl
from jax.experimental.pallas import tpu as pltpu


# ----------------------------- device helper ------------------------------ #
_MULTI_TC_CACHE = None


def _is_multi_tc_chip():
    """True only on chips with 2 TensorCores (v7x): the 2-block M split pays
    there; on v5e/v6e it is a serial loop with pure per-step overhead."""
    global _MULTI_TC_CACHE
    if _MULTI_TC_CACHE is None:
        try:
            kind = jax.devices()[0].device_kind.lower()
        except Exception:
            kind = ""
        _MULTI_TC_CACHE = ("v7" in kind) or ("7x" in kind)
    return _MULTI_TC_CACHE


# ----------------------------- Pallas kernels ------------------------------ #
def _bn_epilogue(acc, gamma, beta, gmat, inv_count):
    """Training-mode BatchNorm on the f32 accumulator.  `gmat` (0/1) pools the
    per-column stats over the phase groups of each channel (None = ungrouped)."""
    colsum = jnp.sum(acc, axis=0, keepdims=True)
    colsq = jnp.sum(acc * acc, axis=0, keepdims=True)
    if gmat is not None:
        mean = jnp.dot(colsum, gmat, preferred_element_type=jnp.float32) * inv_count
        ex2 = jnp.dot(colsq, gmat, preferred_element_type=jnp.float32) * inv_count
    else:
        mean = colsum * inv_count
        ex2 = colsq * inv_count
    var = jnp.maximum(ex2 - mean * mean, 0.0)
    scale = gamma * jax.lax.rsqrt(var + 1e-5)
    shift = beta - mean * scale
    return acc * scale + shift


def _make_kernel(n_a, has_bias, has_bn, grouped_bn, has_tanh, inv_count):
    """matmul (K-split over n_a operands) + fused bias / BatchNorm / tanh."""

    def kernel(*refs):
        i = 0
        a_refs = refs[i:i + n_a]; i += n_a
        w_refs = refs[i:i + n_a]; i += n_a
        acc = jnp.dot(a_refs[0][...], w_refs[0][...],
                      preferred_element_type=jnp.float32)
        for t in range(1, n_a):
            acc = acc + jnp.dot(a_refs[t][...], w_refs[t][...],
                                preferred_element_type=jnp.float32)
        if has_bias:
            acc = acc + refs[i][...]
            i += 1
        if has_bn:
            gamma = refs[i][...]
            beta = refs[i + 1][...]
            i += 2
            gmat = None
            if grouped_bn:
                gmat = refs[i][...]
                i += 1
            acc = _bn_epilogue(acc, gamma, beta, gmat, inv_count)
        if has_tanh:
            acc = jnp.tanh(acc)
        out_ref = refs[-1]
        out_ref[...] = acc.astype(out_ref.dtype)

    return kernel


def fused_matmul(a_list, w_list, *, bias=None, gamma=None, beta=None,
                 bn_groups=1, group_mat=None, tanh=False,
                 out_dtype=jnp.bfloat16):
    """out = epilogue(sum_i a_i @ w_i); a_i bf16 [M,K_i], w_i bf16 [K_i,N]."""
    M = a_list[0].shape[0]
    N = w_list[0].shape[1]
    has_bn = gamma is not None
    grouped = has_bn and bn_groups > 1
    # BN needs the whole output in one block (global batch stats).  The
    # 2-block M split is only worth it on 2-TensorCore chips (v7x).
    if (not has_bn) and M % 256 == 0 and M > 256 and _is_multi_tc_chip():
        tm = 256
    else:
        tm = M
    if has_bn:
        assert tm == M, "in-kernel BN stats require the full layer in one block"
    kernel = _make_kernel(len(a_list), bias is not None, has_bn, grouped,
                          tanh, 1.0 / float(bn_groups * M))

    inputs, in_specs = [], []
    for a in a_list:
        inputs.append(a)
        in_specs.append(pl.BlockSpec((tm, a.shape[1]), lambda i: (i, 0)))
    for w in w_list:
        inputs.append(w)
        in_specs.append(pl.BlockSpec(w.shape, lambda i: (0, 0)))
    for extra in (bias, gamma, beta, group_mat if grouped else None):
        if extra is not None:
            inputs.append(extra)
            in_specs.append(pl.BlockSpec(extra.shape, lambda i: (0, 0)))

    return pl.pallas_call(
        kernel,
        out_shape=jax.ShapeDtypeStruct((M, N), out_dtype),
        grid=(M // tm,),
        in_specs=in_specs,
        out_specs=pl.BlockSpec((tm, N), lambda i: (i, 0)),
        compiler_params=pltpu.CompilerParams(
            dimension_semantics=("parallel",) if tm != M else ("arbitrary",)),
    )(*inputs)


def _make_bottleneck_kernel(inv0, inv1):
    """Fused d1 -> d0 -> u0 -> u1 (innermost down, innermost up + BN, l1 up +
    BN).  All transposed convs are per-output-pixel effective-weight matmuls,
    so the body is pure 2-D dots + elementwise epilogues (no reshapes)."""

    def kernel(d1_ref, wd0_ref, wu0_ref, g0_ref, b0_ref, t0_ref,
               w1s_ref, w1u_ref, g1_ref, b1_ref, t1_ref, out_ref):
        d1 = d1_ref[...]                                   # bf16 [N, 4C]
        # innermost down: LeakyReLU(0.2) -> Conv2d(k4,s2,p1) on a 2x2 map
        a = jnp.where(d1 > 0, d1, 0.2 * d1)
        d0 = jnp.dot(a, wd0_ref[...], preferred_element_type=jnp.float32)
        # innermost up: ReLU -> ConvT(k4,s2,p1) 1x1->2x2 (center phase tap) -> BN
        b = jnp.maximum(d0, 0.0).astype(jnp.bfloat16)
        u0 = jnp.dot(b, wu0_ref[...], preferred_element_type=jnp.float32)
        u0 = _bn_epilogue(u0, g0_ref[...], b0_ref[...], t0_ref[...], inv0)
        # l1 up: ReLU(cat[d1, u0]) -> ConvT 2x2->4x4 via per-output-pixel
        # effective weights (output columns ordered (i, j, a, b, co)) -> BN.
        # The skip concat is realised as a K-split (two dots).
        r_skip = jnp.maximum(d1, 0)
        r_up = jnp.maximum(u0, 0.0).astype(jnp.bfloat16)
        u1 = (jnp.dot(r_skip, w1s_ref[...], preferred_element_type=jnp.float32)
              + jnp.dot(r_up, w1u_ref[...], preferred_element_type=jnp.float32))
        u1 = _bn_epilogue(u1, g1_ref[...], b1_ref[...], t1_ref[...], inv1)
        out_ref[...] = u1.astype(out_ref.dtype)

    return kernel


def bottleneck_fused(d1, bw):
    """d1 [N,2,2,8nf] -> u1 [N,4,4,4nf] in a single pallas_call."""
    n, h, w, c = d1.shape                      # h == w == 2
    d1_flat = d1.reshape(n, h * w * c)         # rows (n), cols (h, w, ci)
    ncols = bw["w1s"].shape[1]                 # 16 * cout1
    cout1 = ncols // 16
    kernel = _make_bottleneck_kernel(1.0 / (4.0 * n), 1.0 / (16.0 * n))
    args = [d1_flat, bw["wd0"], bw["wu0"],
            bw["bn0"]["g"], bw["bn0"]["b"], bw["bn0"]["T"],
            bw["w1s"], bw["w1u"],
            bw["bn1"]["g"], bw["bn1"]["b"], bw["bn1"]["T"]]
    out = pl.pallas_call(
        kernel,
        out_shape=jax.ShapeDtypeStruct((n, ncols), jnp.bfloat16),
        grid=(1,),
        in_specs=[pl.BlockSpec(a.shape, lambda i: (0, 0)) for a in args],
        out_specs=pl.BlockSpec((n, ncols), lambda i: (0, 0)),
        compiler_params=pltpu.CompilerParams(dimension_semantics=("arbitrary",)),
    )(*args)
    # columns are (i, j, a, b, co) -> pixel shuffle to [N, 4, 4, cout1]
    out = out.reshape(n, 2, 2, 2, 2, cout1).transpose(0, 1, 3, 2, 4, 5)
    return out.reshape(n, 4, 4, cout1)


# ------------------------------ conv wrappers ------------------------------ #
def conv_down(x, wmat, *, leaky=False, bn=None):
    """Conv2d(k=4,s=2,p=1,bias=False) with fused pre-LeakyReLU / post-BN."""
    n, h, wdt, cin = x.shape
    hout, wout = h // 2, wdt // 2
    x = x.astype(jnp.bfloat16)                 # im2col runs in bf16
    if leaky:
        x = jnp.where(x > 0, x, 0.2 * x)
    xp = jnp.pad(x, ((0, 0), (1, 1), (1, 1), (0, 0)))
    taps = [xp[:, kh:kh + 2 * hout:2, kw:kw + 2 * wout:2, :]
            for kh in range(4) for kw in range(4)]
    patches = jnp.stack(taps, axis=3).reshape(n * hout * wout, 16 * cin)
    if bn is None:
        out = fused_matmul([patches], [wmat])
    else:
        out = fused_matmul([patches], [wmat], gamma=bn["g"], beta=bn["b"])
    return out.reshape(n, hout, wout, -1)


def conv_up(xs, wmats, *, bias=None, bn=None, tanh=False,
            out_dtype=jnp.bfloat16):
    """ReLU -> ConvTranspose2d(k=4,s=2,p=1), phase-decomposed.

    `xs` are the channel groups of the (never materialised) skip concat,
    `wmats` the matching [9*Cin_i, 4*Cout] phase weight matrices.  Optional
    fused bias / BatchNorm / Tanh epilogues run inside the kernel.
    """
    n, h, wdt, _ = xs[0].shape
    a_list = []
    for x in xs:
        x = jnp.maximum(x.astype(jnp.bfloat16), 0)            # uprelu (bf16)
        xp = jnp.pad(x, ((0, 0), (1, 1), (1, 1), (0, 0)))
        cin = x.shape[-1]
        taps = [xp[:, r:r + h, c:c + wdt, :]
                for r in range(3) for c in range(3)]
        a_list.append(jnp.stack(taps, axis=3).reshape(n * h * wdt, 9 * cin))
    # TODO(synk): in-kernel per-tap accumulation (review item 4) skipped —
    #             requires 4-D slicing + row-collapse reshapes inside the kernel.
    if bn is None:
        out = fused_matmul(a_list, wmats, bias=bias, tanh=tanh,
                           out_dtype=out_dtype)
    else:
        out = fused_matmul(a_list, wmats, gamma=bn["g"], beta=bn["b"],
                           bn_groups=4, group_mat=bn["T"], out_dtype=out_dtype)
    cout = out.shape[1] // 4
    out = out.reshape(n, h, wdt, 2, 2, cout)          # (..., a, b, co)
    out = out.transpose(0, 1, 3, 2, 4, 5).reshape(n, 2 * h, 2 * wdt, cout)
    return out


# ------------------------------- parameters ------------------------------- #
def _uniform(key, shape, bound):
    return jax.random.uniform(key, shape, jnp.float32, -bound, bound)


def init_generator_params(key, input_nc, output_nc, nf):
    keys = iter(jax.random.split(key, 16))

    def conv_w(cout, cin):          # Conv2d weight [Cout, Cin, 4, 4]
        return _uniform(next(keys), (cout, cin, 4, 4), 1.0 / np.sqrt(cin * 16))

    def convT_w(cin, cout):         # ConvTranspose2d weight [Cin, Cout, 4, 4]
        # PyTorch's default init computes fan_in = weight.size(1)*k*k = Cout*16.
        return _uniform(next(keys), (cin, cout, 4, 4), 1.0 / np.sqrt(cout * 16))

    ones, zeros = jnp.ones, jnp.zeros
    p = {}
    p["l0"] = dict(down_w=conv_w(nf * 8, nf * 8),                 # innermost
                   up_w=convT_w(nf * 8, nf * 8),
                   up_g=ones(nf * 8), up_b=zeros(nf * 8))
    p["l1"] = dict(down_w=conv_w(nf * 8, nf * 4),
                   dn_g=ones(nf * 8), dn_b=zeros(nf * 8),
                   up_w=convT_w(nf * 16, nf * 4),
                   up_g=ones(nf * 4), up_b=zeros(nf * 4))
    p["l2"] = dict(down_w=conv_w(nf * 4, nf * 2),
                   dn_g=ones(nf * 4), dn_b=zeros(nf * 4),
                   up_w=convT_w(nf * 8, nf * 2),
                   up_g=ones(nf * 2), up_b=zeros(nf * 2))
    p["l3"] = dict(down_w=conv_w(nf * 2, nf),
                   dn_g=ones(nf * 2), dn_b=zeros(nf * 2),
                   up_w=convT_w(nf * 4, nf),
                   up_g=ones(nf), up_b=zeros(nf))
    p["l4"] = dict(down_w=conv_w(nf, input_nc),                   # outermost
                   up_w=convT_w(nf * 2, output_nc),
                   up_bias=_uniform(next(keys), (output_nc,),
                                    1.0 / np.sqrt(output_nc * 16)))
    return p


# Phase-selection tensor S[a, r, kh]: output row-phase a, 3x3 neighbourhood
# tap r, contributing transposed-conv kernel row kh (k=4, s=2, p=1).
_PHASE_SEL = np.zeros((2, 3, 4), np.float32)
_PHASE_SEL[0, 0, 3] = 1.0
_PHASE_SEL[0, 1, 1] = 1.0
_PHASE_SEL[1, 1, 2] = 1.0
_PHASE_SEL[1, 2, 0] = 1.0


def _down_wmat(w):
    """Conv2d weight [Cout,Cin,4,4] -> bf16 matmul weight [(kh,kw,ci), co]."""
    cout, cin = w.shape[0], w.shape[1]
    return jnp.transpose(w, (2, 3, 1, 0)).reshape(16 * cin, cout).astype(jnp.bfloat16)


def _phase_tensor(w):
    """ConvT weight [Cin,Cout,4,4] -> phase tensor (r,c,ci,a,b,co)."""
    s = jnp.asarray(_PHASE_SEL)
    return jnp.einsum("ark,bcl,iokl->rciabo", s, s, w)


def _up_phase_wmat(w):
    """ConvT weight -> bf16 phase matmul weight [(r,c,ci), (a,b,co)]."""
    cin, cout = w.shape[0], w.shape[1]
    wm = _phase_tensor(w)
    return wm.reshape(9 * cin, 4 * cout).astype(jnp.bfloat16)


def _center_phase_wmat(w):
    """Phase weight for a 1x1 input (only the centre tap r=c=1 is nonzero)."""
    cin, cout = w.shape[0], w.shape[1]
    wm = _phase_tensor(w)
    return wm[1, 1].reshape(cin, 4 * cout).astype(jnp.bfloat16)


def _eff_up_wmat_2x2(w):
    """Per-output-pixel effective phase weights for a 2x2 input.

    Returns [(h,w,ci), (i,j,a,b,co)] = [4*Cin, 16*Cout]: for output pixel
    (i,j) the contributing tap of input pixel (h,w) is (r,c)=(h-i+1, w-j+1).
    """
    cin, cout = w.shape[0], w.shape[1]
    wm = _phase_tensor(w)                                  # (r,c,ci,a,b,co)
    blocks = []
    for i in range(2):
        for j in range(2):
            blk = wm[1 - i:3 - i, 1 - j:3 - j]             # (h,w,ci,a,b,co)
            blocks.append(blk.reshape(4 * cin, 4 * cout))
    return jnp.concatenate(blocks, axis=1).astype(jnp.bfloat16)


def _bn_down(g, b):
    c = g.shape[0]
    return dict(g=g.reshape(1, c), b=b.reshape(1, c))


def _bn_tiled(g, b, reps):
    """gamma/beta tiled over `reps` column groups + 0/1 pooling matrix T."""
    c = g.shape[0]
    n = reps * c
    idx = np.arange(n)
    tmat = jnp.asarray((idx[:, None] % c == idx[None, :] % c).astype(np.float32))
    return dict(g=jnp.tile(g.reshape(1, c), (1, reps)),
                b=jnp.tile(b.reshape(1, c), (1, reps)),
                T=tmat)


def prepare_params(p):
    """One-time conversion to kernel-ready layouts (bf16 matmul weights etc.)."""
    q = {}
    for lvl in ("l2", "l3"):
        w = p[lvl]["up_w"]
        half = w.shape[0] // 2
        q[lvl] = {"down_w": _down_wmat(p[lvl]["down_w"]),
                  "dn_bn": _bn_down(p[lvl]["dn_g"], p[lvl]["dn_b"]),
                  "up_w": [_up_phase_wmat(w[:half]), _up_phase_wmat(w[half:])],
                  "up_bn": _bn_tiled(p[lvl]["up_g"], p[lvl]["up_b"], 4)}
    q["l1"] = {"down_w": _down_wmat(p["l1"]["down_w"]),
               "dn_bn": _bn_down(p["l1"]["dn_g"], p["l1"]["dn_b"])}
    w4 = p["l4"]["up_w"]
    half = w4.shape[0] // 2
    cout = w4.shape[1]
    q["l4"] = {"down_w": _down_wmat(p["l4"]["down_w"]),
               "up_w": [_up_phase_wmat(w4[:half]), _up_phase_wmat(w4[half:])],
               "up_bias": jnp.tile(p["l4"]["up_bias"].reshape(1, cout), (1, 4))}
    # fused bottleneck (l0 down + l0 up + l1 up)
    wd = p["l0"]["down_w"]                                 # [C, C, 4, 4]
    C = wd.shape[0]
    # 2x2 input padded to 4x4 -> only kernel taps kh,kw in {1,2} contribute.
    wd0 = jnp.transpose(wd[:, :, 1:3, 1:3], (2, 3, 1, 0)).reshape(4 * C, C)
    w1 = p["l1"]["up_w"]                                   # [2C, 4nf, 4, 4]
    q["bott"] = {
        "wd0": wd0.astype(jnp.bfloat16),
        "wu0": _center_phase_wmat(p["l0"]["up_w"]),
        "bn0": _bn_tiled(p["l0"]["up_g"], p["l0"]["up_b"], 4),
        "w1s": _eff_up_wmat_2x2(w1[:C]),                   # skip (d1) half
        "w1u": _eff_up_wmat_2x2(w1[C:]),                   # up (u0) half
        "bn1": _bn_tiled(p["l1"]["up_g"], p["l1"]["up_b"], 16),
    }
    return q


# --------------------------------- forward --------------------------------- #
def generator_forward(prep, x_nchw):
    x = jnp.transpose(x_nchw, (0, 2, 3, 1)).astype(jnp.bfloat16)  # NCHW -> NHWC
    p1, p2, p3, p4 = (prep[k] for k in ("l1", "l2", "l3", "l4"))

    # encoder
    d4 = conv_down(x, p4["down_w"])                               # [N,16,16, nf]
    d3 = conv_down(d4, p3["down_w"], leaky=True, bn=p3["dn_bn"])  # [N,8,8, 2nf]
    d2 = conv_down(d3, p2["down_w"], leaky=True, bn=p2["dn_bn"])  # [N,4,4, 4nf]
    d1 = conv_down(d2, p1["down_w"], leaky=True, bn=p1["dn_bn"])  # [N,2,2, 8nf]

    # fused bottleneck: d1 -> d0 -> u0 -> u1 in a single pallas_call
    u1 = bottleneck_fused(d1, prep["bott"])                       # [N,4,4, 4nf]

    # decoder (skip concats realised as K-splits inside the up kernels)
    u2 = conv_up([d2, u1], p2["up_w"], bn=p2["up_bn"])            # [N,8,8, 2nf]
    u3 = conv_up([d3, u2], p3["up_w"], bn=p3["up_bn"])            # [N,16,16, nf]
    out = conv_up([d4, u3], p4["up_w"], bias=p4["up_bias"], tanh=True,
                  out_dtype=jnp.float32)                          # [N,32,32, out_nc]
    return jnp.transpose(out, (0, 3, 1, 2))                       # NHWC -> NCHW


# ----------------------------------- main ----------------------------------- #
if __name__ == "__main__":
    input_nc, output_nc, nf = 3, 3, 8            # num_downs = 5 -> 32x32 input
    key = jax.random.PRNGKey(0)
    kp, kx = jax.random.split(key)
    raw_params = init_generator_params(kp, input_nc, output_nc, nf)
    prep = prepare_params(raw_params)            # one-time layout preparation
    x = jax.random.normal(kx, (2, input_nc, 32, 32), jnp.float32)  # NCHW

    fwd = jax.jit(generator_forward)
    out = fwd(prep, x)
    jax.block_until_ready(out)
    assert out.shape == (2, output_nc, 32, 32), out.shape
    assert bool(jnp.all(jnp.isfinite(out)))
    print("KERNEL_OK")
</pallas_src>

<mosaic_0001>
module attributes {stable_mosaic.version = 11 : i64} {
  func.func @kernel(%arg0: i32, %arg1: memref<512x48xbf16, #tpu.memory_space<vmem>>, %arg2: memref<48x8xbf16, #tpu.memory_space<vmem>>, %arg3: memref<512x8xbf16, #tpu.memory_space<vmem>>) attributes {dimension_semantics = [#tpu.dimension_semantics<arbitrary>], iteration_bounds = array<i64: 1>, scalar_prefetch = 0 : i64, scratch_operands = 0 : i64, tpu.core_type = #tpu.core_type<tc>, window_params = [{transform_indices = @transform_0, window_bounds = array<i64: 512, 48>}, {pipeline_mode = #tpu.pipeline_mode<synchronous>, transform_indices = @transform_1, window_bounds = array<i64: 48, 8>}, {transform_indices = @transform_2, window_bounds = array<i64: 512, 8>}]} {
    %c0 = arith.constant 0 : index
    %c0_0 = arith.constant 0 : index
    %0 = vector.load %arg1[%c0, %c0_0] : memref<512x48xbf16, #tpu.memory_space<vmem>>, vector<512x48xbf16>
    %c0_1 = arith.constant 0 : index
    %c0_2 = arith.constant 0 : index
    %1 = vector.load %arg2[%c0_1, %c0_2] : memref<48x8xbf16, #tpu.memory_space<vmem>>, vector<48x8xbf16>
    %cst = arith.constant dense<0.000000e+00> : vector<512x8xf32>
    %2 = tpu.matmul %0, %1, %cst {dimension_numbers = #tpu.dot_dimension_numbers<[1], [0], [0], [1], [0, 0, 1, 1], [], []>} : vector<512x48xbf16>, vector<48x8xbf16>, vector<512x8xf32> -> vector<512x8xf32>
    %3 = arith.truncf %2 : vector<512x8xf32> to vector<512x8xbf16>
    %c0_3 = arith.constant 0 : index
    %c0_4 = arith.constant 0 : index
    %4 = vector.load %arg3[%c0_3, %c0_4] : memref<512x8xbf16, #tpu.memory_space<vmem>>, vector<512x8xbf16>
    tpu.vector_store %arg3[%c0_3, %c0_4], %3 {strides = array<i32>} : memref<512x8xbf16, #tpu.memory_space<vmem>>, vector<512x8xbf16>,
    return
  }
  func.func @transform_0(%arg0: i32) -> (i32, i32) {
    %c0_i32 = arith.constant 0 : i32
    %c0_i32_0 = arith.constant 0 : i32
    return %arg0, %c0_i32 : i32, i32
  }
  func.func @transform_1(%arg0: i32) -> (i32, i32) {
    %c0_i32 = arith.constant 0 : i32
    %c0_i32_0 = arith.constant 0 : i32
    %c0_i32_1 = arith.constant 0 : i32
    return %c0_i32, %c0_i32_0 : i32, i32
  }
  func.func @transform_2(%arg0: i32) -> (i32, i32) {
    %c0_i32 = arith.constant 0 : i32
    %c0_i32_0 = arith.constant 0 : i32
    return %arg0, %c0_i32 : i32, i32
  }
}

module attributes {stable_mosaic.version = 11 : i64} {
  func.func @kernel(%arg0: i32, %arg1: memref<128x128xbf16, #tpu.memory_space<vmem>>, %arg2: memref<128x16xbf16, #tpu.memory_space<vmem>>, %arg3: memref<1x16xf32, #tpu.memory_space<vmem>>, %arg4: memref<1x16xf32, #tpu.memory_space<vmem>>, %arg5: memref<128x16xbf16, #tpu.memory_space<vmem>>) attributes {dimension_semantics = [#tpu.dimension_semantics<arbitrary>], iteration_bounds = array<i64: 1>, scalar_prefetch = 0 : i64, scratch_operands = 0 : i64, tpu.core_type = #tpu.core_type<tc>, window_params = [{transform_indices = @transform_0, window_bounds = array<i64: 128, 128>}, {pipeline_mode = #tpu.pipeline_mode<synchronous>, transform_indices = @transform_1, window_bounds = array<i64: 128, 16>}, {pipeline_mode = #tpu.pipeline_mode<synchronous>, transform_indices = @transform_2, window_bounds = array<i64: 1, 16>}, {pipeline_mode = #tpu.pipeline_mode<synchronous>, transform_indices = @transform_3, window_bounds = array<i64: 1, 16>}, {transform_indices = @transform_4, window_bounds = array<i64: 128, 16>}]} {
    %c0 = arith.constant 0 : index
    %c0_0 = arith.constant 0 : index
    %0 = vector.load %arg1[%c0, %c0_0] : memref<128x128xbf16, #tpu.memory_space<vmem>>, vector<128x128xbf16>
    %c0_1 = arith.constant 0 : index
    %c0_2 = arith.constant 0 : index
    %1 = vector.load %arg2[%c0_1, %c0_2] : memref<128x16xbf16, #tpu.memory_space<vmem>>, vector<128x16xbf16>
    %cst = arith.constant dense<0.000000e+00> : vector<128x16xf32>
    %2 = tpu.matmul %0, %1, %cst {dimension_numbers = #tpu.dot_dimension_numbers<[1], [0], [0], [1], [0, 0, 1, 1], [], []>} : vector<128x128xbf16>, vector<128x16xbf16>, vector<128x16xf32> -> vector<128x16xf32>
    %c0_3 = arith.constant 0 : index
    %c0_4 = arith.constant 0 : index
    %3 = vector.load %arg3[%c0_3, %c0_4] : memref<1x16xf32, #tpu.memory_space<vmem>>, vector<1x16xf32>
    %c0_5 = arith.constant 0 : index
    %c0_6 = arith.constant 0 : index
    %4 = vector.load %arg4[%c0_5, %c0_6] : memref<1x16xf32, #tpu.memory_space<vmem>>, vector<1x16xf32>
    %cst_7 = arith.constant dense<0.000000e+00> : vector<16xf32>
    %5 = vector.multi_reduction <add>, %2, %cst_7 [0] : vector<128x16xf32> to vector<16xf32>
    %6 = vector.shape_cast %5 : vector<16xf32> to vector<1x16xf32>
    %7 = arith.mulf %2, %2 : vector<128x16xf32>
    %cst_8 = arith.constant dense<0.000000e+00> : vector<16xf32>
    %8 = vector.multi_reduction <add>, %7, %cst_8 [0] : vector<128x16xf32> to vector<16xf32>
    %9 = vector.shape_cast %8 : vector<16xf32> to vector<1x16xf32>
    %cst_9 = arith.constant 7.812500e-03 : f32
    %10 = vector.broadcast %cst_9 : f32 to vector<1x16xf32>
    %11 = arith.mulf %6, %10 : vector<1x16xf32>
    %cst_10 = arith.constant 7.812500e-03 : f32
    %12 = vector.broadcast %cst_10 : f32 to vector<1x16xf32>
    %13 = arith.mulf %9, %12 : vector<1x16xf32>
    %14 = arith.mulf %11, %11 : vector<1x16xf32>
    %15 = arith.subf %13, %14 : vector<1x16xf32>
    %cst_11 = arith.constant 0.000000e+00 : f32
    %16 = vector.broadcast %cst_11 : f32 to vector<1x16xf32>
    %17 = arith.maximumf %15, %16 : vector<1x16xf32>
    %cst_12 = arith.constant 9.99999974E-6 : f32
    %18 = vector.broadcast %cst_12 : f32 to vector<1x16xf32>
    %19 = arith.addf %17, %18 : vector<1x16xf32>
    %20 = math.rsqrt %19 : vector<1x16xf32>
    %21 = arith.mulf %3, %20 : vector<1x16xf32>
    %22 = arith.mulf %11, %21 : vector<1x16xf32>
    %23 = arith.subf %4, %22 : vector<1x16xf32>
    %24 = vector.broadcast %21 : vector<1x16xf32> to vector<128x16xf32>
    %25 = arith.mulf %2, %24 : vector<128x16xf32>
    %26 = vector.broadcast %23 : vector<1x16xf32> to vector<128x16xf32>
    %27 = arith.addf %25, %26 : vector<128x16xf32>
    %28 = arith.truncf %27 : vector<128x16xf32> to vector<128x16xbf16>
    %c0_13 = arith.constant 0 : index
    %c0_14 = arith.constant 0 : index
    %29 = vector.load %arg5[%c0_13, %c0_14] : memref<128x16xbf16, #tpu.memory_space<vmem>>, vector<128x16xbf16>
    tpu.vector_store %arg5[%c0_13, %c0_14], %28 {strides = array<i32>} : memref<128x16xbf16, #tpu.memory_space<vmem>>, vector<128x16xbf16>,
    return
  }
  func.func @transform_0(%arg0: i32) -> (i32, i32) {
    %c0_i32 = arith.constant 0 : i32
    %c0_i32_0 = arith.constant 0 : i32
    return %arg0, %c0_i32 : i32, i32
  }
  func.func @transform_1(%arg0: i32) -> (i32, i32) {
    %c0_i32 = arith.constant 0 : i32
    %c0_i32_0 = arith.constant 0 : i32
    %c0_i32_1 = arith.constant 0 : i32
    return %c0_i32, %c0_i32_0 : i32, i32
  }
  func.func @transform_2(%arg0: i32) -> (i32, i32) {
    %c0_i32 = arith.constant 0 : i32
    %c0_i32_0 = arith.constant 0 : i32
    %c0_i32_1 = arith.constant 0 : i32
    return %c0_i32, %c0_i32_0 : i32, i32
  }
  func.func @transform_3(%arg0: i32) -> (i32, i32) {
    %c0_i32 = arith.constant 0 : i32
    %c0_i32_0 = arith.constant 0 : i32
    %c0_i32_1 = arith.constant 0 : i32
    return %c0_i32, %c0_i32_0 : i32, i32
  }
  func.func @transform_4(%arg0: i32) -> (i32, i32) {
    %c0_i32 = arith.constant 0 : i32
    %c0_i32_0 = arith.constant 0 : i32
    return %arg0, %c0_i32 : i32, i32
  }
}

module attributes {stable_mosaic.version = 11 : i64} {
  func.func @kernel(%arg0: i32, %arg1: memref<32x256xbf16, #tpu.memory_space<vmem>>, %arg2: memref<256x32xbf16, #tpu.memory_space<vmem>>, %arg3: memref<1x32xf32, #tpu.memory_space<vmem>>, %arg4: memref<1x32xf32, #tpu.memory_space<vmem>>, %arg5: memref<32x32xbf16, #tpu.memory_space<vmem>>) attributes {dimension_semantics = [#tpu.dimension_semantics<arbitrary>], iteration_bounds = array<i64: 1>, scalar_prefetch = 0 : i64, scratch_operands = 0 : i64, tpu.core_type = #tpu.core_type<tc>, window_params = [{transform_indices = @transform_0, window_bounds = array<i64: 32, 256>}, {pipeline_mode = #tpu.pipeline_mode<synchronous>, transform_indices = @transform_1, window_bounds = array<i64: 256, 32>}, {pipeline_mode = #tpu.pipeline_mode<synchronous>, transform_indices = @transform_2, window_bounds = array<i64: 1, 32>}, {pipeline_mode = #tpu.pipeline_mode<synchronous>, transform_indices = @transform_3, window_bounds = array<i64: 1, 32>}, {transform_indices = @transform_4, window_bounds = array<i64: 32, 32>}]} {
    %c0 = arith.constant 0 : index
    %c0_0 = arith.constant 0 : index
    %0 = vector.load %arg1[%c0, %c0_0] : memref<32x256xbf16, #tpu.memory_space<vmem>>, vector<32x256xbf16>
    %c0_1 = arith.constant 0 : index
    %c0_2 = arith.constant 0 : index
    %1 = vector.load %arg2[%c0_1, %c0_2] : memref<256x32xbf16, #tpu.memory_space<vmem>>, vector<256x32xbf16>
    %cst = arith.constant dense<0.000000e+00> : vector<32x32xf32>
    %2 = tpu.matmul %0, %1, %cst {dimension_numbers = #tpu.dot_dimension_numbers<[1], [0], [0], [1], [0, 0, 1, 1], [], []>} : vector<32x256xbf16>, vector<256x32xbf16>, vector<32x32xf32> -> vector<32x32xf32>
    %c0_3 = arith.constant 0 : index
    %c0_4 = arith.constant 0 : index
    %3 = vector.load %arg3[%c0_3, %c0_4] : memref<1x32xf32, #tpu.memory_space<vmem>>, vector<1x32xf32>
    %c0_5 = arith.constant 0 : index
    %c0_6 = arith.constant 0 : index
    %4 = vector.load %arg4[%c0_5, %c0_6] : memref<1x32xf32, #tpu.memory_space<vmem>>, vector<1x32xf32>
    %cst_7 = arith.constant dense<0.000000e+00> : vector<32xf32>
    %5 = vector.multi_reduction <add>, %2, %cst_7 [0] : vector<32x32xf32> to vector<32xf32>
    %6 = vector.shape_cast %5 : vector<32xf32> to vector<1x32xf32>
    %7 = arith.mulf %2, %2 : vector<32x32xf32>
    %cst_8 = arith.constant dense<0.000000e+00> : vector<32xf32>
    %8 = vector.multi_reduction <add>, %7, %cst_8 [0] : vector<32x32xf32> to vector<32xf32>
    %9 = vector.shape_cast %8 : vector<32xf32> to vector<1x32xf32>
    %cst_9 = arith.constant 3.125000e-02 : f32
    %10 = vector.broadcast %cst_9 : f32 to vector<1x32xf32>
    %11 = arith.mulf %6, %10 : vector<1x32xf32>
    %cst_10 = arith.constant 3.125000e-02 : f32
    %12 = vector.broadcast %cst_10 : f32 to vector<1x32xf32>
    %13 = arith.mulf %9, %12 : vector<1x32xf32>
    %14 = arith.mulf %11, %11 : vector<1x32xf32>
    %15 = arith.subf %13, %14 : vector<1x32xf32>
    %cst_11 = arith.constant 0.000000e+00 : f32
    %16 = vector.broadcast %cst_11 : f32 to vector<1x32xf32>
    %17 = arith.maximumf %15, %16 : vector<1x32xf32>
    %cst_12 = arith.constant 9.99999974E-6 : f32
    %18 = vector.broadcast %cst_12 : f32 to vector<1x32xf32>
    %19 = arith.addf %17, %18 : vector<1x32xf32>
    %20 = math.rsqrt %19 : vector<1x32xf32>
    %21 = arith.mulf %3, %20 : vector<1x32xf32>
    %22 = arith.mulf %11, %21 : vector<1x32xf32>
    %23 = arith.subf %4, %22 : vector<1x32xf32>
    %24 = vector.broadcast %21 : vector<1x32xf32> to vector<32x32xf32>
    %25 = arith.mulf %2, %24 : vector<32x32xf32>
    %26 = vector.broadcast %23 : vector<1x32xf32> to vector<32x32xf32>
    %27 = arith.addf %25, %26 : vector<32x32xf32>
    %28 = arith.truncf %27 : vector<32x32xf32> to vector<32x32xbf16>
    %c0_13 = arith.constant 0 : index
    %c0_14 = arith.constant 0 : index
    %29 = vector.load %arg5[%c0_13, %c0_14] : memref<32x32xbf16, #tpu.memory_space<vmem>>, vector<32x32xbf16>
    tpu.vector_store %arg5[%c0_13, %c0_14], %28 {strides = array<i32>} : memref<32x32xbf16, #tpu.memory_space<vmem>>, vector<32x32xbf16>,
    return
  }
  func.func @transform_0(%arg0: i32) -> (i32, i32) {
    %c0_i32 = arith.constant 0 : i32
    %c0_i32_0 = arith.constant 0 : i32
    return %arg0, %c0_i32 : i32, i32
  }
  func.func @transform_1(%arg0: i32) -> (i32, i32) {
    %c0_i32 = arith.constant 0 : i32
    %c0_i32_0 = arith.constant 0 : i32
    %c0_i32_1 = arith.constant 0 : i32
    return %c0_i32, %c0_i32_0 : i32, i32
  }
  func.func @transform_2(%arg0: i32) -> (i32, i32) {
    %c0_i32 = arith.constant 0 : i32
    %c0_i32_0 = arith.constant 0 : i32
    %c0_i32_1 = arith.constant 0 : i32
    return %c0_i32, %c0_i32_0 : i32, i32
  }
  func.func @transform_3(%arg0: i32) -> (i32, i32) {
    %c0_i32 = arith.constant 0 : i32
    %c0_i32_0 = arith.constant 0 : i32
    %c0_i32_1 = arith.constant 0 : i32
    return %c0_i32, %c0_i32_0 : i32, i32
  }
  func.func @transform_4(%arg0: i32) -> (i32, i32) {
    %c0_i32 = arith.constant 0 : i32
    %c0_i32_0 = arith.constant 0 : i32
    return %arg0, %c0_i32 : i32, i32
  }
}

module attributes {stable_mosaic.version = 11 : i64} {
  func.func @kernel(%arg0: i32, %arg1: memref<8x512xbf16, #tpu.memory_space<vmem>>, %arg2: memref<512x64xbf16, #tpu.memory_space<vmem>>, %arg3: memref<1x64xf32, #tpu.memory_space<vmem>>, %arg4: memref<1x64xf32, #tpu.memory_space<vmem>>, %arg5: memref<8x64xbf16, #tpu.memory_space<vmem>>) attributes {dimension_semantics = [#tpu.dimension_semantics<arbitrary>], iteration_bounds = array<i64: 1>, scalar_prefetch = 0 : i64, scratch_operands = 0 : i64, tpu.core_type = #tpu.core_type<tc>, window_params = [{transform_indices = @transform_0, window_bounds = array<i64: 8, 512>}, {pipeline_mode = #tpu.pipeline_mode<synchronous>, transform_indices = @transform_1, window_bounds = array<i64: 512, 64>}, {pipeline_mode = #tpu.pipeline_mode<synchronous>, transform_indices = @transform_2, window_bounds = array<i64: 1, 64>}, {pipeline_mode = #tpu.pipeline_mode<synchronous>, transform_indices = @transform_3, window_bounds = array<i64: 1, 64>}, {transform_indices = @transform_4, window_bounds = array<i64: 8, 64>}]} {
    %c0 = arith.constant 0 : index
    %c0_0 = arith.constant 0 : index
    %0 = vector.load %arg1[%c0, %c0_0] : memref<8x512xbf16, #tpu.memory_space<vmem>>, vector<8x512xbf16>
    %c0_1 = arith.constant 0 : index
    %c0_2 = arith.constant 0 : index
    %1 = vector.load %arg2[%c0_1, %c0_2] : memref<512x64xbf16, #tpu.memory_space<vmem>>, vector<512x64xbf16>
    %cst = arith.constant dense<0.000000e+00> : vector<8x64xf32>
    %2 = tpu.matmul %0, %1, %cst {dimension_numbers = #tpu.dot_dimension_numbers<[1], [0], [0], [1], [0, 0, 1, 1], [], []>} : vector<8x512xbf16>, vector<512x64xbf16>, vector<8x64xf32> -> vector<8x64xf32>
    %c0_3 = arith.constant 0 : index
    %c0_4 = arith.constant 0 : index
    %3 = vector.load %arg3[%c0_3, %c0_4] : memref<1x64xf32, #tpu.memory_space<vmem>>, vector<1x64xf32>
    %c0_5 = arith.constant 0 : index
    %c0_6 = arith.constant 0 : index
    %4 = vector.load %arg4[%c0_5, %c0_6] : memref<1x64xf32, #tpu.memory_space<vmem>>, vector<1x64xf32>
    %cst_7 = arith.constant dense<0.000000e+00> : vector<64xf32>
    %5 = vector.multi_reduction <add>, %2, %cst_7 [0] : vector<8x64xf32> to vector<64xf32>
    %6 = vector.shape_cast %5 : vector<64xf32> to vector<1x64xf32>
    %7 = arith.mulf %2, %2 : vector<8x64xf32>
    %cst_8 = arith.constant dense<0.000000e+00> : vector<64xf32>
    %8 = vector.multi_reduction <add>, %7, %cst_8 [0] : vector<8x64xf32> to vector<64xf32>
    %9 = vector.shape_cast %8 : vector<64xf32> to vector<1x64xf32>
    %cst_9 = arith.constant 1.250000e-01 : f32
    %10 = vector.broadcast %cst_9 : f32 to vector<1x64xf32>
    %11 = arith.mulf %6, %10 : vector<1x64xf32>
    %cst_10 = arith.constant 1.250000e-01 : f32
    %12 = vector.broadcast %cst_10 : f32 to vector<1x64xf32>
    %13 = arith.mulf %9, %12 : vector<1x64xf32>
    %14 = arith.mulf %11, %11 : vector<1x64xf32>
    %15 = arith.subf %13, %14 : vector<1x64xf32>
    %cst_11 = arith.constant 0.000000e+00 : f32
    %16 = vector.broadcast %cst_11 : f32 to vector<1x64xf32>
    %17 = arith.maximumf %15, %16 : vector<1x64xf32>
    %cst_12 = arith.constant 9.99999974E-6 : f32
    %18 = vector.broadcast %cst_12 : f32 to vector<1x64xf32>
    %19 = arith.addf %17, %18 : vector<1x64xf32>
    %20 = math.rsqrt %19 : vector<1x64xf32>
    %21 = arith.mulf %3, %20 : vector<1x64xf32>
    %22 = arith.mulf %11, %21 : vector<1x64xf32>
    %23 = arith.subf %4, %22 : vector<1x64xf32>
    %24 = vector.broadcast %21 : vector<1x64xf32> to vector<8x64xf32>
    %25 = arith.mulf %2, %24 : vector<8x64xf32>
    %26 = vector.broadcast %23 : vector<1x64xf32> to vector<8x64xf32>
    %27 = arith.addf %25, %26 : vector<8x64xf32>
    %28 = arith.truncf %27 : vector<8x64xf32> to vector<8x64xbf16>
    %c0_13 = arith.constant 0 : index
    %c0_14 = arith.constant 0 : index
    %29 = vector.load %arg5[%c0_13, %c0_14] : memref<8x64xbf16, #tpu.memory_space<vmem>>, vector<8x64xbf16>
    tpu.vector_store %arg5[%c0_13, %c0_14], %28 {strides = array<i32>} : memref<8x64xbf16, #tpu.memory_space<vmem>>, vector<8x64xbf16>,
    return
  }
  func.func @transform_0(%arg0: i32) -> (i32, i32) {
    %c0_i32 = arith.constant 0 : i32
    %c0_i32_0 = arith.constant 0 : i32
    return %arg0, %c0_i32 : i32, i32
  }
  func.func @transform_1(%arg0: i32) -> (i32, i32) {
    %c0_i32 = arith.constant 0 : i32
    %c0_i32_0 = arith.constant 0 : i32
    %c0_i32_1 = arith.constant 0 : i32
    return %c0_i32, %c0_i32_0 : i32, i32
  }
  func.func @transform_2(%arg0: i32) -> (i32, i32) {
    %c0_i32 = arith.constant 0 : i32
    %c0_i32_0 = arith.constant 0 : i32
    %c0_i32_1 = arith.constant 0 : i32
    return %c0_i32, %c0_i32_0 : i32, i32
  }
  func.func @transform_3(%arg0: i32) -> (i32, i32) {
    %c0_i32 = arith.constant 0 : i32
    %c0_i32_0 = arith.constant 0 : i32
    %c0_i32_1 = arith.constant 0 : i32
    return %c0_i32, %c0_i32_0 : i32, i32
  }
  func.func @transform_4(%arg0: i32) -> (i32, i32) {
    %c0_i32 = arith.constant 0 : i32
    %c0_i32_0 = arith.constant 0 : i32
    return %arg0, %c0_i32 : i32, i32
  }
}

module attributes {stable_mosaic.version = 11 : i64} {
  func.func @kernel(%arg0: i32, %arg1: memref<2x256xbf16, #tpu.memory_space<vmem>>, %arg2: memref<256x64xbf16, #tpu.memory_space<vmem>>, %arg3: memref<64x256xbf16, #tpu.memory_space<vmem>>, %arg4: memref<1x256xf32, #tpu.memory_space<vmem>>, %arg5: memref<1x256xf32, #tpu.memory_space<vmem>>, %arg6: memref<256x256xf32, #tpu.memory_space<vmem>>, %arg7: memref<256x512xbf16, #tpu.memory_space<vmem>>, %arg8: memref<256x512xbf16, #tpu.memory_space<vmem>>, %arg9: memref<1x512xf32, #tpu.memory_space<vmem>>, %arg10: memref<1x512xf32, #tpu.memory_space<vmem>>, %arg11: memref<512x512xf32, #tpu.memory_space<vmem>>, %arg12: memref<2x512xbf16, #tpu.memory_space<vmem>>) attributes {dimension_semantics = [#tpu.dimension_semantics<arbitrary>], iteration_bounds = array<i64: 1>, scalar_prefetch = 0 : i64, scratch_operands = 0 : i64, tpu.core_type = #tpu.core_type<tc>, window_params = [{pipeline_mode = #tpu.pipeline_mode<synchronous>, transform_indices = @transform_0, window_bounds = array<i64: 2, 256>}, {pipeline_mode = #tpu.pipeline_mode<synchronous>, transform_indices = @transform_1, window_bounds = array<i64: 256, 64>}, {pipeline_mode = #tpu.pipeline_mode<synchronous>, transform_indices = @transform_2, window_bounds = array<i64: 64, 256>}, {pipeline_mode = #tpu.pipeline_mode<synchronous>, transform_indices = @transform_3, window_bounds = array<i64: 1, 256>}, {pipeline_mode = #tpu.pipeline_mode<synchronous>, transform_indices = @transform_4, window_bounds = array<i64: 1, 256>}, {pipeline_mode = #tpu.pipeline_mode<synchronous>, transform_indices = @transform_5, window_bounds = array<i64: 256, 256>}, {pipeline_mode = #tpu.pipeline_mode<synchronous>, transform_indices = @transform_6, window_bounds = array<i64: 256, 512>}, {pipeline_mode = #tpu.pipeline_mode<synchronous>, transform_indices = @transform_7, window_bounds = array<i64: 256, 512>}, {pipeline_mode = #tpu.pipeline_mode<synchronous>, transform_indices = @transform_8, window_bounds = array<i64: 1, 512>}, {pipeline_mode = #tpu.pipeline_mode<synchronous>, transform_indices = @transform_9, window_bounds = array<i64: 1, 512>}, {pipeline_mode = #tpu.pipeline_mode<synchronous>, transform_indices = @transform_10, window_bounds = array<i64: 512, 512>}, {pipeline_mode = #tpu.pipeline_mode<synchronous>, transform_indices = @transform_11, window_bounds = array<i64: 2, 512>}]} {
    %c0 = arith.constant 0 : index
    %c0_0 = arith.constant 0 : index
    %0 = vector.load %arg1[%c0, %c0_0] : memref<2x256xbf16, #tpu.memory_space<vmem>>, vector<2x256xbf16>
    %cst = arith.constant 0.000000e+00 : bf16
    %1 = vector.broadcast %cst : bf16 to vector<2x256xbf16>
    %2 = arith.cmpf ogt, %0, %1 : vector<2x256xbf16>
    %cst_1 = arith.constant 2.001950e-01 : bf16
    %3 = vector.broadcast %cst_1 : bf16 to vector<2x256xbf16>
    %4 = arith.mulf %3, %0 : vector<2x256xbf16>
    %5 = arith.select %2, %0, %4 : vector<2x256xi1>, vector<2x256xbf16>
    %c0_2 = arith.constant 0 : index
    %c0_3 = arith.constant 0 : index
    %6 = vector.load %arg2[%c0_2, %c0_3] : memref<256x64xbf16, #tpu.memory_space<vmem>>, vector<256x64xbf16>
    %cst_4 = arith.constant dense<0.000000e+00> : vector<2x64xf32>
    %7 = tpu.matmul %5, %6, %cst_4 {dimension_numbers = #tpu.dot_dimension_numbers<[1], [0], [0], [1], [0, 0, 1, 1], [], []>} : vector<2x256xbf16>, vector<256x64xbf16>, vector<2x64xf32> -> vector<2x64xf32>
    %cst_5 = arith.constant 0.000000e+00 : f32
    %8 = vector.broadcast %cst_5 : f32 to vector<2x64xf32>
    %9 = arith.maximumf %7, %8 : vector<2x64xf32>
    %10 = arith.truncf %9 : vector<2x64xf32> to vector<2x64xbf16>
    %c0_6 = arith.constant 0 : index
    %c0_7 = arith.constant 0 : index
    %11 = vector.load %arg3[%c0_6, %c0_7] : memref<64x256xbf16, #tpu.memory_space<vmem>>, vector<64x256xbf16>
    %cst_8 = arith.constant dense<0.000000e+00> : vector<2x256xf32>
    %12 = tpu.matmul %10, %11, %cst_8 {dimension_numbers = #tpu.dot_dimension_numbers<[1], [0], [0], [1], [0, 0, 1, 1], [], []>} : vector<2x64xbf16>, vector<64x256xbf16>, vector<2x256xf32> -> vector<2x256xf32>
    %c0_9 = arith.constant 0 : index
    %c0_10 = arith.constant 0 : index
    %13 = vector.load %arg4[%c0_9, %c0_10] : memref<1x256xf32, #tpu.memory_space<vmem>>, vector<1x256xf32>
    %c0_11 = arith.constant 0 : index
    %c0_12 = arith.constant 0 : index
    %14 = vector.load %arg5[%c0_11, %c0_12] : memref<1x256xf32, #tpu.memory_space<vmem>>, vector<1x256xf32>
    %c0_13 = arith.constant 0 : index
    %c0_14 = arith.constant 0 : index
    %15 = vector.load %arg6[%c0_13, %c0_14] : memref<256x256xf32, #tpu.memory_space<vmem>>, vector<256x256xf32>
    %cst_15 = arith.constant dense<0.000000e+00> : vector<256xf32>
    %16 = vector.multi_reduction <add>, %12, %cst_15 [0] : vector<2x256xf32> to vector<256xf32>
    %17 = vector.shape_cast %16 : vector<256xf32> to vector<1x256xf32>
    %18 = arith.mulf %12, %12 : vector<2x256xf32>
    %cst_16 = arith.constant dense<0.000000e+00> : vector<256xf32>
    %19 = vector.multi_reduction <add>, %18, %cst_16 [0] : vector<2x256xf32> to vector<256xf32>
    %20 = vector.shape_cast %19 : vector<256xf32> to vector<1x256xf32>
    %cst_17 = arith.constant dense<0.000000e+00> : vector<1x256xf32>
    %21 = tpu.matmul %17, %15, %cst_17 {dimension_numbers = #tpu.dot_dimension_numbers<[1], [0], [0], [1], [0, 0, 1, 1], [], []>} : vector<1x256xf32>, vector<256x256xf32>, vector<1x256xf32> -> vector<1x256xf32>
    %cst_18 = arith.constant 1.250000e-01 : f32
    %22 = vector.broadcast %cst_18 : f32 to vector<1x256xf32>
    %23 = arith.mulf %21, %22 : vector<1x256xf32>
    %cst_19 = arith.constant dense<0.000000e+00> : vector<1x256xf32>
    %24 = tpu.matmul %20, %15, %cst_19 {dimension_numbers = #tpu.dot_dimension_numbers<[1], [0], [0], [1], [0, 0, 1, 1], [], []>} : vector<1x256xf32>, vector<256x256xf32>, vector<1x256xf32> -> vector<1x256xf32>
    %cst_20 = arith.constant 1.250000e-01 : f32
    %25 = vector.broadcast %cst_20 : f32 to vector<1x256xf32>
    %26 = arith.mulf %24, %25 : vector<1x256xf32>
    %27 = arith.mulf %23, %23 : vector<1x256xf32>
    %28 = arith.subf %26, %27 : vector<1x256xf32>
    %cst_21 = arith.constant 0.000000e+00 : f32
    %29 = vector.broadcast %cst_21 : f32 to vector<1x256xf32>
    %30 = arith.maximumf %28, %29 : vector<1x256xf32>
    %cst_22 = arith.constant 9.99999974E-6 : f32
    %31 = vector.broadcast %cst_22 : f32 to vector<1x256xf32>
    %32 = arith.addf %30, %31 : vector<1x256xf32>
    %33 = math.rsqrt %32 : vector<1x256xf32>
    %34 = arith.mulf %13, %33 : vector<1x256xf32>
    %35 = arith.mulf %23, %34 : vector<1x256xf32>
    %36 = arith.subf %14, %35 : vector<1x256xf32>
    %37 = vector.broadcast %34 : vector<1x256xf32> to vector<2x256xf32>
    %38 = arith.mulf %12, %37 : vector<2x256xf32>
    %39 = vector.broadcast %36 : vector<1x256xf32> to vector<2x256xf32>
    %40 = arith.addf %38, %39 : vector<2x256xf32>
    %cst_23 = arith.constant 0.000000e+00 : bf16
    %41 = vector.broadcast %cst_23 : bf16 to vector<2x256xbf16>
    %42 = arith.maximumf %0, %41 : vector<2x256xbf16>
    %cst_24 = arith.constant 0.000000e+00 : f32
    %43 = vector.broadcast %cst_24 : f32 to vector<2x256xf32>
    %44 = arith.maximumf %40, %43 : vector<2x256xf32>
    %45 = arith.truncf %44 : vector<2x256xf32> to vector<2x256xbf16>
    %c0_25 = arith.constant 0 : index
    %c0_26 = arith.constant 0 : index
    %46 = vector.load %arg7[%c0_25, %c0_26] : memref<256x512xbf16, #tpu.memory_space<vmem>>, vector<256x512xbf16>
    %cst_27 = arith.constant dense<0.000000e+00> : vector<2x512xf32>
    %47 = tpu.matmul %42, %46, %cst_27 {dimension_numbers = #tpu.dot_dimension_numbers<[1], [0], [0], [1], [0, 0, 1, 1], [], []>} : vector<2x256xbf16>, vector<256x512xbf16>, vector<2x512xf32> -> vector<2x512xf32>
    %c0_28 = arith.constant 0 : index
    %c0_29 = arith.constant 0 : index
    %48 = vector.load %arg8[%c0_28, %c0_29] : memref<256x512xbf16, #tpu.memory_space<vmem>>, vector<256x512xbf16>
    %cst_30 = arith.constant dense<0.000000e+00> : vector<2x512xf32>
    %49 = tpu.matmul %45, %48, %cst_30 {dimension_numbers = #tpu.dot_dimension_numbers<[1], [0], [0], [1], [0, 0, 1, 1], [], []>} : vector<2x256xbf16>, vector<256x512xbf16>, vector<2x512xf32> -> vector<2x512xf32>
    %50 = arith.addf %47, %49 : vector<2x512xf32>
    %c0_31 = arith.constant 0 : index
    %c0_32 = arith.constant 0 : index
    %51 = vector.load %arg9[%c0_31, %c0_32] : memref<1x512xf32, #tpu.memory_space<vmem>>, vector<1x512xf32>
    %c0_33 = arith.constant 0 : index
    %c0_34 = arith.constant 0 : index
    %52 = vector.load %arg10[%c0_33, %c0_34] : memref<1x512xf32, #tpu.memory_space<vmem>>, vector<1x512xf32>
    %c0_35 = arith.constant 0 : index
    %c0_36 = arith.constant 0 : index
    %53 = vector.load %arg11[%c0_35, %c0_36] : memref<512x512xf32, #tpu.memory_space<vmem>>, vector<512x512xf32>
    %cst_37 = arith.constant dense<0.000000e+00> : vector<512xf32>
    %54 = vector.multi_reduction <add>, %50, %cst_37 [0] : vector<2x512xf32> to vector<512xf32>
    %55 = vector.shape_cast %54 : vector<512xf32> to vector<1x512xf32>
    %56 = arith.mulf %50, %50 : vector<2x512xf32>
    %cst_38 = arith.constant dense<0.000000e+00> : vector<512xf32>
    %57 = vector.multi_reduction <add>, %56, %cst_38 [0] : vector<2x512xf32> to vector<512xf32>
    %58 = vector.shape_cast %57 : vector<512xf32> to vector<1x512xf32>
    %cst_39 = arith.constant dense<0.000000e+00> : vector<1x512xf32>
    %59 = tpu.matmul %55, %53, %cst_39 {dimension_numbers = #tpu.dot_dimension_numbers<[1], [0], [0], [1], [0, 0, 1, 1], [], []>} : vector<1x512xf32>, vector<512x512xf32>, vector<1x512xf32> -> vector<1x512xf32>
    %cst_40 = arith.constant 3.125000e-02 : f32
    %60 = vector.broadcast %cst_40 : f32 to vector<1x512xf32>
    %61 = arith.mulf %59, %60 : vector<1x512xf32>
    %cst_41 = arith.constant dense<0.000000e+00> : vector<1x512xf32>
    %62 = tpu.matmul %58, %53, %cst_41 {dimension_numbers = #tpu.dot_dimension_numbers<[1], [0], [0], [1], [0, 0, 1, 1], [], []>} : vector<1x512xf32>, vector<512x512xf32>, vector<1x512xf32> -> vector<1x512xf32>
    %cst_42 = arith.constant 3.125000e-02 : f32
    %63 = vector.broadcast %cst_42 : f32 to vector<1x512xf32>
    %64 = arith.mulf %62, %63 : vector<1x512xf32>
    %65 = arith.mulf %61, %61 : vector<1x512xf32>
    %66 = arith.subf %64, %65 : vector<1x512xf32>
    %cst_43 = arith.constant 0.000000e+00 : f32
    %67 = vector.broadcast %cst_43 : f32 to vector<1x512xf32>
    %68 = arith.maximumf %66, %67 : vector<1x512xf32>
    %cst_44 = arith.constant 9.99999974E-6 : f32
    %69 = vector.broadcast %cst_44 : f32 to vector<1x512xf32>
    %70 = arith.addf %68, %69 : vector<1x512xf32>
    %71 = math.rsqrt %70 : vector<1x512xf32>
    %72 = arith.mulf %51, %71 : vector<1x512xf32>
    %73 = arith.mulf %61, %72 : vector<1x512xf32>
    %74 = arith.subf %52, %73 : vector<1x512xf32>
    %75 = vector.broadcast %72 : vector<1x512xf32> to vector<2x512xf32>
    %76 = arith.mulf %50, %75 : vector<2x512xf32>
    %77 = vector.broadcast %74 : vector<1x512xf32> to vector<2x512xf32>
    %78 = arith.addf %76, %77 : vector<2x512xf32>
    %79 = arith.truncf %78 : vector<2x512xf32> to vector<2x512xbf16>
    %c0_45 = arith.constant 0 : index
    %c0_46 = arith.constant 0 : index
    %80 = vector.load %arg12[%c0_45, %c0_46] : memref<2x512xbf16, #tpu.memory_space<vmem>>, vector<2x512xbf16>
    tpu.vector_store %arg12[%c0_45, %c0_46], %79 {strides = array<i32>} : memref<2x512xbf16, #tpu.memory_space<vmem>>, vector<2x512xbf16>,
    return
  }
  func.func @transform_0(%arg0: i32) -> (i32, i32) {
    %c0_i32 = arith.constant 0 : i32
    %c0_i32_0 = arith.constant 0 : i32
    %c0_i32_1 = arith.constant 0 : i32
    return %c0_i32, %c0_i32_0 : i32, i32
  }
  func.func @transform_1(%arg0: i32) -> (i32, i32) {
    %c0_i32 = arith.constant 0 : i32
    %c0_i32_0 = arith.constant 0 : i32
    %c0_i32_1 = arith.constant 0 : i32
    return %c0_i32, %c0_i32_0 : i32, i32
  }
  func.func @transform_2(%arg0: i32) -> (i32, i32) {
    %c0_i32 = arith.constant 0 : i32
    %c0_i32_0 = arith.constant 0 : i32
    %c0_i32_1 = arith.constant 0 : i32
    return %c0_i32, %c0_i32_0 : i32, i32
  }
  func.func @transform_3(%arg0: i32) -> (i32, i32) {
    %c0_i32 = arith.constant 0 : i32
    %c0_i32_0 = arith.constant 0 : i32
    %c0_i32_1 = arith.constant 0 : i32
    return %c0_i32, %c0_i32_0 : i32, i32
  }
  func.func @transform_4(%arg0: i32) -> (i32, i32) {
    %c0_i32 = arith.constant 0 : i32
    %c0_i32_0 = arith.constant 0 : i32
    %c0_i32_1 = arith.constant 0 : i32
    return %c0_i32, %c0_i32_0 : i32, i32
  }
  func.func @transform_5(%arg0: i32) -> (i32, i32) {
    %c0_i32 = arith.constant 0 : i32
    %c0_i32_0 = arith.constant 0 : i32
    %c0_i32_1 = arith.constant 0 : i32
    return %c0_i32, %c0_i32_0 : i32, i32
  }
  func.func @transform_6(%arg0: i32) -> (i32, i32) {
    %c0_i32 = arith.constant 0 : i32
    %c0_i32_0 = arith.constant 0 : i32
    %c0_i32_1 = arith.constant 0 : i32
    return %c0_i32, %c0_i32_0 : i32, i32
  }
  func.func @transform_7(%arg0: i32) -> (i32, i32) {
    %c0_i32 = arith.constant 0 : i32
    %c0_i32_0 = arith.constant 0 : i32
    %c0_i32_1 = arith.constant 0 : i32
    return %c0_i32, %c0_i32_0 : i32, i32
  }
  func.func @transform_8(%arg0: i32) -> (i32, i32) {
    %c0_i32 = arith.constant 0 : i32
    %c0_i32_0 = arith.constant 0 : i32
    %c0_i32_1 = arith.constant 0 : i32
    return %c0_i32, %c0_i32_0 : i32, i32
  }
  func.func @transform_9(%arg0: i32) -> (i32, i32) {
    %c0_i32 = arith.constant 0 : i32
    %c0_i32_0 = arith.constant 0 : i32
    %c0_i32_1 = arith.constant 0 : i32
    return %c0_i32, %c0_i32_0 : i32, i32
  }
  func.func @transform_10(%arg0: i32) -> (i32, i32) {
    %c0_i32 = arith.constant 0 : i32
    %c0_i32_0 = arith.constant 0 : i32
    %c0_i32_1 = arith.constant 0 : i32
    return %c0_i32, %c0_i32_0 : i32, i32
  }
  func.func @transform_11(%arg0: i32) -> (i32, i32) {
    %c0_i32 = arith.constant 0 : i32
    %c0_i32_0 = arith.constant 0 : i32
    %c0_i32_1 = arith.constant 0 : i32
    return %c0_i32, %c0_i32_0 : i32, i32
  }
}

module attributes {stable_mosaic.version = 11 : i64} {
  func.func @kernel(%arg0: i32, %arg1: memref<32x288xbf16, #tpu.memory_space<vmem>>, %arg2: memref<32x288xbf16, #tpu.memory_space<vmem>>, %arg3: memref<288x64xbf16, #tpu.memory_space<vmem>>, %arg4: memref<288x64xbf16, #tpu.memory_space<vmem>>, %arg5: memref<1x64xf32, #tpu.memory_space<vmem>>, %arg6: memref<1x64xf32, #tpu.memory_space<vmem>>, %arg7: memref<64x64xf32, #tpu.memory_space<vmem>>, %arg8: memref<32x64xbf16, #tpu.memory_space<vmem>>) attributes {dimension_semantics = [#tpu.dimension_semantics<arbitrary>], iteration_bounds = array<i64: 1>, scalar_prefetch = 0 : i64, scratch_operands = 0 : i64, tpu.core_type = #tpu.core_type<tc>, window_params = [{transform_indices = @transform_0, window_bounds = array<i64: 32, 288>}, {transform_indices = @transform_1, window_bounds = array<i64: 32, 288>}, {pipeline_mode = #tpu.pipeline_mode<synchronous>, transform_indices = @transform_2, window_bounds = array<i64: 288, 64>}, {pipeline_mode = #tpu.pipeline_mode<synchronous>, transform_indices = @transform_3, window_bounds = array<i64: 288, 64>}, {pipeline_mode = #tpu.pipeline_mode<synchronous>, transform_indices = @transform_4, window_bounds = array<i64: 1, 64>}, {pipeline_mode = #tpu.pipeline_mode<synchronous>, transform_indices = @transform_5, window_bounds = array<i64: 1, 64>}, {pipeline_mode = #tpu.pipeline_mode<synchronous>, transform_indices = @transform_6, window_bounds = array<i64: 64, 64>}, {transform_indices = @transform_7, window_bounds = array<i64: 32, 64>}]} {
    %c0 = arith.constant 0 : index
    %c0_0 = arith.constant 0 : index
    %0 = vector.load %arg1[%c0, %c0_0] : memref<32x288xbf16, #tpu.memory_space<vmem>>, vector<32x288xbf16>
    %c0_1 = arith.constant 0 : index
    %c0_2 = arith.constant 0 : index
    %1 = vector.load %arg3[%c0_1, %c0_2] : memref<288x64xbf16, #tpu.memory_space<vmem>>, vector<288x64xbf16>
    %cst = arith.constant dense<0.000000e+00> : vector<32x64xf32>
    %2 = tpu.matmul %0, %1, %cst {dimension_numbers = #tpu.dot_dimension_numbers<[1], [0], [0], [1], [0, 0, 1, 1], [], []>} : vector<32x288xbf16>, vector<288x64xbf16>, vector<32x64xf32> -> vector<32x64xf32>
    %c0_3 = arith.constant 0 : index
    %c0_4 = arith.constant 0 : index
    %3 = vector.load %arg2[%c0_3, %c0_4] : memref<32x288xbf16, #tpu.memory_space<vmem>>, vector<32x288xbf16>
    %c0_5 = arith.constant 0 : index
    %c0_6 = arith.constant 0 : index
    %4 = vector.load %arg4[%c0_5, %c0_6] : memref<288x64xbf16, #tpu.memory_space<vmem>>, vector<288x64xbf16>
    %cst_7 = arith.constant dense<0.000000e+00> : vector<32x64xf32>
    %5 = tpu.matmul %3, %4, %cst_7 {dimension_numbers = #tpu.dot_dimension_numbers<[1], [0], [0], [1], [0, 0, 1, 1], [], []>} : vector<32x288xbf16>, vector<288x64xbf16>, vector<32x64xf32> -> vector<32x64xf32>
    %6 = arith.addf %2, %5 : vector<32x64xf32>
    %c0_8 = arith.constant 0 : index
    %c0_9 = arith.constant 0 : index
    %7 = vector.load %arg5[%c0_8, %c0_9] : memref<1x64xf32, #tpu.memory_space<vmem>>, vector<1x64xf32>
    %c0_10 = arith.constant 0 : index
    %c0_11 = arith.constant 0 : index
    %8 = vector.load %arg6[%c0_10, %c0_11] : memref<1x64xf32, #tpu.memory_space<vmem>>, vector<1x64xf32>
    %c0_12 = arith.constant 0 : index
    %c0_13 = arith.constant 0 : index
    %9 = vector.load %arg7[%c0_12, %c0_13] : memref<64x64xf32, #tpu.memory_space<vmem>>, vector<64x64xf32>
    %cst_14 = arith.constant dense<0.000000e+00> : vector<64xf32>
    %10 = vector.multi_reduction <add>, %6, %cst_14 [0] : vector<32x64xf32> to vector<64xf32>
    %11 = vector.shape_cast %10 : vector<64xf32> to vector<1x64xf32>
    %12 = arith.mulf %6, %6 : vector<32x64xf32>
    %cst_15 = arith.constant dense<0.000000e+00> : vector<64xf32>
    %13 = vector.multi_reduction <add>, %12, %cst_15 [0] : vector<32x64xf32> to vector<64xf32>
    %14 = vector.shape_cast %13 : vector<64xf32> to vector<1x64xf32>
    %cst_16 = arith.constant dense<0.000000e+00> : vector<1x64xf32>
    %15 = tpu.matmul %11, %9, %cst_16 {dimension_numbers = #tpu.dot_dimension_numbers<[1], [0], [0], [1], [0, 0, 1, 1], [], []>} : vector<1x64xf32>, vector<64x64xf32>, vector<1x64xf32> -> vector<1x64xf32>
    %cst_17 = arith.constant 7.812500e-03 : f32
    %16 = vector.broadcast %cst_17 : f32 to vector<1x64xf32>
    %17 = arith.mulf %15, %16 : vector<1x64xf32>
    %cst_18 = arith.constant dense<0.000000e+00> : vector<1x64xf32>
    %18 = tpu.matmul %14, %9, %cst_18 {dimension_numbers = #tpu.dot_dimension_numbers<[1], [0], [0], [1], [0, 0, 1, 1], [], []>} : vector<1x64xf32>, vector<64x64xf32>, vector<1x64xf32> -> vector<1x64xf32>
    %cst_19 = arith.constant 7.812500e-03 : f32
    %19 = vector.broadcast %cst_19 : f32 to vector<1x64xf32>
    %20 = arith.mulf %18, %19 : vector<1x64xf32>
    %21 = arith.mulf %17, %17 : vector<1x64xf32>
    %22 = arith.subf %20, %21 : vector<1x64xf32>
    %cst_20 = arith.constant 0.000000e+00 : f32
    %23 = vector.broadcast %cst_20 : f32 to vector<1x64xf32>
    %24 = arith.maximumf %22, %23 : vector<1x64xf32>
    %cst_21 = arith.constant 9.99999974E-6 : f32
    %25 = vector.broadcast %cst_21 : f32 to vector<1x64xf32>
    %26 = arith.addf %24, %25 : vector<1x64xf32>
    %27 = math.rsqrt %26 : vector<1x64xf32>
    %28 = arith.mulf %7, %27 : vector<1x64xf32>
    %29 = arith.mulf %17, %28 : vector<1x64xf32>
    %30 = arith.subf %8, %29 : vector<1x64xf32>
    %31 = vector.broadcast %28 : vector<1x64xf32> to vector<32x64xf32>
    %32 = arith.mulf %6, %31 : vector<32x64xf32>
    %33 = vector.broadcast %30 : vector<1x64xf32> to vector<32x64xf32>
    %34 = arith.addf %32, %33 : vector<32x64xf32>
    %35 = arith.truncf %34 : vector<32x64xf32> to vector<32x64xbf16>
    %c0_22 = arith.constant 0 : index
    %c0_23 = arith.constant 0 : index
    %36 = vector.load %arg8[%c0_22, %c0_23] : memref<32x64xbf16, #tpu.memory_space<vmem>>, vector<32x64xbf16>
    tpu.vector_store %arg8[%c0_22, %c0_23], %35 {strides = array<i32>} : memref<32x64xbf16, #tpu.memory_space<vmem>>, vector<32x64xbf16>,
    return
  }
  func.func @transform_0(%arg0: i32) -> (i32, i32) {
    %c0_i32 = arith.constant 0 : i32
    %c0_i32_0 = arith.constant 0 : i32
    return %arg0, %c0_i32 : i32, i32
  }
  func.func @transform_1(%arg0: i32) -> (i32, i32) {
    %c0_i32 = arith.constant 0 : i32
    %c0_i32_0 = arith.constant 0 : i32
    return %arg0, %c0_i32 : i32, i32
  }
  func.func @transform_2(%arg0: i32) -> (i32, i32) {
    %c0_i32 = arith.constant 0 : i32
    %c0_i32_0 = arith.constant 0 : i32
    %c0_i32_1 = arith.constant 0 : i32
    return %c0_i32, %c0_i32_0 : i32, i32
  }
  func.func @transform_3(%arg0: i32) -> (i32, i32) {
    %c0_i32 = arith.constant 0 : i32
    %c0_i32_0 = arith.constant 0 : i32
    %c0_i32_1 = arith.constant 0 : i32
    return %c0_i32, %c0_i32_0 : i32, i32
  }
  func.func @transform_4(%arg0: i32) -> (i32, i32) {
    %c0_i32 = arith.constant 0 : i32
    %c0_i32_0 = arith.constant 0 : i32
    %c0_i32_1 = arith.constant 0 : i32
    return %c0_i32, %c0_i32_0 : i32, i32
  }
  func.func @transform_5(%arg0: i32) -> (i32, i32) {
    %c0_i32 = arith.constant 0 : i32
    %c0_i32_0 = arith.constant 0 : i32
    %c0_i32_1 = arith.constant 0 : i32
    return %c0_i32, %c0_i32_0 : i32, i32
  }
  func.func @transform_6(%arg0: i32) -> (i32, i32) {
    %c0_i32 = arith.constant 0 : i32
    %c0_i32_0 = arith.constant 0 : i32
    %c0_i32_1 = arith.constant 0 : i32
    return %c0_i32, %c0_i32_0 : i32, i32
  }
  func.func @transform_7(%arg0: i32) -> (i32, i32) {
    %c0_i32 = arith.constant 0 : i32
    %c0_i32_0 = arith.constant 0 : i32
    return %arg0, %c0_i32 : i32, i32
  }
}

module attributes {stable_mosaic.version = 11 : i64} {
  func.func @kernel(%arg0: i32, %arg1: memref<128x144xbf16, #tpu.memory_space<vmem>>, %arg2: memref<128x144xbf16, #tpu.memory_space<vmem>>, %arg3: memref<144x32xbf16, #tpu.memory_space<vmem>>, %arg4: memref<144x32xbf16, #tpu.memory_space<vmem>>, %arg5: memref<1x32xf32, #tpu.memory_space<vmem>>, %arg6: memref<1x32xf32, #tpu.memory_space<vmem>>, %arg7: memref<32x32xf32, #tpu.memory_space<vmem>>, %arg8: memref<128x32xbf16, #tpu.memory_space<vmem>>) attributes {dimension_semantics = [#tpu.dimension_semantics<arbitrary>], iteration_bounds = array<i64: 1>, scalar_prefetch = 0 : i64, scratch_operands = 0 : i64, tpu.core_type = #tpu.core_type<tc>, window_params = [{transform_indices = @transform_0, window_bounds = array<i64: 128, 144>}, {transform_indices = @transform_1, window_bounds = array<i64: 128, 144>}, {pipeline_mode = #tpu.pipeline_mode<synchronous>, transform_indices = @transform_2, window_bounds = array<i64: 144, 32>}, {pipeline_mode = #tpu.pipeline_mode<synchronous>, transform_indices = @transform_3, window_bounds = array<i64: 144, 32>}, {pipeline_mode = #tpu.pipeline_mode<synchronous>, transform_indices = @transform_4, window_bounds = array<i64: 1, 32>}, {pipeline_mode = #tpu.pipeline_mode<synchronous>, transform_indices = @transform_5, window_bounds = array<i64: 1, 32>}, {pipeline_mode = #tpu.pipeline_mode<synchronous>, transform_indices = @transform_6, window_bounds = array<i64: 32, 32>}, {transform_indices = @transform_7, window_bounds = array<i64: 128, 32>}]} {
    %c0 = arith.constant 0 : index
    %c0_0 = arith.constant 0 : index
    %0 = vector.load %arg1[%c0, %c0_0] : memref<128x144xbf16, #tpu.memory_space<vmem>>, vector<128x144xbf16>
    %c0_1 = arith.constant 0 : index
    %c0_2 = arith.constant 0 : index
    %1 = vector.load %arg3[%c0_1, %c0_2] : memref<144x32xbf16, #tpu.memory_space<vmem>>, vector<144x32xbf16>
    %cst = arith.constant dense<0.000000e+00> : vector<128x32xf32>
    %2 = tpu.matmul %0, %1, %cst {dimension_numbers = #tpu.dot_dimension_numbers<[1], [0], [0], [1], [0, 0, 1, 1], [], []>} : vector<128x144xbf16>, vector<144x32xbf16>, vector<128x32xf32> -> vector<128x32xf32>
    %c0_3 = arith.constant 0 : index
    %c0_4 = arith.constant 0 : index
    %3 = vector.load %arg2[%c0_3, %c0_4] : memref<128x144xbf16, #tpu.memory_space<vmem>>, vector<128x144xbf16>
    %c0_5 = arith.constant 0 : index
    %c0_6 = arith.constant 0 : index
    %4 = vector.load %arg4[%c0_5, %c0_6] : memref<144x32xbf16, #tpu.memory_space<vmem>>, vector<144x32xbf16>
    %cst_7 = arith.constant dense<0.000000e+00> : vector<128x32xf32>
    %5 = tpu.matmul %3, %4, %cst_7 {dimension_numbers = #tpu.dot_dimension_numbers<[1], [0], [0], [1], [0, 0, 1, 1], [], []>} : vector<128x144xbf16>, vector<144x32xbf16>, vector<128x32xf32> -> vector<128x32xf32>
    %6 = arith.addf %2, %5 : vector<128x32xf32>
    %c0_8 = arith.constant 0 : index
    %c0_9 = arith.constant 0 : index
    %7 = vector.load %arg5[%c0_8, %c0_9] : memref<1x32xf32, #tpu.memory_space<vmem>>, vector<1x32xf32>
    %c0_10 = arith.constant 0 : index
    %c0_11 = arith.constant 0 : index
    %8 = vector.load %arg6[%c0_10, %c0_11] : memref<1x32xf32, #tpu.memory_space<vmem>>, vector<1x32xf32>
    %c0_12 = arith.constant 0 : index
    %c0_13 = arith.constant 0 : index
    %9 = vector.load %arg7[%c0_12, %c0_13] : memref<32x32xf32, #tpu.memory_space<vmem>>, vector<32x32xf32>
    %cst_14 = arith.constant dense<0.000000e+00> : vector<32xf32>
    %10 = vector.multi_reduction <add>, %6, %cst_14 [0] : vector<128x32xf32> to vector<32xf32>
    %11 = vector.shape_cast %10 : vector<32xf32> to vector<1x32xf32>
    %12 = arith.mulf %6, %6 : vector<128x32xf32>
    %cst_15 = arith.constant dense<0.000000e+00> : vector<32xf32>
    %13 = vector.multi_reduction <add>, %12, %cst_15 [0] : vector<128x32xf32> to vector<32xf32>
    %14 = vector.shape_cast %13 : vector<32xf32> to vector<1x32xf32>
    %cst_16 = arith.constant dense<0.000000e+00> : vector<1x32xf32>
    %15 = tpu.matmul %11, %9, %cst_16 {dimension_numbers = #tpu.dot_dimension_numbers<[1], [0], [0], [1], [0, 0, 1, 1], [], []>} : vector<1x32xf32>, vector<32x32xf32>, vector<1x32xf32> -> vector<1x32xf32>
    %cst_17 = arith.constant 0.001953125 : f32
    %16 = vector.broadcast %cst_17 : f32 to vector<1x32xf32>
    %17 = arith.mulf %15, %16 : vector<1x32xf32>
    %cst_18 = arith.constant dense<0.000000e+00> : vector<1x32xf32>
    %18 = tpu.matmul %14, %9, %cst_18 {dimension_numbers = #tpu.dot_dimension_numbers<[1], [0], [0], [1], [0, 0, 1, 1], [], []>} : vector<1x32xf32>, vector<32x32xf32>, vector<1x32xf32> -> vector<1x32xf32>
    %cst_19 = arith.constant 0.001953125 : f32
    %19 = vector.broadcast %cst_19 : f32 to vector<1x32xf32>
    %20 = arith.mulf %18, %19 : vector<1x32xf32>
    %21 = arith.mulf %17, %17 : vector<1x32xf32>
    %22 = arith.subf %20, %21 : vector<1x32xf32>
    %cst_20 = arith.constant 0.000000e+00 : f32
    %23 = vector.broadcast %cst_20 : f32 to vector<1x32xf32>
    %24 = arith.maximumf %22, %23 : vector<1x32xf32>
    %cst_21 = arith.constant 9.99999974E-6 : f32
    %25 = vector.broadcast %cst_21 : f32 to vector<1x32xf32>
    %26 = arith.addf %24, %25 : vector<1x32xf32>
    %27 = math.rsqrt %26 : vector<1x32xf32>
    %28 = arith.mulf %7, %27 : vector<1x32xf32>
    %29 = arith.mulf %17, %28 : vector<1x32xf32>
    %30 = arith.subf %8, %29 : vector<1x32xf32>
    %31 = vector.broadcast %28 : vector<1x32xf32> to vector<128x32xf32>
    %32 = arith.mulf %6, %31 : vector<128x32xf32>
    %33 = vector.broadcast %30 : vector<1x32xf32> to vector<128x32xf32>
    %34 = arith.addf %32, %33 : vector<128x32xf32>
    %35 = arith.truncf %34 : vector<128x32xf32> to vector<128x32xbf16>
    %c0_22 = arith.constant 0 : index
    %c0_23 = arith.constant 0 : index
    %36 = vector.load %arg8[%c0_22, %c0_23] : memref<128x32xbf16, #tpu.memory_space<vmem>>, vector<128x32xbf16>
    tpu.vector_store %arg8[%c0_22, %c0_23], %35 {strides = array<i32>} : memref<128x32xbf16, #tpu.memory_space<vmem>>, vector<128x32xbf16>,
    return
  }
  func.func @transform_0(%arg0: i32) -> (i32, i32) {
    %c0_i32 = arith.constant 0 : i32
    %c0_i32_0 = arith.constant 0 : i32
    return %arg0, %c0_i32 : i32, i32
  }
  func.func @transform_1(%arg0: i32) -> (i32, i32) {
    %c0_i32 = arith.constant 0 : i32
    %c0_i32_0 = arith.constant 0 : i32
    return %arg0, %c0_i32 : i32, i32
  }
  func.func @transform_2(%arg0: i32) -> (i32, i32) {
    %c0_i32 = arith.constant 0 : i32
    %c0_i32_0 = arith.constant 0 : i32
    %c0_i32_1 = arith.constant 0 : i32
    return %c0_i32, %c0_i32_0 : i32, i32
  }
  func.func @transform_3(%arg0: i32) -> (i32, i32) {
    %c0_i32 = arith.constant 0 : i32
    %c0_i32_0 = arith.constant 0 : i32
    %c0_i32_1 = arith.constant 0 : i32
    return %c0_i32, %c0_i32_0 : i32, i32
  }
  func.func @transform_4(%arg0: i32) -> (i32, i32) {
    %c0_i32 = arith.constant 0 : i32
    %c0_i32_0 = arith.constant 0 : i32
    %c0_i32_1 = arith.constant 0 : i32
    return %c0_i32, %c0_i32_0 : i32, i32
  }
  func.func @transform_5(%arg0: i32) -> (i32, i32) {
    %c0_i32 = arith.constant 0 : i32
    %c0_i32_0 = arith.constant 0 : i32
    %c0_i32_1 = arith.constant 0 : i32
    return %c0_i32, %c0_i32_0 : i32, i32
  }
  func.func @transform_6(%arg0: i32) -> (i32, i32) {
    %c0_i32 = arith.constant 0 : i32
    %c0_i32_0 = arith.constant 0 : i32
    %c0_i32_1 = arith.constant 0 : i32
    return %c0_i32, %c0_i32_0 : i32, i32
  }
  func.func @transform_7(%arg0: i32) -> (i32, i32) {
    %c0_i32 = arith.constant 0 : i32
    %c0_i32_0 = arith.constant 0 : i32
    return %arg0, %c0_i32 : i32, i32
  }
}

module attributes {stable_mosaic.version = 11 : i64} {
  func.func @kernel(%arg0: i32, %arg1: memref<512x72xbf16, #tpu.memory_space<vmem>>, %arg2: memref<512x72xbf16, #tpu.memory_space<vmem>>, %arg3: memref<72x12xbf16, #tpu.memory_space<vmem>>, %arg4: memref<72x12xbf16, #tpu.memory_space<vmem>>, %arg5: memref<1x12xf32, #tpu.memory_space<vmem>>, %arg6: memref<512x12xf32, #tpu.memory_space<vmem>>) attributes {dimension_semantics = [#tpu.dimension_semantics<arbitrary>], iteration_bounds = array<i64: 1>, scalar_prefetch = 0 : i64, scratch_operands = 0 : i64, tpu.core_type = #tpu.core_type<tc>, window_params = [{transform_indices = @transform_0, window_bounds = array<i64: 512, 72>}, {transform_indices = @transform_1, window_bounds = array<i64: 512, 72>}, {pipeline_mode = #tpu.pipeline_mode<synchronous>, transform_indices = @transform_2, window_bounds = array<i64: 72, 12>}, {pipeline_mode = #tpu.pipeline_mode<synchronous>, transform_indices = @transform_3, window_bounds = array<i64: 72, 12>}, {pipeline_mode = #tpu.pipeline_mode<synchronous>, transform_indices = @transform_4, window_bounds = array<i64: 1, 12>}, {transform_indices = @transform_5, window_bounds = array<i64: 512, 12>}]} {
    %c0 = arith.constant 0 : index
    %c0_0 = arith.constant 0 : index
    %0 = vector.load %arg1[%c0, %c0_0] : memref<512x72xbf16, #tpu.memory_space<vmem>>, vector<512x72xbf16>
    %c0_1 = arith.constant 0 : index
    %c0_2 = arith.constant 0 : index
    %1 = vector.load %arg3[%c0_1, %c0_2] : memref<72x12xbf16, #tpu.memory_space<vmem>>, vector<72x12xbf16>
    %cst = arith.constant dense<0.000000e+00> : vector<512x12xf32>
    %2 = tpu.matmul %0, %1, %cst {dimension_numbers = #tpu.dot_dimension_numbers<[1], [0], [0], [1], [0, 0, 1, 1], [], []>} : vector<512x72xbf16>, vector<72x12xbf16>, vector<512x12xf32> -> vector<512x12xf32>
    %c0_3 = arith.constant 0 : index
    %c0_4 = arith.constant 0 : index
    %3 = vector.load %arg2[%c0_3, %c0_4] : memref<512x72xbf16, #tpu.memory_space<vmem>>, vector<512x72xbf16>
    %c0_5 = arith.constant 0 : index
    %c0_6 = arith.constant 0 : index
    %4 = vector.load %arg4[%c0_5, %c0_6] : memref<72x12xbf16, #tpu.memory_space<vmem>>, vector<72x12xbf16>
    %cst_7 = arith.constant dense<0.000000e+00> : vector<512x12xf32>
    %5 = tpu.matmul %3, %4, %cst_7 {dimension_numbers = #tpu.dot_dimension_numbers<[1], [0], [0], [1], [0, 0, 1, 1], [], []>} : vector<512x72xbf16>, vector<72x12xbf16>, vector<512x12xf32> -> vector<512x12xf32>
    %6 = arith.addf %2, %5 : vector<512x12xf32>
    %c0_8 = arith.constant 0 : index
    %c0_9 = arith.constant 0 : index
    %7 = vector.load %arg5[%c0_8, %c0_9] : memref<1x12xf32, #tpu.memory_space<vmem>>, vector<1x12xf32>
    %8 = vector.broadcast %7 : vector<1x12xf32> to vector<512x12xf32>
    %9 = arith.addf %6, %8 : vector<512x12xf32>
    %10 = math.tanh %9 : vector<512x12xf32>
    %c0_10 = arith.constant 0 : index
    %c0_11 = arith.constant 0 : index
    %11 = vector.load %arg6[%c0_10, %c0_11] : memref<512x12xf32, #tpu.memory_space<vmem>>, vector<512x12xf32>
    tpu.vector_store %arg6[%c0_10, %c0_11], %10 {strides = array<i32>} : memref<512x12xf32, #tpu.memory_space<vmem>>, vector<512x12xf32>,
    return
  }
  func.func @transform_0(%arg0: i32) -> (i32, i32) {
    %c0_i32 = arith.constant 0 : i32
    %c0_i32_0 = arith.constant 0 : i32
    return %arg0, %c0_i32 : i32, i32
  }
  func.func @transform_1(%arg0: i32) -> (i32, i32) {
    %c0_i32 = arith.constant 0 : i32
    %c0_i32_0 = arith.constant 0 : i32
    return %arg0, %c0_i32 : i32, i32
  }
  func.func @transform_2(%arg0: i32) -> (i32, i32) {
    %c0_i32 = arith.constant 0 : i32
    %c0_i32_0 = arith.constant 0 : i32
    %c0_i32_1 = arith.constant 0 : i32
    return %c0_i32, %c0_i32_0 : i32, i32
  }
  func.func @transform_3(%arg0: i32) -> (i32, i32) {
    %c0_i32 = arith.constant 0 : i32
    %c0_i32_0 = arith.constant 0 : i32
    %c0_i32_1 = arith.constant 0 : i32
    return %c0_i32, %c0_i32_0 : i32, i32
  }
  func.func @transform_4(%arg0: i32) -> (i32, i32) {
    %c0_i32 = arith.constant 0 : i32
    %c0_i32_0 = arith.constant 0 : i32
    %c0_i32_1 = arith.constant 0 : i32
    return %c0_i32, %c0_i32_0 : i32, i32
  }
  func.func @transform_5(%arg0: i32) -> (i32, i32) {
    %c0_i32 = arith.constant 0 : i32
    %c0_i32_0 = arith.constant 0 : i32
    return %arg0, %c0_i32 : i32, i32
  }
}

</mosaic_0001>

<bundles_post_ra>
// kernel: generator_forward.8
= control target key start
LH: loop header
LB: loop body
LE: loop exit
PB: predicated region body
PF: predicated region fallthrough
CT: control target
= control target key end

     0   :  { %vm260_vm0 = vcmask 392192   ;;  %vm902_vm1 = vcmask 60416   ;;  %s1720_s1 = inlined_call_operand.vmem [shape: bf16[48,8], index: 1, kind: input, shape index: {}]   ;;  %s1721_s0 = inlined_call_operand.vmem [shape: bf16[512,48], index: 0, kind: input, shape index: {}]   ;;  %s1722_s2 = inlined_call_operand.vmem [shape: bf16[512,8], index: 2, kind: output, shape index: {}]  }
   0x1   :  { %v1277_v0 = vld [vmem:[%s1720_s1] sm:$0xff]   ;;  %v1278_v1 = vld [vmem:[%s1720_s1 + $0x8] sm:$0xff]   ;;  %v1279_v2 = vld [vmem:[%s1720_s1 + $0x10] sm:$0xff]  }
   0x2   :  { %1201 = vmatprep.subr.bf16.mxu0 %v1277_v0  ;;  %1271 = vmatprep.subr.bf16.mxu1 %v1277_v0  ;;  %v1280_v3 = vld [vmem:[%s1721_s0] sm:$0xff]   ;;  %v1282_v5 = vld [vmem:[%s1721_s0 + $0x8] sm:$0xff]   ;;  %v1284_v7 = vld [vmem:[%s1721_s0 + $0x10] sm:$0xff]  }
   0x3   :  { %1202 = vmatpush3.bf16.msra.mxu0 %v1277_v0  ;;  %1274 = vmatpush3.bf16.msra.mxu1 %v1277_v0  ;;  %v1281_v4 = vld [vmem:[%s1721_s0 + $0x80] sm:$0xff]   ;;  %v1283_v6 = vld [vmem:[%s1721_s0 + $0x88] sm:$0xff]   ;;  %v1285_v8 = vld [vmem:[%s1721_s0 + $0x90] sm:$0xff]  }
   0x4   :  { %1203 = vmatprep.subr.bf16.mxu0 %v1278_v1  ;;  %1272 = vmatprep.subr.bf16.mxu1 %v1278_v1  ;;  %v1286_v9 = vld [vmem:[%s1721_s0 + $0x18] sm:$0xff]   ;;  %v1288_v11 = vld [vmem:[%s1721_s0 + $0x20] sm:$0xff]   ;;  %v1290_v13 = vld [vmem:[%s1721_s0 + $0x28] sm:$0xff]  }
   0x5   :  { %1207 = vmatprep.mubr.msk.bf16.mxu0 %vm260_vm0, %v1280_v3  ;;  %1239 = vmatprep.mubr.msk.bf16.mxu1 %vm260_vm0, %v1281_v4  ;;  %v1287_v10 = vld [vmem:[%s1721_s0 + $0x98] sm:$0xff]   ;;  %v1289_v12 = vld [vmem:[%s1721_s0 + $0xa0] sm:$0xff]   ;;  %v1291_v14 = vld [vmem:[%s1721_s0 + $0xa8] sm:$0xff]  }
   0x6   :  { %v1292_v15 = vld [vmem:[%s1721_s0 + $0x30] sm:$0xff]   ;;  %v1294_v17 = vld [vmem:[%s1721_s0 + $0x38] sm:$0xff]   ;;  %v1296_v19 = vld [vmem:[%s1721_s0 + $0x40] sm:$0xff]  }
   0x7   :  { %1204 = vmatpush3.bf16.msra.mxu0 %v1278_v1  ;;  %1275 = vmatpush3.bf16.msra.mxu1 %v1278_v1  ;;  %v1293_v16 = vld [vmem:[%s1721_s0 + $0xb0] sm:$0xff]   ;;  %v1295_v18 = vld [vmem:[%s1721_s0 + $0xb8] sm:$0xff]   ;;  %v1297_v20 = vld [vmem:[%s1721_s0 + $0xc0] sm:$0xff]  }
   0x8   :  { %1205 = vmatprep.subr.bf16.mxu0 %v1279_v2  ;;  %1273 = vmatprep.subr.bf16.mxu1 %v1279_v2  ;;  %v1298_v21 = vld [vmem:[%s1721_s0 + $0x48] sm:$0xff]   ;;  %v1300_v23 = vld [vmem:[%s1721_s0 + $0x50] sm:$0xff]   ;;  %v1302_v25 = vld [vmem:[%s1721_s0 + $0x58] sm:$0xff]  }
   0x9   :  { %v1299_v22 = vld [vmem:[%s1721_s0 + $0xc8] sm:$0xff]   ;;  %v1301_v24 = vld [vmem:[%s1721_s0 + $0xd0] sm:$0xff]   ;;  %v1303_v26 = vld [vmem:[%s1721_s0 + $0xd8] sm:$0xff]  }
   0xa   :  { %v1304_v27 = vld [vmem:[%s1721_s0 + $0x60] sm:$0xff]   ;;  %v1306_v29 = vld [vmem:[%s1721_s0 + $0x68] sm:$0xff]   ;;  %v1308_v31 = vld [vmem:[%s1721_s0 + $0x70] sm:$0xff]  }
   0xb   :  { %1206 = vmatpush3.bf16.msra.mxu0 %v1279_v2  ;;  %1276 = vmatpush3.bf16.msra.mxu1 %v1279_v2  ;;  %v1305_v28 = vld [vmem:[%s1721_s0 + $0xe0] sm:$0xff]   ;;  %v1307_v30 = vld [vmem:[%s1721_s0 + $0xe8] sm:$0xff]   ;;  %v1309_v32 = vld [vmem:[%s1721_s0 + $0xf0] sm:$0xff]  }
   0xc   :  { %v1310_v33 = vld [vmem:[%s1721_s0 + $0x78] sm:$0xff]  }
   0xd   :  { %v1311_v34 = vld [vmem:[%s1721_s0 + $0xf8] sm:$0xff]  }
   0xe   :  { %1208 = vmatmul.mubr.msk.bf16.vlgmr.msra.gmra.mrb[0].mxu0 %vm260_vm0, %v1282_v5  ;;  %1240 = vmatmul.mubr.msk.bf16.vlgmr.msra.gmra.mrb[0].mxu1 %vm260_vm0, %v1283_v6 }
   0xf   :  { %1211 = vmatprep.mubr.msk.bf16.mxu0 %vm260_vm0, %v1284_v7  ;;  %1243 = vmatprep.mubr.msk.bf16.mxu1 %vm260_vm0, %v1285_v8 }
  0x16   :  { %1212 = vmatmul.mubr.msk.bf16.gmra.mrb[4].mxu0 %vm260_vm0, %v1286_v9  ;;  %1244 = vmatmul.mubr.msk.bf16.gmra.mrb[4].mxu1 %vm260_vm0, %v1287_v10 }
  0x17   :  { %1215 = vmatprep.mubr.msk.bf16.mxu0 %vm260_vm0, %v1288_v11  ;;  %1247 = vmatprep.mubr.msk.bf16.mxu1 %vm260_vm0, %v1289_v12 }
  0x1e   :  { %1216 = vmatmul.mubr.msk.bf16.gmra.mrb[8].mxu0 %vm260_vm0, %v1290_v13  ;;  %1248 = vmatmul.mubr.msk.bf16.gmra.mrb[8].mxu1 %vm260_vm0, %v1291_v14 }
  0x1f   :  { %1219 = vmatprep.mubr.msk.bf16.mxu0 %vm260_vm0, %v1292_v15  ;;  %1251 = vmatprep.mubr.msk.bf16.mxu1 %vm260_vm0, %v1293_v16 }
  0x26   :  { %1220 = vmatmul.mubr.msk.bf16.gmra.mrb[12].mxu0 %vm260_vm0, %v1294_v17  ;;  %1252 = vmatmul.mubr.msk.bf16.gmra.mrb[12].mxu1 %vm260_vm0, %v1295_v18 }
  0x27   :  { %1223 = vmatprep.mubr.msk.bf16.mxu0 %vm260_vm0, %v1296_v19  ;;  %1255 = vmatprep.mubr.msk.bf16.mxu1 %vm260_vm0, %v1297_v20 }
  0x2e   :  { %1224 = vmatmul.mubr.msk.bf16.gmra.mrb[16].mxu0 %vm260_vm0, %v1298_v21  ;;  %1256 = vmatmul.mubr.msk.bf16.gmra.mrb[16].mxu1 %vm260_vm0, %v1299_v22 }
  0x2f   :  { %1227 = vmatprep.mubr.msk.bf16.mxu0 %vm260_vm0, %v1300_v23  ;;  %1259 = vmatprep.mubr.msk.bf16.mxu1 %vm260_vm0, %v1301_v24 }
  0x36   :  { %1228 = vmatmul.mubr.msk.bf16.gmra.mrb[20].mxu0 %vm260_vm0, %v1302_v25  ;;  %1260 = vmatmul.mubr.msk.bf16.gmra.mrb[20].mxu1 %vm260_vm0, %v1303_v26 }
  0x37   :  { %1231 = vmatprep.mubr.msk.bf16.mxu0 %vm260_vm0, %v1304_v27  ;;  %1263 = vmatprep.mubr.msk.bf16.mxu1 %vm260_vm0, %v1305_v28 }
  0x3e   :  { %1232 = vmatmul.mubr.msk.bf16.gmra.mrb[24].mxu0 %vm260_vm0, %v1306_v29  ;;  %1264 = vmatmul.mubr.msk.bf16.gmra.mrb[24].mxu1 %vm260_vm0, %v1307_v30 }
  0x3f   :  { %1235 = vmatprep.mubr.msk.bf16.mxu0 %vm260_vm0, %v1308_v31  ;;  %1267 = vmatprep.mubr.msk.bf16.mxu1 %vm260_vm0, %v1309_v32 }
  0x46   :  { %1236 = vmatmul.mubr.msk.bf16.gmra.mrb[28].mxu0 %vm260_vm0, %v1310_v33  ;;  %1268 = vmatmul.mubr.msk.bf16.gmra.mrb[28].mxu1 %vm260_vm0, %v1311_v34 }
  0xe1   :  { %v1209_v35 = vpop.f32.mrb[0].mxu0  ;;  %v1241_v36 = vpop.f32.mrb[0].mxu1 }
  0xe2   :  { %v1104_v37 = vpack.c.bf16 %v1209_v35, %v1209_v35  ;;  %v1136_v38 = vpack.c.bf16 %v1241_v36, %v1241_v36  ;;  %v391_v39 = vpop.f32.mrb[1].mxu0  ;;  %v519_v40 = vpop.f32.mrb[1].mxu1 }
  0xe3   :  { %v1102_v41 = vpack.c.bf16 %v391_v39, %v391_v39  ;;  %v1134_v42 = vpack.c.bf16 %v519_v40, %v519_v40  ;;  %v1210_v43 = vpop.f32.mrb[2].mxu0  ;;  %v1242_v44 = vpop.f32.mrb[2].mxu1 }
  0xe4   :  { %905 = vst.msk [vmem:[%s1722_s2 + $0x8] sm:$0xf] %vm902_vm1, %v1104_v37  ;;  %937 = vst.msk [vmem:[%s1722_s2 + $0x88] sm:$0xf] %vm902_vm1, %v1136_v38  ;;  %v1105_v45 = vpack.c.bf16 %v1210_v43, %v1210_v43  ;;  %v1137_v46 = vpack.c.bf16 %v1242_v44, %v1242_v44  ;;  %v394_v47 = vpop.f32.mrb[3].mxu0  ;;  %v522_v48 = vpop.f32.mrb[3].mxu1 }
  0xe5   :  { %903 = vst.msk [vmem:[%s1722_s2] sm:$0xf] %vm902_vm1, %v1102_v41  ;;  %935 = vst.msk [vmem:[%s1722_s2 + $0x80] sm:$0xf] %vm902_vm1, %v1134_v42  ;;  %v1103_v49 = vpack.c.bf16 %v394_v47, %v394_v47  ;;  %v1135_v50 = vpack.c.bf16 %v522_v48, %v522_v48 }
  0xe6   :  { %906 = vst.msk [vmem:[%s1722_s2 + $0xc] sm:$0xf] %vm902_vm1, %v1105_v45  ;;  %938 = vst.msk [vmem:[%s1722_s2 + $0x8c] sm:$0xf] %vm902_vm1, %v1137_v46 }
  0xe7   :  { %904 = vst.msk [vmem:[%s1722_s2 + $0x4] sm:$0xf] %vm902_vm1, %v1103_v49  ;;  %936 = vst.msk [vmem:[%s1722_s2 + $0x84] sm:$0xf] %vm902_vm1, %v1135_v50 }
  0xe9   :  { %v1213_v51 = vpop.f32.mrb[4].mxu0  ;;  %v1245_v52 = vpop.f32.mrb[4].mxu1 }
  0xea   :  { %v1108_v53 = vpack.c.bf16 %v1213_v51, %v1213_v51  ;;  %v1140_v54 = vpack.c.bf16 %v1245_v52, %v1245_v52  ;;  %v407_v55 = vpop.f32.mrb[5].mxu0  ;;  %v535_v56 = vpop.f32.mrb[5].mxu1 }
  0xeb   :  { %v1106_v57 = vpack.c.bf16 %v407_v55, %v407_v55  ;;  %v1138_v58 = vpack.c.bf16 %v535_v56, %v535_v56  ;;  %v1214_v59 = vpop.f32.mrb[6].mxu0  ;;  %v1246_v60 = vpop.f32.mrb[6].mxu1 }
  0xec   :  { %909 = vst.msk [vmem:[%s1722_s2 + $0x18] sm:$0xf] %vm902_vm1, %v1108_v53  ;;  %941 = vst.msk [vmem:[%s1722_s2 + $0x98] sm:$0xf] %vm902_vm1, %v1140_v54  ;;  %v1109_v61 = vpack.c.bf16 %v1214_v59, %v1214_v59  ;;  %v1141_v62 = vpack.c.bf16 %v1246_v60, %v1246_v60  ;;  %v410_v63 = vpop.f32.mrb[7].mxu0  ;;  %v538_v0 = vpop.f32.mrb[7].mxu1 }
  0xed   :  { %907 = vst.msk [vmem:[%s1722_s2 + $0x10] sm:$0xf] %vm902_vm1, %v1106_v57  ;;  %939 = vst.msk [vmem:[%s1722_s2 + $0x90] sm:$0xf] %vm902_vm1, %v1138_v58  ;;  %v1107_v1 = vpack.c.bf16 %v410_v63, %v410_v63  ;;  %v1139_v2 = vpack.c.bf16 %v538_v0, %v538_v0 }
  0xee   :  { %910 = vst.msk [vmem:[%s1722_s2 + $0x1c] sm:$0xf] %vm902_vm1, %v1109_v61  ;;  %942 = vst.msk [vmem:[%s1722_s2 + $0x9c] sm:$0xf] %vm902_vm1, %v1141_v62 }
  0xef   :  { %908 = vst.msk [vmem:[%s1722_s2 + $0x14] sm:$0xf] %vm902_vm1, %v1107_v1  ;;  %940 = vst.msk [vmem:[%s1722_s2 + $0x94] sm:$0xf] %vm902_vm1, %v1139_v2 }
  0xf1   :  { %v1217_v3 = vpop.f32.mrb[8].mxu0  ;;  %v1249_v4 = vpop.f32.mrb[8].mxu1 }
  0xf2   :  { %v1112_v5 = vpack.c.bf16 %v1217_v3, %v1217_v3  ;;  %v1144_v6 = vpack.c.bf16 %v1249_v4, %v1249_v4  ;;  %v423_v7 = vpop.f32.mrb[9].mxu0  ;;  %v551_v8 = vpop.f32.mrb[9].mxu1 }
  0xf3   :  { %v1110_v9 = vpack.c.bf16 %v423_v7, %v423_v7  ;;  %v1142_v10 = vpack.c.bf16 %v551_v8, %v551_v8  ;;  %v1218_v11 = vpop.f32.mrb[10].mxu0  ;;  %v1250_v12 = vpop.f32.mrb[10].mxu1 }
  0xf4   :  { %913 = vst.msk [vmem:[%s1722_s2 + $0x28] sm:$0xf] %vm902_vm1, %v1112_v5  ;;  %945 = vst.msk [vmem:[%s1722_s2 + $0xa8] sm:$0xf] %vm902_vm1, %v1144_v6  ;;  %v1113_v13 = vpack.c.bf16 %v1218_v11, %v1218_v11  ;;  %v1145_v14 = vpack.c.bf16 %v1250_v12, %v1250_v12  ;;  %v426_v15 = vpop.f32.mrb[11].mxu0  ;;  %v554_v16 = vpop.f32.mrb[11].mxu1 }
  0xf5   :  { %911 = vst.msk [vmem:[%s1722_s2 + $0x20] sm:$0xf] %vm902_vm1, %v1110_v9  ;;  %943 = vst.msk [vmem:[%s1722_s2 + $0xa0] sm:$0xf] %vm902_vm1, %v1142_v10  ;;  %v1111_v17 = vpack.c.bf16 %v426_v15, %v426_v15  ;;  %v1143_v18 = vpack.c.bf16 %v554_v16, %v554_v16 }
  0xf6   :  { %914 = vst.msk [vmem:[%s1722_s2 + $0x2c] sm:$0xf] %vm902_vm1, %v1113_v13  ;;  %946 = vst.msk [vmem:[%s1722_s2 + $0xac] sm:$0xf] %vm902_vm1, %v1145_v14 }
  0xf7   :  { %912 = vst.msk [vmem:[%s1722_s2 + $0x24] sm:$0xf] %vm902_vm1, %v1111_v17  ;;  %944 = vst.msk [vmem:[%s1722_s2 + $0xa4] sm:$0xf] %vm902_vm1, %v1143_v18 }
  0xf9   :  { %v1221_v19 = vpop.f32.mrb[12].mxu0  ;;  %v1253_v20 = vpop.f32.mrb[12].mxu1 }
  0xfa   :  { %v1116_v21 = vpack.c.bf16 %v1221_v19, %v1221_v19  ;;  %v1148_v22 = vpack.c.bf16 %v1253_v20, %v1253_v20  ;;  %v439_v23 = vpop.f32.mrb[13].mxu0  ;;  %v567_v24 = vpop.f32.mrb[13].mxu1 }
  0xfb   :  { %v1114_v25 = vpack.c.bf16 %v439_v23, %v439_v23  ;;  %v1146_v26 = vpack.c.bf16 %v567_v24, %v567_v24  ;;  %v1222_v27 = vpop.f32.mrb[14].mxu0  ;;  %v1254_v28 = vpop.f32.mrb[14].mxu1 }
  0xfc   :  { %917 = vst.msk [vmem:[%s1722_s2 + $0x38] sm:$0xf] %vm902_vm1, %v1116_v21  ;;  %949 = vst.msk [vmem:[%s1722_s2 + $0xb8] sm:$0xf] %vm902_vm1, %v1148_v22  ;;  %v1117_v29 = vpack.c.bf16 %v1222_v27, %v1222_v27  ;;  %v1149_v30 = vpack.c.bf16 %v1254_v28, %v1254_v28  ;;  %v442_v31 = vpop.f32.mrb[15].mxu0  ;;  %v570_v32 = vpop.f32.mrb[15].mxu1 }
  0xfd   :  { %915 = vst.msk [vmem:[%s1722_s2 + $0x30] sm:$0xf] %vm902_vm1, %v1114_v25  ;;  %947 = vst.msk [vmem:[%s1722_s2 + $0xb0] sm:$0xf] %vm902_vm1, %v1146_v26  ;;  %v1115_v33 = vpack.c.bf16 %v442_v31, %v442_v31  ;;  %v1147_v34 = vpack.c.bf16 %v570_v32, %v570_v32 }
  0xfe   :  { %918 = vst.msk [vmem:[%s1722_s2 + $0x3c] sm:$0xf] %vm902_vm1, %v1117_v29  ;;  %950 = vst.msk [vmem:[%s1722_s2 + $0xbc] sm:$0xf] %vm902_vm1, %v1149_v30 }
  0xff   :  { %916 = vst.msk [vmem:[%s1722_s2 + $0x34] sm:$0xf] %vm902_vm1, %v1115_v33  ;;  %948 = vst.msk [vmem:[%s1722_s2 + $0xb4] sm:$0xf] %vm902_vm1, %v1147_v34 }
 0x101   :  { %v1225_v35 = vpop.f32.mrb[16].mxu0  ;;  %v1257_v36 = vpop.f32.mrb[16].mxu1 }
 0x102   :  { %v1120_v37 = vpack.c.bf16 %v1225_v35, %v1225_v35  ;;  %v1152_v38 = vpack.c.bf16 %v1257_v36, %v1257_v36  ;;  %v455_v39 = vpop.f32.mrb[17].mxu0  ;;  %v583_v40 = vpop.f32.mrb[17].mxu1 }
 0x103   :  { %v1118_v41 = vpack.c.bf16 %v455_v39, %v455_v39  ;;  %v1150_v42 = vpack.c.bf16 %v583_v40, %v583_v40  ;;  %v1226_v43 = vpop.f32.mrb[18].mxu0  ;;  %v1258_v44 = vpop.f32.mrb[18].mxu1 }
 0x104   :  { %921 = vst.msk [vmem:[%s1722_s2 + $0x48] sm:$0xf] %vm902_vm1, %v1120_v37  ;;  %953 = vst.msk [vmem:[%s1722_s2 + $0xc8] sm:$0xf] %vm902_vm1, %v1152_v38  ;;  %v1121_v45 = vpack.c.bf16 %v1226_v43, %v1226_v43  ;;  %v1153_v46 = vpack.c.bf16 %v1258_v44, %v1258_v44  ;;  %v458_v47 = vpop.f32.mrb[19].mxu0  ;;  %v586_v48 = vpop.f32.mrb[19].mxu1 }
 0x105   :  { %919 = vst.msk [vmem:[%s1722_s2 + $0x40] sm:$0xf] %vm902_vm1, %v1118_v41  ;;  %951 = vst.msk [vmem:[%s1722_s2 + $0xc0] sm:$0xf] %vm902_vm1, %v1150_v42  ;;  %v1119_v49 = vpack.c.bf16 %v458_v47, %v458_v47  ;;  %v1151_v50 = vpack.c.bf16 %v586_v48, %v586_v48 }
 0x106   :  { %922 = vst.msk [vmem:[%s1722_s2 + $0x4c] sm:$0xf] %vm902_vm1, %v1121_v45  ;;  %954 = vst.msk [vmem:[%s1722_s2 + $0xcc] sm:$0xf] %vm902_vm1, %v1153_v46 }
 0x107   :  { %920 = vst.msk [vmem:[%s1722_s2 + $0x44] sm:$0xf] %vm902_vm1, %v1119_v49  ;;  %952 = vst.msk [vmem:[%s1722_s2 + $0xc4] sm:$0xf] %vm902_vm1, %v1151_v50 }
 0x109   :  { %v1229_v51 = vpop.f32.mrb[20].mxu0  ;;  %v1261_v52 = vpop.f32.mrb[20].mxu1 }
 0x10a   :  { %v1124_v53 = vpack.c.bf16 %v1229_v51, %v1229_v51  ;;  %v1156_v54 = vpack.c.bf16 %v1261_v52, %v1261_v52  ;;  %v471_v55 = vpop.f32.mrb[21].mxu0  ;;  %v599_v56 = vpop.f32.mrb[21].mxu1 }
 0x10b   :  { %v1122_v57 = vpack.c.bf16 %v471_v55, %v471_v55  ;;  %v1154_v58 = vpack.c.bf16 %v599_v56, %v599_v56  ;;  %v1230_v59 = vpop.f32.mrb[22].mxu0  ;;  %v1262_v60 = vpop.f32.mrb[22].mxu1 }
 0x10c   :  { %925 = vst.msk [vmem:[%s1722_s2 + $0x58] sm:$0xf] %vm902_vm1, %v1124_v53  ;;  %957 = vst.msk [vmem:[%s1722_s2 + $0xd8] sm:$0xf] %vm902_vm1, %v1156_v54  ;;  %v1125_v61 = vpack.c.bf16 %v1230_v59, %v1230_v59  ;;  %v1157_v62 = vpack.c.bf16 %v1262_v60, %v1262_v60  ;;  %v474_v63 = vpop.f32.mrb[23].mxu0  ;;  %v602_v0 = vpop.f32.mrb[23].mxu1 }
 0x10d   :  { %923 = vst.msk [vmem:[%s1722_s2 + $0x50] sm:$0xf] %vm902_vm1, %v1122_v57  ;;  %955 = vst.msk [vmem:[%s1722_s2 + $0xd0] sm:$0xf] %vm902_vm1, %v1154_v58  ;;  %v1123_v1 = vpack.c.bf16 %v474_v63, %v474_v63  ;;  %v1155_v2 = vpack.c.bf16 %v602_v0, %v602_v0 }
 0x10e   :  { %926 = vst.msk [vmem:[%s1722_s2 + $0x5c] sm:$0xf] %vm902_vm1, %v1125_v61  ;;  %958 = vst.msk [vmem:[%s1722_s2 + $0xdc] sm:$0xf] %vm902_vm1, %v1157_v62 }
 0x10f   :  { %924 = vst.msk [vmem:[%s1722_s2 + $0x54] sm:$0xf] %vm902_vm1, %v1123_v1  ;;  %956 = vst.msk [vmem:[%s1722_s2 + $0xd4] sm:$0xf] %vm902_vm1, %v1155_v2 }
 0x111   :  { %v1233_v3 = vpop.f32.mrb[24].mxu0  ;;  %v1265_v4 = vpop.f32.mrb[24].mxu1 }
 0x112   :  { %v1128_v5 = vpack.c.bf16 %v1233_v3, %v1233_v3  ;;  %v1160_v6 = vpack.c.bf16 %v1265_v4, %v1265_v4  ;;  %v487_v7 = vpop.f32.mrb[25].mxu0  ;;  %v615_v8 = vpop.f32.mrb[25].mxu1 }
 0x113   :  { %v1126_v9 = vpack.c.bf16 %v487_v7, %v487_v7  ;;  %v1158_v10 = vpack.c.bf16 %v615_v8, %v615_v8  ;;  %v1234_v11 = vpop.f32.mrb[26].mxu0  ;;  %v1266_v12 = vpop.f32.mrb[26].mxu1 }
 0x114   :  { %929 = vst.msk [vmem:[%s1722_s2 + $0x68] sm:$0xf] %vm902_vm1, %v1128_v5  ;;  %961 = vst.msk [vmem:[%s1722_s2 + $0xe8] sm:$0xf] %vm902_vm1, %v1160_v6  ;;  %v1129_v13 = vpack.c.bf16 %v1234_v11, %v1234_v11  ;;  %v1161_v14 = vpack.c.bf16 %v1266_v12, %v1266_v12  ;;  %v490_v15 = vpop.f32.mrb[27].mxu0  ;;  %v618_v16 = vpop.f32.mrb[27].mxu1 }
 0x115   :  { %927 = vst.msk [vmem:[%s1722_s2 + $0x60] sm:$0xf] %vm902_vm1, %v1126_v9  ;;  %959 = vst.msk [vmem:[%s1722_s2 + $0xe0] sm:$0xf] %vm902_vm1, %v1158_v10  ;;  %v1127_v17 = vpack.c.bf16 %v490_v15, %v490_v15  ;;  %v1159_v18 = vpack.c.bf16 %v618_v16, %v618_v16 }
 0x116   :  { %930 = vst.msk [vmem:[%s1722_s2 + $0x6c] sm:$0xf] %vm902_vm1, %v1129_v13  ;;  %962 = vst.msk [vmem:[%s1722_s2 + $0xec] sm:$0xf] %vm902_vm1, %v1161_v14 }
 0x117   :  { %928 = vst.msk [vmem:[%s1722_s2 + $0x64] sm:$0xf] %vm902_vm1, %v1127_v17  ;;  %960 = vst.msk [vmem:[%s1722_s2 + $0xe4] sm:$0xf] %vm902_vm1, %v1159_v18 }
 0x119   :  { %v1237_v19 = vpop.f32.mrb[28].mxu0  ;;  %v1269_v20 = vpop.f32.mrb[28].mxu1 }
 0x11a   :  { %v1132_v21 = vpack.c.bf16 %v1237_v19, %v1237_v19  ;;  %v1164_v22 = vpack.c.bf16 %v1269_v20, %v1269_v20  ;;  %v503_v23 = vpop.f32.mrb[29].mxu0  ;;  %v631_v24 = vpop.f32.mrb[29].mxu1 }
 0x11b   :  { %v1130_v25 = vpack.c.bf16 %v503_v23, %v503_v23  ;;  %v1162_v26 = vpack.c.bf16 %v631_v24, %v631_v24  ;;  %v1238_v27 = vpop.f32.mrb[30].mxu0  ;;  %v1270_v28 = vpop.f32.mrb[30].mxu1 }
 0x11c   :  { %933 = vst.msk [vmem:[%s1722_s2 + $0x78] sm:$0xf] %vm902_vm1, %v1132_v21  ;;  %965 = vst.msk [vmem:[%s1722_s2 + $0xf8] sm:$0xf] %vm902_vm1, %v1164_v22  ;;  %v1133_v29 = vpack.c.bf16 %v1238_v27, %v1238_v27  ;;  %v1165_v30 = vpack.c.bf16 %v1270_v28, %v1270_v28  ;;  %v506_v31 = vpop.f32.mrb[31].mxu0  ;;  %v634_v32 = vpop.f32.mrb[31].mxu1 }
 0x11d   :  { %931 = vst.msk [vmem:[%s1722_s2 + $0x70] sm:$0xf] %vm902_vm1, %v1130_v25  ;;  %963 = vst.msk [vmem:[%s1722_s2 + $0xf0] sm:$0xf] %vm902_vm1, %v1162_v26  ;;  %v1131_v33 = vpack.c.bf16 %v506_v31, %v506_v31  ;;  %v1163_v34 = vpack.c.bf16 %v634_v32, %v634_v32 }
 0x11e   :  { %934 = vst.msk [vmem:[%s1722_s2 + $0x7c] sm:$0xf] %vm902_vm1, %v1133_v29  ;;  %966 = vst.msk [vmem:[%s1722_s2 + $0xfc] sm:$0xf] %vm902_vm1, %v1165_v30 }
 0x11f   :  { %932 = vst.msk [vmem:[%s1722_s2 + $0x74] sm:$0xf] %vm902_vm1, %v1131_v33  ;;  %964 = vst.msk [vmem:[%s1722_s2 + $0xf4] sm:$0xf] %vm902_vm1, %v1163_v34 }

// kernel: generator_forward.9
= control target key start
LH: loop header
LB: loop body
LE: loop exit
PB: predicated region body
PF: predicated region fallthrough
CT: control target
= control target key end

     0   :  { %vm245_vm0 = vcmask 130048   ;;  %vm454_vm1 = vcmask 125952   ;;  %s876_s1 = inlined_call_operand.vmem [shape: bf16[128,16], index: 1, kind: input, shape index: {}]   ;;  %s877_s0 = inlined_call_operand.vmem [shape: bf16[128,128], index: 0, kind: input, shape index: {}]   ;;  %s878_s2 = inlined_call_operand.vmem [shape: f32[1,16], index: 2, kind: input, shape index: {}]   ;;  %s879_s3 = inlined_call_operand.vmem [shape: f32[1,16], index: 3, kind: input, shape index: {}]   ;;  %s880_s4 = inlined_call_operand.vmem [shape: bf16[128,16], index: 4, kind: output, shape index: {}]  }
   0x1   :  { %v587_v0 = vld [vmem:[%s876_s1] sm:$0xff]   ;;  %v588_v1 = vld [vmem:[%s876_s1 + $0x8] sm:$0xff]   ;;  %v589_v2 = vld [vmem:[%s876_s1 + $0x10] sm:$0xff]  }
   0x2   :  { %539 = vmatprep.subr.bf16.mxu0 %v587_v0  ;;  %571 = vmatprep.subr.bf16.mxu1 %v587_v0  ;;  %v590_v3 = vld [vmem:[%s876_s1 + $0x18] sm:$0xff]   ;;  %v595_v4 = vld [vmem:[%s877_s0] sm:$0xff]   ;;  %v592_v7 = vld [vmem:[%s876_s1 + $0x28] sm:$0xff]  }
   0x3   :  { %540 = vmatpush3.bf16.msra.mxu0 %v587_v0  ;;  %579 = vmatpush3.bf16.msra.mxu1 %v587_v0  ;;  %v591_v5 = vld [vmem:[%s876_s1 + $0x20] sm:$0xff]   ;;  %v593_v8 = vld [vmem:[%s876_s1 + $0x30] sm:$0xff]   ;;  %v594_v9 = vld [vmem:[%s876_s1 + $0x38] sm:$0xff]  }
   0x4   :  { %541 = vmatprep.subr.bf16.mxu0 %v588_v1  ;;  %572 = vmatprep.subr.bf16.mxu1 %v588_v1  ;;  %v599_v6 = vld [vmem:[%s877_s0 + $0x20] sm:$0xff]   ;;  %v596_v10 = vld [vmem:[%s877_s0 + $0x8] sm:$0xff]   ;;  %v597_v12 = vld [vmem:[%s877_s0 + $0x10] sm:$0xff]  }
   0x5   :  { %555 = vmatprep.mubr.bf16.mxu0 %v595_v4  ;;  %563 = vmatprep.mubr.bf16.mxu1 %v599_v6  ;;  %v600_v11 = vld [vmem:[%s877_s0 + $0x28] sm:$0xff]   ;;  %v601_v13 = vld [vmem:[%s877_s0 + $0x30] sm:$0xff]   ;;  %v598_v14 = vld [vmem:[%s877_s0 + $0x18] sm:$0xff]  }
   0x6   :  { %v602_v15 = vld [vmem:[%s877_s0 + $0x38] sm:$0xff]  }
   0x7   :  { %542 = vmatpush3.bf16.msra.mxu0 %v588_v1  ;;  %580 = vmatpush3.bf16.msra.mxu1 %v588_v1 }
   0x8   :  { %543 = vmatprep.subr.bf16.mxu0 %v589_v2  ;;  %573 = vmatprep.subr.bf16.mxu1 %v589_v2 }
   0xb   :  { %544 = vmatpush3.bf16.msra.mxu0 %v589_v2  ;;  %581 = vmatpush3.bf16.msra.mxu1 %v589_v2 }
   0xc   :  { %545 = vmatprep.subr.bf16.mxu0 %v590_v3  ;;  %574 = vmatprep.subr.bf16.mxu1 %v590_v3 }
   0xf   :  { %546 = vmatpush3.bf16.msra.mxu0 %v590_v3  ;;  %582 = vmatpush3.bf16.msra.mxu1 %v590_v3 }
  0x10   :  { %547 = vmatprep.subr.bf16.mxu0 %v591_v5  ;;  %575 = vmatprep.subr.bf16.mxu1 %v591_v5 }
  0x13   :  { %548 = vmatpush3.bf16.msra.mxu0 %v591_v5  ;;  %583 = vmatpush3.bf16.msra.mxu1 %v591_v5 }
  0x14   :  { %549 = vmatprep.subr.bf16.mxu0 %v592_v7  ;;  %576 = vmatprep.subr.bf16.mxu1 %v592_v7 }
  0x17   :  { %550 = vmatpush3.bf16.msra.mxu0 %v592_v7  ;;  %584 = vmatpush3.bf16.msra.mxu1 %v592_v7 }
  0x18   :  { %551 = vmatprep.subr.bf16.mxu0 %v593_v8  ;;  %577 = vmatprep.subr.bf16.mxu1 %v593_v8 }
  0x1b   :  { %552 = vmatpush3.bf16.msra.mxu0 %v593_v8  ;;  %585 = vmatpush3.bf16.msra.mxu1 %v593_v8 }
  0x1c   :  { %553 = vmatprep.subr.bf16.mxu0 %v594_v9  ;;  %578 = vmatprep.subr.bf16.mxu1 %v594_v9 }
  0x1f   :  { %554 = vmatpush3.bf16.msra.mxu0 %v594_v9  ;;  %586 = vmatpush3.bf16.msra.mxu1 %v594_v9 }
  0x22   :  { %556 = vmatmul.mubr.bf16.vlgmr.msra.gmra.mrb[0].mxu0 %v596_v10  ;;  %564 = vmatmul.mubr.bf16.vlgmr.msra.gmra.mrb[0].mxu1 %v600_v11 }
  0x23   :  { %559 = vmatprep.mubr.bf16.mxu0 %v597_v12  ;;  %567 = vmatprep.mubr.bf16.mxu1 %v601_v13 }
  0x2a   :  { %560 = vmatmul.mubr.bf16.gmra.mrb[4].mxu0 %v598_v14  ;;  %568 = vmatmul.mubr.bf16.gmra.mrb[4].mxu1 %v602_v15 }
  0xf5   :  { %v678_v16 = vpop.f32.mrb[0].mxu0  ;;  %v680_v17 = vpop.f32.mrb[0].mxu1 }
  0xf6   :  { %v682_v18 = vpop.f32.mrb[1].mxu0  ;;  %v684_v19 = vpop.f32.mrb[1].mxu1  ;;  %v285_v25 = vmul.f32 %v678_v16, %v678_v16  ;;  %v249_v30 = vsel %vm245_vm0, %v678_v16, 0.0  ;;  %v293_v11 = vmul.f32 %v680_v17, %v680_v17  ;;  %v265_v15 = vsel %vm245_vm0, %v680_v17, 0.0 }
  0xf7   :  { %v283_v20 = vmul.f32 %v682_v18, %v682_v18  ;;  %v688_v21 = vpop.f32.mrb[2].mxu0  ;;  %v690_v22 = vpop.f32.mrb[2].mxu1  ;;  %v246_v26 = vsel %vm245_vm0, %v682_v18, 0.0  ;;  %v291_v62 = vmul.f32 %v684_v19, %v684_v19  ;;  %v261_v3 = vsel %vm245_vm0, %v684_v19, 0.0 }
  0xf8   :  { %v692_v23 = vpop.f32.mrb[3].mxu0  ;;  %v694_v24 = vpop.f32.mrb[3].mxu1  ;;  %v286_v32 = vmul.f32 %v688_v21, %v688_v21  ;;  %v302_v36 = vsel %vm245_vm0, %v285_v25, 0.0  ;;  %v251_v37 = vsel %vm245_vm0, %v688_v21, 0.0 }
  0xf9   :  { %v247_v27 = vsel %vm245_vm0, %v692_v23, 0.0  ;;  %v284_v28 = vmul.f32 %v692_v23, %v692_v23  ;;  %v299_v31 = vsel %vm245_vm0, %v283_v20, 0.0  ;;  %v314_v7 = vsel %vm245_vm0, %v291_v62, 0.0 }
  0xfa   :  { %v248_v29 = vadd.f32 %v247_v27, %v246_v26  ;;  %v304_v44 = vsel %vm245_vm0, %v286_v32, 0.0  ;;  %v292_v8 = vmul.f32 %v694_v24, %v694_v24  ;;  %v263_v12 = vsel %vm245_vm0, %v694_v24, 0.0 }
  0xfb   :  { %v300_v33 = vsel %vm245_vm0, %v284_v28, 0.0  ;;  %v294_v20 = vmul.f32 %v690_v22, %v690_v22 }
  0xfc   :  { %v250_v34 = vadd.f32 %v249_v30, %v248_v29  ;;  %v301_v35 = vadd.f32 %v300_v33, %v299_v31  ;;  %v316_v25 = vsel %vm245_vm0, %v292_v8, 0.0  ;;  %v318_v29 = vsel %vm245_vm0, %v293_v11, 0.0 }
  0xfd   :  { %v713_v38 = vpop.f32.mrb[4].mxu0  ;;  %v715_v39 = vpop.f32.mrb[4].mxu1  ;;  %v267_v30 = vsel %vm245_vm0, %v690_v22, 0.0 }
  0xfe   :  { %v303_v40 = vadd.f32 %v302_v36, %v301_v35  ;;  %v717_v41 = vpop.f32.mrb[5].mxu0  ;;  %v252_v42 = vadd.f32 %v251_v37, %v250_v34  ;;  %v719_v43 = vpop.f32.mrb[5].mxu1  ;;  %v289_v53 = vmul.f32 %v713_v38, %v713_v38  ;;  %v257_v59 = vsel %vm245_vm0, %v713_v38, 0.0 }
  0xff   :  { %v253_v45 = vsel %vm245_vm0, %v717_v41, 0.0  ;;  %v287_v46 = vmul.f32 %v717_v41, %v717_v41  ;;  %v726_v47 = vpop.f32.mrb[6].mxu0  ;;  %v728_v48 = vpop.f32.mrb[6].mxu1  ;;  %v295_v26 = vmul.f32 %v719_v43, %v719_v43  ;;  %v269_v31 = vsel %vm245_vm0, %v719_v43, 0.0 }
 0x100   :  { %v254_v49 = vadd.f32 %v253_v45, %v252_v42  ;;  %v305_v50 = vadd.f32 %v304_v44, %v303_v40  ;;  %v730_v51 = vpop.f32.mrb[7].mxu0  ;;  %v732_v52 = vpop.f32.mrb[7].mxu1  ;;  %v290_v60 = vmul.f32 %v726_v47, %v726_v47  ;;  %v310_v1 = vsel %vm245_vm0, %v289_v53, 0.0 }
 0x101   :  { %v306_v54 = vsel %vm245_vm0, %v287_v46, 0.0  ;;  %v255_v55 = vsel %vm245_vm0, %v730_v51, 0.0  ;;  %v288_v56 = vmul.f32 %v730_v51, %v730_v51  ;;  %v259_v2 = vsel %vm245_vm0, %v726_v47, 0.0 }
 0x102   :  { %v307_v57 = vadd.f32 %v306_v54, %v305_v50  ;;  %v256_v58 = vadd.f32 %v255_v55, %v254_v49  ;;  %v312_v6 = vsel %vm245_vm0, %v290_v60, 0.0  ;;  %v320_v34 = vsel %vm245_vm0, %v294_v20, 0.0 }
 0x103   :  { %v308_v61 = vsel %vm245_vm0, %v288_v56, 0.0  ;;  %v322_v35 = vsel %vm245_vm0, %v295_v26, 0.0  ;;  %v296_v36 = vmul.f32 %v732_v52, %v732_v52  ;;  %v297_v42 = vmul.f32 %v715_v39, %v715_v39  ;;  %v243_v26 = vld [vmem:[%s878_s2] sm:$0x1] }
 0x104   :  { %v258_v63 = vadd.f32 %v257_v59, %v256_v58  ;;  %v309_v0 = vadd.f32 %v308_v61, %v307_v57  ;;  %v271_v44 = vsel %vm245_vm0, %v732_v52, 0.0  ;;  %v273_v49 = vsel %vm245_vm0, %v715_v39, 0.0 }
 0x105   :  { %v298_v50 = vmul.f32 %v728_v48, %v728_v48  ;;  %v324_v53 = vsel %vm245_vm0, %v296_v36, 0.0  ;;  %v326_v56 = vsel %vm245_vm0, %v297_v42, 0.0  ;;  %v275_v57 = vsel %vm245_vm0, %v728_v48, 0.0 }
 0x106   :  { %v311_v4 = vadd.f32 %v310_v1, %v309_v0  ;;  %v260_v5 = vadd.f32 %v259_v2, %v258_v63  ;;  %v347_v20 = vlaneseq }
 0x107   :  { %v328_v60 = vsel %vm245_vm0, %v298_v50, 0.0 }
 0x108   :  { %v262_v9 = vadd.f32 %v261_v3, %v260_v5  ;;  %v313_v10 = vadd.f32 %v312_v6, %v311_v4 }
 0x10a   :  { %v315_v13 = vadd.f32 %v314_v7, %v313_v10  ;;  %v264_v14 = vadd.f32 %v263_v12, %v262_v9 }
 0x10c   :  { %v266_v27 = vadd.f32 %v265_v15, %v264_v14  ;;  %v317_v28 = vadd.f32 %v316_v25, %v315_v13  ;;  %v348_v25 = vshrl.u32 %v347_v20, 7 }
 0x10e   :  { %v319_v32 = vadd.f32 %v318_v29, %v317_v28  ;;  %v268_v33 = vadd.f32 %v267_v30, %v266_v27  ;;  %v349_v27 = vsub.s32 0, %v348_v25  ;;  %v244_v30 = vld [vmem:[%s879_s3] sm:$0x1] }
 0x110   :  { %v270_v37 = vadd.f32 %v269_v31, %v268_v33  ;;  %v321_v40 = vadd.f32 %v320_v34, %v319_v32 }
 0x112   :  { %v323_v45 = vadd.f32 %v322_v35, %v321_v40  ;;  %v272_v46 = vadd.f32 %v271_v44, %v270_v37 }
 0x114   :  { %v274_v54 = vadd.f32 %v273_v49, %v272_v46  ;;  %v325_v55 = vadd.f32 %v324_v53, %v323_v45 }
 0x116   :  { %v276_v58 = vadd.f32 %v275_v57, %v274_v54  ;;  %v327_v59 = vadd.f32 %v326_v56, %v325_v55 }
 0x118   :  { %v277_v61 = vrot.slane %v276_v58, 4  ;;  %v329_v62 = vadd.f32 %v328_v60, %v327_v59 }
 0x11a   :  { %v278_v63 = vadd.f32 %v277_v61, %v276_v58  ;;  %v330_v0 = vrot.slane %v329_v62, 4 }
 0x11c   :  { %v279_v1 = vrot.slane %v278_v63, 2  ;;  %v331_v2 = vadd.f32 %v330_v0, %v329_v62 }
 0x11e   :  { %v280_v3 = vadd.f32 %v279_v1, %v278_v63  ;;  %v332_v4 = vrot.slane %v331_v2, 2 }
 0x120   :  { %v281_v5 = vrot.slane %v280_v3, 1  ;;  %v333_v6 = vadd.f32 %v332_v4, %v331_v2 }
 0x122   :  { %v282_v7 = vadd.f32 %v281_v5, %v280_v3  ;;  %v334_v8 = vrot.slane %v333_v6, 1 }
 0x124   :  { %v335_v9 = vadd.f32 %v334_v8, %v333_v6  ;;  %v336_v10 = vmul.f32 0.0078125, %v282_v7 }
 0x126   :  { %v337_v11 = vmul.f32 0.0078125, %v335_v9  ;;  %v338_v12 = vmul.f32 %v336_v10, %v336_v10 }
 0x128   :  { %v339_v13 = vsub.f32 %v337_v11, %v338_v12 }
 0x12a   :  { %v340_v14 = vmax.f32 %v339_v13, 0.0 }
 0x12c   :  { %v341_v15 = vadd.f32 1e-05, %v340_v14 }
 0x12e   :  { %603 = vrsqrt.f32 %v341_v15 }
 0x138   :  { %v604_v28 = vpop.eup %603 }
 0x139   :  { %v343_v29 = vmul.f32 %v604_v28, %v243_v26 }
 0x13b   :  { %v344_v31 = vmul.f32 %v343_v29, %v336_v10  ;;  %v350_v32 = vrot.slane %v343_v29, %v349_v27 }
 0x13d   :  { %v345_v33 = vsub.f32 %v244_v30, %v344_v31  ;;  %v352_v34 = vmul.f32 %v350_v32, %v682_v18  ;;  %v353_v35 = vmul.f32 %v350_v32, %v692_v23  ;;  %v354_v36 = vmul.f32 %v678_v16, %v350_v32 }
 0x13e   :  { %v355_v37 = vmul.f32 %v688_v21, %v350_v32  ;;  %v356_v40 = vmul.f32 %v350_v32, %v717_v41  ;;  %v357_v42 = vmul.f32 %v350_v32, %v730_v51  ;;  %v358_v44 = vmul.f32 %v713_v38, %v350_v32 }
 0x13f   :  { %v359_v45 = vmul.f32 %v726_v47, %v350_v32  ;;  %v360_v46 = vmul.f32 %v350_v32, %v684_v19  ;;  %v361_v49 = vmul.f32 %v350_v32, %v694_v24  ;;  %v362_v18 = vmul.f32 %v680_v17, %v350_v32 }
 0x140   :  { %v363_v23 = vmul.f32 %v690_v22, %v350_v32  ;;  %v364_v16 = vmul.f32 %v350_v32, %v719_v43  ;;  %v365_v21 = vmul.f32 %v350_v32, %v732_v52  ;;  %v366_v41 = vmul.f32 %v715_v39, %v350_v32 }
 0x141   :  { %v367_v51 = vmul.f32 %v728_v48, %v350_v32  ;;  %v372_v50 = vrot.slane %v345_v33, %v349_v27 }
 0x143   :  { %v374_v38 = vadd.f32 %v372_v50, %v352_v34  ;;  %v375_v47 = vadd.f32 %v372_v50, %v353_v35  ;;  %v376_v53 = vadd.f32 %v372_v50, %v354_v36  ;;  %v377_v19 = vadd.f32 %v372_v50, %v355_v37 }
 0x144   :  { %v378_v54 = vadd.f32 %v372_v50, %v356_v40  ;;  %v379_v24 = vadd.f32 %v372_v50, %v357_v42  ;;  %v380_v55 = vadd.f32 %v372_v50, %v358_v44  ;;  %v381_v17 = vadd.f32 %v372_v50, %v359_v45 }
 0x145   :  { %v382_v56 = vadd.f32 %v372_v50, %v360_v46  ;;  %v383_v22 = vadd.f32 %v372_v50, %v361_v49  ;;  %v384_v57 = vadd.f32 %v372_v50, %v362_v18  ;;  %v385_v43 = vadd.f32 %v372_v50, %v363_v23 }
 0x146   :  { %v386_v58 = vadd.f32 %v372_v50, %v364_v16  ;;  %v387_v52 = vadd.f32 %v372_v50, %v365_v21  ;;  %v388_v59 = vadd.f32 %v372_v50, %v366_v41  ;;  %v389_v39 = vadd.f32 %v372_v50, %v367_v51 }
 0x147   :  { %v507_v60 = vpack.c.bf16 %v374_v38, %v374_v38  ;;  %v508_v48 = vpack.c.bf16 %v375_v47, %v375_v47  ;;  %v509_v61 = vpack.c.bf16 %v376_v53, %v376_v53  ;;  %v510_v62 = vpack.c.bf16 %v377_v19, %v377_v19 }
 0x148   :  { %v511_v63 = vpack.c.bf16 %v378_v54, %v378_v54  ;;  %v512_v0 = vpack.c.bf16 %v379_v24, %v379_v24  ;;  %v513_v1 = vpack.c.bf16 %v380_v55, %v380_v55  ;;  %v514_v2 = vpack.c.bf16 %v381_v17, %v381_v17 }
 0x149   :  { %v515_v3 = vpack.c.bf16 %v382_v56, %v382_v56  ;;  %v516_v4 = vpack.c.bf16 %v383_v22, %v383_v22  ;;  %v517_v5 = vpack.c.bf16 %v384_v57, %v384_v57  ;;  %v518_v6 = vpack.c.bf16 %v385_v43, %v385_v43  ;;  %455 = vst.msk [vmem:[%s880_s4] sm:$0xf] %vm454_vm1, %v507_v60 }
 0x14a   :  { %456 = vst.msk [vmem:[%s880_s4 + $0x4] sm:$0xf] %vm454_vm1, %v508_v48  ;;  %457 = vst.msk [vmem:[%s880_s4 + $0x8] sm:$0xf] %vm454_vm1, %v509_v61  ;;  %v519_v7 = vpack.c.bf16 %v386_v58, %v386_v58  ;;  %v520_v8 = vpack.c.bf16 %v387_v52, %v387_v52  ;;  %v521_v9 = vpack.c.bf16 %v388_v59, %v388_v59 }
 0x14b   :  { %458 = vst.msk [vmem:[%s880_s4 + $0xc] sm:$0xf] %vm454_vm1, %v510_v62  ;;  %v522_v10 = vpack.c.bf16 %v389_v39, %v389_v39  ;;  %459 = vst.msk [vmem:[%s880_s4 + $0x10] sm:$0xf] %vm454_vm1, %v511_v63 }
 0x14c   :  { %460 = vst.msk [vmem:[%s880_s4 + $0x14] sm:$0xf] %vm454_vm1, %v512_v0  ;;  %461 = vst.msk [vmem:[%s880_s4 + $0x18] sm:$0xf] %vm454_vm1, %v513_v1 }
 0x14d   :  { %462 = vst.msk [vmem:[%s880_s4 + $0x1c] sm:$0xf] %vm454_vm1, %v514_v2  ;;  %463 = vst.msk [vmem:[%s880_s4 + $0x20] sm:$0xf] %vm454_vm1, %v515_v3 }
 0x14e   :  { %464 = vst.msk [vmem:[%s880_s4 + $0x24] sm:$0xf] %vm454_vm1, %v516_v4  ;;  %465 = vst.msk [vmem:[%s880_s4 + $0x28] sm:$0xf] %vm454_vm1, %v517_v5 }
 0x14f   :  { %466 = vst.msk [vmem:[%s880_s4 + $0x2c] sm:$0xf] %vm454_vm1, %v518_v6  ;;  %467 = vst.msk [vmem:[%s880_s4 + $0x30] sm:$0xf] %vm454_vm1, %v519_v7 }
 0x150   :  { %468 = vst.msk [vmem:[%s880_s4 + $0x34] sm:$0xf] %vm454_vm1, %v520_v8  ;;  %469 = vst.msk [vmem:[%s880_s4 + $0x38] sm:$0xf] %vm454_vm1, %v521_v9 }
 0x151   :  { %470 = vst.msk [vmem:[%s880_s4 + $0x3c] sm:$0xf] %vm454_vm1, %v522_v10 }

// kernel: generator_forward.10
= control target key start
LH: loop header
LB: loop body
LE: loop exit
PB: predicated region body
PF: predicated region fallthrough
CT: control target
= control target key end

     0   :  { %vm221_vm0 = vcmask 261120   ;;  %vm298_vm1 = vcmask 257024   ;;  %s514_s1 = inlined_call_operand.vmem [shape: bf16[256,32], index: 1, kind: input, shape index: {}]   ;;  %s515_s0 = inlined_call_operand.vmem [shape: bf16[32,256], index: 0, kind: input, shape index: {}]   ;;  %s516_s2 = inlined_call_operand.vmem [shape: f32[1,32], index: 2, kind: input, shape index: {}]   ;;  %s517_s3 = inlined_call_operand.vmem [shape: f32[1,32], index: 3, kind: input, shape index: {}]   ;;  %s518_s4 = inlined_call_operand.vmem [shape: bf16[32,32], index: 4, kind: output, shape index: {}]  }
   0x1   :  { %v379_v0 = vld [vmem:[%s514_s1 + $0x40] sm:$0xff]   ;;  %v381_v2 = vld [vmem:[%s514_s1 + $0x48] sm:$0xff]   ;;  %v383_v4 = vld [vmem:[%s514_s1 + $0x50] sm:$0xff]  }
   0x2   :  { %v380_v1 = vld [vmem:[%s514_s1] sm:$0xff]   ;;  %335 = vmatprep.subr.bf16.mxu0 %v379_v0  ;;  %363 = vmatprep.subr.bf16.mxu1 %v379_v0  ;;  %v382_v3 = vld [vmem:[%s514_s1 + $0x8] sm:$0xff]   ;;  %v384_v5 = vld [vmem:[%s514_s1 + $0x10] sm:$0xff]  }
   0x3   :  { %336 = vmatpush3.bf16.msra.mxu0 %v380_v1  ;;  %371 = vmatpush3.bf16.msra.mxu1 %v380_v1  ;;  %v385_v6 = vld [vmem:[%s514_s1 + $0x58] sm:$0xff]   ;;  %v387_v8 = vld [vmem:[%s514_s1 + $0x60] sm:$0xff]   ;;  %v389_v10 = vld [vmem:[%s514_s1 + $0x68] sm:$0xff]  }
   0x4   :  { %337 = vmatprep.subr.bf16.mxu0 %v381_v2  ;;  %364 = vmatprep.subr.bf16.mxu1 %v381_v2  ;;  %v386_v7 = vld [vmem:[%s514_s1 + $0x18] sm:$0xff]   ;;  %v388_v9 = vld [vmem:[%s514_s1 + $0x20] sm:$0xff]   ;;  %v390_v13 = vld [vmem:[%s514_s1 + $0x28] sm:$0xff]  }
   0x5   :  { %v397_v11 = vld [vmem:[%s515_s0 + $0x4] ss:$8 sps:$4 sm:$0xff]   ;;  %v400_v12 = vld [vmem:[%s515_s0 + $0x14] ss:$8 sps:$4 sm:$0xff]   ;;  %v395_v18 = vld [vmem:[%s515_s0] ss:$8 sps:$4 sm:$0xff]  }
   0x6   :  { %v391_v14 = vld [vmem:[%s514_s1 + $0x70] sm:$0xff]   ;;  %202 = vmatprep.mubr.bf16.mxu0 %v397_v11  ;;  %210 = vmatprep.mubr.bf16.mxu1 %v400_v12  ;;  %v393_v16 = vld [vmem:[%s514_s1 + $0x78] sm:$0xff]  }
   0x7   :  { %338 = vmatpush3.bf16.msra.mxu0 %v382_v3  ;;  %372 = vmatpush3.bf16.msra.mxu1 %v382_v3  ;;  %v392_v15 = vld [vmem:[%s514_s1 + $0x30] sm:$0xff]   ;;  %v394_v17 = vld [vmem:[%s514_s1 + $0x38] sm:$0xff]  }
   0x8   :  { %339 = vmatprep.subr.bf16.mxu0 %v383_v4  ;;  %365 = vmatprep.subr.bf16.mxu1 %v383_v4  ;;  %v398_v19 = vld [vmem:[%s515_s0 + $0x10] ss:$8 sps:$4 sm:$0xff]   ;;  %v263_v4 = vlaneseq }
   0xb   :  { %340 = vmatpush3.bf16.msra.mxu0 %v384_v5  ;;  %373 = vmatpush3.bf16.msra.mxu1 %v384_v5  ;;  %v264_v5 = vshrl.u32 %v263_v4, 7 }
   0xc   :  { %341 = vmatprep.subr.bf16.mxu0 %v385_v6  ;;  %366 = vmatprep.subr.bf16.mxu1 %v385_v6  ;;  %v219_v6 = vld [vmem:[%s516_s2] sm:$0x1] }
   0xf   :  { %342 = vmatpush3.bf16.msra.mxu0 %v386_v7  ;;  %374 = vmatpush3.bf16.msra.mxu1 %v386_v7  ;;  %v265_v7 = vsub.s32 0, %v264_v5 }
  0x10   :  { %343 = vmatprep.subr.bf16.mxu0 %v387_v8  ;;  %367 = vmatprep.subr.bf16.mxu1 %v387_v8 }
  0x13   :  { %344 = vmatpush3.bf16.msra.mxu0 %v388_v9  ;;  %375 = vmatpush3.bf16.msra.mxu1 %v388_v9 }
  0x14   :  { %345 = vmatprep.subr.bf16.mxu0 %v389_v10  ;;  %368 = vmatprep.subr.bf16.mxu1 %v389_v10  ;;  %v220_v10 = vld [vmem:[%s517_s3] sm:$0x1] }
  0x17   :  { %346 = vmatpush3.bf16.msra.mxu0 %v390_v13  ;;  %376 = vmatpush3.bf16.msra.mxu1 %v390_v13 }
  0x18   :  { %347 = vmatprep.subr.bf16.mxu0 %v391_v14  ;;  %369 = vmatprep.subr.bf16.mxu1 %v391_v14 }
  0x1b   :  { %348 = vmatpush3.bf16.msra.mxu0 %v392_v15  ;;  %377 = vmatpush3.bf16.msra.mxu1 %v392_v15 }
  0x1c   :  { %349 = vmatprep.subr.bf16.mxu0 %v393_v16  ;;  %370 = vmatprep.subr.bf16.mxu1 %v393_v16 }
  0x1f   :  { %350 = vmatpush3.bf16.msra.mxu0 %v394_v17  ;;  %378 = vmatpush3.bf16.msra.mxu1 %v394_v17 }
  0x22   :  { %203 = vmatmul.mubr.bf16.vlgmr.msra.gmra.mrb[0].mxu0 %v395_v18  ;;  %211 = vmatmul.mubr.bf16.vlgmr.msra.gmra.mrb[0].mxu1 %v398_v19 }
  0xf5   :  { %v351_v20 = vpop.f32.mrb[0].mxu0  ;;  %v357_v21 = vpop.f32.mrb[0].mxu1 }
  0xf6   :  { %v352_v22 = vpop.f32.mrb[1].mxu0  ;;  %v358_v23 = vpop.f32.mrb[1].mxu1 }
  0xf7   :  { %v353_v24 = vadd.f32 %v352_v22, %v351_v20  ;;  %v354_v25 = vpop.f32.mrb[2].mxu0  ;;  %v359_v26 = vadd.f32 %v358_v23, %v357_v21  ;;  %v360_v27 = vpop.f32.mrb[2].mxu1 }
  0xf8   :  { %v355_v28 = vpop.f32.mrb[3].mxu0  ;;  %v361_v29 = vpop.f32.mrb[3].mxu1 }
  0xf9   :  { %v235_v30 = vmul.f32 %v353_v24, %v353_v24  ;;  %v237_v31 = vmul.f32 %v359_v26, %v359_v26  ;;  %v356_v32 = vadd.f32 %v355_v28, %v354_v25  ;;  %v362_v33 = vadd.f32 %v361_v29, %v360_v27 }
  0xfa   :  { %v222_v34 = vsel %vm221_vm0, %v353_v24, 0.0  ;;  %v225_v35 = vsel %vm221_vm0, %v359_v26, 0.0 }
  0xfb   :  { %v223_v36 = vsel %vm221_vm0, %v356_v32, 0.0  ;;  %v236_v37 = vmul.f32 %v356_v32, %v356_v32  ;;  %v239_v39 = vsel %vm221_vm0, %v235_v30, 0.0  ;;  %v242_v40 = vsel %vm221_vm0, %v237_v31, 0.0 }
  0xfc   :  { %v224_v38 = vadd.f32 %v223_v36, %v222_v34  ;;  %v238_v42 = vmul.f32 %v362_v33, %v362_v33  ;;  %v227_v45 = vsel %vm221_vm0, %v362_v33, 0.0 }
  0xfd   :  { %v240_v41 = vsel %vm221_vm0, %v236_v37, 0.0 }
  0xfe   :  { %v241_v43 = vadd.f32 %v240_v41, %v239_v39  ;;  %v226_v44 = vadd.f32 %v225_v35, %v224_v38  ;;  %v244_v48 = vsel %vm221_vm0, %v238_v42, 0.0 }
 0x100   :  { %v228_v46 = vadd.f32 %v227_v45, %v226_v44  ;;  %v243_v47 = vadd.f32 %v242_v40, %v241_v43 }
 0x102   :  { %v229_v49 = vrot.slane %v228_v46, 4  ;;  %v245_v50 = vadd.f32 %v244_v48, %v243_v47 }
 0x104   :  { %v230_v51 = vadd.f32 %v229_v49, %v228_v46  ;;  %v246_v52 = vrot.slane %v245_v50, 4 }
 0x106   :  { %v231_v53 = vrot.slane %v230_v51, 2  ;;  %v247_v54 = vadd.f32 %v246_v52, %v245_v50 }
 0x108   :  { %v232_v55 = vadd.f32 %v231_v53, %v230_v51  ;;  %v248_v56 = vrot.slane %v247_v54, 2 }
 0x10a   :  { %v233_v57 = vrot.slane %v232_v55, 1  ;;  %v249_v58 = vadd.f32 %v248_v56, %v247_v54 }
 0x10c   :  { %v234_v59 = vadd.f32 %v233_v57, %v232_v55  ;;  %v250_v60 = vrot.slane %v249_v58, 1 }
 0x10e   :  { %v251_v61 = vadd.f32 %v250_v60, %v249_v58  ;;  %v252_v62 = vmul.f32 0.03125, %v234_v59 }
 0x110   :  { %v253_v63 = vmul.f32 0.03125, %v251_v61  ;;  %v254_v0 = vmul.f32 %v252_v62, %v252_v62 }
 0x112   :  { %v255_v1 = vsub.f32 %v253_v63, %v254_v0 }
 0x114   :  { %v256_v2 = vmax.f32 %v255_v1, 0.0 }
 0x116   :  { %v257_v3 = vadd.f32 1e-05, %v256_v2 }
 0x118   :  { %401 = vrsqrt.f32 %v257_v3 }
 0x122   :  { %v402_v8 = vpop.eup %401 }
 0x123   :  { %v259_v9 = vmul.f32 %v402_v8, %v219_v6 }
 0x125   :  { %v260_v11 = vmul.f32 %v259_v9, %v252_v62  ;;  %v266_v12 = vrot.slane %v259_v9, %v265_v7 }
 0x127   :  { %v261_v13 = vsub.f32 %v220_v10, %v260_v11  ;;  %v268_v14 = vmul.f32 %v353_v24, %v266_v12  ;;  %v269_v15 = vmul.f32 %v356_v32, %v266_v12  ;;  %v270_v16 = vmul.f32 %v359_v26, %v266_v12 }
 0x128   :  { %v271_v17 = vmul.f32 %v362_v33, %v266_v12 }
 0x129   :  { %v276_v18 = vrot.slane %v261_v13, %v265_v7 }
 0x12b   :  { %v278_v19 = vadd.f32 %v276_v18, %v268_v14  ;;  %v279_v20 = vadd.f32 %v276_v18, %v269_v15  ;;  %v280_v21 = vadd.f32 %v276_v18, %v270_v16  ;;  %v281_v22 = vadd.f32 %v276_v18, %v271_v17 }
 0x12d   :  { %v331_v23 = vpack.c.bf16 %v278_v19, %v278_v19  ;;  %v332_v25 = vpack.c.bf16 %v279_v20, %v279_v20  ;;  %v333_v27 = vpack.c.bf16 %v280_v21, %v280_v21  ;;  %v334_v28 = vpack.c.bf16 %v281_v22, %v281_v22 }
 0x12f   :  { %299 = vst.msk [vmem:[%s518_s4] sm:$0xf] %vm298_vm1, %v331_v23  ;;  %300 = vst.msk [vmem:[%s518_s4 + $0x4] sm:$0xf] %vm298_vm1, %v332_v25 }
 0x130   :  { %301 = vst.msk [vmem:[%s518_s4 + $0x8] sm:$0xf] %vm298_vm1, %v333_v27  ;;  %302 = vst.msk [vmem:[%s518_s4 + $0xc] sm:$0xf] %vm298_vm1, %v334_v28 }

// kernel: generator_forward.11
= control target key start
LH: loop header
LB: loop body
LE: loop exit
PB: predicated region body
PF: predicated region fallthrough
CT: control target
= control target key end

     0   :  { %vm372_vm0 = vcmask 523264   ;;  %vm413_vm1 = vcmask 519168   ;;  %s673_s1 = inlined_call_operand.vmem [shape: bf16[512,64], index: 1, kind: input, shape index: {}]   ;;  %s674_s0 = inlined_call_operand.vmem [shape: bf16[8,512], index: 0, kind: input, shape index: {}]   ;;  %s675_s2 = inlined_call_operand.vmem [shape: f32[1,64], index: 2, kind: input, shape index: {}]   ;;  %s676_s3 = inlined_call_operand.vmem [shape: f32[1,64], index: 3, kind: input, shape index: {}]   ;;  %s677_s4 = inlined_call_operand.vmem [shape: bf16[8,64], index: 4, kind: output, shape index: {}]  }
   0x1   :  { %v499_v0 = vld [vmem:[%s673_s1 + $0x40] sm:$0xff]   ;;  %v503_v4 = vld [vmem:[%s673_s1 + $0x48] sm:$0xff]   ;;  %v507_v8 = vld [vmem:[%s673_s1 + $0x50] sm:$0xff]  }
   0x2   :  { %v500_v1 = vld [vmem:[%s673_s1 + $0xc0] sm:$0xff]   ;;  %455 = vmatprep.subr.bf16.mxu0 %v499_v0  ;;  %v504_v5 = vld [vmem:[%s673_s1 + $0xc8] sm:$0xff]   ;;  %v508_v9 = vld [vmem:[%s673_s1 + $0xd0] sm:$0xff]  }
   0x3   :  { %v501_v2 = vld [vmem:[%s673_s1] sm:$0xff]   ;;  %477 = vmatprep.subr.bf16.mxu1 %v500_v1  ;;  %v505_v6 = vld [vmem:[%s673_s1 + $0x8] sm:$0xff]   ;;  %v509_v10 = vld [vmem:[%s673_s1 + $0x10] sm:$0xff]  }
   0x4   :  { %v502_v3 = vld [vmem:[%s673_s1 + $0x80] sm:$0xff]   ;;  %456 = vmatpush3.bf16.msra.mxu0 %v501_v2  ;;  %v506_v7 = vld [vmem:[%s673_s1 + $0x88] sm:$0xff]   ;;  %v510_v11 = vld [vmem:[%s673_s1 + $0x90] sm:$0xff]  }
   0x5   :  { %478 = vmatpush3.bf16.msra.mxu1 %v502_v3  ;;  %457 = vmatprep.subr.bf16.mxu0 %v503_v4  ;;  %v511_v12 = vld [vmem:[%s673_s1 + $0x58] sm:$0xff]   ;;  %v515_v16 = vld [vmem:[%s673_s1 + $0x60] sm:$0xff]   ;;  %v519_v20 = vld [vmem:[%s673_s1 + $0x68] sm:$0xff]  }
   0x6   :  { %479 = vmatprep.subr.bf16.mxu1 %v504_v5  ;;  %v512_v13 = vld [vmem:[%s673_s1 + $0xd8] sm:$0xff]   ;;  %v516_v17 = vld [vmem:[%s673_s1 + $0xe0] sm:$0xff]   ;;  %v520_v21 = vld [vmem:[%s673_s1 + $0xe8] sm:$0xff]  }
   0x7   :  { %v513_v14 = vld [vmem:[%s673_s1 + $0x18] sm:$0xff]   ;;  %v517_v18 = vld [vmem:[%s673_s1 + $0x20] sm:$0xff]   ;;  %v521_v22 = vld [vmem:[%s673_s1 + $0x28] sm:$0xff]  }
   0x8   :  { %458 = vmatpush3.bf16.msra.mxu0 %v505_v6  ;;  %v514_v15 = vld [vmem:[%s673_s1 + $0x98] sm:$0xff]   ;;  %v518_v19 = vld [vmem:[%s673_s1 + $0xa0] sm:$0xff]   ;;  %v522_v23 = vld [vmem:[%s673_s1 + $0xa8] sm:$0xff]   ;;  %v399_v6 = vlaneseq }
   0x9   :  { %480 = vmatpush3.bf16.msra.mxu1 %v506_v7  ;;  %459 = vmatprep.subr.bf16.mxu0 %v507_v8  ;;  %v523_v24 = vld [vmem:[%s673_s1 + $0x70] sm:$0xff]   ;;  %v527_v28 = vld [vmem:[%s673_s1 + $0x78] sm:$0xff]   ;;  %v18_v32 = vld [vmem:[%s674_s0] sm:$0xff] }
   0xa   :  { %481 = vmatprep.subr.bf16.mxu1 %v508_v9  ;;  %v524_v25 = vld [vmem:[%s673_s1 + $0xf0] sm:$0xff]   ;;  %v528_v29 = vld [vmem:[%s673_s1 + $0xf8] sm:$0xff]   ;;  %v19_v33 = vld [vmem:[%s674_s0 + $0x8] sm:$0xff]  ;;  %v419_v34 = vcombine.low %v18_v32, %v18_v32  ;;  %v420_v35 = vcombine.high %v18_v32, %v18_v32  ;;  %v400_v7 = vshrl.u32 %v399_v6, 7 }
   0xb   :  { %v525_v26 = vld [vmem:[%s673_s1 + $0x30] sm:$0xff]   ;;  %v529_v30 = vld [vmem:[%s673_s1 + $0x38] sm:$0xff]   ;;  %v421_v36 = vcombine.low %v19_v33, %v19_v33  ;;  %v422_v37 = vcombine.high %v19_v33, %v19_v33  ;;  %v370_v8 = vld [vmem:[%s675_s2] sm:$0x1] }
   0xc   :  { %460 = vmatpush3.bf16.msra.mxu0 %v509_v10  ;;  %v526_v27 = vld [vmem:[%s673_s1 + $0xb0] sm:$0xff]   ;;  %v530_v31 = vld [vmem:[%s673_s1 + $0xb8] sm:$0xff]   ;;  %322 = vmatprep.mubr.bf16.mxu0 %v420_v35  ;;  %v401_v9 = vsub.s32 0, %v400_v7 }
   0xd   :  { %482 = vmatpush3.bf16.msra.mxu1 %v510_v11  ;;  %461 = vmatprep.subr.bf16.mxu0 %v511_v12  ;;  %v371_v12 = vld [vmem:[%s676_s3] sm:$0x1] }
   0xe   :  { %483 = vmatprep.subr.bf16.mxu1 %v512_v13  ;;  %362 = vmatprep.mubr.bf16.mxu1 %v422_v37 }
  0x10   :  { %462 = vmatpush3.bf16.msra.mxu0 %v513_v14 }
  0x11   :  { %484 = vmatpush3.bf16.msra.mxu1 %v514_v15  ;;  %463 = vmatprep.subr.bf16.mxu0 %v515_v16 }
  0x12   :  { %485 = vmatprep.subr.bf16.mxu1 %v516_v17 }
  0x14   :  { %464 = vmatpush3.bf16.msra.mxu0 %v517_v18 }
  0x15   :  { %486 = vmatpush3.bf16.msra.mxu1 %v518_v19  ;;  %465 = vmatprep.subr.bf16.mxu0 %v519_v20 }
  0x16   :  { %487 = vmatprep.subr.bf16.mxu1 %v520_v21 }
  0x18   :  { %466 = vmatpush3.bf16.msra.mxu0 %v521_v22 }
  0x19   :  { %488 = vmatpush3.bf16.msra.mxu1 %v522_v23  ;;  %467 = vmatprep.subr.bf16.mxu0 %v523_v24 }
  0x1a   :  { %489 = vmatprep.subr.bf16.mxu1 %v524_v25 }
  0x1c   :  { %468 = vmatpush3.bf16.msra.mxu0 %v525_v26 }
  0x1d   :  { %490 = vmatpush3.bf16.msra.mxu1 %v526_v27  ;;  %469 = vmatprep.subr.bf16.mxu0 %v527_v28 }
  0x1e   :  { %491 = vmatprep.subr.bf16.mxu1 %v528_v29 }
  0x20   :  { %470 = vmatpush3.bf16.msra.mxu0 %v529_v30 }
  0x21   :  { %492 = vmatpush3.bf16.msra.mxu1 %v530_v31 }
  0x23   :  { %323 = vmatmul.mubr.bf16.vlgmr.msra.gmra.mrb[0].mxu0 %v419_v34 }
  0x24   :  { %363 = vmatmul.mubr.bf16.vlgmr.msra.gmra.mrb[0].mxu1 %v421_v36 }
  0xf6   :  { %v471_v38 = vpop.f32.mrb[0].mxu0 }
  0xf7   :  { %v493_v39 = vpop.f32.mrb[0].mxu1  ;;  %v472_v40 = vpop.f32.mrb[1].mxu0 }
  0xf8   :  { %v494_v41 = vpop.f32.mrb[1].mxu1  ;;  %v473_v42 = vadd.f32 %v472_v40, %v471_v38  ;;  %v474_v44 = vpop.f32.mrb[2].mxu0 }
  0xf9   :  { %v495_v43 = vadd.f32 %v494_v41, %v493_v39  ;;  %v496_v45 = vpop.f32.mrb[2].mxu1  ;;  %v475_v46 = vpop.f32.mrb[3].mxu0 }
  0xfa   :  { %v497_v47 = vpop.f32.mrb[3].mxu1 }
  0xfb   :  { %v365_v48 = vadd.f32 %v495_v43, %v473_v42 }
  0xfd   :  { %v373_v49 = vsel %vm372_vm0, %v365_v48, 0.0  ;;  %v380_v50 = vmul.f32 %v365_v48, %v365_v48 }
  0xfe   :  { %v374_v51 = vrot.slane %v373_v49, 4 }
  0xff   :  { %v381_v52 = vsel %vm372_vm0, %v380_v50, 0.0 }
 0x100   :  { %v375_v53 = vadd.f32 %v374_v51, %v373_v49  ;;  %v382_v54 = vrot.slane %v381_v52, 4 }
 0x102   :  { %v376_v55 = vrot.slane %v375_v53, 2  ;;  %v383_v56 = vadd.f32 %v382_v54, %v381_v52 }
 0x104   :  { %v377_v57 = vadd.f32 %v376_v55, %v375_v53  ;;  %v384_v58 = vrot.slane %v383_v56, 2 }
 0x106   :  { %v378_v59 = vrot.slane %v377_v57, 1  ;;  %v385_v60 = vadd.f32 %v384_v58, %v383_v56 }
 0x108   :  { %v379_v61 = vadd.f32 %v378_v59, %v377_v57  ;;  %v386_v62 = vrot.slane %v385_v60, 1 }
 0x10a   :  { %v387_v63 = vadd.f32 %v386_v62, %v385_v60  ;;  %v388_v0 = vmul.f32 0.125, %v379_v61 }
 0x10c   :  { %v389_v1 = vmul.f32 0.125, %v387_v63  ;;  %v390_v2 = vmul.f32 %v388_v0, %v388_v0 }
 0x10e   :  { %v391_v3 = vsub.f32 %v389_v1, %v390_v2 }
 0x110   :  { %v392_v4 = vmax.f32 %v391_v3, 0.0 }
 0x112   :  { %v393_v5 = vadd.f32 1e-05, %v392_v4 }
 0x114   :  { %535 = vrsqrt.f32 %v393_v5 }
 0x11e   :  { %v536_v10 = vpop.eup %535 }
 0x11f   :  { %v395_v11 = vmul.f32 %v536_v10, %v370_v8 }
 0x121   :  { %v396_v13 = vmul.f32 %v395_v11, %v388_v0  ;;  %v402_v14 = vrot.slane %v395_v11, %v401_v9 }
 0x123   :  { %v397_v15 = vsub.f32 %v371_v12, %v396_v13  ;;  %v404_v16 = vmul.f32 %v402_v14, %v365_v48 }
 0x125   :  { %v409_v17 = vrot.slane %v397_v15, %v401_v9 }
 0x127   :  { %v411_v18 = vadd.f32 %v409_v17, %v404_v16 }
 0x129   :  { %v412_v19 = vpack.c.bf16 %v411_v18, %v411_v18 }
 0x12b   :  { %414 = vst.msk [vmem:[%s677_s4] sm:$0xf] %vm413_vm1, %v412_v19 }

// kernel: generator_forward.13
= control target key start
LH: loop header
LB: loop body
LE: loop exit
PB: predicated region body
PF: predicated region fallthrough
CT: control target
= control target key end

     0   :  { %vm253_vm0 = vcmask 261120   ;;  %v1133_v51 = vmov 0.0|0.0   ;;  %vm1134_vm1 = vmmov 0   ;;  %v1135_v61 = vmov 0.0   ;;  %s1428_s3 = inlined_call_operand.vmem [shape: bf16[288,64], index: 3, kind: input, shape index: {}]   ;;  %s1429_s1 = inlined_call_operand.vmem [shape: bf16[32,288], index: 1, kind: input, shape index: {}]   ;;  %s1430_s2 = inlined_call_operand.vmem [shape: bf16[288,64], index: 2, kind: input, shape index: {}]   ;;  %s1431_s0 = inlined_call_operand.vmem [shape: bf16[32,288], index: 0, kind: input, shape index: {}]   ;;  %s1432_s6 = inlined_call_operand.vmem [shape: f32[64,64], index: 6, kind: input, shape index: {}]   ;;  %s1433_s4 = inlined_call_operand.vmem [shape: f32[1,64], index: 4, kind: input, shape index: {}]   ;;  %s1434_s5 = inlined_call_operand.vmem [shape: f32[1,64], index: 5, kind: input, shape index: {}]   ;;  %s1435_s7 = inlined_call_operand.vmem [shape: bf16[32,64], index: 7, kind: output, shape index: {}]  }
   0x1   :  { %v1079_v0 = vld [vmem:[%s1428_s3 + $0x80] sm:$0xff]   ;;  %v1080_v1 = vld [vmem:[%s1428_s3 + $0x88] sm:$0xff]   ;;  %v1091_v12 = vld [vmem:[%s1428_s3 + $0x50] sm:$0xff]   ;;  %vm610_vm2 = vcmask 523264   ;;  %vm833_vm3 = vcmask 519168  }
   0x2   :  { %986 = vmatprep.subr.bf16.mxu1 %v1079_v0  ;;  %v1081_v2 = vld [vmem:[%s1428_s3 + $0x40] sm:$0xff]   ;;  %v1082_v3 = vld [vmem:[%s1429_s1 + $0x8] ss:$12 sps:$4 sm:$0xff]   ;;  %v1095_v16 = vld [vmem:[%s1428_s3 + $0x58] sm:$0xff]  }
   0x3   :  { %987 = vmatpush3.bf16.msra.mxu1 %v1079_v0  ;;  %904 = vmatprep.subr.bf16.mxu0 %v1081_v2  ;;  %v1083_v4 = vld [vmem:[%s1430_s2 + $0x40] sm:$0xff]   ;;  %v1087_v8 = vld [vmem:[%s1428_s3 + $0x48] sm:$0xff]   ;;  %v1092_v13 = vld [vmem:[%s1430_s2 + $0x50] sm:$0xff]  }
   0x4   :  { %988 = vmatprep.subr.bf16.mxu1 %v1080_v1  ;;  %990 = vmatprep.mubr.msk.bf16.mxu1 %vm253_vm0, %v1082_v3  ;;  %v1084_v5 = vld [vmem:[%s1428_s3] sm:$0xff]   ;;  %v1088_v9 = vld [vmem:[%s1430_s2 + $0x48] sm:$0xff]   ;;  %v1093_v14 = vld [vmem:[%s1428_s3 + $0x10] sm:$0xff]  }
   0x5   :  { %v1085_v6 = vld [vmem:[%s1429_s1 + $0x20] ss:$12 sps:$4 sm:$0xff]   ;;  %905 = vmatpush3.bf16.msra.mxu0 %v1084_v5  ;;  %v1094_v15 = vld [vmem:[%s1430_s2 + $0x10] sm:$0xff]   ;;  %v1096_v17 = vld [vmem:[%s1430_s2 + $0x58] sm:$0xff]  }
   0x6   :  { %v1086_v7 = vld [vmem:[%s1430_s2] sm:$0xff]   ;;  %906 = vmatprep.subr.bf16.mxu0 %v1087_v8  ;;  %v1089_v10 = vld [vmem:[%s1428_s3 + $0x8] sm:$0xff]   ;;  %v1097_v18 = vld [vmem:[%s1428_s3 + $0x18] sm:$0xff]  }
   0x7   :  { %989 = vmatpush3.bf16.msra.mxu1 %v1080_v1  ;;  %v1090_v11 = vld [vmem:[%s1430_s2 + $0x8] sm:$0xff]   ;;  %v1098_v19 = vld [vmem:[%s1430_s2 + $0x18] sm:$0xff]   ;;  %v1099_v20 = vld [vmem:[%s1428_s3 + $0x60] sm:$0xff]  }
   0x8   :  { %936 = vmatprep.subr.bf16.mxu1 %v1083_v4  ;;  %v1100_v21 = vld [vmem:[%s1430_s2 + $0x60] sm:$0xff]   ;;  %v1103_v24 = vld [vmem:[%s1428_s3 + $0x68] sm:$0xff]   ;;  %v1107_v28 = vld [vmem:[%s1428_s3 + $0x70] sm:$0xff]  }
   0x9   :  { %907 = vmatpush3.bf16.msra.mxu0 %v1089_v10  ;;  %v1101_v22 = vld [vmem:[%s1428_s3 + $0x20] sm:$0xff]   ;;  %v1104_v25 = vld [vmem:[%s1430_s2 + $0x68] sm:$0xff]   ;;  %v1108_v29 = vld [vmem:[%s1430_s2 + $0x70] sm:$0xff]  }
   0xa   :  { %991 = vmatmul.mubr.msk.bf16.vlgmr.msra.gmra.mrb[0].mxu1 %vm253_vm0, %v1085_v6  ;;  %908 = vmatprep.subr.bf16.mxu0 %v1091_v12  ;;  %v1102_v23 = vld [vmem:[%s1430_s2 + $0x20] sm:$0xff]   ;;  %v1105_v26 = vld [vmem:[%s1428_s3 + $0x28] sm:$0xff]   ;;  %v1109_v30 = vld [vmem:[%s1428_s3 + $0x30] sm:$0xff]  }
   0xb   :  { %937 = vmatpush3.bf16.msra.mxu1 %v1086_v7  ;;  %v1106_v27 = vld [vmem:[%s1430_s2 + $0x28] sm:$0xff]   ;;  %v1110_v31 = vld [vmem:[%s1430_s2 + $0x30] sm:$0xff]   ;;  %v1111_v32 = vld [vmem:[%s1428_s3 + $0x78] sm:$0xff]  }
   0xc   :  { %938 = vmatprep.subr.bf16.mxu1 %v1088_v9  ;;  %v1112_v33 = vld [vmem:[%s1430_s2 + $0x78] sm:$0xff]   ;;  %v1115_v36 = vld [vmem:[%s1429_s1] ss:$12 sps:$4 sm:$0xff]   ;;  %v1117_v37 = vld [vmem:[%s1429_s1 + $0x4] ss:$12 sps:$4 sm:$0xff]  }
   0xd   :  { %909 = vmatpush3.bf16.msra.mxu0 %v1093_v14  ;;  %v1113_v34 = vld [vmem:[%s1428_s3 + $0x38] sm:$0xff]   ;;  %v1118_v38 = vld [vmem:[%s1431_s0] ss:$12 sps:$4 sm:$0xff]   ;;  %v1120_v39 = vld [vmem:[%s1431_s0 + $0x4] ss:$12 sps:$4 sm:$0xff]   ;;  %292 = vmatprep.mubr.bf16.mxu0 %v1117_v37 }
   0xe   :  { %910 = vmatprep.subr.bf16.mxu0 %v1095_v16  ;;  %v1114_v35 = vld [vmem:[%s1430_s2 + $0x38] sm:$0xff]   ;;  %v1121_v40 = vld [vmem:[%s1430_s2 + $0x80] sm:$0xff]   ;;  %534 = vmatprep.mubr.bf16.mxu1 %v1120_v39  ;;  %v1128_v43 = vld [vmem:[%s1430_s2 + $0x88] sm:$0xff]  }
   0xf   :  { %939 = vmatpush3.bf16.msra.mxu1 %v1090_v11  ;;  %v1122_v41 = vld [vmem:[%s1429_s1 + $0x1c] ss:$12 sps:$4 sm:$0xff]   ;;  %v1126_v44 = vld [vmem:[%s1429_s1 + $0x18] ss:$12 sps:$4 sm:$0xff]   ;;  %v1130_v47 = vld [vmem:[%s1431_s0 + $0x20] ss:$12 sps:$4 sm:$0xff]  }
  0x10   :  { %940 = vmatprep.subr.bf16.mxu1 %v1092_v13  ;;  %v1124_v42 = vld [vmem:[%s1431_s0 + $0x1c] ss:$12 sps:$4 sm:$0xff]   ;;  %v1127_v45 = vld [vmem:[%s1431_s0 + $0x18] ss:$12 sps:$4 sm:$0xff]   ;;  %v604_v52 = vld [vmem:[%s1432_s6 + $0x10] sm:$0xff] }
  0x11   :  { %911 = vmatpush3.bf16.msra.mxu0 %v1097_v18  ;;  %v1129_v46 = vld [vmem:[%s1431_s0 + $0x8] ss:$12 sps:$4 sm:$0xff]   ;;  %v602_v48 = vld [vmem:[%s1432_s6] sm:$0xff]  ;;  %v605_v53 = vld [vmem:[%s1432_s6 + $0x18] sm:$0xff] }
  0x12   :  { %912 = vmatprep.subr.bf16.mxu0 %v1099_v20  ;;  %v603_v49 = vld [vmem:[%s1432_s6 + $0x8] sm:$0xff]  ;;  %v1341_v54 = vpack.c.bf16 %v605_v53, %v604_v52  ;;  %v606_v55 = vld [vmem:[%s1432_s6 + $0x20] sm:$0xff]  ;;  %v608_v58 = vld [vmem:[%s1432_s6 + $0x30] sm:$0xff] }
  0x13   :  { %941 = vmatpush3.bf16.msra.mxu1 %v1094_v15  ;;  %v1330_v50 = vpack.c.bf16 %v603_v49, %v602_v48  ;;  %v607_v56 = vld [vmem:[%s1432_s6 + $0x28] sm:$0xff]  ;;  %v609_v59 = vld [vmem:[%s1432_s6 + $0x38] sm:$0xff] }
  0x14   :  { %942 = vmatprep.subr.bf16.mxu1 %v1096_v17  ;;  %v1351_v57 = vpack.c.bf16 %v607_v56, %v606_v55  ;;  %v1361_v60 = vpack.c.bf16 %v609_v59, %v608_v58 }
  0x15   :  { %913 = vmatpush3.bf16.msra.mxu0 %v1101_v22 }
  0x16   :  { %914 = vmatprep.subr.bf16.mxu0 %v1103_v24 }
  0x17   :  { %943 = vmatpush3.bf16.msra.mxu1 %v1098_v19 }
  0x18   :  { %944 = vmatprep.subr.bf16.mxu1 %v1100_v21 }
  0x19   :  { %915 = vmatpush3.bf16.msra.mxu0 %v1105_v26 }
  0x1a   :  { %916 = vmatprep.subr.bf16.mxu0 %v1107_v28 }
  0x1b   :  { %945 = vmatpush3.bf16.msra.mxu1 %v1102_v23 }
  0x1c   :  { %946 = vmatprep.subr.bf16.mxu1 %v1104_v25 }
  0x1d   :  { %917 = vmatpush3.bf16.msra.mxu0 %v1109_v30 }
  0x1e   :  { %918 = vmatprep.subr.bf16.mxu0 %v1111_v32 }
  0x1f   :  { %947 = vmatpush3.bf16.msra.mxu1 %v1106_v27 }
  0x20   :  { %948 = vmatprep.subr.bf16.mxu1 %v1108_v29 }
  0x21   :  { %919 = vmatpush3.bf16.msra.mxu0 %v1113_v34 }
  0x22   :  { %1040 = vmatprep.subr.bf16.mxu0 %v1133_v51 }
  0x23   :  { %949 = vmatpush3.bf16.msra.mxu1 %v1110_v31 }
  0x24   :  { %950 = vmatprep.subr.bf16.mxu1 %v1112_v33  ;;  %293 = vmatmul.mubr.bf16.vlgmr.msra.gmra.mrb[0].mxu0 %v1115_v36 }
  0x25   :  { %300 = vmatprep.mubr.bf16.mxu0 %v1122_v41  ;;  %1042 = vmatpush3.bf16.msra.mxu0 %v1330_v50 }
  0x26   :  { %1043 = vmatprep.subr.bf16.mxu0 %v1133_v51 }
  0x27   :  { %951 = vmatpush3.bf16.msra.mxu1 %v1114_v35 }
  0x28   :  { %994 = vmatprep.subr.bf16.mxu1 %v1121_v40 }
  0x29   :  { %1045 = vmatpush3.bf16.msra.mxu0 %v1341_v54 }
  0x2a   :  { %535 = vmatmul.mubr.bf16.vlgmr.msra.gmra.mrb[4].mxu1 %v1118_v38  ;;  %1046 = vmatprep.subr.bf16.mxu0 %v1133_v51 }
  0x2b   :  { %995 = vmatpush3.bf16.msra.mxu1 %v1121_v40  ;;  %542 = vmatprep.mubr.bf16.mxu1 %v1124_v42 }
  0x2c   :  { %996 = vmatprep.subr.bf16.mxu1 %v1128_v43  ;;  %301 = vmatmul.mubr.bf16.gmra.mrb[4].mxu0 %v1126_v44 }
  0x2d   :  { %1048 = vmatpush3.bf16.msra.mxu0 %v1351_v57  ;;  %1018 = vmatprep.mubr.msk.f32.mxu0 %vm1134_vm1, %v1135_v61 }
  0x2e   :  { %1049 = vmatprep.subr.bf16.mxu0 %v1133_v51 }
  0x2f   :  { %997 = vmatpush3.bf16.msra.mxu1 %v1128_v43 }
  0x31   :  { %1051 = vmatpush3.bf16.msra.mxu0 %v1361_v60 }
  0x32   :  { %543 = vmatmul.mubr.bf16.gmra.mrb[8].mxu1 %v1127_v45  ;;  %1052 = vmatprep.subr.bf16.mxu0 %v1133_v51 }
  0x33   :  { %998 = vmatprep.mubr.msk.bf16.mxu1 %vm253_vm0, %v1129_v46 }
  0x3a   :  { %999 = vmatmul.mubr.msk.bf16.vlgmr.msra.gmra.mrb[0].mxu1 %vm253_vm0, %v1130_v47 }
  0xf7   :  { %v920_v62 = vpop.f32.mrb[0].mxu0 }
  0xf8   :  { %v921_v63 = vpop.f32.mrb[1].mxu0 }
  0xf9   :  { %v922_v1 = vadd.f32 %v921_v63, %v920_v62  ;;  %v923_v2 = vpop.f32.mrb[2].mxu0 }
  0xfa   :  { %v924_v4 = vpop.f32.mrb[3].mxu0 }
  0xfb   :  { %v925_v7 = vadd.f32 %v924_v4, %v923_v2 }
  0xfd   :  { %v952_v0 = vpop.f32.mrb[4].mxu1 }
  0xfe   :  { %v953_v3 = vpop.f32.mrb[5].mxu1 }
  0xff   :  { %v954_v5 = vadd.f32 %v953_v3, %v952_v0  ;;  %v955_v6 = vpop.f32.mrb[6].mxu1  ;;  %v926_v11 = vpop.f32.mrb[4].mxu0 }
 0x100   :  { %v956_v8 = vpop.f32.mrb[7].mxu1  ;;  %v927_v13 = vpop.f32.mrb[5].mxu0 }
 0x101   :  { %v957_v9 = vadd.f32 %v956_v8, %v955_v6  ;;  %v1066_v10 = vadd.f32 %v954_v5, %v922_v1  ;;  %v928_v15 = vadd.f32 %v927_v13, %v926_v11  ;;  %v929_v16 = vpop.f32.mrb[6].mxu0 }
 0x102   :  { %v930_v18 = vpop.f32.mrb[7].mxu0 }
 0x103   :  { %v1070_v12 = vadd.f32 %v957_v9, %v925_v7  ;;  %v931_v21 = vadd.f32 %v930_v18, %v929_v16  ;;  %v601_v16 = vld [vmem:[%s1434_s5] sm:$0x1] }
 0x105   :  { %v958_v14 = vpop.f32.mrb[8].mxu1 }
 0x106   :  { %v959_v17 = vpop.f32.mrb[9].mxu1 }
 0x107   :  { %v960_v19 = vadd.f32 %v959_v17, %v958_v14  ;;  %v961_v20 = vpop.f32.mrb[10].mxu1 }
 0x108   :  { %v962_v22 = vpop.f32.mrb[11].mxu1 }
 0x109   :  { %v963_v23 = vadd.f32 %v962_v22, %v961_v20  ;;  %v1064_v24 = vadd.f32 %v960_v19, %v928_v15 }
 0x10b   :  { %v1068_v25 = vadd.f32 %v963_v23, %v931_v21 }
 0x10d   :  { %v1000_v26 = vpop.f32.mrb[0].mxu1 }
 0x10e   :  { %v1367_v27 = vadd.f32 %v1064_v24, %v1000_v26  ;;  %v585_v28 = vpop.f32.mrb[1].mxu1 }
 0x10f   :  { %v1369_v29 = vadd.f32 %v1066_v10, %v585_v28  ;;  %v1001_v30 = vpop.f32.mrb[2].mxu1 }
 0x110   :  { %v1371_v31 = vadd.f32 %v1068_v25, %v1001_v30  ;;  %v588_v32 = vpop.f32.mrb[3].mxu1  ;;  %v626_v35 = vmul.f32 %v1367_v27, %v1367_v27  ;;  %v614_v40 = vsel %vm610_vm2, %v1367_v27, 0.0 }
 0x111   :  { %v624_v33 = vmul.f32 %v1369_v29, %v1369_v29  ;;  %v1375_v34 = vadd.f32 %v1070_v12, %v588_v32  ;;  %v611_v36 = vsel %vm610_vm2, %v1369_v29, 0.0 }
 0x112   :  { %v631_v45 = vsel %vm610_vm2, %v626_v35, 0.0  ;;  %v616_v46 = vsel %vm610_vm2, %v1371_v31, 0.0  ;;  %v627_v47 = vmul.f32 %v1371_v31, %v1371_v31 }
 0x113   :  { %v612_v37 = vsel %vm610_vm2, %v1375_v34, 0.0  ;;  %v625_v38 = vmul.f32 %v1375_v34, %v1375_v34  ;;  %v628_v41 = vsel %vm610_vm2, %v624_v33, 0.0 }
 0x114   :  { %v613_v39 = vadd.f32 %v612_v37, %v611_v36  ;;  %v633_v53 = vsel %vm610_vm2, %v627_v47, 0.0 }
 0x115   :  { %v629_v42 = vsel %vm610_vm2, %v625_v38, 0.0 }
 0x116   :  { %v615_v43 = vadd.f32 %v614_v40, %v613_v39  ;;  %v630_v44 = vadd.f32 %v629_v42, %v628_v41 }
 0x118   :  { %v617_v48 = vadd.f32 %v616_v46, %v615_v43  ;;  %v632_v49 = vadd.f32 %v631_v45, %v630_v44 }
 0x11a   :  { %v618_v52 = vrot.slane %v617_v48, 4  ;;  %v634_v56 = vadd.f32 %v633_v53, %v632_v49 }
 0x11c   :  { %v619_v55 = vadd.f32 %v618_v52, %v617_v48  ;;  %v635_v62 = vrot.slane %v634_v56, 4 }
 0x11e   :  { %v620_v58 = vrot.slane %v619_v55, 2  ;;  %v636_v1 = vadd.f32 %v635_v62, %v634_v56 }
 0x120   :  { %v621_v59 = vadd.f32 %v620_v58, %v619_v55  ;;  %v637_v2 = vrot.slane %v636_v1, 2 }
 0x122   :  { %v622_v63 = vrot.slane %v621_v59, 1  ;;  %v638_v3 = vadd.f32 %v637_v2, %v636_v1 }
 0x124   :  { %v623_v0 = vadd.f32 %v622_v63, %v621_v59  ;;  %v639_v4 = vrot.slane %v638_v3, 1 }
 0x126   :  { %1019 = vmatmul.mubr.msk.f32.vlgmr.msra.gmra.mrb[8].mxu0 %vm610_vm2, %v623_v0  ;;  %v640_v5 = vadd.f32 %v639_v4, %v638_v3 }
 0x127   :  { %1054 = vmatpush3.bf16.msra.mxu0 %v1330_v50  ;;  %1037 = vmatprep.mubr.msk.f32.mxu0 %vm1134_vm1, %v1135_v61 }
 0x128   :  { %1055 = vmatprep.subr.bf16.mxu0 %v1133_v51 }
 0x12b   :  { %1057 = vmatpush3.bf16.msra.mxu0 %v1341_v54 }
 0x12c   :  { %1058 = vmatprep.subr.bf16.mxu0 %v1133_v51 }
 0x12f   :  { %1060 = vmatpush3.bf16.msra.mxu0 %v1351_v57  ;;  %v798_v57 = vlaneseq }
 0x130   :  { %1061 = vmatprep.subr.bf16.mxu0 %v1133_v51  ;;  %v600_v51 = vld [vmem:[%s1433_s4] sm:$0x1] }
 0x131   :  { %v799_v13 = vshrl.u32 %v798_v57, 7 }
 0x133   :  { %1063 = vmatpush3.bf16.msra.mxu0 %v1361_v60  ;;  %v800_v60 = vsub.s32 0, %v799_v13 }
 0x136   :  { %1038 = vmatmul.mubr.msk.f32.vlgmr.msra.gmra.mrb[10].mxu0 %vm610_vm2, %v640_v5 }
 0x1f9   :  { %v710_v50 = vpop.f32.mrb[8].mxu0 }
 0x1fa   :  { %v1020_v61 = vpop.f32.mrb[9].mxu0  ;;  %v714_v6 = vmul.f32 0.0078125, %v710_v50 }
 0x1fc   :  { %v789_v8 = vmul.f32 %v714_v6, %v714_v6 }
 0x209   :  { %v784_v7 = vpop.f32.mrb[10].mxu0 }
 0x20a   :  { %v788_v9 = vmul.f32 0.0078125, %v784_v7  ;;  %v1039_v54 = vpop.f32.mrb[11].mxu0 }
 0x20c   :  { %v790_v10 = vsub.f32 %v788_v9, %v789_v8 }
 0x20e   :  { %v791_v11 = vmax.f32 %v790_v10, 0.0 }
 0x210   :  { %v792_v12 = vadd.f32 1e-05, %v791_v11 }
 0x212   :  { %1131 = vrsqrt.f32 %v792_v12 }
 0x21c   :  { %v1132_v14 = vpop.eup %1131 }
 0x21d   :  { %v794_v15 = vmul.f32 %v1132_v14, %v600_v51 }
 0x21f   :  { %v795_v17 = vmul.f32 %v794_v15, %v714_v6  ;;  %v801_v18 = vrot.slane %v794_v15, %v800_v60 }
 0x221   :  { %v796_v19 = vsub.f32 %v601_v16, %v795_v17  ;;  %v803_v20 = vmul.f32 %v1369_v29, %v801_v18  ;;  %v804_v21 = vmul.f32 %v1375_v34, %v801_v18  ;;  %v805_v22 = vmul.f32 %v1367_v27, %v801_v18 }
 0x222   :  { %v806_v23 = vmul.f32 %v1371_v31, %v801_v18 }
 0x223   :  { %v811_v24 = vrot.slane %v796_v19, %v800_v60 }
 0x225   :  { %v813_v25 = vadd.f32 %v811_v24, %v803_v20  ;;  %v814_v26 = vadd.f32 %v811_v24, %v804_v21  ;;  %v815_v28 = vadd.f32 %v811_v24, %v805_v22  ;;  %v816_v30 = vadd.f32 %v811_v24, %v806_v23 }
 0x227   :  { %v900_v32 = vpack.c.bf16 %v813_v25, %v813_v25  ;;  %v901_v33 = vpack.c.bf16 %v814_v26, %v814_v26  ;;  %v902_v35 = vpack.c.bf16 %v815_v28, %v815_v28  ;;  %v903_v36 = vpack.c.bf16 %v816_v30, %v816_v30 }
 0x229   :  { %834 = vst.msk [vmem:[%s1435_s7] sm:$0xf] %vm833_vm3, %v900_v32  ;;  %835 = vst.msk [vmem:[%s1435_s7 + $0x4] sm:$0xf] %vm833_vm3, %v901_v33 }
 0x22a   :  { %836 = vst.msk [vmem:[%s1435_s7 + $0x8] sm:$0xf] %vm833_vm3, %v902_v35  ;;  %837 = vst.msk [vmem:[%s1435_s7 + $0xc] sm:$0xf] %vm833_vm3, %v903_v36 }

// kernel: generator_forward.14
= control target key start
LH: loop header
LB: loop body
LE: loop exit
PB: predicated region body
PF: predicated region fallthrough
CT: control target
= control target key end

     0   :  { %v1224_v0 = vmov 0   ;;  %vm221_vm0 = vcmask 130048   ;;  %v1225_v51 = vmov 0.0|0.0   ;;  %vm1226_vm1 = vmmov 0   ;;  %s1705_s3 = inlined_call_operand.vmem [shape: bf16[144,32], index: 3, kind: input, shape index: {}]   ;;  %s1706_s2 = inlined_call_operand.vmem [shape: bf16[144,32], index: 2, kind: input, shape index: {}]   ;;  %s1707_s1 = inlined_call_operand.vmem [shape: bf16[128,144], index: 1, kind: input, shape index: {}]   ;;  %s1708_s0 = inlined_call_operand.vmem [shape: bf16[128,144], index: 0, kind: input, shape index: {}]   ;;  %s1709_s6 = inlined_call_operand.vmem [shape: f32[32,32], index: 6, kind: input, shape index: {}]   ;;  %s1710_s4 = inlined_call_operand.vmem [shape: f32[1,32], index: 4, kind: input, shape index: {}]   ;;  %s1711_s5 = inlined_call_operand.vmem [shape: f32[1,32], index: 5, kind: input, shape index: {}]   ;;  %s1712_s7 = inlined_call_operand.vmem [shape: bf16[128,32], index: 7, kind: output, shape index: {}]  }
   0x1   :  { %246 = vmatprep.subr.bf16.mxu0 %v1224_v0  ;;  %v1156_v1 = vld [vmem:[%s1705_s3] sm:$0xff]   ;;  %1116 = vmatprep.subr.bf16.mxu1 %v1224_v0  ;;  %v1157_v2 = vld [vmem:[%s1705_s3 + $0x8] sm:$0xff]   ;;  %v1158_v5 = vld [vmem:[%s1705_s3 + $0x10] sm:$0xff]   ;;  %v1227_v58 = vmov 0.0   ;;  %vm596_vm2 = vcmask 261120   ;;  %vm951_vm3 = vcmask 257024  }
   0x2   :  { %247 = vmatpush1.bf16.msra.mxu0 %v1156_v1  ;;  %v1159_v3 = vld [vmem:[%s1706_s2] sm:$0xff]   ;;  %v1283_v4 = vld [vmem:[%s1706_s2 + $0x8] sm:$0xff]   ;;  %v1294_v6 = vld [vmem:[%s1706_s2 + $0x10] sm:$0xff]  }
   0x3   :  { %248 = vmatprep.subr.bf16.mxu0 %v1224_v0  ;;  %1125 = vmatpush1.bf16.msra.mxu1 %v1159_v3  ;;  %v1160_v7 = vld [vmem:[%s1705_s3 + $0x18] sm:$0xff]   ;;  %v1162_v9 = vld [vmem:[%s1705_s3 + $0x20] sm:$0xff]   ;;  %v1164_v12 = vld [vmem:[%s1705_s3 + $0x28] sm:$0xff]  }
   0x4   :  { %1117 = vmatprep.subr.bf16.mxu1 %v1224_v0  ;;  %v1305_v8 = vld [vmem:[%s1706_s2 + $0x18] sm:$0xff]   ;;  %v1315_v10 = vld [vmem:[%s1706_s2 + $0x20] sm:$0xff]   ;;  %v1169_v13 = vld [vmem:[%s1706_s2 + $0x28] sm:$0xff]  }
   0x5   :  { %v1174_v11 = vld [vmem:[%s1707_s1 + $0x4] ss:$8 sps:$4 sm:$0xff]   ;;  %v1181_v14 = vld [vmem:[%s1708_s0 + $0x14] ss:$8 sps:$4 sm:$0xff]   ;;  %v1172_v20 = vld [vmem:[%s1707_s1] ss:$8 sps:$4 sm:$0xff]  }
   0x6   :  { %249 = vmatpush1.bf16.msra.mxu0 %v1157_v2  ;;  %997 = vmatprep.mubr.msk.bf16.mxu0 %vm221_vm0, %v1174_v11  ;;  %v1166_v15 = vld [vmem:[%s1705_s3 + $0x30] sm:$0xff]   ;;  %v1168_v17 = vld [vmem:[%s1705_s3 + $0x38] sm:$0xff]   ;;  %v1170_v19 = vld [vmem:[%s1705_s3 + $0x40] sm:$0xff]  }
   0x7   :  { %250 = vmatprep.subr.bf16.mxu0 %v1224_v0  ;;  %1126 = vmatpush1.bf16.msra.mxu1 %v1283_v4  ;;  %v1171_v16 = vld [vmem:[%s1706_s2 + $0x30] sm:$0xff]   ;;  %v1175_v18 = vld [vmem:[%s1706_s2 + $0x38] sm:$0xff]   ;;  %v1176_v21 = vld [vmem:[%s1706_s2 + $0x40] sm:$0xff]  }
   0x8   :  { %1118 = vmatprep.subr.bf16.mxu1 %v1224_v0  ;;  %1031 = vmatprep.mubr.msk.bf16.mxu1 %vm221_vm0, %v1181_v14  ;;  %v1177_v22 = vld [vmem:[%s1707_s1 + $0x14] ss:$8 sps:$4 sm:$0xff]   ;;  %v1179_v23 = vld [vmem:[%s1708_s0 + $0x10] ss:$8 sps:$4 sm:$0xff]   ;;  %v1185_v24 = vld [vmem:[%s1708_s0 + $0x24] ss:$8 sps:$4 sm:$0xff]  }
   0x9   :  { %v1182_v25 = vld [vmem:[%s1707_s1 + $0x10] ss:$8 sps:$4 sm:$0xff]   ;;  %v1183_v26 = vld [vmem:[%s1707_s1 + $0x24] ss:$8 sps:$4 sm:$0xff]   ;;  %v1188_v27 = vld [vmem:[%s1708_s0 + $0x20] ss:$8 sps:$4 sm:$0xff]  }
   0xa   :  { %251 = vmatpush1.bf16.msra.mxu0 %v1158_v5  ;;  %v1191_v28 = vld [vmem:[%s1708_s0 + $0x34] ss:$8 sps:$4 sm:$0xff]   ;;  %v1187_v29 = vld [vmem:[%s1707_s1 + $0x20] ss:$8 sps:$4 sm:$0xff]   ;;  %v1194_v31 = vld [vmem:[%s1708_s0 + $0x30] ss:$8 sps:$4 sm:$0xff]  }
   0xb   :  { %252 = vmatprep.subr.bf16.mxu0 %v1224_v0  ;;  %1127 = vmatpush1.bf16.msra.mxu1 %v1294_v6  ;;  %v1189_v30 = vld [vmem:[%s1707_s1 + $0x34] ss:$8 sps:$4 sm:$0xff]   ;;  %v1197_v32 = vld [vmem:[%s1708_s0 + $0x44] ss:$8 sps:$4 sm:$0xff]   ;;  %v1193_v33 = vld [vmem:[%s1707_s1 + $0x30] ss:$8 sps:$4 sm:$0xff]  }
   0xc   :  { %1119 = vmatprep.subr.bf16.mxu1 %v1224_v0  ;;  %v1195_v34 = vld [vmem:[%s1707_s1 + $0x44] ss:$8 sps:$4 sm:$0xff]   ;;  %v1200_v35 = vld [vmem:[%s1708_s0 + $0x40] ss:$8 sps:$4 sm:$0xff]   ;;  %v1203_v36 = vld [vmem:[%s1708_s0 + $0x54] ss:$8 sps:$4 sm:$0xff]  }
   0xd   :  { %v1199_v37 = vld [vmem:[%s1707_s1 + $0x40] ss:$8 sps:$4 sm:$0xff]   ;;  %v1201_v38 = vld [vmem:[%s1707_s1 + $0x54] ss:$8 sps:$4 sm:$0xff]   ;;  %v1206_v39 = vld [vmem:[%s1708_s0 + $0x50] ss:$8 sps:$4 sm:$0xff]  }
   0xe   :  { %253 = vmatpush1.bf16.msra.mxu0 %v1160_v7  ;;  %v1209_v40 = vld [vmem:[%s1708_s0 + $0x64] ss:$8 sps:$4 sm:$0xff]   ;;  %v1205_v41 = vld [vmem:[%s1707_s1 + $0x50] ss:$8 sps:$4 sm:$0xff]   ;;  %v1212_v43 = vld [vmem:[%s1708_s0 + $0x60] ss:$8 sps:$4 sm:$0xff]  }
   0xf   :  { %254 = vmatprep.subr.bf16.mxu0 %v1224_v0  ;;  %1128 = vmatpush1.bf16.msra.mxu1 %v1305_v8  ;;  %v1207_v42 = vld [vmem:[%s1707_s1 + $0x64] ss:$8 sps:$4 sm:$0xff]   ;;  %v1215_v44 = vld [vmem:[%s1708_s0 + $0x74] ss:$8 sps:$4 sm:$0xff]   ;;  %v1211_v45 = vld [vmem:[%s1707_s1 + $0x60] ss:$8 sps:$4 sm:$0xff]  }
  0x10   :  { %1120 = vmatprep.subr.bf16.mxu1 %v1224_v0  ;;  %v1213_v46 = vld [vmem:[%s1707_s1 + $0x74] ss:$8 sps:$4 sm:$0xff]   ;;  %v1218_v47 = vld [vmem:[%s1708_s0 + $0x70] ss:$8 sps:$4 sm:$0xff]   ;;  %v1221_v49 = vld [vmem:[%s1708_s0 + $0x4] ss:$8 sps:$4 sm:$0xff]  }
  0x11   :  { %v1217_v48 = vld [vmem:[%s1707_s1 + $0x70] ss:$8 sps:$4 sm:$0xff]   ;;  %v1219_v50 = vld [vmem:[%s1708_s0] ss:$8 sps:$4 sm:$0xff]  }
  0x12   :  { %255 = vmatpush1.bf16.msra.mxu0 %v1162_v9  ;;  %v592_v52 = vld [vmem:[%s1709_s6] sm:$0xff]  ;;  %v593_v53 = vld [vmem:[%s1709_s6 + $0x8] sm:$0xff]  ;;  %v594_v55 = vld [vmem:[%s1709_s6 + $0x10] sm:$0xff] }
  0x13   :  { %256 = vmatprep.subr.bf16.mxu0 %v1224_v0  ;;  %1129 = vmatpush1.bf16.msra.mxu1 %v1315_v10  ;;  %v1484_v54 = vpack.c.bf16 %v593_v53, %v592_v52  ;;  %v595_v56 = vld [vmem:[%s1709_s6 + $0x18] sm:$0xff] }
  0x14   :  { %1121 = vmatprep.subr.bf16.mxu1 %v1224_v0  ;;  %v1494_v57 = vpack.c.bf16 %v595_v56, %v594_v55 }
  0x16   :  { %257 = vmatpush1.bf16.msra.mxu0 %v1164_v12 }
  0x17   :  { %258 = vmatprep.subr.bf16.mxu0 %v1224_v0  ;;  %1130 = vmatpush1.bf16.msra.mxu1 %v1169_v13 }
  0x18   :  { %1122 = vmatprep.subr.bf16.mxu1 %v1224_v0 }
  0x1a   :  { %259 = vmatpush1.bf16.msra.mxu0 %v1166_v15 }
  0x1b   :  { %260 = vmatprep.subr.bf16.mxu0 %v1224_v0  ;;  %1131 = vmatpush1.bf16.msra.mxu1 %v1171_v16 }
  0x1c   :  { %1123 = vmatprep.subr.bf16.mxu1 %v1224_v0 }
  0x1e   :  { %261 = vmatpush1.bf16.msra.mxu0 %v1168_v17 }
  0x1f   :  { %262 = vmatprep.subr.bf16.mxu0 %v1224_v0  ;;  %1132 = vmatpush1.bf16.msra.mxu1 %v1175_v18 }
  0x20   :  { %1124 = vmatprep.subr.bf16.mxu1 %v1224_v0 }
  0x22   :  { %263 = vmatpush1.bf16.msra.mxu0 %v1170_v19 }
  0x23   :  { %493 = vmatprep.subr.bf16.mxu0 %v1224_v0  ;;  %1133 = vmatpush1.bf16.msra.mxu1 %v1176_v21 }
  0x24   :  { %1104 = vmatprep.subr.bf16.mxu1 %v1225_v51 }
  0x25   :  { %279 = vmatmul.mubr.bf16.vlgmr.msra.gmra.mrb[0].mxu0 %v1172_v20 }
  0x26   :  { %494 = vmatpush1.bf16.msra.mxu0 %v1159_v3  ;;  %998 = vmatprep.mubr.msk.bf16.mxu0 %vm221_vm0, %v1177_v22 }
  0x27   :  { %495 = vmatprep.subr.bf16.mxu0 %v1224_v0  ;;  %534 = vmatmul.mubr.bf16.vlgmr.msra.gmra.mrb[0].mxu1 %v1179_v23 }
  0x28   :  { %1032 = vmatprep.mubr.msk.bf16.mxu1 %vm221_vm0, %v1185_v24  ;;  %1106 = vmatpush3.bf16.msra.mxu1 %v1484_v54 }
  0x29   :  { %1107 = vmatprep.subr.bf16.mxu1 %v1225_v51 }
  0x2a   :  { %496 = vmatpush1.bf16.msra.mxu0 %v1283_v4 }
  0x2b   :  { %497 = vmatprep.subr.bf16.mxu0 %v1224_v0 }
  0x2c   :  { %1109 = vmatpush3.bf16.msra.mxu1 %v1494_v57 }
  0x2d   :  { %287 = vmatmul.mubr.bf16.gmra.mrb[4].mxu0 %v1182_v25  ;;  %1110 = vmatprep.subr.bf16.mxu1 %v1225_v51 }
  0x2e   :  { %999 = vmatprep.mubr.msk.bf16.mxu0 %vm221_vm0, %v1183_v26  ;;  %498 = vmatpush1.bf16.msra.mxu0 %v1294_v6 }
  0x2f   :  { %499 = vmatprep.subr.bf16.mxu0 %v1224_v0  ;;  %542 = vmatmul.mubr.bf16.gmra.mrb[4].mxu1 %v1188_v27 }
  0x30   :  { %1033 = vmatprep.mubr.msk.bf16.mxu1 %vm221_vm0, %v1191_v28 }
  0x32   :  { %500 = vmatpush1.bf16.msra.mxu0 %v1305_v8 }
  0x33   :  { %501 = vmatprep.subr.bf16.mxu0 %v1224_v0 }
  0x35   :  { %295 = vmatmul.mubr.bf16.gmra.mrb[8].mxu0 %v1187_v29 }
  0x36   :  { %1000 = vmatprep.mubr.msk.bf16.mxu0 %vm221_vm0, %v1189_v30  ;;  %502 = vmatpush1.bf16.msra.mxu0 %v1315_v10 }
  0x37   :  { %503 = vmatprep.subr.bf16.mxu0 %v1224_v0  ;;  %550 = vmatmul.mubr.bf16.gmra.mrb[8].mxu1 %v1194_v31 }
  0x38   :  { %1034 = vmatprep.mubr.msk.bf16.mxu1 %vm221_vm0, %v1197_v32 }
  0x3a   :  { %504 = vmatpush1.bf16.msra.mxu0 %v1169_v13 }
  0x3b   :  { %505 = vmatprep.subr.bf16.mxu0 %v1224_v0 }
  0x3d   :  { %303 = vmatmul.mubr.bf16.gmra.mrb[12].mxu0 %v1193_v33 }
  0x3e   :  { %1001 = vmatprep.mubr.msk.bf16.mxu0 %vm221_vm0, %v1195_v34  ;;  %506 = vmatpush1.bf16.msra.mxu0 %v1171_v16 }
  0x3f   :  { %507 = vmatprep.subr.bf16.mxu0 %v1224_v0  ;;  %558 = vmatmul.mubr.bf16.gmra.mrb[12].mxu1 %v1200_v35 }
  0x40   :  { %1035 = vmatprep.mubr.msk.bf16.mxu1 %vm221_vm0, %v1203_v36 }
  0x42   :  { %508 = vmatpush1.bf16.msra.mxu0 %v1175_v18 }
  0x43   :  { %509 = vmatprep.subr.bf16.mxu0 %v1224_v0 }
  0x45   :  { %311 = vmatmul.mubr.bf16.gmra.mrb[16].mxu0 %v1199_v37 }
  0x46   :  { %1002 = vmatprep.mubr.msk.bf16.mxu0 %vm221_vm0, %v1201_v38  ;;  %510 = vmatpush1.bf16.msra.mxu0 %v1176_v21 }
  0x47   :  { %566 = vmatmul.mubr.bf16.gmra.mrb[16].mxu1 %v1206_v39 }
  0x48   :  { %1036 = vmatprep.mubr.msk.bf16.mxu1 %vm221_vm0, %v1209_v40 }
  0x4d   :  { %319 = vmatmul.mubr.bf16.gmra.mrb[20].mxu0 %v1205_v41 }
  0x4e   :  { %1003 = vmatprep.mubr.msk.bf16.mxu0 %vm221_vm0, %v1207_v42 }
  0x4f   :  { %574 = vmatmul.mubr.bf16.gmra.mrb[20].mxu1 %v1212_v43 }
  0x50   :  { %1037 = vmatprep.mubr.msk.bf16.mxu1 %vm221_vm0, %v1215_v44 }
  0x55   :  { %327 = vmatmul.mubr.bf16.gmra.mrb[24].mxu0 %v1211_v45 }
  0x56   :  { %1004 = vmatprep.mubr.msk.bf16.mxu0 %vm221_vm0, %v1213_v46 }
  0x57   :  { %582 = vmatmul.mubr.bf16.gmra.mrb[24].mxu1 %v1218_v47 }
  0x58   :  { %1090 = vmatprep.mubr.msk.f32.mxu1 %vm1226_vm1, %v1227_v58 }
  0x5d   :  { %335 = vmatmul.mubr.bf16.gmra.mrb[28].mxu0 %v1217_v48 }
  0x5e   :  { %1030 = vmatprep.mubr.msk.bf16.mxu0 %vm221_vm0, %v1221_v49 }
  0x65   :  { %526 = vmatmul.mubr.bf16.vlgmr.msra.gmra.mrb[0].mxu0 %v1219_v50 }
  0xfa   :  { %v535_v59 = vpop.f32.mrb[0].mxu1 }
  0xfb   :  { %v537_v60 = vpop.f32.mrb[1].mxu1 }
  0xfc   :  { %v538_v61 = vpop.f32.mrb[2].mxu1 }
  0xfd   :  { %v540_v62 = vpop.f32.mrb[3].mxu1 }
 0x100   :  { %v288_v63 = vpop.f32.mrb[4].mxu0 }
 0x101   :  { %v1500_v0 = vadd.f32 %v535_v59, %v288_v63  ;;  %v290_v1 = vpop.f32.mrb[5].mxu0 }
 0x102   :  { %v291_v2 = vpop.f32.mrb[6].mxu0  ;;  %v543_v5 = vpop.f32.mrb[4].mxu1 }
 0x103   :  { %v1502_v3 = vadd.f32 %v538_v61, %v291_v2  ;;  %v293_v4 = vpop.f32.mrb[7].mxu0  ;;  %v545_v6 = vpop.f32.mrb[5].mxu1 }
 0x104   :  { %v546_v7 = vpop.f32.mrb[6].mxu1 }
 0x105   :  { %v548_v8 = vpop.f32.mrb[7].mxu1 }
 0x108   :  { %v296_v9 = vpop.f32.mrb[8].mxu0 }
 0x109   :  { %v1504_v10 = vadd.f32 %v543_v5, %v296_v9  ;;  %v298_v11 = vpop.f32.mrb[9].mxu0 }
 0x10a   :  { %v299_v12 = vpop.f32.mrb[10].mxu0  ;;  %v551_v15 = vpop.f32.mrb[8].mxu1 }
 0x10b   :  { %v1506_v13 = vadd.f32 %v546_v7, %v299_v12  ;;  %v301_v14 = vpop.f32.mrb[11].mxu0  ;;  %v553_v16 = vpop.f32.mrb[9].mxu1  ;;  %v636_v12 = vmul.f32 %v1500_v0, %v1500_v0 }
 0x10c   :  { %v554_v17 = vpop.f32.mrb[10].mxu1 }
 0x10d   :  { %v556_v18 = vpop.f32.mrb[11].mxu1 }
 0x110   :  { %v304_v19 = vpop.f32.mrb[12].mxu0 }
 0x111   :  { %v1508_v20 = vadd.f32 %v551_v15, %v304_v19  ;;  %v306_v21 = vpop.f32.mrb[13].mxu0  ;;  %v600_v19 = vsel %vm596_vm2, %v1500_v0, 0.0 }
 0x112   :  { %v307_v22 = vpop.f32.mrb[14].mxu0  ;;  %v559_v25 = vpop.f32.mrb[12].mxu1  ;;  %v637_v21 = vmul.f32 %v1502_v3, %v1502_v3 }
 0x113   :  { %v1510_v23 = vadd.f32 %v554_v17, %v307_v22  ;;  %v309_v24 = vpop.f32.mrb[15].mxu0  ;;  %v561_v26 = vpop.f32.mrb[13].mxu1 }
 0x114   :  { %v562_v27 = vpop.f32.mrb[14].mxu1 }
 0x115   :  { %v564_v28 = vpop.f32.mrb[15].mxu1 }
 0x116   :  { %v602_v28 = vsel %vm596_vm2, %v1502_v3, 0.0 }
 0x118   :  { %v312_v29 = vpop.f32.mrb[16].mxu0 }
 0x119   :  { %v1512_v30 = vadd.f32 %v559_v25, %v312_v29  ;;  %v314_v31 = vpop.f32.mrb[17].mxu0  ;;  %v638_v29 = vmul.f32 %v1504_v10, %v1504_v10 }
 0x11a   :  { %v315_v32 = vpop.f32.mrb[18].mxu0  ;;  %v567_v35 = vpop.f32.mrb[16].mxu1 }
 0x11b   :  { %v1514_v33 = vadd.f32 %v562_v27, %v315_v32  ;;  %v317_v34 = vpop.f32.mrb[19].mxu0  ;;  %v569_v36 = vpop.f32.mrb[17].mxu1  ;;  %v653_v27 = vsel %vm596_vm2, %v636_v12, 0.0 }
 0x11c   :  { %v570_v37 = vpop.f32.mrb[18].mxu1  ;;  %v655_v34 = vsel %vm596_vm2, %v637_v21, 0.0  ;;  %v639_v36 = vmul.f32 %v1506_v13, %v1506_v13 }
 0x11d   :  { %v572_v38 = vpop.f32.mrb[19].mxu1 }
 0x120   :  { %v320_v39 = vpop.f32.mrb[20].mxu0 }
 0x121   :  { %v1516_v40 = vadd.f32 %v567_v35, %v320_v39  ;;  %v322_v41 = vpop.f32.mrb[21].mxu0  ;;  %v604_v35 = vsel %vm596_vm2, %v1504_v10, 0.0  ;;  %v657_v39 = vsel %vm596_vm2, %v638_v29, 0.0 }
 0x122   :  { %v323_v42 = vpop.f32.mrb[22].mxu0  ;;  %v575_v45 = vpop.f32.mrb[20].mxu1  ;;  %v606_v41 = vsel %vm596_vm2, %v1506_v13, 0.0 }
 0x123   :  { %v1518_v43 = vadd.f32 %v570_v37, %v323_v42  ;;  %v325_v44 = vpop.f32.mrb[23].mxu0  ;;  %v577_v46 = vpop.f32.mrb[21].mxu1  ;;  %v640_v42 = vmul.f32 %v1508_v20, %v1508_v20  ;;  %v644_v12 = vmul.f32 %v1516_v40, %v1516_v40 }
 0x124   :  { %v578_v47 = vpop.f32.mrb[22].mxu1  ;;  %v659_v46 = vsel %vm596_vm2, %v639_v36, 0.0 }
 0x125   :  { %v580_v48 = vpop.f32.mrb[23].mxu1 }
 0x126   :  { %v641_v48 = vmul.f32 %v1510_v23, %v1510_v23 }
 0x128   :  { %v328_v49 = vpop.f32.mrb[24].mxu0 }
 0x129   :  { %v1520_v50 = vadd.f32 %v575_v45, %v328_v49  ;;  %v330_v52 = vpop.f32.mrb[25].mxu0 }
 0x12a   :  { %v331_v53 = vpop.f32.mrb[26].mxu0  ;;  %v583_v59 = vpop.f32.mrb[24].mxu1 }
 0x12b   :  { %v1522_v55 = vadd.f32 %v578_v47, %v331_v53  ;;  %v333_v56 = vpop.f32.mrb[27].mxu0  ;;  %v585_v60 = vpop.f32.mrb[25].mxu1  ;;  %v608_v47 = vsel %vm596_vm2, %v1508_v20, 0.0  ;;  %v661_v53 = vsel %vm596_vm2, %v640_v42, 0.0  ;;  %v620_v29 = vsel %vm596_vm2, %v1520_v50, 0.0 }
 0x12c   :  { %v586_v61 = vpop.f32.mrb[26].mxu1  ;;  %v610_v56 = vsel %vm596_vm2, %v1510_v23, 0.0 }
 0x12d   :  { %v588_v62 = vpop.f32.mrb[27].mxu1  ;;  %v622_v36 = vsel %vm596_vm2, %v1522_v55, 0.0 }
 0x12e   :  { %v663_v62 = vsel %vm596_vm2, %v641_v48, 0.0 }
 0x130   :  { %v336_v63 = vpop.f32.mrb[28].mxu0 }
 0x131   :  { %v1524_v1 = vadd.f32 %v583_v59, %v336_v63  ;;  %v338_v2 = vpop.f32.mrb[29].mxu0  ;;  %v642_v59 = vmul.f32 %v1512_v30, %v1512_v30  ;;  %v612_v63 = vsel %vm596_vm2, %v1512_v30, 0.0 }
 0x132   :  { %v339_v4 = vpop.f32.mrb[30].mxu0  ;;  %v643_v2 = vmul.f32 %v1514_v33, %v1514_v33 }
 0x133   :  { %v1526_v5 = vadd.f32 %v586_v61, %v339_v4  ;;  %v341_v6 = vpop.f32.mrb[31].mxu0  ;;  %v624_v42 = vsel %vm596_vm2, %v1524_v1, 0.0 }
 0x135   :  { %v626_v48 = vsel %vm596_vm2, %v1526_v5, 0.0 }
 0x138   :  { %v1528_v7 = vpop.f32.mrb[0].mxu0 }
 0x139   :  { %v634_v8 = vmul.f32 %v1528_v7, %v1528_v7  ;;  %v529_v9 = vpop.f32.mrb[1].mxu0  ;;  %v597_v14 = vsel %vm596_vm2, %v1528_v7, 0.0 }
 0x13a   :  { %v1532_v11 = vpop.f32.mrb[2].mxu0  ;;  %v614_v9 = vsel %vm596_vm2, %v1514_v33, 0.0 }
 0x13b   :  { %v598_v15 = vsel %vm596_vm2, %v1532_v11, 0.0  ;;  %v635_v16 = vmul.f32 %v1532_v11, %v1532_v11  ;;  %v532_v17 = vpop.f32.mrb[3].mxu0  ;;  %v650_v22 = vsel %vm596_vm2, %v634_v8, 0.0  ;;  %v665_v8 = vsel %vm596_vm2, %v642_v59, 0.0 }
 0x13c   :  { %v599_v18 = vadd.f32 %v598_v15, %v597_v14  ;;  %v616_v17 = vsel %vm596_vm2, %v1516_v40, 0.0 }
 0x13d   :  { %v651_v24 = vsel %vm596_vm2, %v635_v16, 0.0  ;;  %v667_v16 = vsel %vm596_vm2, %v643_v2, 0.0 }
 0x13e   :  { %v601_v25 = vadd.f32 %v600_v19, %v599_v18  ;;  %v652_v26 = vadd.f32 %v651_v24, %v650_v22  ;;  %v645_v18 = vmul.f32 %v1518_v43, %v1518_v43  ;;  %v669_v22 = vsel %vm596_vm2, %v644_v12, 0.0 }
 0x13f   :  { %v618_v24 = vsel %vm596_vm2, %v1518_v43, 0.0 }
 0x140   :  { %v603_v31 = vadd.f32 %v602_v28, %v601_v25  ;;  %v654_v32 = vadd.f32 %v653_v27, %v652_v26  ;;  %v646_v25 = vmul.f32 %v1520_v50, %v1520_v50  ;;  %v671_v28 = vsel %vm596_vm2, %v645_v18, 0.0 }
 0x142   :  { %v605_v37 = vadd.f32 %v604_v35, %v603_v31  ;;  %v656_v38 = vadd.f32 %v655_v34, %v654_v32  ;;  %v647_v31 = vmul.f32 %v1522_v55, %v1522_v55  ;;  %v673_v35 = vsel %vm596_vm2, %v646_v25, 0.0 }
 0x144   :  { %v607_v44 = vadd.f32 %v606_v41, %v605_v37  ;;  %v658_v45 = vadd.f32 %v657_v39, %v656_v38  ;;  %v648_v37 = vmul.f32 %v1524_v1, %v1524_v1  ;;  %v675_v41 = vsel %vm596_vm2, %v647_v31, 0.0 }
 0x146   :  { %v609_v49 = vadd.f32 %v608_v47, %v607_v44  ;;  %v660_v52 = vadd.f32 %v659_v46, %v658_v45  ;;  %v649_v44 = vmul.f32 %v1526_v5, %v1526_v5  ;;  %v677_v47 = vsel %vm596_vm2, %v648_v37, 0.0 }
 0x148   :  { %v611_v60 = vadd.f32 %v610_v56, %v609_v49  ;;  %v662_v61 = vadd.f32 %v661_v53, %v660_v52  ;;  %v679_v53 = vsel %vm596_vm2, %v649_v44, 0.0 }
 0x14a   :  { %v613_v4 = vadd.f32 %v612_v63, %v611_v60  ;;  %v664_v6 = vadd.f32 %v663_v62, %v662_v61 }
 0x14c   :  { %v615_v14 = vadd.f32 %v614_v9, %v613_v4  ;;  %v666_v15 = vadd.f32 %v665_v8, %v664_v6 }
 0x14e   :  { %v617_v19 = vadd.f32 %v616_v17, %v615_v14  ;;  %v668_v21 = vadd.f32 %v667_v16, %v666_v15 }
 0x150   :  { %v619_v26 = vadd.f32 %v618_v24, %v617_v19  ;;  %v670_v27 = vadd.f32 %v669_v22, %v668_v21 }
 0x152   :  { %v621_v32 = vadd.f32 %v620_v29, %v619_v26  ;;  %v672_v34 = vadd.f32 %v671_v28, %v670_v27  ;;  %v591_v29 = vld [vmem:[%s1711_s5] sm:$0x1] }
 0x154   :  { %v623_v38 = vadd.f32 %v622_v36, %v621_v32  ;;  %v674_v39 = vadd.f32 %v673_v35, %v672_v34 }
 0x156   :  { %v625_v45 = vadd.f32 %v624_v42, %v623_v38  ;;  %v676_v46 = vadd.f32 %v675_v41, %v674_v39 }
 0x158   :  { %v627_v49 = vadd.f32 %v626_v48, %v625_v45  ;;  %v678_v52 = vadd.f32 %v677_v47, %v676_v46 }
 0x15a   :  { %v628_v56 = vrot.slane %v627_v49, 4  ;;  %v680_v59 = vadd.f32 %v679_v53, %v678_v52 }
 0x15c   :  { %v629_v60 = vadd.f32 %v628_v56, %v627_v49  ;;  %v681_v61 = vrot.slane %v680_v59, 4 }
 0x15e   :  { %v630_v62 = vrot.slane %v629_v60, 2  ;;  %v682_v63 = vadd.f32 %v681_v61, %v680_v59 }
 0x160   :  { %v631_v2 = vadd.f32 %v630_v62, %v629_v60  ;;  %v683_v4 = vrot.slane %v682_v63, 2 }
 0x162   :  { %v632_v6 = vrot.slane %v631_v2, 1  ;;  %v684_v9 = vadd.f32 %v683_v4, %v682_v63 }
 0x164   :  { %v633_v8 = vadd.f32 %v632_v6, %v631_v2  ;;  %v685_v12 = vrot.slane %v684_v9, 1 }
 0x166   :  { %1091 = vmatmul.mubr.msk.f32.vlgmr.msra.gmra.mrb[28].mxu1 %vm596_vm2, %v633_v8  ;;  %v686_v14 = vadd.f32 %v685_v12, %v684_v9 }
 0x167   :  { %1112 = vmatpush3.bf16.msra.mxu1 %v1484_v54  ;;  %1101 = vmatprep.mubr.msk.f32.mxu1 %vm1226_vm1, %v1227_v58  ;;  %v844_v58 = vlaneseq }
 0x168   :  { %1113 = vmatprep.subr.bf16.mxu1 %v1225_v51  ;;  %v590_v51 = vld [vmem:[%s1710_s4] sm:$0x1] }
 0x169   :  { %v845_v26 = vshrl.u32 %v844_v58, 7 }
 0x16b   :  { %1115 = vmatpush3.bf16.msra.mxu1 %v1494_v57  ;;  %v846_v57 = vsub.s32 0, %v845_v26 }
 0x16e   :  { %1102 = vmatmul.mubr.msk.f32.vlgmr.msra.gmra.mrb[30].mxu1 %vm596_vm2, %v686_v14 }
 0x239   :  { %v756_v15 = vpop.f32.mrb[28].mxu1 }
 0x23a   :  { %v1092_v16 = vpop.f32.mrb[29].mxu1  ;;  %v760_v17 = vmul.f32 0.001953125, %v756_v15 }
 0x23c   :  { %v835_v19 = vmul.f32 %v760_v17, %v760_v17 }
 0x241   :  { %v830_v18 = vpop.f32.mrb[30].mxu1 }
 0x242   :  { %v834_v21 = vmul.f32 0.001953125, %v830_v18  ;;  %v1103_v22 = vpop.f32.mrb[31].mxu1 }
 0x244   :  { %v836_v24 = vsub.f32 %v834_v21, %v835_v19 }
 0x246   :  { %v837_v54 = vmax.f32 %v836_v24, 0.0 }
 0x248   :  { %v838_v25 = vadd.f32 1e-05, %v837_v54 }
 0x24a   :  { %1222 = vrsqrt.f32 %v838_v25 }
 0x254   :  { %v1223_v27 = vpop.eup %1222 }
 0x255   :  { %v840_v28 = vmul.f32 %v1223_v27, %v590_v51 }
 0x257   :  { %v841_v31 = vmul.f32 %v840_v28, %v760_v17  ;;  %v847_v32 = vrot.slane %v840_v28, %v846_v57 }
 0x259   :  { %v842_v34 = vsub.f32 %v591_v29, %v841_v31  ;;  %v849_v35 = vmul.f32 %v847_v32, %v1528_v7  ;;  %v850_v36 = vmul.f32 %v847_v32, %v1532_v11  ;;  %v851_v37 = vmul.f32 %v847_v32, %v1500_v0 }
 0x25a   :  { %v852_v38 = vmul.f32 %v847_v32, %v1502_v3  ;;  %v853_v39 = vmul.f32 %v847_v32, %v1504_v10  ;;  %v854_v41 = vmul.f32 %v847_v32, %v1506_v13  ;;  %v855_v42 = vmul.f32 %v847_v32, %v1508_v20 }
 0x25b   :  { %v856_v44 = vmul.f32 %v847_v32, %v1510_v23  ;;  %v857_v45 = vmul.f32 %v847_v32, %v1512_v30  ;;  %v858_v46 = vmul.f32 %v847_v32, %v1514_v33  ;;  %v859_v7 = vmul.f32 %v847_v32, %v1516_v40 }
 0x25c   :  { %v860_v11 = vmul.f32 %v847_v32, %v1518_v43  ;;  %v869_v0 = vrot.slane %v842_v34, %v846_v57  ;;  %v861_v3 = vmul.f32 %v847_v32, %v1520_v50  ;;  %v862_v10 = vmul.f32 %v847_v32, %v1522_v55 }
 0x25d   :  { %v863_v47 = vmul.f32 %v847_v32, %v1524_v1  ;;  %v864_v13 = vmul.f32 %v847_v32, %v1526_v5 }
 0x25e   :  { %v871_v20 = vadd.f32 %v869_v0, %v849_v35  ;;  %v872_v48 = vadd.f32 %v869_v0, %v850_v36  ;;  %v873_v23 = vadd.f32 %v869_v0, %v851_v37  ;;  %v874_v49 = vadd.f32 %v869_v0, %v852_v38 }
 0x25f   :  { %v875_v30 = vadd.f32 %v869_v0, %v853_v39  ;;  %v876_v52 = vadd.f32 %v869_v0, %v854_v41  ;;  %v877_v33 = vadd.f32 %v869_v0, %v855_v42  ;;  %v878_v53 = vadd.f32 %v869_v0, %v856_v44 }
 0x260   :  { %v879_v40 = vadd.f32 %v869_v0, %v857_v45  ;;  %v880_v56 = vadd.f32 %v869_v0, %v858_v46  ;;  %v881_v43 = vadd.f32 %v869_v0, %v859_v7  ;;  %v882_v59 = vadd.f32 %v869_v0, %v860_v11 }
 0x261   :  { %v883_v60 = vadd.f32 %v869_v0, %v861_v3  ;;  %v884_v50 = vadd.f32 %v869_v0, %v862_v10  ;;  %v885_v61 = vadd.f32 %v869_v0, %v863_v47  ;;  %v886_v55 = vadd.f32 %v869_v0, %v864_v13 }
 0x262   :  { %v1056_v62 = vpack.c.bf16 %v871_v20, %v871_v20  ;;  %v1057_v1 = vpack.c.bf16 %v872_v48, %v872_v48  ;;  %v1058_v63 = vpack.c.bf16 %v873_v23, %v873_v23  ;;  %v1059_v5 = vpack.c.bf16 %v874_v49, %v874_v49 }
 0x263   :  { %v1060_v2 = vpack.c.bf16 %v875_v30, %v875_v30  ;;  %v1061_v4 = vpack.c.bf16 %v876_v52, %v876_v52  ;;  %v1062_v6 = vpack.c.bf16 %v877_v33, %v877_v33  ;;  %v1063_v8 = vpack.c.bf16 %v878_v53, %v878_v53 }
 0x264   :  { %v1064_v9 = vpack.c.bf16 %v879_v40, %v879_v40  ;;  %v1065_v12 = vpack.c.bf16 %v880_v56, %v880_v56  ;;  %v1066_v14 = vpack.c.bf16 %v881_v43, %v881_v43  ;;  %v1067_v15 = vpack.c.bf16 %v882_v59, %v882_v59  ;;  %952 = vst.msk [vmem:[%s1712_s7] sm:$0xf] %vm951_vm3, %v1056_v62 }
 0x265   :  { %953 = vst.msk [vmem:[%s1712_s7 + $0x4] sm:$0xf] %vm951_vm3, %v1057_v1  ;;  %954 = vst.msk [vmem:[%s1712_s7 + $0x8] sm:$0xf] %vm951_vm3, %v1058_v63  ;;  %v1068_v16 = vpack.c.bf16 %v883_v60, %v883_v60  ;;  %v1069_v17 = vpack.c.bf16 %v884_v50, %v884_v50  ;;  %v1070_v18 = vpack.c.bf16 %v885_v61, %v885_v61 }
 0x266   :  { %955 = vst.msk [vmem:[%s1712_s7 + $0xc] sm:$0xf] %vm951_vm3, %v1059_v5  ;;  %v1071_v19 = vpack.c.bf16 %v886_v55, %v886_v55  ;;  %956 = vst.msk [vmem:[%s1712_s7 + $0x10] sm:$0xf] %vm951_vm3, %v1060_v2 }
 0x267   :  { %957 = vst.msk [vmem:[%s1712_s7 + $0x14] sm:$0xf] %vm951_vm3, %v1061_v4  ;;  %958 = vst.msk [vmem:[%s1712_s7 + $0x18] sm:$0xf] %vm951_vm3, %v1062_v6 }
 0x268   :  { %959 = vst.msk [vmem:[%s1712_s7 + $0x1c] sm:$0xf] %vm951_vm3, %v1063_v8  ;;  %960 = vst.msk [vmem:[%s1712_s7 + $0x20] sm:$0xf] %vm951_vm3, %v1064_v9 }
 0x269   :  { %961 = vst.msk [vmem:[%s1712_s7 + $0x24] sm:$0xf] %vm951_vm3, %v1065_v12  ;;  %962 = vst.msk [vmem:[%s1712_s7 + $0x28] sm:$0xf] %vm951_vm3, %v1066_v14 }
 0x26a   :  { %963 = vst.msk [vmem:[%s1712_s7 + $0x2c] sm:$0xf] %vm951_vm3, %v1067_v15  ;;  %964 = vst.msk [vmem:[%s1712_s7 + $0x30] sm:$0xf] %vm951_vm3, %v1068_v16 }
 0x26b   :  { %965 = vst.msk [vmem:[%s1712_s7 + $0x34] sm:$0xf] %vm951_vm3, %v1069_v17  ;;  %966 = vst.msk [vmem:[%s1712_s7 + $0x38] sm:$0xf] %vm951_vm3, %v1070_v18 }
 0x26c   :  { %967 = vst.msk [vmem:[%s1712_s7 + $0x3c] sm:$0xf] %vm951_vm3, %v1071_v19 }

// kernel: generator_forward.12
= control target key start
LH: loop header
LB: loop body
LE: loop exit
PB: predicated region body
PF: predicated region fallthrough
CT: control target
= control target key end

     0   :  { %v3748_v7 = vmov 1966171168   ;;  %v80_v9 = vlaneseq  ;;  %v3749_v37 = vmov 0   ;;  %vm287_vm1 = vcmask 523264   ;;  %s5901_s1 = inlined_call_operand.vmem [shape: bf16[256,64], index: 1, kind: input, shape index: {}]   ;;  %s5902_s0 = inlined_call_operand.vmem [shape: bf16[2,256], index: 0, kind: input, shape index: {}]   ;;  %s5903_s2 = inlined_call_operand.vmem [shape: bf16[64,256], index: 2, kind: input, shape index: {}]   ;;  %s5904_s5 = inlined_call_operand.vmem [shape: f32[256,256], index: 5, kind: input, shape index: {}]   ;;  %s5905_s7 = inlined_call_operand.vmem [shape: bf16[256,512], index: 7, kind: input, shape index: {}]   ;;  %s5906_s6 = inlined_call_operand.vmem [shape: bf16[256,512], index: 6, kind: input, shape index: {}]   ;;  %s5907_s3 = inlined_call_operand.vmem [shape: f32[1,256], index: 3, kind: input, shape index: {}]   ;;  %s5908_s4 = inlined_call_operand.vmem [shape: f32[1,256], index: 4, kind: input, shape index: {}]   ;;  %s5909_s10 = inlined_call_operand.vmem [shape: f32[512,512], index: 10, kind: input, shape index: {}]   ;;  %s5910_s8 = inlined_call_operand.vmem [shape: f32[1,512], index: 8, kind: input, shape index: {}]   ;;  %s5911_s9 = inlined_call_operand.vmem [shape: f32[1,512], index: 9, kind: input, shape index: {}]   ;;  %s5912_s11 = inlined_call_operand.vmem [shape: bf16[2,512], index: 11, kind: output, shape index: {}]  }
   0x1   :  { %v3515_v0 = vld [vmem:[%s5901_s1 + $0x40] sm:$0xff]   ;;  %v3517_v2 = vld [vmem:[%s5901_s1 + $0x48] sm:$0xff]   ;;  %v3519_v4 = vld [vmem:[%s5901_s1 + $0x50] sm:$0xff]   ;;  %v78_v8 = vunpack.c.l.s4 %v3748_v7  ;;  %323 = vmatprep.mubr.bf16.mxu1 %v3749_v37  ;;  %vm398_vm2 = vcmask 1041408  }
   0x2   :  { %v3516_v1 = vld [vmem:[%s5901_s1] sm:$0xff]   ;;  %2835 = vmatprep.subr.bf16.mxu0 %v3515_v0  ;;  %v3518_v3 = vld [vmem:[%s5901_s1 + $0x8] sm:$0xff]   ;;  %v3520_v5 = vld [vmem:[%s5901_s1 + $0x10] sm:$0xff]   ;;  %v3837_v13 = vshrl.u32 %v80_v9, 7 }
   0x3   :  { %2836 = vmatpush3.bf16.msra.mxu0 %v3516_v1  ;;  %v3521_v6 = vld [vmem:[%s5901_s1 + $0x58] sm:$0xff]   ;;  %v3523_v11 = vld [vmem:[%s5901_s1 + $0x60] sm:$0xff]   ;;  %v79_v12 = vunpack.c.0.s8 %v78_v8  ;;  %v3525_v15 = vld [vmem:[%s5901_s1 + $0x68] sm:$0xff]  }
   0x4   :  { %2837 = vmatprep.subr.bf16.mxu0 %v3517_v2  ;;  %v3522_v10 = vld [vmem:[%s5901_s1 + $0x18] sm:$0xff]   ;;  %6002 = vst [vmem:[#allocation2_spill] sm:$0xff] %v3837_v13  ;;  %v3524_v14 = vld [vmem:[%s5901_s1 + $0x20] sm:$0xff]   ;;  %v3526_v18 = vld [vmem:[%s5901_s1 + $0x28] sm:$0xff]  }
   0x5   :  { %v40_v16 = vld [vmem:[%s5902_s0] sm:$0x3]  ;;  %v3849_v17 = vsub.s32 %v79_v12, %v3837_v13  ;;  %v3531_v20 = vld [vmem:[%s5903_s2 + $0x4] ss:$8 sps:$4 sm:$0xff]   ;;  %v3534_v22 = vld [vmem:[%s5903_s2 + $0x14] ss:$8 sps:$4 sm:$0xff]  }
   0x6   :  { %vm41_vm0 = vcmp.gt.bf16.partialorder %v40_v16, 0  ;;  %v42_v19 = vmul.bf16 1045249613, %v40_v16  ;;  %v3533_v21 = vld [vmem:[%s5903_s2] ss:$8 sps:$4 sm:$0xff]   ;;  %v3527_v23 = vld [vmem:[%s5901_s1 + $0x70] sm:$0xff]   ;;  %291 = vmatprep.subr.bf16.mxu1 %v3531_v20 }
   0x7   :  { %2838 = vmatpush3.bf16.msra.mxu0 %v3518_v3  ;;  %6003 = vst [vmem:[#allocation3_spill] sm:$0xff] %v3849_v17  ;;  %292 = vmatpush1.bf16.msra.mxu1 %v3533_v21  ;;  %v3536_v26 = vld [vmem:[%s5903_s2 + $0x10] ss:$8 sps:$4 sm:$0xff]   ;;  %v3537_v33 = vld [vmem:[%s5903_s2 + $0x24] ss:$8 sps:$4 sm:$0xff]  }
   0x8   :  { %2839 = vmatprep.subr.bf16.mxu0 %v3519_v4  ;;  %v43_v24 = vsel %vm41_vm0, %v40_v16, %v42_v19  ;;  %293 = vmatprep.subr.bf16.mxu1 %v3534_v22  ;;  %v3528_v28 = vld [vmem:[%s5901_s1 + $0x30] sm:$0xff]   ;;  %v3529_v29 = vld [vmem:[%s5901_s1 + $0x78] sm:$0xff]   ;;  %v3539_v34 = vld [vmem:[%s5903_s2 + $0x20] ss:$8 sps:$4 sm:$0xff]  }
   0x9   :  { %v83_v25 = vrot.slane %v43_v24, %v3849_v17  ;;  %v3530_v31 = vld [vmem:[%s5901_s1 + $0x38] sm:$0xff]   ;;  %v335_v38 = vld [vmem:[%s5904_s5 + $0x8] sm:$0xff]  ;;  %v334_v40 = vld [vmem:[%s5904_s5] sm:$0xff] }
   0xa   :  { %v3540_v35 = vld [vmem:[%s5903_s2 + $0x34] ss:$8 sps:$4 sm:$0xff]   ;;  %v3542_v36 = vld [vmem:[%s5903_s2 + $0x30] ss:$8 sps:$4 sm:$0xff]   ;;  %v339_v43 = vld [vmem:[%s5904_s5 + $0x28] sm:$0xff] }
   0xb   :  { %2840 = vmatpush3.bf16.msra.mxu0 %v3520_v5  ;;  %v84_v27 = vcombine.high %v83_v25, %v83_v25  ;;  %294 = vmatpush1.bf16.msra.mxu1 %v3536_v26  ;;  %v91_v32 = vrot.slane %v83_v25, %v3849_v17  ;;  %v337_v39 = vld [vmem:[%s5904_s5 + $0x18] sm:$0xff]  ;;  %v336_v42 = vld [vmem:[%s5904_s5 + $0x10] sm:$0xff]  ;;  %v338_v47 = vld [vmem:[%s5904_s5 + $0x20] sm:$0xff] }
   0xc   :  { %2841 = vmatprep.subr.bf16.mxu0 %v3521_v6  ;;  %295 = vmatprep.subr.bf16.mxu1 %v3537_v33  ;;  %v2857_v41 = vpack.c.bf16 %v337_v39, %v335_v38  ;;  %v341_v44 = vld [vmem:[%s5904_s5 + $0x38] sm:$0xff]  ;;  %v3912_v45 = vpack.c.bf16 %v336_v42, %v334_v40  ;;  %v340_v48 = vld [vmem:[%s5904_s5 + $0x30] sm:$0xff]  ;;  %v343_v49 = vld [vmem:[%s5904_s5 + $0x48] sm:$0xff] }
   0xd   :  { %v98_v30 = vrot.slane %v84_v27, %v3849_v17  ;;  %v3914_v46 = vpack.c.bf16 %v341_v44, %v339_v43  ;;  %v345_v50 = vld [vmem:[%s5904_s5 + $0x58] sm:$0xff]  ;;  %v3930_v51 = vpack.c.bf16 %v340_v48, %v338_v47  ;;  %v342_v53 = vld [vmem:[%s5904_s5 + $0x40] sm:$0xff]  ;;  %v344_v54 = vld [vmem:[%s5904_s5 + $0x50] sm:$0xff] }
   0xe   :  { %v3932_v52 = vpack.c.bf16 %v345_v50, %v343_v49  ;;  %v347_v55 = vld [vmem:[%s5904_s5 + $0x68] sm:$0xff]  ;;  %v349_v56 = vld [vmem:[%s5904_s5 + $0x78] sm:$0xff]  ;;  %v3948_v57 = vpack.c.bf16 %v344_v54, %v342_v53  ;;  %v346_v59 = vld [vmem:[%s5904_s5 + $0x60] sm:$0xff] }
   0xf   :  { %2842 = vmatpush3.bf16.msra.mxu0 %v3522_v10  ;;  %229 = vmatprep.mubr.bf16.mxu0 %v98_v30  ;;  %v3950_v58 = vpack.c.bf16 %v349_v56, %v347_v55  ;;  %v348_v60 = vld [vmem:[%s5904_s5 + $0x70] sm:$0xff]  ;;  %v351_v61 = vld [vmem:[%s5904_s5 + $0x88] sm:$0xff]  ;;  %v353_v62 = vld [vmem:[%s5904_s5 + $0x98] sm:$0xff] }
  0x10   :  { %2843 = vmatprep.subr.bf16.mxu0 %v3523_v11  ;;  %296 = vmatpush1.bf16.msra.mxu1 %v3539_v34  ;;  %v3966_v63 = vpack.c.bf16 %v348_v60, %v346_v59  ;;  %v3968_v0 = vpack.c.bf16 %v353_v62, %v351_v61  ;;  %v350_v1 = vld [vmem:[%s5904_s5 + $0x80] sm:$0xff]  ;;  %v352_v2 = vld [vmem:[%s5904_s5 + $0x90] sm:$0xff]  ;;  %v355_v3 = vld [vmem:[%s5904_s5 + $0xa8] sm:$0xff] }
  0x11   :  { %297 = vmatprep.subr.bf16.mxu1 %v3540_v35  ;;  %v357_v4 = vld [vmem:[%s5904_s5 + $0xb8] sm:$0xff]  ;;  %v3984_v5 = vpack.c.bf16 %v352_v2, %v350_v1  ;;  %v354_v7 = vld [vmem:[%s5904_s5 + $0xa0] sm:$0xff]  ;;  %v356_v8 = vld [vmem:[%s5904_s5 + $0xb0] sm:$0xff] }
  0x12   :  { %v3986_v6 = vpack.c.bf16 %v357_v4, %v355_v3  ;;  %v359_v9 = vld [vmem:[%s5904_s5 + $0xc8] sm:$0xff]  ;;  %v361_v10 = vld [vmem:[%s5904_s5 + $0xd8] sm:$0xff]  ;;  %v4002_v11 = vpack.c.bf16 %v356_v8, %v354_v7  ;;  %v362_v21 = vld [vmem:[%s5904_s5 + $0xe0] sm:$0xff] }
  0x13   :  { %2844 = vmatpush3.bf16.msra.mxu0 %v3524_v14  ;;  %v4004_v12 = vpack.c.bf16 %v361_v10, %v359_v9  ;;  %v358_v14 = vld [vmem:[%s5904_s5 + $0xc0] sm:$0xff]  ;;  %v363_v16 = vld [vmem:[%s5904_s5 + $0xe8] sm:$0xff]  ;;  %v364_v22 = vld [vmem:[%s5904_s5 + $0xf0] sm:$0xff] }
  0x14   :  { %2845 = vmatprep.subr.bf16.mxu0 %v3525_v15  ;;  %298 = vmatpush1.bf16.msra.mxu1 %v3542_v36  ;;  %v360_v15 = vld [vmem:[%s5904_s5 + $0xd0] sm:$0xff]  ;;  %v369_v24 = vld [vmem:[%s5904_s5 + $0x118] sm:$0xff]  ;;  %v2887_v25 = vpack.c.bf16 %v364_v22, %v362_v21  ;;  %v366_v27 = vld [vmem:[%s5904_s5 + $0x100] sm:$0xff] }
  0x15   :  { %2858 = vmatprep.subr.bf16.mxu1 %v2857_v41  ;;  %v2883_v19 = vpack.c.bf16 %v360_v15, %v358_v14  ;;  %v373_v30 = vld [vmem:[%s5904_s5 + $0x138] sm:$0xff]  ;;  %v370_v33 = vld [vmem:[%s5904_s5 + $0x120] sm:$0xff]  ;;  %v372_v34 = vld [vmem:[%s5904_s5 + $0x130] sm:$0xff] }
  0x16   :  { %v375_v35 = vld [vmem:[%s5904_s5 + $0x148] sm:$0xff]  ;;  %v377_v36 = vld [vmem:[%s5904_s5 + $0x158] sm:$0xff]  ;;  %v2895_v38 = vpack.c.bf16 %v372_v34, %v370_v33  ;;  %v374_v40 = vld [vmem:[%s5904_s5 + $0x140] sm:$0xff] }
  0x17   :  { %2846 = vmatpush3.bf16.msra.mxu0 %v3526_v18  ;;  %v365_v18 = vld [vmem:[%s5904_s5 + $0xf8] sm:$0xff]  ;;  %v2897_v39 = vpack.c.bf16 %v377_v36, %v375_v35  ;;  %v379_v42 = vld [vmem:[%s5904_s5 + $0x168] sm:$0xff]  ;;  %v378_v48 = vld [vmem:[%s5904_s5 + $0x160] sm:$0xff] }
  0x18   :  { %2847 = vmatprep.subr.bf16.mxu0 %v3527_v23  ;;  %v2885_v20 = vpack.c.bf16 %v365_v18, %v363_v16  ;;  %v367_v23 = vld [vmem:[%s5904_s5 + $0x108] sm:$0xff]  ;;  %v381_v43 = vld [vmem:[%s5904_s5 + $0x178] sm:$0xff]  ;;  %v380_v49 = vld [vmem:[%s5904_s5 + $0x170] sm:$0xff] }
  0x19   :  { %v2889_v26 = vpack.c.bf16 %v369_v24, %v367_v23  ;;  %v2901_v47 = vpack.c.bf16 %v381_v43, %v379_v42  ;;  %v2903_v50 = vpack.c.bf16 %v380_v49, %v378_v48  ;;  %v387_v62 = vld [vmem:[%s5904_s5 + $0x1a8] sm:$0xff]  ;;  %v386_v1 = vld [vmem:[%s5904_s5 + $0x1a0] sm:$0xff]  ;;  %v388_v2 = vld [vmem:[%s5904_s5 + $0x1b0] sm:$0xff] }
  0x1a   :  { %v2911_v3 = vpack.c.bf16 %v388_v2, %v386_v1  ;;  %v391_v4 = vld [vmem:[%s5904_s5 + $0x1c8] sm:$0xff]  ;;  %v390_v7 = vld [vmem:[%s5904_s5 + $0x1c0] sm:$0xff]  ;;  %v392_v8 = vld [vmem:[%s5904_s5 + $0x1d0] sm:$0xff] }
  0x1b   :  { %2848 = vmatpush3.bf16.msra.mxu0 %v3528_v28  ;;  %v368_v28 = vld [vmem:[%s5904_s5 + $0x110] sm:$0xff]  ;;  %v2915_v9 = vpack.c.bf16 %v392_v8, %v390_v7  ;;  %v395_v10 = vld [vmem:[%s5904_s5 + $0x1e8] sm:$0xff]  ;;  %v394_v14 = vld [vmem:[%s5904_s5 + $0x1e0] sm:$0xff] }
  0x1c   :  { %2849 = vmatprep.subr.bf16.mxu0 %v3529_v29  ;;  %v371_v29 = vld [vmem:[%s5904_s5 + $0x128] sm:$0xff]  ;;  %v396_v15 = vld [vmem:[%s5904_s5 + $0x1f0] sm:$0xff] }
  0x1d   :  { %v2919_v16 = vpack.c.bf16 %v396_v15, %v394_v14  ;;  %v3545_v18 = vld [vmem:[%s5905_s7 + $0x4] ss:$16 sps:$4 sm:$0xff]   ;;  %v3558_v1 = vld [vmem:[%s5905_s7 + $0x48] ss:$16 sps:$4 sm:$0xff]   ;;  %v3566_v2 = vld [vmem:[%s5905_s7 + $0x6c] ss:$16 sps:$4 sm:$0xff]  }
  0x1e   :  { %v3567_v7 = vld [vmem:[%s5905_s7 + $0x80] ss:$16 sps:$4 sm:$0xff]   ;;  %v3570_v8 = vld [vmem:[%s5905_s7 + $0x88] ss:$16 sps:$4 sm:$0xff]   ;;  %v3581_v14 = vld [vmem:[%s5905_s7 + $0xc4] ss:$16 sps:$4 sm:$0xff]  }
  0x1f   :  { %2850 = vmatpush3.bf16.msra.mxu0 %v3530_v31  ;;  %v2891_v31 = vpack.c.bf16 %v368_v28, %v366_v27  ;;  %v3584_v15 = vld [vmem:[%s5905_s7 + $0xcc] ss:$16 sps:$4 sm:$0xff]  }
  0x20   :  { %2922 = vmatprep.subr.bf16.mxu0 %v2857_v41  ;;  %v376_v41 = vld [vmem:[%s5904_s5 + $0x150] sm:$0xff] }
  0x21   :  { %v2899_v44 = vpack.c.bf16 %v376_v41, %v374_v40 }
  0x22   :  { %230 = vmatmul.mubr.bf16.vlgmr.msra.gmra.mrb[0].mxu0 %v91_v32  ;;  %v2893_v32 = vpack.c.bf16 %v373_v30, %v371_v29 }
  0x23   :  { %2924 = vmatpush1.bf16.msra.mxu0 %v3912_v45 }
  0x24   :  { %2926 = vmatprep.subr.bf16.mxu0 %v3914_v46 }
  0x27   :  { %2928 = vmatpush1.bf16.msra.mxu0 %v3930_v51 }
  0x28   :  { %2930 = vmatprep.subr.bf16.mxu0 %v3932_v52 }
  0x2b   :  { %2932 = vmatpush1.bf16.msra.mxu0 %v3948_v57 }
  0x2c   :  { %2934 = vmatprep.subr.bf16.mxu0 %v3950_v58 }
  0x2f   :  { %2936 = vmatpush1.bf16.msra.mxu0 %v3966_v63 }
  0x30   :  { %2938 = vmatprep.subr.bf16.mxu0 %v3968_v0 }
  0x33   :  { %2940 = vmatpush1.bf16.msra.mxu0 %v3984_v5 }
  0x34   :  { %2942 = vmatprep.subr.bf16.mxu0 %v3986_v6 }
  0x37   :  { %2944 = vmatpush1.bf16.msra.mxu0 %v4002_v11 }
  0x38   :  { %2946 = vmatprep.subr.bf16.mxu0 %v4004_v12 }
  0x3b   :  { %2948 = vmatpush1.bf16.msra.mxu0 %v2883_v19 }
  0x3c   :  { %2950 = vmatprep.subr.bf16.mxu0 %v2885_v20 }
  0x3f   :  { %2952 = vmatpush1.bf16.msra.mxu0 %v2887_v25 }
  0x40   :  { %2954 = vmatprep.subr.bf16.mxu0 %v2889_v26 }
  0x43   :  { %2956 = vmatpush1.bf16.msra.mxu0 %v2891_v31 }
  0x44   :  { %2958 = vmatprep.subr.bf16.mxu0 %v2893_v32 }
  0x47   :  { %2960 = vmatpush1.bf16.msra.mxu0 %v2895_v38 }
  0x48   :  { %2962 = vmatprep.subr.bf16.mxu0 %v2897_v39 }
  0x4b   :  { %2964 = vmatpush1.bf16.msra.mxu0 %v2899_v44 }
  0x4c   :  { %2966 = vmatprep.subr.bf16.mxu0 %v2901_v47 }
  0x4f   :  { %2968 = vmatpush1.bf16.msra.mxu0 %v2903_v50 }
  0xf5   :  { %v2851_v53 = vpop.f32.mrb[0].mxu0 }
  0xf6   :  { %v2852_v54 = vpop.f32.mrb[1].mxu0 }
  0xf7   :  { %v2853_v55 = vadd.f32 %v2852_v54, %v2851_v53  ;;  %v2854_v56 = vpop.f32.mrb[2].mxu0 }
  0xf8   :  { %v2855_v59 = vpop.f32.mrb[3].mxu0  ;;  %v3543_v56 = vld [vmem:[%s5905_s7] ss:$16 sps:$4 sm:$0xff]  }
  0xf9   :  { %v237_v60 = vmax.f32 %v2853_v55, 0.0 }
  0xfb   :  { %v238_v61 = vpack.c.bf16 %v237_v60, %v237_v60  ;;  %v3551_v60 = vld [vmem:[%s5905_s7 + $0x24] ss:$16 sps:$4 sm:$0xff]  }
  0xfd   :  { %2703 = vmatmul.mubr.msk.bf16.vlgmr.msra.gmra.mrb[0].mxu1 %vm287_vm1, %v238_v61 }
  0xfe   :  { %2860 = vmatpush1.bf16.msra.mxu1 %v3912_v45  ;;  %v383_v45 = vld [vmem:[%s5904_s5 + $0x188] sm:$0xff] }
  0xff   :  { %2862 = vmatprep.subr.bf16.mxu1 %v3914_v46  ;;  %v385_v46 = vld [vmem:[%s5904_s5 + $0x198] sm:$0xff] }
 0x102   :  { %2864 = vmatpush1.bf16.msra.mxu1 %v3930_v51  ;;  %v2905_v51 = vpack.c.bf16 %v385_v46, %v383_v45  ;;  %v3546_v45 = vld [vmem:[%s5905_s7 + $0x8] ss:$16 sps:$4 sm:$0xff]  }
 0x103   :  { %2866 = vmatprep.subr.bf16.mxu1 %v3932_v52  ;;  %v382_v52 = vld [vmem:[%s5904_s5 + $0x180] sm:$0xff] }
 0x104   :  { %2970 = vmatprep.subr.bf16.mxu0 %v2905_v51 }
 0x106   :  { %2868 = vmatpush1.bf16.msra.mxu1 %v3948_v57  ;;  %v384_v57 = vld [vmem:[%s5904_s5 + $0x190] sm:$0xff] }
 0x107   :  { %2870 = vmatprep.subr.bf16.mxu1 %v3950_v58  ;;  %v2907_v58 = vpack.c.bf16 %v384_v57, %v382_v52  ;;  %v3549_v52 = vld [vmem:[%s5905_s7 + $0x20] ss:$16 sps:$4 sm:$0xff]   ;;  %v3557_v57 = vld [vmem:[%s5905_s7 + $0x44] ss:$16 sps:$4 sm:$0xff]  }
 0x109   :  { %2972 = vmatpush1.bf16.msra.mxu0 %v2907_v58 }
 0x10a   :  { %2872 = vmatpush1.bf16.msra.mxu1 %v3966_v63  ;;  %v389_v63 = vld [vmem:[%s5904_s5 + $0x1b8] sm:$0xff] }
 0x10b   :  { %2874 = vmatprep.subr.bf16.mxu1 %v3968_v0  ;;  %v2909_v0 = vpack.c.bf16 %v389_v63, %v387_v62  ;;  %v3560_v62 = vld [vmem:[%s5905_s7 + $0x4c] ss:$16 sps:$4 sm:$0xff]   ;;  %v3555_v63 = vld [vmem:[%s5905_s7 + $0x40] ss:$16 sps:$4 sm:$0xff]  }
 0x10d   :  { %2974 = vmatprep.subr.bf16.mxu0 %v2909_v0 }
 0x10e   :  { %2876 = vmatpush1.bf16.msra.mxu1 %v3984_v5  ;;  %2976 = vmatpush1.bf16.msra.mxu0 %v2911_v3  ;;  %v393_v5 = vld [vmem:[%s5904_s5 + $0x1d8] sm:$0xff] }
 0x10f   :  { %2878 = vmatprep.subr.bf16.mxu1 %v3986_v6  ;;  %v2913_v6 = vpack.c.bf16 %v393_v5, %v391_v4  ;;  %v3564_v4 = vld [vmem:[%s5905_s7 + $0x68] ss:$16 sps:$4 sm:$0xff]   ;;  %v3569_v5 = vld [vmem:[%s5905_s7 + $0x84] ss:$16 sps:$4 sm:$0xff]  }
 0x111   :  { %2978 = vmatprep.subr.bf16.mxu0 %v2913_v6 }
 0x112   :  { %2880 = vmatpush1.bf16.msra.mxu1 %v4002_v11  ;;  %2980 = vmatpush1.bf16.msra.mxu0 %v2915_v9  ;;  %v397_v11 = vld [vmem:[%s5904_s5 + $0x1f8] sm:$0xff] }
 0x113   :  { %2882 = vmatprep.subr.bf16.mxu1 %v4004_v12  ;;  %v2917_v12 = vpack.c.bf16 %v397_v11, %v395_v10  ;;  %v3578_v10 = vld [vmem:[%s5905_s7 + $0xac] ss:$16 sps:$4 sm:$0xff]   ;;  %v3573_v11 = vld [vmem:[%s5905_s7 + $0xa0] ss:$16 sps:$4 sm:$0xff]  }
 0x115   :  { %2982 = vmatprep.subr.bf16.mxu0 %v2917_v12 }
 0x116   :  { %2884 = vmatpush1.bf16.msra.mxu1 %v2883_v19  ;;  %2984 = vmatpush1.bf16.msra.mxu0 %v2919_v16  ;;  %v3548_v19 = vld [vmem:[%s5905_s7 + $0xc] ss:$16 sps:$4 sm:$0xff]  }
 0x117   :  { %2886 = vmatprep.subr.bf16.mxu1 %v2885_v20  ;;  %1145 = vmatprep.subr.bf16.mxu0 %v3548_v19  ;;  %v3587_v19 = vld [vmem:[%s5905_s7 + $0xe4] ss:$16 sps:$4 sm:$0xff]  }
 0x11a   :  { %2888 = vmatpush1.bf16.msra.mxu1 %v2887_v25 }
 0x11b   :  { %2890 = vmatprep.subr.bf16.mxu1 %v2889_v26 }
 0x11e   :  { %2892 = vmatpush1.bf16.msra.mxu1 %v2891_v31 }
 0x11f   :  { %2894 = vmatprep.subr.bf16.mxu1 %v2893_v32 }
 0x122   :  { %2896 = vmatpush1.bf16.msra.mxu1 %v2895_v38 }
 0x123   :  { %2898 = vmatprep.subr.bf16.mxu1 %v2897_v39 }
 0x126   :  { %2900 = vmatpush1.bf16.msra.mxu1 %v2899_v44 }
 0x127   :  { %2902 = vmatprep.subr.bf16.mxu1 %v2901_v47 }
 0x12a   :  { %2904 = vmatpush1.bf16.msra.mxu1 %v2903_v50 }
 0x12b   :  { %2906 = vmatprep.subr.bf16.mxu1 %v2905_v51  ;;  %v3554_v51 = vld [vmem:[%s5905_s7 + $0x2c] ss:$16 sps:$4 sm:$0xff]  }
 0x12e   :  { %2908 = vmatpush1.bf16.msra.mxu1 %v2907_v58  ;;  %v3552_v58 = vld [vmem:[%s5905_s7 + $0x28] ss:$16 sps:$4 sm:$0xff]  }
 0x12f   :  { %2910 = vmatprep.subr.bf16.mxu1 %v2909_v0  ;;  %v3563_v0 = vld [vmem:[%s5905_s7 + $0x64] ss:$16 sps:$4 sm:$0xff]  }
 0x132   :  { %2912 = vmatpush1.bf16.msra.mxu1 %v2911_v3  ;;  %v3561_v3 = vld [vmem:[%s5905_s7 + $0x60] ss:$16 sps:$4 sm:$0xff]  }
 0x133   :  { %2914 = vmatprep.subr.bf16.mxu1 %v2913_v6  ;;  %v3572_v6 = vld [vmem:[%s5905_s7 + $0x8c] ss:$16 sps:$4 sm:$0xff]  }
 0x136   :  { %2916 = vmatpush1.bf16.msra.mxu1 %v2915_v9  ;;  %v3575_v9 = vld [vmem:[%s5905_s7 + $0xa4] ss:$16 sps:$4 sm:$0xff]  }
 0x137   :  { %2918 = vmatprep.subr.bf16.mxu1 %v2917_v12  ;;  %v3576_v12 = vld [vmem:[%s5905_s7 + $0xa8] ss:$16 sps:$4 sm:$0xff]  }
 0x13a   :  { %2920 = vmatpush1.bf16.msra.mxu1 %v2919_v16  ;;  %v3579_v16 = vld [vmem:[%s5905_s7 + $0xc0] ss:$16 sps:$4 sm:$0xff]  }
 0x13b   :  { %1104 = vmatprep.subr.bf16.mxu1 %v3545_v18  ;;  %v3582_v18 = vld [vmem:[%s5905_s7 + $0xc8] ss:$16 sps:$4 sm:$0xff]  }
 0x1d0   :  { %v4140_v20 = vpop.f32.mrb[0].mxu1 }
 0x1d1   :  { %v399_v21 = vsel %vm398_vm2, %v4140_v20, 0.0  ;;  %v413_v22 = vmul.f32 %v4140_v20, %v4140_v20  ;;  %v4146_v23 = vpop.f32.mrb[1].mxu1 }
 0x1d2   :  { %v400_v24 = vrot.slane %v399_v21, 4  ;;  %v406_v25 = vsel %vm398_vm2, %v4146_v23, 0.0  ;;  %v414_v26 = vmul.f32 %v4146_v23, %v4146_v23  ;;  %v329_v27 = vpop.f32.mrb[2].mxu1 }
 0x1d3   :  { %v415_v28 = vsel %vm398_vm2, %v413_v22, 0.0  ;;  %v407_v29 = vrot.slane %v406_v25, 4  ;;  %v330_v30 = vpop.f32.mrb[3].mxu1  ;;  %v3585_v22 = vld [vmem:[%s5905_s7 + $0xe0] ss:$16 sps:$4 sm:$0xff]  }
 0x1d4   :  { %v401_v31 = vadd.f32 %v400_v24, %v399_v21  ;;  %v416_v32 = vrot.slane %v415_v28, 4  ;;  %v422_v33 = vsel %vm398_vm2, %v414_v26, 0.0  ;;  %v3590_v21 = vld [vmem:[%s5905_s7 + $0xec] ss:$16 sps:$4 sm:$0xff]   ;;  %v3588_v24 = vld [vmem:[%s5905_s7 + $0xe8] ss:$16 sps:$4 sm:$0xff]  }
 0x1d5   :  { %v408_v34 = vadd.f32 %v407_v29, %v406_v25  ;;  %v423_v35 = vrot.slane %v422_v33, 4  ;;  %v3593_v25 = vld [vmem:[%s5905_s7 + $0x104] ss:$16 sps:$4 sm:$0xff]   ;;  %v3596_v26 = vld [vmem:[%s5905_s7 + $0x10c] ss:$16 sps:$4 sm:$0xff]  }
 0x1d6   :  { %v402_v36 = vrot.slane %v401_v31, 2  ;;  %v417_v38 = vadd.f32 %v416_v32, %v415_v28  ;;  %v3591_v27 = vld [vmem:[%s5905_s7 + $0x100] ss:$16 sps:$4 sm:$0xff]   ;;  %v3594_v28 = vld [vmem:[%s5905_s7 + $0x108] ss:$16 sps:$4 sm:$0xff]  }
 0x1d7   :  { %v409_v39 = vrot.slane %v408_v34, 2  ;;  %v424_v40 = vadd.f32 %v423_v35, %v422_v33  ;;  %v3599_v29 = vld [vmem:[%s5905_s7 + $0x124] ss:$16 sps:$4 sm:$0xff]   ;;  %v3602_v30 = vld [vmem:[%s5905_s7 + $0x12c] ss:$16 sps:$4 sm:$0xff]  }
 0x1d8   :  { %v403_v41 = vadd.f32 %v402_v36, %v401_v31  ;;  %v418_v42 = vrot.slane %v417_v38, 2  ;;  %v3597_v31 = vld [vmem:[%s5905_s7 + $0x120] ss:$16 sps:$4 sm:$0xff]   ;;  %v3600_v32 = vld [vmem:[%s5905_s7 + $0x128] ss:$16 sps:$4 sm:$0xff]  }
 0x1d9   :  { %v410_v43 = vadd.f32 %v409_v39, %v408_v34  ;;  %v425_v44 = vrot.slane %v424_v40, 2  ;;  %v3605_v33 = vld [vmem:[%s5905_s7 + $0x144] ss:$16 sps:$4 sm:$0xff]   ;;  %v3603_v34 = vld [vmem:[%s5905_s7 + $0x140] ss:$16 sps:$4 sm:$0xff]  }
 0x1da   :  { %v404_v47 = vrot.slane %v403_v41, 1  ;;  %v419_v48 = vadd.f32 %v418_v42, %v417_v38  ;;  %v3606_v35 = vld [vmem:[%s5905_s7 + $0x148] ss:$16 sps:$4 sm:$0xff]   ;;  %v3608_v36 = vld [vmem:[%s5905_s7 + $0x14c] ss:$16 sps:$4 sm:$0xff]  }
 0x1db   :  { %v411_v49 = vrot.slane %v410_v43, 1  ;;  %v426_v50 = vadd.f32 %v425_v44, %v424_v40  ;;  %v3611_v38 = vld [vmem:[%s5905_s7 + $0x164] ss:$16 sps:$4 sm:$0xff]   ;;  %v3614_v39 = vld [vmem:[%s5905_s7 + $0x16c] ss:$16 sps:$4 sm:$0xff]  }
 0x1dc   :  { %v420_v53 = vrot.slane %v419_v48, 1  ;;  %v405_v59 = vadd.f32 %v404_v47, %v403_v41  ;;  %v3609_v40 = vld [vmem:[%s5905_s7 + $0x160] ss:$16 sps:$4 sm:$0xff]   ;;  %v3612_v41 = vld [vmem:[%s5905_s7 + $0x168] ss:$16 sps:$4 sm:$0xff]  }
 0x1dd   :  { %v412_v54 = vadd.f32 %v411_v49, %v410_v43  ;;  %v427_v55 = vrot.slane %v426_v50, 1  ;;  %v3617_v42 = vld [vmem:[%s5905_s7 + $0x184] ss:$16 sps:$4 sm:$0xff]   ;;  %v3620_v43 = vld [vmem:[%s5905_s7 + $0x18c] ss:$16 sps:$4 sm:$0xff]  }
 0x1de   :  { %v421_v46 = vadd.f32 %v420_v53, %v419_v48  ;;  %v3615_v44 = vld [vmem:[%s5905_s7 + $0x180] ss:$16 sps:$4 sm:$0xff]   ;;  %v3618_v47 = vld [vmem:[%s5905_s7 + $0x188] ss:$16 sps:$4 sm:$0xff]   ;;  %v3623_v48 = vld [vmem:[%s5905_s7 + $0x1a4] ss:$16 sps:$4 sm:$0xff]  }
 0x1df   :  { %493 = vmatprep.mubr.f32.mxu1 %v412_v54  ;;  %v428_v61 = vadd.f32 %v427_v55, %v426_v50  ;;  %v3626_v49 = vld [vmem:[%s5905_s7 + $0x1ac] ss:$16 sps:$4 sm:$0xff]   ;;  %v3621_v50 = vld [vmem:[%s5905_s7 + $0x1a0] ss:$16 sps:$4 sm:$0xff]   ;;  %v3624_v53 = vld [vmem:[%s5905_s7 + $0x1a8] ss:$16 sps:$4 sm:$0xff]  }
 0x1e0   :  { %494 = vmatmul.mubr.f32.vlgmr.msra.gmra.mrb[4].mxu1 %v405_v59  ;;  %v3629_v54 = vld [vmem:[%s5905_s7 + $0x1c4] ss:$16 sps:$4 sm:$0xff]   ;;  %v3632_v55 = vld [vmem:[%s5905_s7 + $0x1cc] ss:$16 sps:$4 sm:$0xff]   ;;  %v3630_v59 = vld [vmem:[%s5905_s7 + $0x1c8] ss:$16 sps:$4 sm:$0xff]  }
 0x1e1   :  { %566 = vmatprep.mubr.f32.mxu0 %v428_v61  ;;  %1105 = vmatpush1.bf16.msra.mxu1 %v3543_v56  ;;  %v3627_v56 = vld [vmem:[%s5905_s7 + $0x1c0] ss:$16 sps:$4 sm:$0xff]   ;;  %v3638_v61 = vld [vmem:[%s5905_s7 + $0x1ec] ss:$16 sps:$4 sm:$0xff]  }
 0x1e2   :  { %567 = vmatmul.mubr.f32.vlgmr.msra.gmra.mrb[4].mxu0 %v421_v46  ;;  %1106 = vmatprep.subr.bf16.mxu1 %v3551_v60  ;;  %v3635_v60 = vld [vmem:[%s5905_s7 + $0x1e4] ss:$16 sps:$4 sm:$0xff]   ;;  %v3636_v46 = vld [vmem:[%s5905_s7 + $0x1e8] ss:$16 sps:$4 sm:$0xff]  }
 0x1e3   :  { %1146 = vmatpush1.bf16.msra.mxu0 %v3546_v45  ;;  %v3633_v45 = vld [vmem:[%s5905_s7 + $0x1e0] ss:$16 sps:$4 sm:$0xff]  }
 0x1e4   :  { %1147 = vmatprep.subr.bf16.mxu0 %v3554_v51  ;;  %v3641_v51 = vld [vmem:[%s5906_s6 + $0x4] ss:$16 sps:$4 sm:$0xff]  }
 0x1e5   :  { %1107 = vmatpush1.bf16.msra.mxu1 %v3549_v52  ;;  %v3644_v52 = vld [vmem:[%s5906_s6 + $0xc] ss:$16 sps:$4 sm:$0xff]  }
 0x1e6   :  { %1108 = vmatprep.subr.bf16.mxu1 %v3557_v57 }
 0x1e7   :  { %1148 = vmatpush1.bf16.msra.mxu0 %v3552_v58 }
 0x1e8   :  { %1149 = vmatprep.subr.bf16.mxu0 %v3560_v62 }
 0x1e9   :  { %1109 = vmatpush1.bf16.msra.mxu1 %v3555_v63 }
 0x1ea   :  { %1110 = vmatprep.subr.bf16.mxu1 %v3563_v0 }
 0x1eb   :  { %1150 = vmatpush1.bf16.msra.mxu0 %v3558_v1 }
 0x1ec   :  { %1151 = vmatprep.subr.bf16.mxu0 %v3566_v2 }
 0x1ed   :  { %1111 = vmatpush1.bf16.msra.mxu1 %v3561_v3 }
 0x1ee   :  { %1112 = vmatprep.subr.bf16.mxu1 %v3569_v5 }
 0x1ef   :  { %1152 = vmatpush1.bf16.msra.mxu0 %v3564_v4 }
 0x1f0   :  { %1153 = vmatprep.subr.bf16.mxu0 %v3572_v6 }
 0x1f1   :  { %1113 = vmatpush1.bf16.msra.mxu1 %v3567_v7 }
 0x1f2   :  { %1114 = vmatprep.subr.bf16.mxu1 %v3575_v9 }
 0x1f3   :  { %1154 = vmatpush1.bf16.msra.mxu0 %v3570_v8 }
 0x1f4   :  { %1155 = vmatprep.subr.bf16.mxu0 %v3578_v10 }
 0x1f5   :  { %1115 = vmatpush1.bf16.msra.mxu1 %v3573_v11 }
 0x1f6   :  { %1116 = vmatprep.subr.bf16.mxu1 %v3581_v14 }
 0x1f7   :  { %1156 = vmatpush1.bf16.msra.mxu0 %v3576_v12 }
 0x1f8   :  { %1157 = vmatprep.subr.bf16.mxu0 %v3584_v15 }
 0x1f9   :  { %1117 = vmatpush1.bf16.msra.mxu1 %v3579_v16 }
 0x1fa   :  { %1118 = vmatprep.subr.bf16.mxu1 %v3587_v19 }
 0x1fb   :  { %1158 = vmatpush1.bf16.msra.mxu0 %v3582_v18  ;;  %v332_v18 = vld [vmem:[%s5907_s3] sm:$0x3] }
 0x1fc   :  { %1159 = vmatprep.subr.bf16.mxu0 %v3590_v21  ;;  %v4352_v21 = vsub.s32 0, %v3837_v13 }
 0x1fd   :  { %1119 = vmatpush1.bf16.msra.mxu1 %v3585_v22  ;;  %v4355_v22 = vsub.s32 1, %v3837_v13  ;;  %v1731_v13 = vld [vmem:[%s5909_s10 + $0x3a0] sm:$0xff] }
 0x1fe   :  { %1120 = vmatprep.subr.bf16.mxu1 %v3593_v25  ;;  %6004 = vst [vmem:[#allocation4_spill] sm:$0xff] %v4352_v21 }
 0x1ff   :  { %1160 = vmatpush1.bf16.msra.mxu0 %v3588_v24  ;;  %6005 = vst [vmem:[#allocation5_spill] sm:$0xff] %v4355_v22 }
 0x200   :  { %1161 = vmatprep.subr.bf16.mxu0 %v3596_v26 }
 0x201   :  { %1121 = vmatpush1.bf16.msra.mxu1 %v3591_v27 }
 0x202   :  { %1122 = vmatprep.subr.bf16.mxu1 %v3599_v29 }
 0x203   :  { %1162 = vmatpush1.bf16.msra.mxu0 %v3594_v28 }
 0x204   :  { %1163 = vmatprep.subr.bf16.mxu0 %v3602_v30 }
 0x205   :  { %1123 = vmatpush1.bf16.msra.mxu1 %v3597_v31 }
 0x206   :  { %1124 = vmatprep.subr.bf16.mxu1 %v3605_v33  ;;  %v333_v33 = vld [vmem:[%s5908_s4] sm:$0x3] }
 0x207   :  { %1164 = vmatpush1.bf16.msra.mxu0 %v3600_v32 }
 0x208   :  { %1165 = vmatprep.subr.bf16.mxu0 %v3608_v36 }
 0x209   :  { %1125 = vmatpush1.bf16.msra.mxu1 %v3603_v34  ;;  %v3747_v34 = vld [vmem:[%s5902_s0] sm:$0x3] }
 0x20a   :  { %1126 = vmatprep.subr.bf16.mxu1 %v3611_v38 }
 0x20b   :  { %1166 = vmatpush1.bf16.msra.mxu0 %v3606_v35  ;;  %v651_v35 = vmax.bf16 %v3749_v37, %v3747_v34  ;;  %v3639_v37 = vld [vmem:[%s5906_s6] ss:$16 sps:$4 sm:$0xff]   ;;  %v3708_v34 = vld [vmem:[%s5906_s6 + $0x168] ss:$16 sps:$4 sm:$0xff]  }
 0x20c   :  { %1167 = vmatprep.subr.bf16.mxu0 %v3614_v39 }
 0x20d   :  { %1127 = vmatpush1.bf16.msra.mxu1 %v3609_v40 }
 0x20e   :  { %1128 = vmatprep.subr.bf16.mxu1 %v3617_v42 }
 0x20f   :  { %1168 = vmatpush1.bf16.msra.mxu0 %v3612_v41 }
 0x210   :  { %1169 = vmatprep.subr.bf16.mxu0 %v3620_v43 }
 0x211   :  { %1129 = vmatpush1.bf16.msra.mxu1 %v3615_v44 }
 0x212   :  { %1130 = vmatprep.subr.bf16.mxu1 %v3623_v48  ;;  %v3642_v48 = vld [vmem:[%s5906_s6 + $0x8] ss:$16 sps:$4 sm:$0xff]  }
 0x213   :  { %1170 = vmatpush1.bf16.msra.mxu0 %v3618_v47 }
 0x214   :  { %1171 = vmatprep.subr.bf16.mxu0 %v3626_v49 }
 0x215   :  { %1131 = vmatpush1.bf16.msra.mxu1 %v3621_v50  ;;  %v3647_v50 = vld [vmem:[%s5906_s6 + $0x24] ss:$16 sps:$4 sm:$0xff]  }
 0x216   :  { %1132 = vmatprep.subr.bf16.mxu1 %v3629_v54 }
 0x217   :  { %1172 = vmatpush1.bf16.msra.mxu0 %v3624_v53  ;;  %v3650_v53 = vld [vmem:[%s5906_s6 + $0x2c] ss:$16 sps:$4 sm:$0xff]  }
 0x218   :  { %1173 = vmatprep.subr.bf16.mxu0 %v3632_v55  ;;  %v3645_v55 = vld [vmem:[%s5906_s6 + $0x20] ss:$16 sps:$4 sm:$0xff]  }
 0x219   :  { %1133 = vmatpush1.bf16.msra.mxu1 %v3627_v56  ;;  %v3648_v56 = vld [vmem:[%s5906_s6 + $0x28] ss:$16 sps:$4 sm:$0xff]  }
 0x21a   :  { %1134 = vmatprep.subr.bf16.mxu1 %v3635_v60  ;;  %v3656_v60 = vld [vmem:[%s5906_s6 + $0x4c] ss:$16 sps:$4 sm:$0xff]  }
 0x21b   :  { %1174 = vmatpush1.bf16.msra.mxu0 %v3630_v59  ;;  %v3653_v59 = vld [vmem:[%s5906_s6 + $0x44] ss:$16 sps:$4 sm:$0xff]  }
 0x21c   :  { %1175 = vmatprep.subr.bf16.mxu0 %v3638_v61  ;;  %v3651_v61 = vld [vmem:[%s5906_s6 + $0x40] ss:$16 sps:$4 sm:$0xff]  }
 0x21d   :  { %1135 = vmatpush1.bf16.msra.mxu1 %v3633_v45  ;;  %v3654_v45 = vld [vmem:[%s5906_s6 + $0x48] ss:$16 sps:$4 sm:$0xff]  }
 0x21e   :  { %1531 = vmatprep.subr.bf16.mxu1 %v3641_v51  ;;  %v3662_v51 = vld [vmem:[%s5906_s6 + $0x6c] ss:$16 sps:$4 sm:$0xff]  }
 0x21f   :  { %1176 = vmatpush1.bf16.msra.mxu0 %v3636_v46  ;;  %v3659_v46 = vld [vmem:[%s5906_s6 + $0x64] ss:$16 sps:$4 sm:$0xff]  }
 0x220   :  { %1572 = vmatprep.subr.bf16.mxu0 %v3644_v52  ;;  %v3657_v52 = vld [vmem:[%s5906_s6 + $0x60] ss:$16 sps:$4 sm:$0xff]  }
 0x2b3   :  { %v495_v57 = vpop.f32.mrb[4].mxu1 }
 0x2b4   :  { %v500_v58 = vmul.f32 0.125, %v495_v57  ;;  %v497_v62 = vpop.f32.mrb[5].mxu1  ;;  %v3660_v57 = vld [vmem:[%s5906_s6 + $0x68] ss:$16 sps:$4 sm:$0xff]  }
 0x2b5   :  { %v501_v63 = vmul.f32 0.125, %v497_v62  ;;  %v568_v0 = vpop.f32.mrb[4].mxu0  ;;  %v3668_v62 = vld [vmem:[%s5906_s6 + $0x8c] ss:$16 sps:$4 sm:$0xff]  }
 0x2b6   :  { %v575_v1 = vmul.f32 %v500_v58, %v500_v58  ;;  %v573_v2 = vmul.f32 0.125, %v568_v0  ;;  %v570_v3 = vpop.f32.mrb[5].mxu0  ;;  %v3666_v0 = vld [vmem:[%s5906_s6 + $0x88] ss:$16 sps:$4 sm:$0xff]  }
 0x2b7   :  { %v576_v4 = vmul.f32 %v501_v63, %v501_v63  ;;  %v574_v5 = vmul.f32 0.125, %v570_v3  ;;  %v3669_v3 = vld [vmem:[%s5906_s6 + $0xa0] ss:$16 sps:$4 sm:$0xff]  }
 0x2b8   :  { %v577_v6 = vsub.f32 %v573_v2, %v575_v1  ;;  %v3671_v1 = vld [vmem:[%s5906_s6 + $0xa4] ss:$16 sps:$4 sm:$0xff]   ;;  %v3674_v2 = vld [vmem:[%s5906_s6 + $0xac] ss:$16 sps:$4 sm:$0xff]  }
 0x2b9   :  { %v578_v7 = vsub.f32 %v574_v5, %v576_v4  ;;  %v3672_v4 = vld [vmem:[%s5906_s6 + $0xa8] ss:$16 sps:$4 sm:$0xff]   ;;  %v3677_v5 = vld [vmem:[%s5906_s6 + $0xc4] ss:$16 sps:$4 sm:$0xff]  }
 0x2ba   :  { %v579_v8 = vmax.f32 %v577_v6, 0.0  ;;  %v3680_v6 = vld [vmem:[%s5906_s6 + $0xcc] ss:$16 sps:$4 sm:$0xff]  }
 0x2bb   :  { %v580_v9 = vmax.f32 %v578_v7, 0.0  ;;  %v3675_v7 = vld [vmem:[%s5906_s6 + $0xc0] ss:$16 sps:$4 sm:$0xff]  }
 0x2bc   :  { %v581_v10 = vadd.f32 1e-05, %v579_v8  ;;  %v3678_v8 = vld [vmem:[%s5906_s6 + $0xc8] ss:$16 sps:$4 sm:$0xff]  }
 0x2bd   :  { %v582_v11 = vadd.f32 1e-05, %v580_v9  ;;  %v3683_v9 = vld [vmem:[%s5906_s6 + $0xe4] ss:$16 sps:$4 sm:$0xff]  }
 0x2be   :  { %3735 = vrsqrt.f32 %v581_v10  ;;  %v3686_v10 = vld [vmem:[%s5906_s6 + $0xec] ss:$16 sps:$4 sm:$0xff]  }
 0x2bf   :  { %3737 = vrsqrt.f32 %v582_v11  ;;  %v3681_v11 = vld [vmem:[%s5906_s6 + $0xe0] ss:$16 sps:$4 sm:$0xff]  }
 0x2c8   :  { %v3736_v12 = vpop.eup %3735 }
 0x2c9   :  { %v3738_v14 = vpop.eup %3737 }
 0x2ca   :  { %v587_v15 = vcombine.low %v3736_v12, %v3738_v14  ;;  %v3684_v12 = vld [vmem:[%s5906_s6 + $0xe8] ss:$16 sps:$4 sm:$0xff]   ;;  %v3689_v14 = vld [vmem:[%s5906_s6 + $0x104] ss:$16 sps:$4 sm:$0xff]  }
 0x2cc   :  { %v594_v16 = vrot.slane %v587_v15, %v3849_v17  ;;  %v3692_v15 = vld [vmem:[%s5906_s6 + $0x10c] ss:$16 sps:$4 sm:$0xff]  }
 0x2ce   :  { %v601_v19 = vrot.slane %v594_v16, %v3849_v17  ;;  %v3687_v16 = vld [vmem:[%s5906_s6 + $0x100] ss:$16 sps:$4 sm:$0xff]  }
 0x2d0   :  { %v603_v24 = vmul.f32 %v601_v19, %v332_v18  ;;  %v3690_v18 = vld [vmem:[%s5906_s6 + $0x108] ss:$16 sps:$4 sm:$0xff]   ;;  %v3695_v19 = vld [vmem:[%s5906_s6 + $0x124] ss:$16 sps:$4 sm:$0xff]  }
 0x2d2   :  { %v608_v25 = vrot.slane %v603_v24, %v4352_v21  ;;  %v612_v26 = vrot.slane %v603_v24, %v4355_v22  ;;  %v3698_v24 = vld [vmem:[%s5906_s6 + $0x12c] ss:$16 sps:$4 sm:$0xff]  }
 0x2d4   :  { %v615_v27 = vmul.f32 %v608_v25, %v500_v58  ;;  %v616_v28 = vmul.f32 %v612_v26, %v501_v63  ;;  %v637_v29 = vmul.f32 %v612_v26, %v4146_v23  ;;  %v636_v30 = vmul.f32 %v608_v25, %v4140_v20  ;;  %v3665_v58 = vld [vmem:[%s5906_s6 + $0x84] ss:$16 sps:$4 sm:$0xff]   ;;  %v3663_v63 = vld [vmem:[%s5906_s6 + $0x80] ss:$16 sps:$4 sm:$0xff]   ;;  %v3696_v26 = vld [vmem:[%s5906_s6 + $0x128] ss:$16 sps:$4 sm:$0xff]  }
 0x2d5   :  { %v4371_v23 = vrot.slane %v651_v35, %v3849_v17  ;;  %v3693_v25 = vld [vmem:[%s5906_s6 + $0x120] ss:$16 sps:$4 sm:$0xff]   ;;  %v3713_v35 = vld [vmem:[%s5906_s6 + $0x184] ss:$16 sps:$4 sm:$0xff]  }
 0x2d6   :  { %v619_v31 = vcombine.low %v615_v27, %v616_v28  ;;  %v3701_v27 = vld [vmem:[%s5906_s6 + $0x144] ss:$16 sps:$4 sm:$0xff]   ;;  %v3704_v28 = vld [vmem:[%s5906_s6 + $0x14c] ss:$16 sps:$4 sm:$0xff]  }
 0x2d7   :  { %v1194_v42 = vcombine.high %v4371_v23, %v4371_v23 }
 0x2d8   :  { %v626_v32 = vrot.slane %v619_v31, %v3849_v17  ;;  %v3707_v31 = vld [vmem:[%s5906_s6 + $0x164] ss:$16 sps:$4 sm:$0xff]  }
 0x2d9   :  { %v1208_v54 = vrot.slane %v1194_v42, %v3849_v17  ;;  %v3720_v42 = vld [vmem:[%s5906_s6 + $0x1a8] ss:$16 sps:$4 sm:$0xff]  }
 0x2da   :  { %v633_v36 = vrot.slane %v626_v32, %v3849_v17  ;;  %v3710_v32 = vld [vmem:[%s5906_s6 + $0x16c] ss:$16 sps:$4 sm:$0xff]  }
 0x2dc   :  { %v635_v38 = vsub.f32 %v333_v33, %v633_v36  ;;  %v3705_v33 = vld [vmem:[%s5906_s6 + $0x160] ss:$16 sps:$4 sm:$0xff]   ;;  %v3716_v36 = vld [vmem:[%s5906_s6 + $0x18c] ss:$16 sps:$4 sm:$0xff]  }
 0x2de   :  { %v646_v20 = vrot.slane %v635_v38, %v4355_v22  ;;  %v642_v39 = vrot.slane %v635_v38, %v4352_v21  ;;  %v3711_v38 = vld [vmem:[%s5906_s6 + $0x180] ss:$16 sps:$4 sm:$0xff]  }
 0x2e0   :  { %v650_v40 = vadd.f32 %v646_v20, %v637_v29  ;;  %v649_v41 = vadd.f32 %v642_v39, %v636_v30  ;;  %v3699_v29 = vld [vmem:[%s5906_s6 + $0x140] ss:$16 sps:$4 sm:$0xff]   ;;  %v3702_v30 = vld [vmem:[%s5906_s6 + $0x148] ss:$16 sps:$4 sm:$0xff]   ;;  %v3719_v39 = vld [vmem:[%s5906_s6 + $0x1a4] ss:$16 sps:$4 sm:$0xff]  }
 0x2e1   :  { %v3714_v20 = vld [vmem:[%s5906_s6 + $0x188] ss:$16 sps:$4 sm:$0xff]  }
 0x2e2   :  { %v653_v43 = vmax.f32 %v650_v40, 0.0  ;;  %v652_v44 = vmax.f32 %v649_v41, 0.0  ;;  %v3722_v40 = vld [vmem:[%s5906_s6 + $0x1ac] ss:$16 sps:$4 sm:$0xff]   ;;  %v3717_v41 = vld [vmem:[%s5906_s6 + $0x1a0] ss:$16 sps:$4 sm:$0xff]  }
 0x2e4   :  { %v655_v47 = vpack.c.bf16 %v653_v43, %v653_v43  ;;  %v654_v49 = vpack.c.bf16 %v652_v44, %v652_v44  ;;  %v3725_v43 = vld [vmem:[%s5906_s6 + $0x1c4] ss:$16 sps:$4 sm:$0xff]   ;;  %v3728_v44 = vld [vmem:[%s5906_s6 + $0x1cc] ss:$16 sps:$4 sm:$0xff]  }
 0x2e6   :  { %1136 = vmatprep.mubr.bf16.mxu1 %v655_v47  ;;  %1177 = vmatprep.mubr.bf16.mxu0 %v655_v47  ;;  %v3723_v47 = vld [vmem:[%s5906_s6 + $0x1c0] ss:$16 sps:$4 sm:$0xff]  }
 0x2e7   :  { %1137 = vmatmul.mubr.bf16.vlgmr.msra.gmra.mrb[8].mxu1 %v654_v49  ;;  %1178 = vmatmul.mubr.bf16.vlgmr.msra.gmra.mrb[8].mxu0 %v654_v49  ;;  %v3734_v49 = vld [vmem:[%s5906_s6 + $0x1ec] ss:$16 sps:$4 sm:$0xff]  }
 0x2e8   :  { %1532 = vmatpush1.bf16.msra.mxu1 %v3639_v37  ;;  %1573 = vmatpush1.bf16.msra.mxu0 %v3642_v48  ;;  %v3726_v37 = vld [vmem:[%s5906_s6 + $0x1c8] ss:$16 sps:$4 sm:$0xff]   ;;  %v3731_v48 = vld [vmem:[%s5906_s6 + $0x1e4] ss:$16 sps:$4 sm:$0xff]  }
 0x2e9   :  { %1533 = vmatprep.subr.bf16.mxu1 %v3647_v50  ;;  %1574 = vmatprep.subr.bf16.mxu0 %v3650_v53  ;;  %v1616_v50 = vld [vmem:[%s5909_s10 + $0x8] sm:$0xff] }
 0x2ea   :  { %1563 = vmatprep.mubr.bf16.mxu1 %v1208_v54  ;;  %1604 = vmatprep.mubr.bf16.mxu0 %v1208_v54  ;;  %v1620_v53 = vld [vmem:[%s5909_s10 + $0x28] sm:$0xff]  ;;  %v1618_v54 = vld [vmem:[%s5909_s10 + $0x18] sm:$0xff] }
 0x2ec   :  { %1534 = vmatpush1.bf16.msra.mxu1 %v3645_v55  ;;  %1575 = vmatpush1.bf16.msra.mxu0 %v3648_v56  ;;  %v1622_v55 = vld [vmem:[%s5909_s10 + $0x38] sm:$0xff]  ;;  %v3729_v56 = vld [vmem:[%s5906_s6 + $0x1e0] ss:$16 sps:$4 sm:$0xff]  }
 0x2ed   :  { %1535 = vmatprep.subr.bf16.mxu1 %v3653_v59  ;;  %1576 = vmatprep.subr.bf16.mxu0 %v3656_v60  ;;  %v3732_v59 = vld [vmem:[%s5906_s6 + $0x1e8] ss:$16 sps:$4 sm:$0xff]   ;;  %v1615_v60 = vld [vmem:[%s5909_s10] sm:$0xff] }
 0x2f0   :  { %1536 = vmatpush1.bf16.msra.mxu1 %v3651_v61  ;;  %1577 = vmatpush1.bf16.msra.mxu0 %v3654_v45  ;;  %v1619_v61 = vld [vmem:[%s5909_s10 + $0x20] sm:$0xff]  ;;  %v4582_v45 = vpack.c.bf16 %v1620_v53, %v1616_v50  ;;  %v1653_v50 = vld [vmem:[%s5909_s10 + $0x130] sm:$0xff]  ;;  %v1656_v53 = vld [vmem:[%s5909_s10 + $0x148] sm:$0xff] }
 0x2f1   :  { %1537 = vmatprep.subr.bf16.mxu1 %v3659_v46  ;;  %1578 = vmatprep.subr.bf16.mxu0 %v3662_v51  ;;  %v4584_v46 = vpack.c.bf16 %v1622_v55, %v1618_v54  ;;  %v1617_v51 = vld [vmem:[%s5909_s10 + $0x10] sm:$0xff]  ;;  %v1660_v54 = vld [vmem:[%s5909_s10 + $0x168] sm:$0xff]  ;;  %v1658_v55 = vld [vmem:[%s5909_s10 + $0x158] sm:$0xff] }
 0x2f4   :  { %1538 = vmatpush1.bf16.msra.mxu1 %v3657_v52  ;;  %1579 = vmatpush1.bf16.msra.mxu0 %v3660_v57  ;;  %v1621_v52 = vld [vmem:[%s5909_s10 + $0x30] sm:$0xff]  ;;  %v1624_v57 = vld [vmem:[%s5909_s10 + $0x48] sm:$0xff] }
 0x2f5   :  { %1539 = vmatprep.subr.bf16.mxu1 %v3665_v58  ;;  %1580 = vmatprep.subr.bf16.mxu0 %v3668_v62  ;;  %v1628_v58 = vld [vmem:[%s5909_s10 + $0x68] sm:$0xff]  ;;  %v1626_v62 = vld [vmem:[%s5909_s10 + $0x58] sm:$0xff] }
 0x2f8   :  { %1540 = vmatpush1.bf16.msra.mxu1 %v3663_v63  ;;  %1581 = vmatpush1.bf16.msra.mxu0 %v3666_v0  ;;  %v1630_v63 = vld [vmem:[%s5909_s10 + $0x78] sm:$0xff]  ;;  %v1201_v0 = vrot.slane %v4371_v23, %v3849_v17 }
 0x2f9   :  { %1541 = vmatprep.subr.bf16.mxu1 %v3671_v1  ;;  %1582 = vmatprep.subr.bf16.mxu0 %v3674_v2  ;;  %v4606_v1 = vpack.c.bf16 %v1619_v61, %v1615_v60  ;;  %v4608_v2 = vpack.c.bf16 %v1621_v52, %v1617_v51  ;;  %v4620_v23 = vpack.c.bf16 %v1630_v63, %v1626_v62  ;;  %v1655_v61 = vld [vmem:[%s5909_s10 + $0x140] sm:$0xff]  ;;  %v1661_v62 = vld [vmem:[%s5909_s10 + $0x170] sm:$0xff]  ;;  %v1664_v63 = vld [vmem:[%s5909_s10 + $0x188] sm:$0xff] }
 0x2fa   :  { %v1659_v51 = vld [vmem:[%s5909_s10 + $0x160] sm:$0xff]  ;;  %v4762_v52 = vpack.c.bf16 %v1660_v54, %v1656_v53 }
 0x2fb   :  { %v1679_v53 = vld [vmem:[%s5909_s10 + $0x200] sm:$0xff] }
 0x2fc   :  { %1542 = vmatpush1.bf16.msra.mxu1 %v3669_v3  ;;  %1583 = vmatpush1.bf16.msra.mxu0 %v3672_v4  ;;  %v1623_v3 = vld [vmem:[%s5909_s10 + $0x40] sm:$0xff] }
 0x2fd   :  { %1543 = vmatprep.subr.bf16.mxu1 %v3677_v5  ;;  %1584 = vmatprep.subr.bf16.mxu0 %v3680_v6  ;;  %v1627_v4 = vld [vmem:[%s5909_s10 + $0x60] sm:$0xff]  ;;  %v4618_v5 = vpack.c.bf16 %v1628_v58, %v1624_v57  ;;  %v1625_v6 = vld [vmem:[%s5909_s10 + $0x50] sm:$0xff] }
 0x2fe   :  { %v1657_v58 = vld [vmem:[%s5909_s10 + $0x150] sm:$0xff]  ;;  %v1683_v54 = vld [vmem:[%s5909_s10 + $0x220] sm:$0xff] }
 0x300   :  { %1544 = vmatpush1.bf16.msra.mxu1 %v3675_v7  ;;  %1585 = vmatpush1.bf16.msra.mxu0 %v3678_v8  ;;  %v1629_v7 = vld [vmem:[%s5909_s10 + $0x70] sm:$0xff]  ;;  %v1632_v8 = vld [vmem:[%s5909_s10 + $0x88] sm:$0xff] }
 0x301   :  { %1545 = vmatprep.subr.bf16.mxu1 %v3683_v9  ;;  %1586 = vmatprep.subr.bf16.mxu0 %v3686_v10  ;;  %v1636_v9 = vld [vmem:[%s5909_s10 + $0xa8] sm:$0xff]  ;;  %v1634_v10 = vld [vmem:[%s5909_s10 + $0x98] sm:$0xff] }
 0x304   :  { %1546 = vmatpush1.bf16.msra.mxu1 %v3681_v11  ;;  %1587 = vmatpush1.bf16.msra.mxu0 %v3684_v12  ;;  %v1638_v11 = vld [vmem:[%s5909_s10 + $0xb8] sm:$0xff]  ;;  %v4642_v12 = vpack.c.bf16 %v1627_v4, %v1623_v3 }
 0x305   :  { %1547 = vmatprep.subr.bf16.mxu1 %v3689_v14  ;;  %1588 = vmatprep.subr.bf16.mxu0 %v3692_v15  ;;  %v4644_v14 = vpack.c.bf16 %v1629_v7, %v1625_v6  ;;  %v1631_v15 = vld [vmem:[%s5909_s10 + $0x80] sm:$0xff]  ;;  %v1666_v3 = vld [vmem:[%s5909_s10 + $0x198] sm:$0xff]  ;;  %v4786_v6 = vpack.c.bf16 %v1659_v51, %v1655_v61  ;;  %v4788_v7 = vpack.c.bf16 %v1661_v62, %v1657_v58  ;;  %v1681_v61 = vld [vmem:[%s5909_s10 + $0x210] sm:$0xff] }
 0x306   :  { %v1670_v4 = vld [vmem:[%s5909_s10 + $0x1b8] sm:$0xff]  ;;  %v1685_v51 = vld [vmem:[%s5909_s10 + $0x230] sm:$0xff]  ;;  %v1688_v58 = vld [vmem:[%s5909_s10 + $0x248] sm:$0xff] }
 0x307   :  { %v1692_v62 = vld [vmem:[%s5909_s10 + $0x268] sm:$0xff] }
 0x308   :  { %1548 = vmatpush1.bf16.msra.mxu1 %v3687_v16  ;;  %1589 = vmatpush1.bf16.msra.mxu0 %v3690_v18  ;;  %v1635_v16 = vld [vmem:[%s5909_s10 + $0xa0] sm:$0xff]  ;;  %v4654_v18 = vpack.c.bf16 %v1636_v9, %v1632_v8 }
 0x309   :  { %1549 = vmatprep.subr.bf16.mxu1 %v3695_v19  ;;  %1590 = vmatprep.subr.bf16.mxu0 %v3698_v24  ;;  %v4656_v19 = vpack.c.bf16 %v1638_v11, %v1634_v10  ;;  %v1633_v24 = vld [vmem:[%s5909_s10 + $0x90] sm:$0xff]  ;;  %v1663_v8 = vld [vmem:[%s5909_s10 + $0x180] sm:$0xff]  ;;  %v4800_v11 = vpack.c.bf16 %v1670_v4, %v1666_v3  ;;  %v4894_v3 = vpack.c.bf16 %v1683_v54, %v1679_v53 }
 0x30a   :  { %v1667_v9 = vld [vmem:[%s5909_s10 + $0x1a0] sm:$0xff]  ;;  %v4896_v4 = vpack.c.bf16 %v1685_v51, %v1681_v61  ;;  %v1697_v53 = vld [vmem:[%s5909_s10 + $0x290] sm:$0xff]  ;;  %v1704_v61 = vld [vmem:[%s5909_s10 + $0x2c8] sm:$0xff] }
 0x30b   :  { %v1701_v54 = vld [vmem:[%s5909_s10 + $0x2b0] sm:$0xff]  ;;  %v1708_v51 = vld [vmem:[%s5909_s10 + $0x2e8] sm:$0xff] }
 0x30c   :  { %1550 = vmatpush1.bf16.msra.mxu1 %v3693_v25  ;;  %1591 = vmatpush1.bf16.msra.mxu0 %v3696_v26  ;;  %v1637_v25 = vld [vmem:[%s5909_s10 + $0xb0] sm:$0xff]  ;;  %v1640_v26 = vld [vmem:[%s5909_s10 + $0xc8] sm:$0xff] }
 0x30d   :  { %1551 = vmatprep.subr.bf16.mxu1 %v3701_v27  ;;  %1592 = vmatprep.subr.bf16.mxu0 %v3704_v28  ;;  %v1644_v27 = vld [vmem:[%s5909_s10 + $0xe8] sm:$0xff]  ;;  %v1642_v28 = vld [vmem:[%s5909_s10 + $0xd8] sm:$0xff] }
 0x310   :  { %1552 = vmatpush1.bf16.msra.mxu1 %v3699_v29  ;;  %1593 = vmatpush1.bf16.msra.mxu0 %v3702_v30  ;;  %v1646_v29 = vld [vmem:[%s5909_s10 + $0xf8] sm:$0xff]  ;;  %v4678_v30 = vpack.c.bf16 %v1635_v16, %v1631_v15  ;;  %v1665_v15 = vld [vmem:[%s5909_s10 + $0x190] sm:$0xff] }
 0x311   :  { %1553 = vmatprep.subr.bf16.mxu1 %v3707_v31  ;;  %1594 = vmatprep.subr.bf16.mxu0 %v3710_v32  ;;  %v4680_v31 = vpack.c.bf16 %v1637_v25, %v1633_v24  ;;  %v1639_v32 = vld [vmem:[%s5909_s10 + $0xc0] sm:$0xff]  ;;  %v1669_v16 = vld [vmem:[%s5909_s10 + $0x1b0] sm:$0xff]  ;;  %v1672_v24 = vld [vmem:[%s5909_s10 + $0x1c8] sm:$0xff] }
 0x312   :  { %v1676_v25 = vld [vmem:[%s5909_s10 + $0x1e8] sm:$0xff] }
 0x314   :  { %1554 = vmatpush1.bf16.msra.mxu1 %v3705_v33  ;;  %1595 = vmatpush1.bf16.msra.mxu0 %v3708_v34  ;;  %v1643_v33 = vld [vmem:[%s5909_s10 + $0xe0] sm:$0xff]  ;;  %v4690_v34 = vpack.c.bf16 %v1644_v27, %v1640_v26  ;;  %v1674_v26 = vld [vmem:[%s5909_s10 + $0x1d8] sm:$0xff] }
 0x315   :  { %1555 = vmatprep.subr.bf16.mxu1 %v3713_v35  ;;  %1596 = vmatprep.subr.bf16.mxu0 %v3716_v36  ;;  %v4692_v35 = vpack.c.bf16 %v1646_v29, %v1642_v28  ;;  %v1641_v36 = vld [vmem:[%s5909_s10 + $0xd0] sm:$0xff]  ;;  %v1678_v27 = vld [vmem:[%s5909_s10 + $0x1f8] sm:$0xff]  ;;  %v4822_v28 = vpack.c.bf16 %v1667_v9, %v1663_v8  ;;  %v4824_v29 = vpack.c.bf16 %v1669_v16, %v1665_v15  ;;  %v1687_v8 = vld [vmem:[%s5909_s10 + $0x240] sm:$0xff] }
 0x316   :  { %v1691_v9 = vld [vmem:[%s5909_s10 + $0x260] sm:$0xff]  ;;  %v4906_v15 = vpack.c.bf16 %v1692_v62, %v1688_v58  ;;  %v1706_v58 = vld [vmem:[%s5909_s10 + $0x2d8] sm:$0xff] }
 0x317   :  { %v1710_v62 = vld [vmem:[%s5909_s10 + $0x2f8] sm:$0xff] }
 0x318   :  { %1556 = vmatpush1.bf16.msra.mxu1 %v3711_v38  ;;  %1597 = vmatpush1.bf16.msra.mxu0 %v3714_v20  ;;  %v1645_v38 = vld [vmem:[%s5909_s10 + $0xf0] sm:$0xff]  ;;  %v1648_v20 = vld [vmem:[%s5909_s10 + $0x108] sm:$0xff] }
 0x319   :  { %1557 = vmatprep.subr.bf16.mxu1 %v3719_v39  ;;  %1598 = vmatprep.subr.bf16.mxu0 %v3722_v40  ;;  %v1652_v39 = vld [vmem:[%s5909_s10 + $0x128] sm:$0xff]  ;;  %v1650_v40 = vld [vmem:[%s5909_s10 + $0x118] sm:$0xff] }
 0x31c   :  { %1558 = vmatpush1.bf16.msra.mxu1 %v3717_v41  ;;  %1599 = vmatpush1.bf16.msra.mxu0 %v3720_v42  ;;  %v1654_v41 = vld [vmem:[%s5909_s10 + $0x138] sm:$0xff]  ;;  %v4714_v42 = vpack.c.bf16 %v1643_v33, %v1639_v32  ;;  %v1671_v32 = vld [vmem:[%s5909_s10 + $0x1c0] sm:$0xff] }
 0x31d   :  { %1559 = vmatprep.subr.bf16.mxu1 %v3725_v43  ;;  %1600 = vmatprep.subr.bf16.mxu0 %v3728_v44  ;;  %v4716_v43 = vpack.c.bf16 %v1645_v38, %v1641_v36  ;;  %v1647_v44 = vld [vmem:[%s5909_s10 + $0x100] sm:$0xff]  ;;  %v4834_v36 = vpack.c.bf16 %v1676_v25, %v1672_v24  ;;  %v4836_v38 = vpack.c.bf16 %v1678_v27, %v1674_v26  ;;  %v1689_v24 = vld [vmem:[%s5909_s10 + $0x250] sm:$0xff]  ;;  %v1696_v26 = vld [vmem:[%s5909_s10 + $0x288] sm:$0xff] }
 0x31e   :  { %v1675_v33 = vld [vmem:[%s5909_s10 + $0x1e0] sm:$0xff]  ;;  %v1693_v25 = vld [vmem:[%s5909_s10 + $0x270] sm:$0xff]  ;;  %v1700_v27 = vld [vmem:[%s5909_s10 + $0x2a8] sm:$0xff] }
 0x320   :  { %1560 = vmatpush1.bf16.msra.mxu1 %v3723_v47  ;;  %1601 = vmatpush1.bf16.msra.mxu0 %v3726_v37  ;;  %v1651_v47 = vld [vmem:[%s5909_s10 + $0x120] sm:$0xff]  ;;  %v4726_v37 = vpack.c.bf16 %v1652_v39, %v1648_v20  ;;  %v1673_v20 = vld [vmem:[%s5909_s10 + $0x1d0] sm:$0xff] }
 0x321   :  { %1561 = vmatprep.subr.bf16.mxu1 %v3731_v48  ;;  %1602 = vmatprep.subr.bf16.mxu0 %v3734_v49  ;;  %v4728_v48 = vpack.c.bf16 %v1654_v41, %v1650_v40  ;;  %v1649_v49 = vld [vmem:[%s5909_s10 + $0x110] sm:$0xff]  ;;  %v1680_v40 = vld [vmem:[%s5909_s10 + $0x208] sm:$0xff] }
 0x322   :  { %v4752_v60 = vpack.c.bf16 %v1653_v50, %v1649_v49  ;;  %v1677_v39 = vld [vmem:[%s5909_s10 + $0x1f0] sm:$0xff]  ;;  %v1684_v41 = vld [vmem:[%s5909_s10 + $0x228] sm:$0xff]  ;;  %v4858_v49 = vpack.c.bf16 %v1675_v33, %v1671_v32  ;;  %v1698_v32 = vld [vmem:[%s5909_s10 + $0x298] sm:$0xff] }
 0x323   :  { %v4860_v50 = vpack.c.bf16 %v1677_v39, %v1673_v20  ;;  %v1702_v33 = vld [vmem:[%s5909_s10 + $0x2b8] sm:$0xff]  ;;  %v4930_v20 = vpack.c.bf16 %v1691_v9, %v1687_v8  ;;  %v4932_v39 = vpack.c.bf16 %v1693_v25, %v1689_v24  ;;  %v1703_v8 = vld [vmem:[%s5909_s10 + $0x2c0] sm:$0xff]  ;;  %v4978_v24 = vpack.c.bf16 %v1708_v51, %v1704_v61 }
 0x324   :  { %1562 = vmatpush1.bf16.msra.mxu1 %v3729_v56  ;;  %1603 = vmatpush1.bf16.msra.mxu0 %v3732_v59  ;;  %v1662_v56 = vld [vmem:[%s5909_s10 + $0x178] sm:$0xff]  ;;  %v4750_v59 = vpack.c.bf16 %v1651_v47, %v1647_v44  ;;  %v1707_v9 = vld [vmem:[%s5909_s10 + $0x2e0] sm:$0xff]  ;;  %v4980_v25 = vpack.c.bf16 %v1710_v62, %v1706_v58 }
 0x325   :  { %2986 = vmatprep.subr.bf16.mxu1 %v4582_v45  ;;  %3114 = vmatprep.subr.bf16.mxu0 %v4584_v46  ;;  %v4764_v57 = vpack.c.bf16 %v1662_v56, %v1658_v55  ;;  %v1682_v44 = vld [vmem:[%s5909_s10 + $0x218] sm:$0xff]  ;;  %v4870_v55 = vpack.c.bf16 %v1684_v41, %v1680_v40  ;;  %6006 = vst [vmem:[#allocation6_spill] sm:$0xff] %v4932_v39  ;;  %v1695_v40 = vld [vmem:[%s5909_s10 + $0x280] sm:$0xff]  ;;  %6011 = vst [vmem:[#allocation11_spill] sm:$0xff] %v4978_v24 }
 0x326   :  { %v1686_v47 = vld [vmem:[%s5909_s10 + $0x238] sm:$0xff]  ;;  %v1699_v41 = vld [vmem:[%s5909_s10 + $0x2a0] sm:$0xff]  ;;  %6012 = vst [vmem:[#allocation12_spill] sm:$0xff] %v4980_v25 }
 0x327   :  { %1564 = vmatmul.mubr.bf16.vlgmr.msra.gmra.mrb[8].mxu1 %v1201_v0  ;;  %1605 = vmatmul.mubr.bf16.vlgmr.msra.gmra.mrb[8].mxu0 %v1201_v0  ;;  %v1668_v0 = vld [vmem:[%s5909_s10 + $0x1a8] sm:$0xff]  ;;  %v4872_v56 = vpack.c.bf16 %v1686_v47, %v1682_v44  ;;  %v4942_v44 = vpack.c.bf16 %v1700_v27, %v1696_v26  ;;  %v4944_v47 = vpack.c.bf16 %v1702_v33, %v1698_v32  ;;  %v1705_v26 = vld [vmem:[%s5909_s10 + $0x2d0] sm:$0xff]  ;;  %v1711_v58 = vld [vmem:[%s5909_s10 + $0x300] sm:$0xff] }
 0x328   :  { %2988 = vmatpush1.bf16.msra.mxu1 %v4606_v1  ;;  %3116 = vmatpush1.bf16.msra.mxu0 %v4608_v2  ;;  %v4798_v10 = vpack.c.bf16 %v1668_v0, %v1664_v63  ;;  %v1690_v63 = vld [vmem:[%s5909_s10 + $0x258] sm:$0xff]  ;;  %v1709_v27 = vld [vmem:[%s5909_s10 + $0x2f0] sm:$0xff]  ;;  %v1712_v32 = vld [vmem:[%s5909_s10 + $0x308] sm:$0xff] }
 0x329   :  { %2990 = vmatprep.subr.bf16.mxu1 %v4618_v5  ;;  %3118 = vmatprep.subr.bf16.mxu0 %v4620_v23  ;;  %v1694_v0 = vld [vmem:[%s5909_s10 + $0x278] sm:$0xff]  ;;  %6007 = vst [vmem:[#allocation7_spill] sm:$0xff] %v4942_v44  ;;  %6008 = vst [vmem:[#allocation8_spill] sm:$0xff] %v4944_v47  ;;  %v1716_v33 = vld [vmem:[%s5909_s10 + $0x328] sm:$0xff] }
 0x32a   :  { %v4908_v16 = vpack.c.bf16 %v1694_v0, %v1690_v63  ;;  %v4966_v63 = vpack.c.bf16 %v1699_v41, %v1695_v40  ;;  %v4968_v0 = vpack.c.bf16 %v1701_v54, %v1697_v53  ;;  %v1714_v40 = vld [vmem:[%s5909_s10 + $0x318] sm:$0xff]  ;;  %v5002_v53 = vpack.c.bf16 %v1707_v9, %v1703_v8  ;;  %v1715_v62 = vld [vmem:[%s5909_s10 + $0x320] sm:$0xff]  ;;  %v1713_v8 = vld [vmem:[%s5909_s10 + $0x310] sm:$0xff] }
 0x32b   :  { %v1718_v41 = vld [vmem:[%s5909_s10 + $0x338] sm:$0xff]  ;;  %v5004_v54 = vpack.c.bf16 %v1709_v27, %v1705_v26  ;;  %v5008_v61 = vpack.c.bf16 %v1716_v33, %v1712_v32  ;;  %v5025_v9 = vpack.c.bf16 %v1715_v62, %v1711_v58  ;;  %v1717_v26 = vld [vmem:[%s5909_s10 + $0x330] sm:$0xff]  ;;  %v1720_v32 = vld [vmem:[%s5909_s10 + $0x348] sm:$0xff] }
 0x32c   :  { %2992 = vmatpush1.bf16.msra.mxu1 %v4642_v12  ;;  %3120 = vmatpush1.bf16.msra.mxu0 %v4644_v14  ;;  %6009 = vst [vmem:[#allocation9_spill] sm:$0xff] %v4966_v63  ;;  %6010 = vst [vmem:[#allocation10_spill] sm:$0xff] %v4968_v0  ;;  %v5010_v51 = vpack.c.bf16 %v1718_v41, %v1714_v40  ;;  %v5030_v27 = vpack.c.bf16 %v1717_v26, %v1713_v8  ;;  %v1724_v33 = vld [vmem:[%s5909_s10 + $0x368] sm:$0xff]  ;;  %v1722_v40 = vld [vmem:[%s5909_s10 + $0x358] sm:$0xff] }
 0x32d   :  { %2994 = vmatprep.subr.bf16.mxu1 %v4654_v18  ;;  %3122 = vmatprep.subr.bf16.mxu0 %v4656_v19  ;;  %6013 = vst [vmem:[#allocation13_spill] sm:$0xff] %v5002_v53  ;;  %6014 = vst [vmem:[#allocation14_spill] sm:$0xff] %v5004_v54  ;;  %v5043_v41 = vpack.c.bf16 %v1724_v33, %v1720_v32  ;;  %v1726_v58 = vld [vmem:[%s5909_s10 + $0x378] sm:$0xff]  ;;  %v1719_v62 = vld [vmem:[%s5909_s10 + $0x340] sm:$0xff] }
 0x32e   :  { %6015 = vst [vmem:[#allocation15_spill] sm:$0xff] %v5008_v61  ;;  %6016 = vst [vmem:[#allocation16_spill] sm:$0xff] %v5010_v51  ;;  %v1723_v8 = vld [vmem:[%s5909_s10 + $0x360] sm:$0xff]  ;;  %v5054_v26 = vpack.c.bf16 %v1726_v58, %v1722_v40  ;;  %v1721_v32 = vld [vmem:[%s5909_s10 + $0x350] sm:$0xff] }
 0x32f   :  { %6017 = vst [vmem:[#allocation17_spill] sm:$0xff] %v5025_v9  ;;  %6018 = vst [vmem:[#allocation18_spill] sm:$0xff] %v5030_v27  ;;  %v5056_v22 = vpack.c.bf16 %v1723_v8, %v1719_v62  ;;  %v1725_v33 = vld [vmem:[%s5909_s10 + $0x370] sm:$0xff]  ;;  %v1728_v40 = vld [vmem:[%s5909_s10 + $0x388] sm:$0xff] }
 0x330   :  { %2996 = vmatpush1.bf16.msra.mxu1 %v4678_v30  ;;  %3124 = vmatpush1.bf16.msra.mxu0 %v4680_v31  ;;  %6019 = vst [vmem:[#allocation19_spill] sm:$0xff] %v5043_v41  ;;  %6020 = vst [vmem:[#allocation20_spill] sm:$0xff] %v5054_v26  ;;  %v5065_v21 = vpack.c.bf16 %v1725_v33, %v1721_v32  ;;  %v1732_v58 = vld [vmem:[%s5909_s10 + $0x3a8] sm:$0xff]  ;;  %v1730_v62 = vld [vmem:[%s5909_s10 + $0x398] sm:$0xff] }
 0x331   :  { %2998 = vmatprep.subr.bf16.mxu1 %v4690_v34  ;;  %3126 = vmatprep.subr.bf16.mxu0 %v4692_v35  ;;  %6021 = vst [vmem:[#allocation21_spill] sm:$0xff] %v5056_v22  ;;  %v5079_v8 = vpack.c.bf16 %v1732_v58, %v1728_v40  ;;  %v1734_v32 = vld [vmem:[%s5909_s10 + $0x3b8] sm:$0xff]  ;;  %v1727_v33 = vld [vmem:[%s5909_s10 + $0x380] sm:$0xff]  ;;  %v1729_v40 = vld [vmem:[%s5909_s10 + $0x390] sm:$0xff] }
 0x332   :  { %6022 = vst [vmem:[#allocation22_spill] sm:$0xff] %v5065_v21  ;;  %v5090_v17 = vpack.c.bf16 %v1734_v32, %v1730_v62  ;;  %v1733_v58 = vld [vmem:[%s5909_s10 + $0x3b0] sm:$0xff]  ;;  %v1738_v62 = vld [vmem:[%s5909_s10 + $0x3d8] sm:$0xff] }
 0x333   :  { %6023 = vst [vmem:[#allocation23_spill] sm:$0xff] %v5079_v8 }
 0x334   :  { %3000 = vmatpush1.bf16.msra.mxu1 %v4714_v42  ;;  %3128 = vmatpush1.bf16.msra.mxu0 %v4716_v43  ;;  %6024 = vst [vmem:[#allocation24_spill] sm:$0xff] %v5090_v17 }
 0x335   :  { %3002 = vmatprep.subr.bf16.mxu1 %v4726_v37  ;;  %3130 = vmatprep.subr.bf16.mxu0 %v4728_v48 }
 0x338   :  { %3004 = vmatpush1.bf16.msra.mxu1 %v4750_v59  ;;  %3132 = vmatpush1.bf16.msra.mxu0 %v4752_v60 }
 0x339   :  { %3006 = vmatprep.subr.bf16.mxu1 %v4762_v52  ;;  %3134 = vmatprep.subr.bf16.mxu0 %v4764_v57 }
 0x33c   :  { %3008 = vmatpush1.bf16.msra.mxu1 %v4786_v6  ;;  %3136 = vmatpush1.bf16.msra.mxu0 %v4788_v7 }
 0x33d   :  { %3010 = vmatprep.subr.bf16.mxu1 %v4798_v10  ;;  %3138 = vmatprep.subr.bf16.mxu0 %v4800_v11 }
 0x340   :  { %3012 = vmatpush1.bf16.msra.mxu1 %v4822_v28  ;;  %3140 = vmatpush1.bf16.msra.mxu0 %v4824_v29 }
 0x341   :  { %3014 = vmatprep.subr.bf16.mxu1 %v4834_v36  ;;  %3142 = vmatprep.subr.bf16.mxu0 %v4836_v38 }
 0x344   :  { %3016 = vmatpush1.bf16.msra.mxu1 %v4858_v49  ;;  %3144 = vmatpush1.bf16.msra.mxu0 %v4860_v50 }
 0x345   :  { %3018 = vmatprep.subr.bf16.mxu1 %v4870_v55  ;;  %3146 = vmatprep.subr.bf16.mxu0 %v4872_v56 }
 0x348   :  { %3020 = vmatpush1.bf16.msra.mxu1 %v4894_v3  ;;  %3148 = vmatpush1.bf16.msra.mxu0 %v4896_v4 }
 0x349   :  { %3022 = vmatprep.subr.bf16.mxu1 %v4906_v15  ;;  %3150 = vmatprep.subr.bf16.mxu0 %v4908_v16 }
 0x34c   :  { %3024 = vmatpush1.bf16.msra.mxu1 %v4930_v20  ;;  %3152 = vmatpush1.bf16.msra.mxu0 %v4932_v39  ;;  %v1753_v39 = vld [vmem:[%s5909_s10 + $0x450] sm:$0xff] }
 0x34d   :  { %3026 = vmatprep.subr.bf16.mxu1 %v4942_v44  ;;  %3154 = vmatprep.subr.bf16.mxu0 %v4944_v47  ;;  %v1747_v47 = vld [vmem:[%s5909_s10 + $0x420] sm:$0xff] }
 0x350   :  { %3028 = vmatpush1.bf16.msra.mxu1 %v4966_v63  ;;  %3156 = vmatpush1.bf16.msra.mxu0 %v4968_v0 }
 0x351   :  { %3030 = vmatprep.subr.bf16.mxu1 %v4978_v24  ;;  %3158 = vmatprep.subr.bf16.mxu0 %v4980_v25 }
 0x354   :  { %3032 = vmatpush1.bf16.msra.mxu1 %v5002_v53  ;;  %3160 = vmatpush1.bf16.msra.mxu0 %v5004_v54 }
 0x355   :  { %3034 = vmatprep.subr.bf16.mxu1 %v5008_v61  ;;  %3162 = vmatprep.subr.bf16.mxu0 %v5010_v51 }
 0x358   :  { %3036 = vmatpush1.bf16.msra.mxu1 %v5025_v9  ;;  %3164 = vmatpush1.bf16.msra.mxu0 %v5030_v27 }
 0x359   :  { %3038 = vmatprep.subr.bf16.mxu1 %v5043_v41  ;;  %3166 = vmatprep.subr.bf16.mxu0 %v5054_v26  ;;  %v1736_v26 = vld [vmem:[%s5909_s10 + $0x3c8] sm:$0xff] }
 0x35c   :  { %3040 = vmatpush1.bf16.msra.mxu1 %v5056_v22  ;;  %3168 = vmatpush1.bf16.msra.mxu0 %v5065_v21  ;;  %v5092_v22 = vpack.c.bf16 %v1731_v13, %v1727_v33  ;;  %v5101_v21 = vpack.c.bf16 %v1733_v58, %v1729_v40  ;;  %v1740_v13 = vld [vmem:[%s5909_s10 + $0x3e8] sm:$0xff]  ;;  %v1742_v33 = vld [vmem:[%s5909_s10 + $0x3f8] sm:$0xff]  ;;  %v1735_v40 = vld [vmem:[%s5909_s10 + $0x3c0] sm:$0xff] }
 0x35d   :  { %3042 = vmatprep.subr.bf16.mxu1 %v5079_v8  ;;  %3170 = vmatprep.subr.bf16.mxu0 %v5090_v17  ;;  %v5114_v32 = vpack.c.bf16 %v1740_v13, %v1736_v26  ;;  %v1739_v58 = vld [vmem:[%s5909_s10 + $0x3e0] sm:$0xff]  ;;  %v5126_v8 = vpack.c.bf16 %v1742_v33, %v1738_v62  ;;  %v1737_v26 = vld [vmem:[%s5909_s10 + $0x3d0] sm:$0xff]  ;;  %v1744_v62 = vld [vmem:[%s5909_s10 + $0x408] sm:$0xff] }
 0x35e   :  { %6025 = vst [vmem:[#allocation25_spill] sm:$0xff] %v5092_v22  ;;  %6026 = vst [vmem:[#allocation26_spill] sm:$0xff] %v5101_v21  ;;  %v5128_v17 = vpack.c.bf16 %v1739_v58, %v1735_v40  ;;  %v1741_v13 = vld [vmem:[%s5909_s10 + $0x3f0] sm:$0xff]  ;;  %v1748_v33 = vld [vmem:[%s5909_s10 + $0x428] sm:$0xff] }
 0x35f   :  { %6027 = vst [vmem:[#allocation27_spill] sm:$0xff] %v5114_v32  ;;  %6028 = vst [vmem:[#allocation28_spill] sm:$0xff] %v5126_v8  ;;  %v1746_v40 = vld [vmem:[%s5909_s10 + $0x418] sm:$0xff]  ;;  %v5150_v58 = vpack.c.bf16 %v1748_v33, %v1744_v62 }
 0x360   :  { %3044 = vmatpush1.bf16.msra.mxu1 %v5092_v22  ;;  %3172 = vmatpush1.bf16.msra.mxu0 %v5101_v21  ;;  %6029 = vst [vmem:[#allocation29_spill] sm:$0xff] %v5128_v17  ;;  %v5137_v22 = vpack.c.bf16 %v1741_v13, %v1737_v26  ;;  %v1750_v26 = vld [vmem:[%s5909_s10 + $0x438] sm:$0xff] }
 0x361   :  { %3046 = vmatprep.subr.bf16.mxu1 %v5114_v32  ;;  %3174 = vmatprep.subr.bf16.mxu0 %v5126_v8  ;;  %6031 = vst [vmem:[#allocation31_spill] sm:$0xff] %v5150_v58  ;;  %v5156_v13 = vpack.c.bf16 %v1750_v26, %v1746_v40 }
 0x362   :  { %6030 = vst [vmem:[#allocation30_spill] sm:$0xff] %v5137_v22 }
 0x363   :  { %6032 = vst [vmem:[#allocation32_spill] sm:$0xff] %v5156_v13 }
 0x364   :  { %3048 = vmatpush1.bf16.msra.mxu1 %v5128_v17  ;;  %3176 = vmatpush1.bf16.msra.mxu0 %v5137_v22 }
 0x365   :  { %3050 = vmatprep.subr.bf16.mxu1 %v5150_v58  ;;  %3178 = vmatprep.subr.bf16.mxu0 %v5156_v13 }
 0x3fa   :  { %v5160_v8 = vpop.f32.mrb[8].mxu1  ;;  %v5162_v32 = vpop.f32.mrb[8].mxu0 }
 0x3fb   :  { %6033 = vst [vmem:[#allocation33_spill] sm:$0xff] %v5162_v32  ;;  %v1871_v62 = vsel %vm398_vm2, %v5160_v8, 0.0  ;;  %v5166_v33 = vpop.f32.mrb[9].mxu1  ;;  %v5168_v17 = vpop.f32.mrb[9].mxu0 }
 0x3fc   :  { %6034 = vst [vmem:[#allocation34_spill] sm:$0xff] %v5166_v33  ;;  %v1872_v21 = vrot.slane %v1871_v62, 4  ;;  %v1878_v40 = vsel %vm398_vm2, %v5166_v33, 0.0  ;;  %v1569_v26 = vpop.f32.mrb[10].mxu1  ;;  %v1610_v22 = vpop.f32.mrb[10].mxu0  ;;  %v1892_v13 = vsel %vm398_vm2, %v5168_v17, 0.0 }
 0x3fd   :  { %v1879_v58 = vrot.slane %v1878_v40, 4  ;;  %v1570_v41 = vpop.f32.mrb[11].mxu1  ;;  %v1611_v27 = vpop.f32.mrb[11].mxu0  ;;  %v1893_v61 = vrot.slane %v1892_v13, 4  ;;  %v1743_v26 = vld [vmem:[%s5909_s10 + $0x400] sm:$0xff] }
 0x3fe   :  { %v1873_v9 = vadd.f32 %v1872_v21, %v1871_v62  ;;  %v1745_v21 = vld [vmem:[%s5909_s10 + $0x410] sm:$0xff]  ;;  %v1754_v27 = vld [vmem:[%s5909_s10 + $0x458] sm:$0xff]  ;;  %v1751_v62 = vld [vmem:[%s5909_s10 + $0x440] sm:$0xff] }
 0x3ff   :  { %v1880_v51 = vadd.f32 %v1879_v58, %v1878_v40  ;;  %v1894_v25 = vadd.f32 %v1893_v61, %v1892_v13  ;;  %v1749_v61 = vld [vmem:[%s5909_s10 + $0x430] sm:$0xff]  ;;  %v1758_v41 = vld [vmem:[%s5909_s10 + $0x478] sm:$0xff]  ;;  %v5198_v13 = vpack.c.bf16 %v1747_v47, %v1743_v26  ;;  %v1755_v40 = vld [vmem:[%s5909_s10 + $0x460] sm:$0xff] }
 0x400   :  { %v1874_v54 = vrot.slane %v1873_v9, 2  ;;  %v1757_v47 = vld [vmem:[%s5909_s10 + $0x470] sm:$0xff] }
 0x401   :  { %v1881_v53 = vrot.slane %v1880_v51, 2  ;;  %v1895_v0 = vrot.slane %v1894_v25, 2 }
 0x402   :  { %v1875_v24 = vadd.f32 %v1874_v54, %v1873_v9 }
 0x403   :  { %v1882_v63 = vadd.f32 %v1881_v53, %v1880_v51  ;;  %v1896_v9 = vadd.f32 %v1895_v0, %v1894_v25  ;;  %v1752_v53 = vld [vmem:[%s5909_s10 + $0x448] sm:$0xff]  ;;  %v5200_v0 = vpack.c.bf16 %v1749_v61, %v1745_v21  ;;  %v5219_v21 = vpack.c.bf16 %v1758_v41, %v1754_v27  ;;  %v1766_v61 = vld [vmem:[%s5909_s10 + $0x4b8] sm:$0xff]  ;;  %v1759_v27 = vld [vmem:[%s5909_s10 + $0x480] sm:$0xff] }
 0x404   :  { %v1876_v22 = vrot.slane %v1875_v24, 1  ;;  %v1756_v51 = vld [vmem:[%s5909_s10 + $0x468] sm:$0xff]  ;;  %v1763_v41 = vld [vmem:[%s5909_s10 + $0x4a0] sm:$0xff] }
 0x405   :  { %v1883_v54 = vrot.slane %v1882_v63, 1  ;;  %6035 = vst [vmem:[#allocation35_spill] sm:$0xff] %v5200_v0  ;;  %v1897_v25 = vrot.slane %v1896_v9, 1  ;;  %v5217_v26 = vpack.c.bf16 %v1756_v51, %v1752_v53  ;;  %6037 = vst [vmem:[#allocation37_spill] sm:$0xff] %v5219_v21  ;;  %v5232_v53 = vpack.c.bf16 %v1755_v40, %v1751_v62  ;;  %v1772_v62 = vld [vmem:[%s5909_s10 + $0x4e8] sm:$0xff]  ;;  %v1770_v40 = vld [vmem:[%s5909_s10 + $0x4d8] sm:$0xff] }
 0x406   :  { %v1877_v44 = vadd.f32 %v1876_v22, %v1875_v24  ;;  %v1764_v24 = vld [vmem:[%s5909_s10 + $0x4a8] sm:$0xff]  ;;  %v1762_v22 = vld [vmem:[%s5909_s10 + $0x498] sm:$0xff]  ;;  %v5234_v51 = vpack.c.bf16 %v1757_v47, %v1753_v39  ;;  %v1765_v39 = vld [vmem:[%s5909_s10 + $0x4b0] sm:$0xff] }
 0x407   :  { %v1884_v58 = vadd.f32 %v1883_v54, %v1882_v63  ;;  %v1760_v63 = vld [vmem:[%s5909_s10 + $0x488] sm:$0xff]  ;;  %6036 = vst [vmem:[#allocation36_spill] sm:$0xff] %v5217_v26  ;;  %v1898_v54 = vadd.f32 %v1897_v25, %v1896_v9  ;;  %6038 = vst [vmem:[#allocation38_spill] sm:$0xff] %v5232_v53  ;;  %v5244_v9 = vpack.c.bf16 %v1766_v61, %v1762_v22  ;;  %v1774_v47 = vld [vmem:[%s5909_s10 + $0x4f8] sm:$0xff] }
 0x408   :  { %6039 = vst [vmem:[#allocation39_spill] sm:$0xff] %v5234_v51  ;;  %v1768_v25 = vld [vmem:[%s5909_s10 + $0x4c8] sm:$0xff]  ;;  %v1767_v22 = vld [vmem:[%s5909_s10 + $0x4c0] sm:$0xff] }
 0x409   :  { %1995 = vmatprep.mubr.f32.mxu1 %v1884_v58  ;;  %2137 = vmatprep.mubr.f32.mxu0 %v1884_v58  ;;  %6041 = vst [vmem:[#allocation41_spill] sm:$0xff] %v5244_v9  ;;  %v1761_v58 = vld [vmem:[%s5909_s10 + $0x490] sm:$0xff]  ;;  %v1771_v61 = vld [vmem:[%s5909_s10 + $0x4e0] sm:$0xff] }
 0x40a   :  { %1996 = vmatmul.mubr.f32.vlgmr.msra.gmra.mrb[6].mxu1 %v1877_v44  ;;  %2138 = vmatmul.mubr.f32.vlgmr.msra.gmra.mrb[6].mxu0 %v1877_v44  ;;  %v5242_v44 = vpack.c.bf16 %v1764_v24, %v1760_v63  ;;  %v5268_v63 = vpack.c.bf16 %v1763_v41, %v1759_v27  ;;  %v5270_v24 = vpack.c.bf16 %v1765_v39, %v1761_v58  ;;  %v1769_v27 = vld [vmem:[%s5909_s10 + $0x4d0] sm:$0xff]  ;;  %v1776_v58 = vld [vmem:[%s5909_s10 + $0x508] sm:$0xff] }
 0x40b   :  { %3052 = vmatpush1.bf16.msra.mxu1 %v5198_v13  ;;  %3180 = vmatpush1.bf16.msra.mxu0 %v5200_v0  ;;  %v1773_v41 = vld [vmem:[%s5909_s10 + $0x4f0] sm:$0xff]  ;;  %v1780_v39 = vld [vmem:[%s5909_s10 + $0x528] sm:$0xff] }
 0x40c   :  { %2066 = vmatprep.mubr.f32.mxu1 %v1898_v54  ;;  %2208 = vmatprep.mubr.f32.mxu0 %v1898_v54  ;;  %6040 = vst [vmem:[#allocation40_spill] sm:$0xff] %v5242_v44  ;;  %6042 = vst [vmem:[#allocation42_spill] sm:$0xff] %v5268_v63  ;;  %v5280_v54 = vpack.c.bf16 %v1772_v62, %v1768_v25  ;;  %v1778_v25 = vld [vmem:[%s5909_s10 + $0x518] sm:$0xff] }
 0x40d   :  { %3054 = vmatprep.subr.bf16.mxu1 %v5217_v26  ;;  %3182 = vmatprep.subr.bf16.mxu0 %v5219_v21  ;;  %6043 = vst [vmem:[#allocation43_spill] sm:$0xff] %v5270_v24  ;;  %v1782_v62 = vld [vmem:[%s5909_s10 + $0x538] sm:$0xff] }
 0x40e   :  { %6044 = vst [vmem:[#allocation44_spill] sm:$0xff] %v5280_v54 }
 0x40f   :  { %3056 = vmatpush1.bf16.msra.mxu1 %v5232_v53  ;;  %3184 = vmatpush1.bf16.msra.mxu0 %v5234_v51  ;;  %v5282_v53 = vpack.c.bf16 %v1774_v47, %v1770_v40  ;;  %v5304_v40 = vpack.c.bf16 %v1771_v61, %v1767_v22  ;;  %v5306_v47 = vpack.c.bf16 %v1773_v41, %v1769_v27  ;;  %v1777_v22 = vld [vmem:[%s5909_s10 + $0x510] sm:$0xff]  ;;  %v1784_v27 = vld [vmem:[%s5909_s10 + $0x548] sm:$0xff] }
 0x410   :  { %3058 = vmatprep.subr.bf16.mxu1 %v5242_v44  ;;  %3186 = vmatprep.subr.bf16.mxu0 %v5244_v9  ;;  %v1775_v9 = vld [vmem:[%s5909_s10 + $0x500] sm:$0xff]  ;;  %v5316_v51 = vpack.c.bf16 %v1780_v39, %v1776_v58  ;;  %v1781_v61 = vld [vmem:[%s5909_s10 + $0x530] sm:$0xff]  ;;  %v1788_v41 = vld [vmem:[%s5909_s10 + $0x568] sm:$0xff] }
 0x411   :  { %6045 = vst [vmem:[#allocation45_spill] sm:$0xff] %v5282_v53  ;;  %6046 = vst [vmem:[#allocation46_spill] sm:$0xff] %v5304_v40  ;;  %v1779_v44 = vld [vmem:[%s5909_s10 + $0x520] sm:$0xff]  ;;  %v1786_v58 = vld [vmem:[%s5909_s10 + $0x558] sm:$0xff] }
 0x412   :  { %6047 = vst [vmem:[#allocation47_spill] sm:$0xff] %v5306_v47  ;;  %6048 = vst [vmem:[#allocation48_spill] sm:$0xff] %v5316_v51  ;;  %v1790_v39 = vld [vmem:[%s5909_s10 + $0x578] sm:$0xff] }
 0x413   :  { %3060 = vmatpush1.bf16.msra.mxu1 %v5268_v63  ;;  %3188 = vmatpush1.bf16.msra.mxu0 %v5270_v24  ;;  %v5318_v63 = vpack.c.bf16 %v1782_v62, %v1778_v25  ;;  %v5340_v25 = vpack.c.bf16 %v1779_v44, %v1775_v9  ;;  %v5342_v62 = vpack.c.bf16 %v1781_v61, %v1777_v22  ;;  %v1785_v44 = vld [vmem:[%s5909_s10 + $0x550] sm:$0xff]  ;;  %v1792_v22 = vld [vmem:[%s5909_s10 + $0x588] sm:$0xff] }
 0x414   :  { %3062 = vmatprep.subr.bf16.mxu1 %v5280_v54  ;;  %3190 = vmatprep.subr.bf16.mxu0 %v5282_v53  ;;  %v1783_v53 = vld [vmem:[%s5909_s10 + $0x540] sm:$0xff]  ;;  %v5352_v24 = vpack.c.bf16 %v1788_v41, %v1784_v27  ;;  %v1789_v9 = vld [vmem:[%s5909_s10 + $0x570] sm:$0xff]  ;;  %v1796_v61 = vld [vmem:[%s5909_s10 + $0x5a8] sm:$0xff] }
 0x415   :  { %6049 = vst [vmem:[#allocation49_spill] sm:$0xff] %v5318_v63  ;;  %6050 = vst [vmem:[#allocation50_spill] sm:$0xff] %v5340_v25  ;;  %v1787_v54 = vld [vmem:[%s5909_s10 + $0x560] sm:$0xff]  ;;  %v1794_v27 = vld [vmem:[%s5909_s10 + $0x598] sm:$0xff] }
 0x416   :  { %6051 = vst [vmem:[#allocation51_spill] sm:$0xff] %v5342_v62  ;;  %6052 = vst [vmem:[#allocation52_spill] sm:$0xff] %v5352_v24  ;;  %v1798_v41 = vld [vmem:[%s5909_s10 + $0x5b8] sm:$0xff] }
 0x417   :  { %3064 = vmatpush1.bf16.msra.mxu1 %v5304_v40  ;;  %3192 = vmatpush1.bf16.msra.mxu0 %v5306_v47  ;;  %v5354_v40 = vpack.c.bf16 %v1790_v39, %v1786_v58  ;;  %v5376_v58 = vpack.c.bf16 %v1787_v54, %v1783_v53  ;;  %v5378_v39 = vpack.c.bf16 %v1789_v9, %v1785_v44  ;;  %v1793_v53 = vld [vmem:[%s5909_s10 + $0x590] sm:$0xff]  ;;  %v1800_v44 = vld [vmem:[%s5909_s10 + $0x5c8] sm:$0xff] }
 0x418   :  { %3066 = vmatprep.subr.bf16.mxu1 %v5316_v51  ;;  %3194 = vmatprep.subr.bf16.mxu0 %v5318_v63  ;;  %v1791_v63 = vld [vmem:[%s5909_s10 + $0x580] sm:$0xff]  ;;  %v5388_v47 = vpack.c.bf16 %v1796_v61, %v1792_v22  ;;  %v1797_v54 = vld [vmem:[%s5909_s10 + $0x5b0] sm:$0xff]  ;;  %v1804_v9 = vld [vmem:[%s5909_s10 + $0x5e8] sm:$0xff] }
 0x419   :  { %6053 = vst [vmem:[#allocation53_spill] sm:$0xff] %v5354_v40  ;;  %6054 = vst [vmem:[#allocation54_spill] sm:$0xff] %v5376_v58  ;;  %v1795_v51 = vld [vmem:[%s5909_s10 + $0x5a0] sm:$0xff]  ;;  %v1802_v22 = vld [vmem:[%s5909_s10 + $0x5d8] sm:$0xff] }
 0x41a   :  { %6055 = vst [vmem:[#allocation55_spill] sm:$0xff] %v5378_v39  ;;  %6056 = vst [vmem:[#allocation56_spill] sm:$0xff] %v5388_v47  ;;  %v1806_v61 = vld [vmem:[%s5909_s10 + $0x5f8] sm:$0xff] }
 0x41b   :  { %3068 = vmatpush1.bf16.msra.mxu1 %v5340_v25  ;;  %3196 = vmatpush1.bf16.msra.mxu0 %v5342_v62  ;;  %v5390_v25 = vpack.c.bf16 %v1798_v41, %v1794_v27  ;;  %v5412_v27 = vpack.c.bf16 %v1795_v51, %v1791_v63  ;;  %v5414_v41 = vpack.c.bf16 %v1797_v54, %v1793_v53  ;;  %v1801_v51 = vld [vmem:[%s5909_s10 + $0x5d0] sm:$0xff]  ;;  %v1808_v53 = vld [vmem:[%s5909_s10 + $0x608] sm:$0xff] }
 0x41c   :  { %3070 = vmatprep.subr.bf16.mxu1 %v5352_v24  ;;  %3198 = vmatprep.subr.bf16.mxu0 %v5354_v40  ;;  %v1799_v40 = vld [vmem:[%s5909_s10 + $0x5c0] sm:$0xff]  ;;  %v5424_v62 = vpack.c.bf16 %v1804_v9, %v1800_v44  ;;  %v1805_v63 = vld [vmem:[%s5909_s10 + $0x5f0] sm:$0xff]  ;;  %v1812_v54 = vld [vmem:[%s5909_s10 + $0x628] sm:$0xff] }
 0x41d   :  { %6057 = vst [vmem:[#allocation57_spill] sm:$0xff] %v5390_v25  ;;  %6058 = vst [vmem:[#allocation58_spill] sm:$0xff] %v5412_v27  ;;  %v1803_v24 = vld [vmem:[%s5909_s10 + $0x5e0] sm:$0xff]  ;;  %v1810_v44 = vld [vmem:[%s5909_s10 + $0x618] sm:$0xff] }
 0x41e   :  { %6059 = vst [vmem:[#allocation59_spill] sm:$0xff] %v5414_v41  ;;  %6060 = vst [vmem:[#allocation60_spill] sm:$0xff] %v5424_v62  ;;  %v1814_v9 = vld [vmem:[%s5909_s10 + $0x638] sm:$0xff] }
 0x41f   :  { %3072 = vmatpush1.bf16.msra.mxu1 %v5376_v58  ;;  %3200 = vmatpush1.bf16.msra.mxu0 %v5378_v39  ;;  %v5426_v58 = vpack.c.bf16 %v1806_v61, %v1802_v22  ;;  %v5448_v22 = vpack.c.bf16 %v1803_v24, %v1799_v40  ;;  %v5450_v61 = vpack.c.bf16 %v1805_v63, %v1801_v51  ;;  %v1809_v24 = vld [vmem:[%s5909_s10 + $0x610] sm:$0xff]  ;;  %v1816_v51 = vld [vmem:[%s5909_s10 + $0x648] sm:$0xff] }
 0x420   :  { %3074 = vmatprep.subr.bf16.mxu1 %v5388_v47  ;;  %3202 = vmatprep.subr.bf16.mxu0 %v5390_v25  ;;  %v1807_v25 = vld [vmem:[%s5909_s10 + $0x600] sm:$0xff]  ;;  %v5460_v39 = vpack.c.bf16 %v1812_v54, %v1808_v53  ;;  %v1813_v40 = vld [vmem:[%s5909_s10 + $0x630] sm:$0xff]  ;;  %v1820_v63 = vld [vmem:[%s5909_s10 + $0x668] sm:$0xff] }
 0x421   :  { %6061 = vst [vmem:[#allocation61_spill] sm:$0xff] %v5426_v58  ;;  %6062 = vst [vmem:[#allocation62_spill] sm:$0xff] %v5448_v22  ;;  %v1811_v47 = vld [vmem:[%s5909_s10 + $0x620] sm:$0xff]  ;;  %v1818_v53 = vld [vmem:[%s5909_s10 + $0x658] sm:$0xff] }
 0x422   :  { %6063 = vst [vmem:[#allocation63_spill] sm:$0xff] %v5450_v61  ;;  %6064 = vst [vmem:[#allocation64_spill] sm:$0xff] %v5460_v39  ;;  %v1822_v54 = vld [vmem:[%s5909_s10 + $0x678] sm:$0xff] }
 0x423   :  { %3076 = vmatpush1.bf16.msra.mxu1 %v5412_v27  ;;  %3204 = vmatpush1.bf16.msra.mxu0 %v5414_v41  ;;  %v5462_v27 = vpack.c.bf16 %v1814_v9, %v1810_v44  ;;  %v5484_v44 = vpack.c.bf16 %v1811_v47, %v1807_v25  ;;  %v5486_v9 = vpack.c.bf16 %v1813_v40, %v1809_v24  ;;  %v1817_v47 = vld [vmem:[%s5909_s10 + $0x650] sm:$0xff]  ;;  %v1824_v24 = vld [vmem:[%s5909_s10 + $0x688] sm:$0xff] }
 0x424   :  { %3078 = vmatprep.subr.bf16.mxu1 %v5424_v62  ;;  %3206 = vmatprep.subr.bf16.mxu0 %v5426_v58  ;;  %v1815_v58 = vld [vmem:[%s5909_s10 + $0x640] sm:$0xff]  ;;  %v5496_v41 = vpack.c.bf16 %v1820_v63, %v1816_v51  ;;  %v1821_v25 = vld [vmem:[%s5909_s10 + $0x670] sm:$0xff]  ;;  %v1828_v40 = vld [vmem:[%s5909_s10 + $0x6a8] sm:$0xff] }
 0x425   :  { %6065 = vst [vmem:[#allocation65_spill] sm:$0xff] %v5462_v27  ;;  %6066 = vst [vmem:[#allocation66_spill] sm:$0xff] %v5484_v44  ;;  %v1819_v62 = vld [vmem:[%s5909_s10 + $0x660] sm:$0xff]  ;;  %v1826_v51 = vld [vmem:[%s5909_s10 + $0x698] sm:$0xff] }
 0x426   :  { %6067 = vst [vmem:[#allocation67_spill] sm:$0xff] %v5486_v9  ;;  %6068 = vst [vmem:[#allocation68_spill] sm:$0xff] %v5496_v41  ;;  %v1830_v63 = vld [vmem:[%s5909_s10 + $0x6b8] sm:$0xff] }
 0x427   :  { %3080 = vmatpush1.bf16.msra.mxu1 %v5448_v22  ;;  %3208 = vmatpush1.bf16.msra.mxu0 %v5450_v61  ;;  %v5498_v22 = vpack.c.bf16 %v1822_v54, %v1818_v53  ;;  %v5520_v53 = vpack.c.bf16 %v1819_v62, %v1815_v58  ;;  %v5522_v54 = vpack.c.bf16 %v1821_v25, %v1817_v47  ;;  %v1825_v62 = vld [vmem:[%s5909_s10 + $0x690] sm:$0xff]  ;;  %v1832_v47 = vld [vmem:[%s5909_s10 + $0x6c8] sm:$0xff] }
 0x428   :  { %3082 = vmatprep.subr.bf16.mxu1 %v5460_v39  ;;  %3210 = vmatprep.subr.bf16.mxu0 %v5462_v27  ;;  %v1823_v27 = vld [vmem:[%s5909_s10 + $0x680] sm:$0xff]  ;;  %v5532_v61 = vpack.c.bf16 %v1828_v40, %v1824_v24  ;;  %v1829_v58 = vld [vmem:[%s5909_s10 + $0x6b0] sm:$0xff]  ;;  %v1836_v25 = vld [vmem:[%s5909_s10 + $0x6e8] sm:$0xff] }
 0x429   :  { %6069 = vst [vmem:[#allocation69_spill] sm:$0xff] %v5498_v22  ;;  %6070 = vst [vmem:[#allocation70_spill] sm:$0xff] %v5520_v53  ;;  %v1827_v39 = vld [vmem:[%s5909_s10 + $0x6a0] sm:$0xff]  ;;  %v1834_v24 = vld [vmem:[%s5909_s10 + $0x6d8] sm:$0xff] }
 0x42a   :  { %6071 = vst [vmem:[#allocation71_spill] sm:$0xff] %v5522_v54  ;;  %6072 = vst [vmem:[#allocation72_spill] sm:$0xff] %v5532_v61  ;;  %v1838_v40 = vld [vmem:[%s5909_s10 + $0x6f8] sm:$0xff] }
 0x42b   :  { %3084 = vmatpush1.bf16.msra.mxu1 %v5484_v44  ;;  %3212 = vmatpush1.bf16.msra.mxu0 %v5486_v9  ;;  %v5534_v44 = vpack.c.bf16 %v1830_v63, %v1826_v51  ;;  %v1900_v51 = vmul.f32 %v5166_v33, %v5166_v33  ;;  %v5558_v63 = vpack.c.bf16 %v1827_v39, %v1823_v27  ;;  %v1835_v9 = vld [vmem:[%s5909_s10 + $0x6e0] sm:$0xff]  ;;  %v1833_v39 = vld [vmem:[%s5909_s10 + $0x6d0] sm:$0xff] }
 0x42c   :  { %3086 = vmatprep.subr.bf16.mxu1 %v5496_v41  ;;  %3214 = vmatprep.subr.bf16.mxu0 %v5498_v22  ;;  %v5560_v22 = vpack.c.bf16 %v1829_v58, %v1825_v62  ;;  %v1831_v41 = vld [vmem:[%s5909_s10 + $0x6c0] sm:$0xff]  ;;  %v5570_v33 = vpack.c.bf16 %v1836_v25, %v1832_v47  ;;  %v1837_v27 = vld [vmem:[%s5909_s10 + $0x6f0] sm:$0xff]  ;;  %v1840_v62 = vld [vmem:[%s5909_s10 + $0x708] sm:$0xff]  ;;  %v1885_v58 = vsel %vm398_vm2, %v5162_v32, 0.0 }
 0x42d   :  { %6073 = vst [vmem:[#allocation73_spill] sm:$0xff] %v5534_v44  ;;  %6074 = vst [vmem:[#allocation74_spill] sm:$0xff] %v5558_v63  ;;  %v1844_v47 = vld [vmem:[%s5909_s10 + $0x728] sm:$0xff]  ;;  %v1842_v25 = vld [vmem:[%s5909_s10 + $0x718] sm:$0xff]  ;;  %v1886_v21 = vrot.slane %v1885_v58, 4 }
 0x42e   :  { %6075 = vst [vmem:[#allocation75_spill] sm:$0xff] %v5560_v22  ;;  %6076 = vst [vmem:[#allocation76_spill] sm:$0xff] %v5570_v33  ;;  %v1843_v32 = vld [vmem:[%s5909_s10 + $0x720] sm:$0xff] }
 0x42f   :  { %3088 = vmatpush1.bf16.msra.mxu1 %v5520_v53  ;;  %3216 = vmatpush1.bf16.msra.mxu0 %v5522_v54  ;;  %v5572_v53 = vpack.c.bf16 %v1838_v40, %v1834_v24  ;;  %v1846_v24 = vld [vmem:[%s5909_s10 + $0x738] sm:$0xff]  ;;  %v1910_v40 = vsel %vm398_vm2, %v1900_v51, 0.0  ;;  %v1839_v54 = vld [vmem:[%s5909_s10 + $0x700] sm:$0xff]  ;;  %v5609_v51 = vpack.c.bf16 %v1844_v47, %v1840_v62  ;;  %v1852_v62 = vld [vmem:[%s5909_s10 + $0x768] sm:$0xff]  ;;  %v1887_v26 = vadd.f32 %v1886_v21, %v1885_v58 }
 0x430   :  { %3090 = vmatprep.subr.bf16.mxu1 %v5532_v61  ;;  %3218 = vmatprep.subr.bf16.mxu0 %v5534_v44  ;;  %v5597_v44 = vpack.c.bf16 %v1835_v9, %v1831_v41  ;;  %v5599_v61 = vpack.c.bf16 %v1837_v27, %v1833_v39  ;;  %v1841_v41 = vld [vmem:[%s5909_s10 + $0x710] sm:$0xff]  ;;  %v1848_v39 = vld [vmem:[%s5909_s10 + $0x748] sm:$0xff]  ;;  %v1911_v27 = vrot.slane %v1910_v40, 4  ;;  %v1850_v47 = vld [vmem:[%s5909_s10 + $0x758] sm:$0xff] }
 0x431   :  { %6077 = vst [vmem:[#allocation77_spill] sm:$0xff] %v5572_v53  ;;  %6080 = vst [vmem:[#allocation80_spill] sm:$0xff] %v5609_v51  ;;  %v1845_v9 = vld [vmem:[%s5909_s10 + $0x730] sm:$0xff]  ;;  %v1856_v21 = vld [vmem:[%s5909_s10 + $0x788] sm:$0xff] }
 0x432   :  { %6078 = vst [vmem:[#allocation78_spill] sm:$0xff] %v5597_v44  ;;  %6079 = vst [vmem:[#allocation79_spill] sm:$0xff] %v5599_v61  ;;  %v1912_v58 = vadd.f32 %v1911_v27, %v1910_v40  ;;  %v1855_v40 = vld [vmem:[%s5909_s10 + $0x780] sm:$0xff] }
 0x433   :  { %3092 = vmatpush1.bf16.msra.mxu1 %v5558_v63  ;;  %3220 = vmatpush1.bf16.msra.mxu0 %v5560_v22  ;;  %v5611_v22 = vpack.c.bf16 %v1846_v24, %v1842_v25  ;;  %v1854_v25 = vld [vmem:[%s5909_s10 + $0x778] sm:$0xff]  ;;  %v5633_v24 = vpack.c.bf16 %v1843_v32, %v1839_v54  ;;  %v1851_v63 = vld [vmem:[%s5909_s10 + $0x760] sm:$0xff]  ;;  %v1849_v32 = vld [vmem:[%s5909_s10 + $0x750] sm:$0xff] }
 0x434   :  { %3094 = vmatprep.subr.bf16.mxu1 %v5570_v33  ;;  %3222 = vmatprep.subr.bf16.mxu0 %v5572_v53  ;;  %v5635_v53 = vpack.c.bf16 %v1845_v9, %v1841_v41  ;;  %v1847_v33 = vld [vmem:[%s5909_s10 + $0x740] sm:$0xff]  ;;  %v1853_v54 = vld [vmem:[%s5909_s10 + $0x770] sm:$0xff]  ;;  %v1860_v41 = vld [vmem:[%s5909_s10 + $0x7a8] sm:$0xff] }
 0x435   :  { %6081 = vst [vmem:[#allocation81_spill] sm:$0xff] %v5611_v22  ;;  %6082 = vst [vmem:[#allocation82_spill] sm:$0xff] %v5633_v24  ;;  %v1858_v9 = vld [vmem:[%s5909_s10 + $0x798] sm:$0xff]  ;;  %v1859_v27 = vld [vmem:[%s5909_s10 + $0x7a0] sm:$0xff] }
 0x436   :  { %6083 = vst [vmem:[#allocation83_spill] sm:$0xff] %v5635_v53 }
 0x437   :  { %3096 = vmatpush1.bf16.msra.mxu1 %v5597_v44  ;;  %3224 = vmatpush1.bf16.msra.mxu0 %v5599_v61  ;;  %v5645_v44 = vpack.c.bf16 %v1852_v62, %v1848_v39  ;;  %v5647_v61 = vpack.c.bf16 %v1854_v25, %v1850_v47  ;;  %v1862_v39 = vld [vmem:[%s5909_s10 + $0x7b8] sm:$0xff]  ;;  %v5669_v62 = vpack.c.bf16 %v1851_v63, %v1847_v33  ;;  %v1888_v25 = vrot.slane %v1887_v26, 2  ;;  %v1857_v33 = vld [vmem:[%s5909_s10 + $0x790] sm:$0xff] }
 0x438   :  { %3098 = vmatprep.subr.bf16.mxu1 %v5609_v51  ;;  %3226 = vmatprep.subr.bf16.mxu0 %v5611_v22  ;;  %v5671_v47 = vpack.c.bf16 %v1853_v54, %v1849_v32  ;;  %v1861_v63 = vld [vmem:[%s5909_s10 + $0x7b0] sm:$0xff]  ;;  %v1864_v32 = vld [vmem:[%s5909_s10 + $0x7c8] sm:$0xff] }
 0x439   :  { %6084 = vst [vmem:[#allocation84_spill] sm:$0xff] %v5645_v44  ;;  %6085 = vst [vmem:[#allocation85_spill] sm:$0xff] %v5647_v61  ;;  %v1868_v54 = vld [vmem:[%s5909_s10 + $0x7e8] sm:$0xff]  ;;  %v1889_v22 = vadd.f32 %v1888_v25, %v1887_v26  ;;  %v1869_v26 = vld [vmem:[%s5909_s10 + $0x7f0] sm:$0xff] }
 0x43a   :  { %v5714_v51 = vpack.c.bf16 %v1868_v54, %v1864_v32 }
 0x43b   :  { %3100 = vmatpush1.bf16.msra.mxu1 %v5633_v24  ;;  %3228 = vmatpush1.bf16.msra.mxu0 %v5635_v53  ;;  %v5681_v24 = vpack.c.bf16 %v1860_v41, %v1856_v21  ;;  %v5683_v53 = vpack.c.bf16 %v1862_v39, %v1858_v9  ;;  %v1866_v21 = vld [vmem:[%s5909_s10 + $0x7d8] sm:$0xff]  ;;  %v1913_v9 = vrot.slane %v1912_v58, 2  ;;  %v5705_v39 = vpack.c.bf16 %v1859_v27, %v1855_v40  ;;  %v1867_v40 = vld [vmem:[%s5909_s10 + $0x7e0] sm:$0xff]  ;;  %v1865_v27 = vld [vmem:[%s5909_s10 + $0x7d0] sm:$0xff] }
 0x43c   :  { %3102 = vmatprep.subr.bf16.mxu1 %v5645_v44  ;;  %3230 = vmatprep.subr.bf16.mxu0 %v5647_v61  ;;  %v1870_v41 = vld [vmem:[%s5909_s10 + $0x7f8] sm:$0xff]  ;;  %v5707_v61 = vpack.c.bf16 %v1861_v63, %v1857_v33  ;;  %v1863_v44 = vld [vmem:[%s5909_s10 + $0x7c0] sm:$0xff]  ;;  %v5731_v63 = vpack.c.bf16 %v1869_v26, %v1865_v27  ;;  %v1890_v32 = vrot.slane %v1889_v22, 1  ;;  %v6114_v27 = vld [vmem:[#allocation36_spill] sm:$0xff] }
 0x43d   :  { %v5716_v0 = vpack.c.bf16 %v1870_v41, %v1866_v21  ;;  %v1914_v25 = vadd.f32 %v1913_v9, %v1912_v58  ;;  %v5729_v33 = vpack.c.bf16 %v1867_v40, %v1863_v44  ;;  %v6111_v44 = vld [vmem:[#allocation31_spill] sm:$0xff]  ;;  %v6112_v41 = vld [vmem:[#allocation32_spill] sm:$0xff]  ;;  %v6115_v26 = vld [vmem:[#allocation37_spill] sm:$0xff] }
 0x43e   :  { %v1891_v21 = vadd.f32 %v1890_v32, %v1889_v22  ;;  %v6113_v40 = vld [vmem:[#allocation35_spill] sm:$0xff] }
 0x43f   :  { %3104 = vmatpush1.bf16.msra.mxu1 %v5669_v62  ;;  %3232 = vmatpush1.bf16.msra.mxu0 %v5671_v47  ;;  %v1915_v54 = vrot.slane %v1914_v25, 1  ;;  %v6117_v32 = vld [vmem:[#allocation39_spill] sm:$0xff] }
 0x440   :  { %3106 = vmatprep.subr.bf16.mxu1 %v5681_v24  ;;  %3234 = vmatprep.subr.bf16.mxu0 %v5683_v53 }
 0x441   :  { %v1916_v58 = vadd.f32 %v1915_v54, %v1914_v25  ;;  %v6116_v25 = vld [vmem:[#allocation38_spill] sm:$0xff]  ;;  %v6118_v54 = vld [vmem:[#allocation40_spill] sm:$0xff] }
 0x443   :  { %3108 = vmatpush1.bf16.msra.mxu1 %v5705_v39  ;;  %3236 = vmatpush1.bf16.msra.mxu0 %v5707_v61 }
 0x444   :  { %3110 = vmatprep.subr.bf16.mxu1 %v5714_v51  ;;  %3238 = vmatprep.subr.bf16.mxu0 %v5716_v0 }
 0x447   :  { %3112 = vmatpush1.bf16.msra.mxu1 %v5729_v33  ;;  %3240 = vmatpush1.bf16.msra.mxu0 %v5731_v63 }
 0x448   :  { %3242 = vmatprep.subr.bf16.mxu1 %v4582_v45  ;;  %3370 = vmatprep.subr.bf16.mxu0 %v4584_v46  ;;  %v1899_v45 = vmul.f32 %v5160_v8, %v5160_v8  ;;  %v1902_v46 = vmul.f32 %v5168_v17, %v5168_v17 }
 0x44a   :  { %2067 = vmatmul.mubr.f32.vlgmr.msra.gmra.mrb[6].mxu1 %v1891_v21  ;;  %2209 = vmatmul.mubr.f32.vlgmr.msra.gmra.mrb[6].mxu0 %v1891_v21  ;;  %v6119_v21 = vld [vmem:[#allocation41_spill] sm:$0xff] }
 0x44b   :  { %3244 = vmatpush1.bf16.msra.mxu1 %v4606_v1  ;;  %2283 = vmatprep.mubr.f32.mxu1 %v1916_v58  ;;  %v6086_v1 = vld [vmem:[#allocation6_spill] sm:$0xff] }
 0x44c   :  { %3372 = vmatpush1.bf16.msra.mxu0 %v4608_v2  ;;  %2425 = vmatprep.mubr.f32.mxu0 %v1916_v58  ;;  %v6087_v2 = vld [vmem:[#allocation7_spill] sm:$0xff]  ;;  %v6120_v58 = vld [vmem:[#allocation42_spill] sm:$0xff] }
 0x44d   :  { %3246 = vmatprep.subr.bf16.mxu1 %v4618_v5  ;;  %3374 = vmatprep.subr.bf16.mxu0 %v4620_v23  ;;  %v1903_v5 = vsel %vm398_vm2, %v1899_v45, 0.0  ;;  %v6088_v23 = vld [vmem:[#allocation8_spill] sm:$0xff]  ;;  %v6121_v45 = vld [vmem:[#allocation43_spill] sm:$0xff] }
 0x44f   :  { %3248 = vmatpush1.bf16.msra.mxu1 %v4642_v12  ;;  %v1924_v12 = vsel %vm398_vm2, %v1902_v46, 0.0  ;;  %v6123_v46 = vld [vmem:[#allocation45_spill] sm:$0xff] }
 0x450   :  { %3376 = vmatpush1.bf16.msra.mxu0 %v4644_v14  ;;  %3250 = vmatprep.subr.bf16.mxu1 %v4654_v18  ;;  %v6089_v14 = vld [vmem:[#allocation9_spill] sm:$0xff]  ;;  %v1904_v18 = vrot.slane %v1903_v5, 4 }
 0x451   :  { %3378 = vmatprep.subr.bf16.mxu0 %v4656_v19  ;;  %v6090_v19 = vld [vmem:[#allocation10_spill] sm:$0xff] }
 0x453   :  { %3252 = vmatpush1.bf16.msra.mxu1 %v4678_v30  ;;  %v6091_v30 = vld [vmem:[#allocation11_spill] sm:$0xff] }
 0x454   :  { %3380 = vmatpush1.bf16.msra.mxu0 %v4680_v31  ;;  %3254 = vmatprep.subr.bf16.mxu1 %v4690_v34  ;;  %v6092_v31 = vld [vmem:[#allocation12_spill] sm:$0xff]  ;;  %v1925_v34 = vrot.slane %v1924_v12, 4 }
 0x455   :  { %3382 = vmatprep.subr.bf16.mxu0 %v4692_v35  ;;  %v6093_v35 = vld [vmem:[#allocation13_spill] sm:$0xff] }
 0x457   :  { %3256 = vmatpush1.bf16.msra.mxu1 %v4714_v42  ;;  %v1905_v42 = vadd.f32 %v1904_v18, %v1903_v5  ;;  %v6126_v5 = vld [vmem:[#allocation48_spill] sm:$0xff] }
 0x458   :  { %3384 = vmatpush1.bf16.msra.mxu0 %v4716_v43  ;;  %3258 = vmatprep.subr.bf16.mxu1 %v4726_v37  ;;  %v6094_v43 = vld [vmem:[#allocation14_spill] sm:$0xff]  ;;  %v6095_v37 = vld [vmem:[#allocation15_spill] sm:$0xff]  ;;  %v6130_v18 = vld [vmem:[#allocation52_spill] sm:$0xff] }
 0x459   :  { %3386 = vmatprep.subr.bf16.mxu0 %v4728_v48  ;;  %v6096_v48 = vld [vmem:[#allocation16_spill] sm:$0xff] }
 0x45b   :  { %3260 = vmatpush1.bf16.msra.mxu1 %v4750_v59  ;;  %v1926_v59 = vadd.f32 %v1925_v34, %v1924_v12  ;;  %v6128_v12 = vld [vmem:[#allocation50_spill] sm:$0xff]  ;;  %v6134_v34 = vld [vmem:[#allocation56_spill] sm:$0xff] }
 0x45c   :  { %3388 = vmatpush1.bf16.msra.mxu0 %v4752_v60  ;;  %3262 = vmatprep.subr.bf16.mxu1 %v4762_v52  ;;  %v6097_v60 = vld [vmem:[#allocation17_spill] sm:$0xff]  ;;  %v1906_v52 = vrot.slane %v1905_v42, 2 }
 0x45d   :  { %3390 = vmatprep.subr.bf16.mxu0 %v4764_v57  ;;  %v6098_v57 = vld [vmem:[#allocation18_spill] sm:$0xff] }
 0x45f   :  { %3264 = vmatpush1.bf16.msra.mxu1 %v4786_v6  ;;  %v6099_v6 = vld [vmem:[#allocation19_spill] sm:$0xff] }
 0x460   :  { %3392 = vmatpush1.bf16.msra.mxu0 %v4788_v7  ;;  %3266 = vmatprep.subr.bf16.mxu1 %v4798_v10  ;;  %v6100_v7 = vld [vmem:[#allocation20_spill] sm:$0xff]  ;;  %v1927_v10 = vrot.slane %v1926_v59, 2 }
 0x461   :  { %3394 = vmatprep.subr.bf16.mxu0 %v4800_v11  ;;  %v6101_v11 = vld [vmem:[#allocation21_spill] sm:$0xff] }
 0x463   :  { %3268 = vmatpush1.bf16.msra.mxu1 %v4822_v28  ;;  %v1907_v28 = vadd.f32 %v1906_v52, %v1905_v42  ;;  %v6136_v42 = vld [vmem:[#allocation58_spill] sm:$0xff]  ;;  %v6142_v52 = vld [vmem:[#allocation64_spill] sm:$0xff] }
 0x464   :  { %3396 = vmatpush1.bf16.msra.mxu0 %v4824_v29  ;;  %3270 = vmatprep.subr.bf16.mxu1 %v4834_v36  ;;  %v6102_v29 = vld [vmem:[#allocation22_spill] sm:$0xff]  ;;  %v6103_v36 = vld [vmem:[#allocation23_spill] sm:$0xff] }
 0x465   :  { %3398 = vmatprep.subr.bf16.mxu0 %v4836_v38  ;;  %v6104_v38 = vld [vmem:[#allocation24_spill] sm:$0xff] }
 0x467   :  { %3272 = vmatpush1.bf16.msra.mxu1 %v4858_v49  ;;  %v1928_v49 = vadd.f32 %v1927_v10, %v1926_v59  ;;  %v6140_v59 = vld [vmem:[#allocation62_spill] sm:$0xff]  ;;  %v6146_v10 = vld [vmem:[#allocation68_spill] sm:$0xff] }
 0x468   :  { %3400 = vmatpush1.bf16.msra.mxu0 %v4860_v50  ;;  %3274 = vmatprep.subr.bf16.mxu1 %v4870_v55  ;;  %v6105_v50 = vld [vmem:[#allocation25_spill] sm:$0xff]  ;;  %v6106_v55 = vld [vmem:[#allocation26_spill] sm:$0xff] }
 0x469   :  { %3402 = vmatprep.subr.bf16.mxu0 %v4872_v56  ;;  %v6107_v56 = vld [vmem:[#allocation27_spill] sm:$0xff] }
 0x46b   :  { %3276 = vmatpush1.bf16.msra.mxu1 %v4894_v3  ;;  %v1908_v3 = vrot.slane %v1907_v28, 1 }
 0x46c   :  { %3404 = vmatpush1.bf16.msra.mxu0 %v4896_v4  ;;  %3278 = vmatprep.subr.bf16.mxu1 %v4906_v15  ;;  %v6108_v4 = vld [vmem:[#allocation28_spill] sm:$0xff]  ;;  %v1929_v15 = vrot.slane %v1928_v49, 1 }
 0x46d   :  { %3406 = vmatprep.subr.bf16.mxu0 %v4908_v16  ;;  %v6109_v16 = vld [vmem:[#allocation29_spill] sm:$0xff]  ;;  %v1909_v22 = vadd.f32 %v1908_v3, %v1907_v28 }
 0x46e   :  { %v1930_v9 = vadd.f32 %v1929_v15, %v1928_v49  ;;  %v6151_v49 = vld [vmem:[#allocation72_spill] sm:$0xff] }
 0x46f   :  { %3280 = vmatpush1.bf16.msra.mxu1 %v4930_v20  ;;  %v6110_v20 = vld [vmem:[#allocation30_spill] sm:$0xff]  ;;  %v6155_v15 = vld [vmem:[#allocation76_spill] sm:$0xff] }
 0x470   :  { %3408 = vmatpush1.bf16.msra.mxu0 %v6086_v1  ;;  %3282 = vmatprep.subr.bf16.mxu1 %v6087_v2  ;;  %v6124_v1 = vld [vmem:[#allocation46_spill] sm:$0xff]  ;;  %v6125_v2 = vld [vmem:[#allocation47_spill] sm:$0xff] }
 0x471   :  { %3410 = vmatprep.subr.bf16.mxu0 %v6088_v23  ;;  %v6127_v23 = vld [vmem:[#allocation49_spill] sm:$0xff] }
 0x473   :  { %3284 = vmatpush1.bf16.msra.mxu1 %v6089_v14  ;;  %v6129_v14 = vld [vmem:[#allocation51_spill] sm:$0xff] }
 0x474   :  { %3412 = vmatpush1.bf16.msra.mxu0 %v6090_v19  ;;  %3286 = vmatprep.subr.bf16.mxu1 %v6091_v30  ;;  %v6131_v19 = vld [vmem:[#allocation53_spill] sm:$0xff]  ;;  %v6132_v30 = vld [vmem:[#allocation54_spill] sm:$0xff] }
 0x475   :  { %3414 = vmatprep.subr.bf16.mxu0 %v6092_v31  ;;  %v6133_v31 = vld [vmem:[#allocation55_spill] sm:$0xff] }
 0x477   :  { %3288 = vmatpush1.bf16.msra.mxu1 %v6093_v35  ;;  %v6135_v35 = vld [vmem:[#allocation57_spill] sm:$0xff] }
 0x478   :  { %3416 = vmatpush1.bf16.msra.mxu0 %v6094_v43  ;;  %3290 = vmatprep.subr.bf16.mxu1 %v6095_v37  ;;  %v6137_v43 = vld [vmem:[#allocation59_spill] sm:$0xff]  ;;  %v6138_v37 = vld [vmem:[#allocation60_spill] sm:$0xff] }
 0x479   :  { %3418 = vmatprep.subr.bf16.mxu0 %v6096_v48  ;;  %v6139_v48 = vld [vmem:[#allocation61_spill] sm:$0xff] }
 0x47b   :  { %3292 = vmatpush1.bf16.msra.mxu1 %v6097_v60  ;;  %v6141_v60 = vld [vmem:[#allocation63_spill] sm:$0xff] }
 0x47c   :  { %3420 = vmatpush1.bf16.msra.mxu0 %v6098_v57  ;;  %3294 = vmatprep.subr.bf16.mxu1 %v6099_v6  ;;  %v6143_v57 = vld [vmem:[#allocation65_spill] sm:$0xff]  ;;  %v6144_v6 = vld [vmem:[#allocation66_spill] sm:$0xff] }
 0x47d   :  { %3422 = vmatprep.subr.bf16.mxu0 %v6100_v7  ;;  %v6145_v7 = vld [vmem:[#allocation67_spill] sm:$0xff] }
 0x47f   :  { %3296 = vmatpush1.bf16.msra.mxu1 %v6101_v11  ;;  %v6147_v11 = vld [vmem:[#allocation33_spill] sm:$0xff] }
 0x480   :  { %3424 = vmatpush1.bf16.msra.mxu0 %v6102_v29  ;;  %3298 = vmatprep.subr.bf16.mxu1 %v6103_v36  ;;  %v1901_v28 = vmul.f32 %v6147_v11, %v6147_v11  ;;  %v6148_v29 = vld [vmem:[#allocation69_spill] sm:$0xff]  ;;  %v6149_v36 = vld [vmem:[#allocation70_spill] sm:$0xff] }
 0x481   :  { %3426 = vmatprep.subr.bf16.mxu0 %v6104_v38  ;;  %v6150_v38 = vld [vmem:[#allocation71_spill] sm:$0xff] }
 0x483   :  { %3300 = vmatpush1.bf16.msra.mxu1 %v6105_v50  ;;  %v1917_v50 = vsel %vm398_vm2, %v1901_v28, 0.0 }
 0x484   :  { %3428 = vmatpush1.bf16.msra.mxu0 %v6106_v55  ;;  %3302 = vmatprep.subr.bf16.mxu1 %v6107_v56  ;;  %v6152_v55 = vld [vmem:[#allocation73_spill] sm:$0xff]  ;;  %v6153_v56 = vld [vmem:[#allocation74_spill] sm:$0xff]  ;;  %v1918_v3 = vrot.slane %v1917_v50, 4 }
 0x485   :  { %3430 = vmatprep.subr.bf16.mxu0 %v6108_v4  ;;  %v6154_v4 = vld [vmem:[#allocation75_spill] sm:$0xff] }
 0x487   :  { %3304 = vmatpush1.bf16.msra.mxu1 %v6109_v16  ;;  %v6156_v16 = vld [vmem:[#allocation77_spill] sm:$0xff] }
 0x488   :  { %3432 = vmatpush1.bf16.msra.mxu0 %v6110_v20  ;;  %3306 = vmatprep.subr.bf16.mxu1 %v6111_v44  ;;  %v6157_v20 = vld [vmem:[#allocation78_spill] sm:$0xff]  ;;  %v6158_v44 = vld [vmem:[#allocation79_spill] sm:$0xff] }
 0x489   :  { %3434 = vmatprep.subr.bf16.mxu0 %v6112_v41  ;;  %v6159_v41 = vld [vmem:[#allocation80_spill] sm:$0xff] }
 0x48a   :  { %2284 = vmatmul.mubr.f32.vlgmr.msra.gmra.mrb[12].mxu1 %v1909_v22 }
 0x48b   :  { %2426 = vmatmul.mubr.f32.vlgmr.msra.gmra.mrb[12].mxu0 %v1909_v22  ;;  %3308 = vmatpush1.bf16.msra.mxu1 %v5198_v13  ;;  %v6122_v13 = vld [vmem:[#allocation44_spill] sm:$0xff]  ;;  %v1919_v22 = vadd.f32 %v1918_v3, %v1917_v50  ;;  %v6166_v3 = vld [vmem:[#allocation2_spill] sm:$0xff] }
 0x48c   :  { %2354 = vmatprep.mubr.f32.mxu1 %v1930_v9  ;;  %3436 = vmatpush1.bf16.msra.mxu0 %v6113_v40  ;;  %v6161_v40 = vld [vmem:[#allocation82_spill] sm:$0xff] }
 0x48d   :  { %2496 = vmatprep.mubr.f32.mxu0 %v1930_v9  ;;  %3310 = vmatprep.subr.bf16.mxu1 %v6114_v27  ;;  %v6160_v9 = vld [vmem:[#allocation81_spill] sm:$0xff]  ;;  %v1920_v27 = vrot.slane %v1919_v22, 2 }
 0x48e   :  { %3438 = vmatprep.subr.bf16.mxu0 %v6115_v26  ;;  %v6162_v26 = vld [vmem:[#allocation83_spill] sm:$0xff] }
 0x48f   :  { %3312 = vmatpush1.bf16.msra.mxu1 %v6116_v25  ;;  %v6163_v25 = vld [vmem:[#allocation84_spill] sm:$0xff] }
 0x490   :  { %3440 = vmatpush1.bf16.msra.mxu0 %v6117_v32  ;;  %3314 = vmatprep.subr.bf16.mxu1 %v6118_v54  ;;  %v6164_v32 = vld [vmem:[#allocation85_spill] sm:$0xff]  ;;  %v1921_v54 = vadd.f32 %v1920_v27, %v1919_v22 }
 0x491   :  { %3442 = vmatprep.subr.bf16.mxu0 %v6119_v21 }
 0x492   :  { %v1922_v21 = vrot.slane %v1921_v54, 1 }
 0x493   :  { %3316 = vmatpush1.bf16.msra.mxu1 %v6120_v58 }
 0x494   :  { %3444 = vmatpush1.bf16.msra.mxu0 %v6121_v45  ;;  %3318 = vmatprep.subr.bf16.mxu1 %v6122_v13 }
 0x495   :  { %3446 = vmatprep.subr.bf16.mxu0 %v6123_v46 }
 0x497   :  { %3320 = vmatpush1.bf16.msra.mxu1 %v6124_v1 }
 0x498   :  { %3448 = vmatpush1.bf16.msra.mxu0 %v6125_v2  ;;  %3322 = vmatprep.subr.bf16.mxu1 %v6126_v5 }
 0x499   :  { %3450 = vmatprep.subr.bf16.mxu0 %v6127_v23 }
 0x49b   :  { %3324 = vmatpush1.bf16.msra.mxu1 %v6128_v12 }
 0x49c   :  { %3452 = vmatpush1.bf16.msra.mxu0 %v6129_v14  ;;  %3326 = vmatprep.subr.bf16.mxu1 %v6130_v18 }
 0x49d   :  { %3454 = vmatprep.subr.bf16.mxu0 %v6131_v19 }
 0x49f   :  { %3328 = vmatpush1.bf16.msra.mxu1 %v6132_v30 }
 0x4a0   :  { %3456 = vmatpush1.bf16.msra.mxu0 %v6133_v31  ;;  %3330 = vmatprep.subr.bf16.mxu1 %v6134_v34 }
 0x4a1   :  { %3458 = vmatprep.subr.bf16.mxu0 %v6135_v35 }
 0x4a3   :  { %3332 = vmatpush1.bf16.msra.mxu1 %v6136_v42 }
 0x4a4   :  { %3460 = vmatpush1.bf16.msra.mxu0 %v6137_v43  ;;  %3334 = vmatprep.subr.bf16.mxu1 %v6138_v37 }
 0x4a5   :  { %3462 = vmatprep.subr.bf16.mxu0 %v6139_v48 }
 0x4a7   :  { %3336 = vmatpush1.bf16.msra.mxu1 %v6140_v59 }
 0x4a8   :  { %3464 = vmatpush1.bf16.msra.mxu0 %v6141_v60  ;;  %3338 = vmatprep.subr.bf16.mxu1 %v6142_v52 }
 0x4a9   :  { %3466 = vmatprep.subr.bf16.mxu0 %v6143_v57 }
 0x4ab   :  { %3340 = vmatpush1.bf16.msra.mxu1 %v6144_v6 }
 0x4ac   :  { %3468 = vmatpush1.bf16.msra.mxu0 %v6145_v7  ;;  %3342 = vmatprep.subr.bf16.mxu1 %v6146_v10 }
 0x4ad   :  { %3470 = vmatprep.subr.bf16.mxu0 %v6148_v29 }
 0x4af   :  { %3344 = vmatpush1.bf16.msra.mxu1 %v6149_v36  ;;  %v6165_v36 = vld [vmem:[#allocation3_spill] sm:$0xff] }
 0x4b0   :  { %3472 = vmatpush1.bf16.msra.mxu0 %v6150_v38  ;;  %3346 = vmatprep.subr.bf16.mxu1 %v6151_v49 }
 0x4b1   :  { %3474 = vmatprep.subr.bf16.mxu0 %v6152_v55  ;;  %v1613_v55 = vld [vmem:[%s5910_s8] sm:$0xf] }
 0x4b3   :  { %3348 = vmatpush1.bf16.msra.mxu1 %v6153_v56 }
 0x4b4   :  { %3476 = vmatpush1.bf16.msra.mxu0 %v6154_v4  ;;  %3350 = vmatprep.subr.bf16.mxu1 %v6155_v15  ;;  %v2568_v4 = vsub.s32 2, %v6166_v3  ;;  %v2572_v15 = vsub.s32 3, %v6166_v3 }
 0x4b5   :  { %3478 = vmatprep.subr.bf16.mxu0 %v6156_v16 }
 0x4b7   :  { %3352 = vmatpush1.bf16.msra.mxu1 %v6157_v20  ;;  %v6167_v20 = vld [vmem:[#allocation4_spill] sm:$0xff] }
 0x4b8   :  { %3480 = vmatpush1.bf16.msra.mxu0 %v6158_v44  ;;  %3354 = vmatprep.subr.bf16.mxu1 %v6159_v41  ;;  %v6168_v44 = vld [vmem:[#allocation5_spill] sm:$0xff] }
 0x4b9   :  { %3482 = vmatprep.subr.bf16.mxu0 %v6160_v9 }
 0x4bb   :  { %3356 = vmatpush1.bf16.msra.mxu1 %v6161_v40 }
 0x4bc   :  { %3484 = vmatpush1.bf16.msra.mxu0 %v6162_v26  ;;  %3358 = vmatprep.subr.bf16.mxu1 %v6163_v25 }
 0x4bd   :  { %3486 = vmatprep.subr.bf16.mxu0 %v6164_v32 }
 0x4bf   :  { %3360 = vmatpush1.bf16.msra.mxu1 %v5669_v62  ;;  %v1923_v62 = vadd.f32 %v1922_v21, %v1921_v54  ;;  %v6169_v21 = vld [vmem:[#allocation34_spill] sm:$0xff] }
 0x4c0   :  { %3488 = vmatpush1.bf16.msra.mxu0 %v5671_v47  ;;  %3362 = vmatprep.subr.bf16.mxu1 %v5681_v24 }
 0x4c1   :  { %3490 = vmatprep.subr.bf16.mxu0 %v5683_v53 }
 0x4c3   :  { %3364 = vmatpush1.bf16.msra.mxu1 %v5705_v39 }
 0x4c4   :  { %3492 = vmatpush1.bf16.msra.mxu0 %v5707_v61  ;;  %3366 = vmatprep.subr.bf16.mxu1 %v5714_v51 }
 0x4c5   :  { %3494 = vmatprep.subr.bf16.mxu0 %v5716_v0 }
 0x4c7   :  { %3368 = vmatpush1.bf16.msra.mxu1 %v5729_v33 }
 0x4c8   :  { %3496 = vmatpush1.bf16.msra.mxu0 %v5731_v63 }
 0x4ca   :  { %2355 = vmatmul.mubr.f32.vlgmr.msra.gmra.mrb[12].mxu1 %v1923_v62 }
 0x4cb   :  { %2497 = vmatmul.mubr.f32.vlgmr.msra.gmra.mrb[12].mxu0 %v1923_v62 }
 0x51d   :  { %v2068_v47 = vpop.f32.mrb[6].mxu1  ;;  %v2210_v24 = vpop.f32.mrb[6].mxu0 }
 0x51e   :  { %v2070_v58 = vpop.f32.mrb[7].mxu1  ;;  %v2212_v53 = vpop.f32.mrb[7].mxu0  ;;  %v2215_v45 = vmul.f32 0.03125, %v2068_v47  ;;  %v2217_v39 = vmul.f32 0.03125, %v2210_v24 }
 0x51f   :  { %v2216_v13 = vmul.f32 0.03125, %v2070_v58  ;;  %v2218_v61 = vmul.f32 0.03125, %v2212_v53 }
 0x520   :  { %v2507_v51 = vmul.f32 %v2215_v45, %v2215_v45  ;;  %v2509_v5 = vmul.f32 %v2217_v39, %v2217_v39 }
 0x521   :  { %v2508_v33 = vmul.f32 %v2216_v13, %v2216_v13  ;;  %v2510_v14 = vmul.f32 %v2218_v61, %v2218_v61 }
 0x59d   :  { %v2356_v46 = vpop.f32.mrb[12].mxu1 }
 0x59e   :  { %v2503_v1 = vmul.f32 0.03125, %v2356_v46  ;;  %v2498_v2 = vpop.f32.mrb[12].mxu0  ;;  %v2358_v0 = vpop.f32.mrb[13].mxu1 }
 0x59f   :  { %v2505_v23 = vmul.f32 0.03125, %v2498_v2  ;;  %v2504_v63 = vmul.f32 0.03125, %v2358_v0  ;;  %v2500_v12 = vpop.f32.mrb[13].mxu0 }
 0x5a0   :  { %v2511_v18 = vsub.f32 %v2503_v1, %v2507_v51  ;;  %v2506_v19 = vmul.f32 0.03125, %v2500_v12 }
 0x5a1   :  { %v2513_v30 = vsub.f32 %v2505_v23, %v2509_v5  ;;  %v2512_v31 = vsub.f32 %v2504_v63, %v2508_v33 }
 0x5a2   :  { %v2515_v34 = vmax.f32 %v2511_v18, 0.0  ;;  %v2514_v35 = vsub.f32 %v2506_v19, %v2510_v14 }
 0x5a3   :  { %v2517_v42 = vmax.f32 %v2513_v30, 0.0  ;;  %v2516_v43 = vmax.f32 %v2512_v31, 0.0 }
 0x5a4   :  { %v2519_v37 = vadd.f32 1e-05, %v2515_v34  ;;  %v2518_v48 = vmax.f32 %v2514_v35, 0.0 }
 0x5a5   :  { %v2521_v59 = vadd.f32 1e-05, %v2517_v42  ;;  %v2520_v60 = vadd.f32 1e-05, %v2516_v43 }
 0x5a6   :  { %3739 = vrsqrt.f32 %v2519_v37  ;;  %v2522_v52 = vadd.f32 1e-05, %v2518_v48 }
 0x5a7   :  { %3741 = vrsqrt.f32 %v2521_v59 }
 0x5a8   :  { %3743 = vrsqrt.f32 %v2520_v60 }
 0x5a9   :  { %3745 = vrsqrt.f32 %v2522_v52 }
 0x5b0   :  { %v3740_v57 = vpop.eup %3739 }
 0x5b1   :  { %v3742_v6 = vpop.eup %3741 }
 0x5b2   :  { %v3744_v7 = vpop.eup %3743 }
 0x5b3   :  { %v3746_v10 = vpop.eup %3745  ;;  %v2531_v28 = vcombine.low %v3740_v57, %v3744_v7 }
 0x5b4   :  { %v2532_v29 = vcombine.low %v3742_v6, %v3746_v10 }
 0x5b5   :  { %v2539_v38 = vrot.slane %v2531_v28, %v6165_v36 }
 0x5b6   :  { %v2546_v49 = vrot.slane %v2532_v29, %v6165_v36 }
 0x5b8   :  { %v2547_v50 = vcombine.low %v2539_v38, %v2546_v49 }
 0x5ba   :  { %v2554_v56 = vrot.slane %v2547_v50, %v6165_v36 }
 0x5bc   :  { %v2556_v16 = vmul.f32 %v2554_v56, %v1613_v55 }
 0x5be   :  { %v2561_v22 = vrot.slane %v2556_v16, %v6167_v20  ;;  %v2565_v41 = vrot.slane %v2556_v16, %v6168_v44  ;;  %v2569_v9 = vrot.slane %v2556_v16, %v2568_v4  ;;  %v2573_v40 = vrot.slane %v2556_v16, %v2572_v15 }
 0x5c0   :  { %v2578_v27 = vmul.f32 %v2561_v22, %v2215_v45  ;;  %v2579_v26 = vmul.f32 %v2565_v41, %v2216_v13  ;;  %v2580_v25 = vmul.f32 %v2569_v9, %v2217_v39  ;;  %v2581_v32 = vmul.f32 %v2573_v40, %v2218_v61  ;;  %v1614_v45 = vld [vmem:[%s5911_s9] sm:$0xf] }
 0x5c1   :  { %v2612_v54 = vmul.f32 %v2561_v22, %v5160_v8  ;;  %v2613_v62 = vmul.f32 %v2565_v41, %v6169_v21  ;;  %v2614_v47 = vmul.f32 %v2569_v9, %v6147_v11  ;;  %v2615_v24 = vmul.f32 %v2573_v40, %v5168_v17 }
 0x5c2   :  { %v2586_v58 = vcombine.low %v2578_v27, %v2579_v26  ;;  %v2587_v53 = vcombine.low %v2580_v25, %v2581_v32 }
 0x5c4   :  { %v2594_v46 = vrot.slane %v2586_v58, %v6165_v36  ;;  %v2601_v51 = vrot.slane %v2587_v53, %v6165_v36 }
 0x5c6   :  { %v2602_v1 = vcombine.low %v2594_v46, %v2601_v51 }
 0x5c8   :  { %v2609_v39 = vrot.slane %v2602_v1, %v6165_v36 }
 0x5ca   :  { %v2611_v8 = vsub.f32 %v1614_v45, %v2609_v39 }
 0x5cc   :  { %v2620_v13 = vrot.slane %v2611_v8, %v6167_v20  ;;  %v2624_v11 = vrot.slane %v2611_v8, %v6168_v44  ;;  %v2628_v61 = vrot.slane %v2611_v8, %v2568_v4  ;;  %v2632_v17 = vrot.slane %v2611_v8, %v2572_v15 }
 0x5ce   :  { %v2637_v2 = vadd.f32 %v2620_v13, %v2612_v54  ;;  %v2638_v0 = vadd.f32 %v2624_v11, %v2613_v62  ;;  %v2639_v5 = vadd.f32 %v2628_v61, %v2614_v47  ;;  %v2640_v33 = vadd.f32 %v2632_v17, %v2615_v24 }
 0x5d0   :  { %v2832_v23 = vpack.c.bf16 %v2638_v0, %v2637_v2  ;;  %v2833_v63 = vpack.c.bf16 %v2640_v33, %v2639_v5 }
 0x5d2   :  { %v2657_v12 = vrot.slane %v2832_v23, %v6165_v36  ;;  %v2664_v14 = vrot.slane %v2833_v63, %v6165_v36 }
 0x5d4   :  { %v2665_v18 = vcombine.low %v2657_v12, %v2664_v14 }
 0x5d6   :  { %2834 = vst.sshfl [vmem:[%s5912_s11] sm:$0x55 pattern:$0x73625140] %v2665_v18 }

// kernel: generator_forward.15
= control target key start
LH: loop header
LB: loop body
LE: loop exit
PB: predicated region body
PF: predicated region fallthrough
CT: control target
= control target key end

     0   :  { %vm354_vm0 = vcmask 588800   ;;  %vm451_vm1 = vcmask 1043456   ;;  %vm1454_vm2 = vcmask 97280   ;;  %s2793_s3 = inlined_call_operand.vmem [shape: bf16[72,12], index: 3, kind: input, shape index: {}]   ;;  %s2794_s2 = inlined_call_operand.vmem [shape: bf16[72,12], index: 2, kind: input, shape index: {}]   ;;  %s2795_s1 = inlined_call_operand.vmem [shape: bf16[512,72], index: 1, kind: input, shape index: {}]   ;;  %s2796_s0 = inlined_call_operand.vmem [shape: bf16[512,72], index: 0, kind: input, shape index: {}]   ;;  %s2797_s4 = inlined_call_operand.vmem [shape: f32[1,12], index: 4, kind: input, shape index: {}]   ;;  %s2798_s5 = inlined_call_operand.vmem [shape: f32[512,12], index: 5, kind: output, shape index: {}]  }
   0x1   :  { %v1950_v0 = vld [vmem:[%s2793_s3] sm:$0xff]   ;;  %v1952_v2 = vld [vmem:[%s2793_s3 + $0x8] sm:$0xff]   ;;  %v1954_v4 = vld [vmem:[%s2793_s3 + $0x10] sm:$0xff]  }
   0x2   :  { %v1951_v1 = vld [vmem:[%s2794_s2] sm:$0xff]   ;;  %1736 = vmatprep.subr.bf16.mxu1 %v1950_v0  ;;  %v1953_v3 = vld [vmem:[%s2794_s2 + $0x8] sm:$0xff]   ;;  %v1955_v5 = vld [vmem:[%s2794_s2 + $0x10] sm:$0xff]  }
   0x3   :  { %1810 = vmatprep.subr.bf16.mxu0 %v1951_v1  ;;  %1737 = vmatpush3.bf16.msra.mxu1 %v1950_v0  ;;  %v1956_v6 = vld [vmem:[%s2793_s3 + $0x18] sm:$0xff]   ;;  %v1960_v8 = vld [vmem:[%s2795_s1] sm:$0xff]   ;;  %v1962_v14 = vld [vmem:[%s2795_s1 + $0x8] sm:$0xff]  }
   0x4   :  { %1811 = vmatpush3.bf16.msra.mxu0 %v1951_v1  ;;  %1738 = vmatprep.subr.bf16.mxu1 %v1952_v2  ;;  %v1957_v7 = vld [vmem:[%s2794_s2 + $0x18] sm:$0xff]   ;;  %v1961_v9 = vld [vmem:[%s2796_s0] sm:$0xff]   ;;  %v1963_v15 = vld [vmem:[%s2796_s0 + $0x8] sm:$0xff]  }
   0x5   :  { %1812 = vmatprep.subr.bf16.mxu0 %v1953_v3  ;;  %v1958_v10 = vld [vmem:[%s2793_s3 + $0x20] ss:$0 sps:$4 sm:$0xff]   ;;  %1746 = vmatprep.mubr.msk.bf16.mxu1 %vm354_vm0, %v1960_v8  ;;  %v1964_v16 = vld [vmem:[%s2795_s1 + $0x10] sm:$0xff]   ;;  %v1966_v18 = vld [vmem:[%s2795_s1 + $0x18] sm:$0xff]  }
   0x6   :  { %v1959_v11 = vld [vmem:[%s2794_s2 + $0x20] ss:$0 sps:$4 sm:$0xff]   ;;  %1820 = vmatprep.mubr.msk.bf16.mxu0 %vm354_vm0, %v1961_v9  ;;  %v453_v12 = vsel %vm451_vm1, %v1958_v10, 0  ;;  %v1965_v17 = vld [vmem:[%s2796_s0 + $0x10] sm:$0xff]   ;;  %v1967_v19 = vld [vmem:[%s2796_s0 + $0x18] sm:$0xff]  }
   0x7   :  { %1739 = vmatpush3.bf16.msra.mxu1 %v1952_v2  ;;  %v1028_v13 = vsel %vm451_vm1, %v1959_v11, 0  ;;  %v1968_v20 = vld [vmem:[%s2795_s1 + $0x20] sm:$0xff]   ;;  %v1970_v22 = vld [vmem:[%s2795_s1 + $0x28] sm:$0xff]   ;;  %v1972_v24 = vld [vmem:[%s2795_s1 + $0x30] sm:$0xff]  }
   0x8   :  { %1813 = vmatpush3.bf16.msra.mxu0 %v1953_v3  ;;  %1740 = vmatprep.subr.bf16.mxu1 %v1954_v4  ;;  %v1969_v21 = vld [vmem:[%s2796_s0 + $0x20] sm:$0xff]   ;;  %v1971_v23 = vld [vmem:[%s2796_s0 + $0x28] sm:$0xff]   ;;  %v1973_v25 = vld [vmem:[%s2796_s0 + $0x30] sm:$0xff]  }
   0x9   :  { %1814 = vmatprep.subr.bf16.mxu0 %v1955_v5  ;;  %v1974_v26 = vld [vmem:[%s2795_s1 + $0x38] sm:$0xff]   ;;  %v1976_v28 = vld [vmem:[%s2795_s1 + $0x40] sm:$0xff]   ;;  %v1978_v30 = vld [vmem:[%s2795_s1 + $0x48] sm:$0xff]  }
   0xa   :  { %v1975_v27 = vld [vmem:[%s2796_s0 + $0x38] sm:$0xff]   ;;  %v1977_v29 = vld [vmem:[%s2796_s0 + $0x40] sm:$0xff]   ;;  %v1979_v31 = vld [vmem:[%s2796_s0 + $0x48] sm:$0xff]  }
   0xb   :  { %1741 = vmatpush3.bf16.msra.mxu1 %v1954_v4  ;;  %v1980_v32 = vld [vmem:[%s2795_s1 + $0x50] sm:$0xff]   ;;  %v1982_v34 = vld [vmem:[%s2795_s1 + $0x58] sm:$0xff]   ;;  %v1984_v36 = vld [vmem:[%s2795_s1 + $0x60] sm:$0xff]  }
   0xc   :  { %1815 = vmatpush3.bf16.msra.mxu0 %v1955_v5  ;;  %1742 = vmatprep.subr.bf16.mxu1 %v1956_v6  ;;  %v1981_v33 = vld [vmem:[%s2796_s0 + $0x50] sm:$0xff]   ;;  %v1983_v35 = vld [vmem:[%s2796_s0 + $0x58] sm:$0xff]   ;;  %v1985_v37 = vld [vmem:[%s2796_s0 + $0x60] sm:$0xff]  }
   0xd   :  { %1816 = vmatprep.subr.bf16.mxu0 %v1957_v7  ;;  %v1986_v38 = vld [vmem:[%s2795_s1 + $0x68] sm:$0xff]   ;;  %v1988_v40 = vld [vmem:[%s2795_s1 + $0x70] sm:$0xff]   ;;  %v1990_v42 = vld [vmem:[%s2795_s1 + $0x78] sm:$0xff]  }
   0xe   :  { %v1987_v39 = vld [vmem:[%s2796_s0 + $0x68] sm:$0xff]   ;;  %v1989_v41 = vld [vmem:[%s2796_s0 + $0x70] sm:$0xff]   ;;  %v1991_v43 = vld [vmem:[%s2796_s0 + $0x78] sm:$0xff]  }
   0xf   :  { %1743 = vmatpush3.bf16.msra.mxu1 %v1956_v6  ;;  %v1992_v44 = vld [vmem:[%s2795_s1 + $0x80] sm:$0xff]   ;;  %v1994_v46 = vld [vmem:[%s2795_s1 + $0x88] sm:$0xff]   ;;  %v1996_v48 = vld [vmem:[%s2795_s1 + $0x90] sm:$0xff]  }
  0x10   :  { %1817 = vmatpush3.bf16.msra.mxu0 %v1957_v7  ;;  %1948 = vmatprep.subr.msk.bf16.mxu1 %vm451_vm1, %v1958_v10  ;;  %v1993_v45 = vld [vmem:[%s2796_s0 + $0x80] sm:$0xff]   ;;  %v1995_v47 = vld [vmem:[%s2796_s0 + $0x88] sm:$0xff]   ;;  %v1997_v49 = vld [vmem:[%s2796_s0 + $0x90] sm:$0xff]  }
  0x11   :  { %1949 = vmatprep.subr.msk.bf16.mxu0 %vm451_vm1, %v1959_v11  ;;  %v1998_v50 = vld [vmem:[%s2795_s1 + $0x98] sm:$0xff]   ;;  %v2000_v52 = vld [vmem:[%s2795_s1 + $0xa0] sm:$0xff]   ;;  %v2002_v54 = vld [vmem:[%s2795_s1 + $0xa8] sm:$0xff]  }
  0x12   :  { %v1999_v51 = vld [vmem:[%s2796_s0 + $0x98] sm:$0xff]   ;;  %v2001_v53 = vld [vmem:[%s2796_s0 + $0xa0] sm:$0xff]   ;;  %v2003_v55 = vld [vmem:[%s2796_s0 + $0xa8] sm:$0xff]  }
  0x13   :  { %1745 = vmatpush3.bf16.msra.mxu1 %v453_v12  ;;  %v2004_v56 = vld [vmem:[%s2795_s1 + $0xb0] sm:$0xff]   ;;  %v2006_v58 = vld [vmem:[%s2795_s1 + $0xb8] sm:$0xff]   ;;  %v2008_v60 = vld [vmem:[%s2795_s1 + $0xc0] sm:$0xff]  }
  0x14   :  { %1819 = vmatpush3.bf16.msra.mxu0 %v1028_v13  ;;  %v2005_v57 = vld [vmem:[%s2796_s0 + $0xb0] sm:$0xff]   ;;  %v2007_v59 = vld [vmem:[%s2796_s0 + $0xb8] sm:$0xff]   ;;  %v2009_v61 = vld [vmem:[%s2796_s0 + $0xc0] sm:$0xff]  }
  0x15   :  { %v2010_v62 = vld [vmem:[%s2795_s1 + $0xc8] sm:$0xff]   ;;  %v2012_v0 = vld [vmem:[%s2795_s1 + $0xd0] sm:$0xff]   ;;  %v2014_v2 = vld [vmem:[%s2795_s1 + $0xd8] sm:$0xff]  }
  0x16   :  { %1747 = vmatmul.mubr.msk.bf16.vlgmr.msra.gmra.mrb[0].mxu1 %vm354_vm0, %v1962_v14  ;;  %v2011_v63 = vld [vmem:[%s2796_s0 + $0xc8] sm:$0xff]   ;;  %v2013_v1 = vld [vmem:[%s2796_s0 + $0xd0] sm:$0xff]   ;;  %v2015_v3 = vld [vmem:[%s2796_s0 + $0xd8] sm:$0xff]  }
  0x17   :  { %1821 = vmatmul.mubr.msk.bf16.vlgmr.msra.gmra.mrb[0].mxu0 %vm354_vm0, %v1963_v15  ;;  %1750 = vmatprep.mubr.msk.bf16.mxu1 %vm354_vm0, %v1964_v16  ;;  %v2016_v4 = vld [vmem:[%s2795_s1 + $0xe0] sm:$0xff]   ;;  %v2018_v6 = vld [vmem:[%s2795_s1 + $0xe8] sm:$0xff]   ;;  %v2020_v8 = vld [vmem:[%s2795_s1 + $0xf0] sm:$0xff]  }
  0x18   :  { %1824 = vmatprep.mubr.msk.bf16.mxu0 %vm354_vm0, %v1965_v17  ;;  %v2017_v5 = vld [vmem:[%s2796_s0 + $0xe0] sm:$0xff]   ;;  %v2019_v7 = vld [vmem:[%s2796_s0 + $0xe8] sm:$0xff]   ;;  %v2021_v9 = vld [vmem:[%s2796_s0 + $0xf0] sm:$0xff]  }
  0x19   :  { %v2022_v10 = vld [vmem:[%s2795_s1 + $0xf8] sm:$0xff]   ;;  %v2471_v14 = vld [vmem:[%s2797_s4] ss:$0 sm:$0xff] }
  0x1a   :  { %v2023_v11 = vld [vmem:[%s2796_s0 + $0xf8] sm:$0xff]  }
  0x1e   :  { %1751 = vmatmul.mubr.msk.bf16.gmra.mrb[4].mxu1 %vm354_vm0, %v1966_v18 }
  0x1f   :  { %1825 = vmatmul.mubr.msk.bf16.gmra.mrb[4].mxu0 %vm354_vm0, %v1967_v19  ;;  %1754 = vmatprep.mubr.msk.bf16.mxu1 %vm354_vm0, %v1968_v20 }
  0x20   :  { %1828 = vmatprep.mubr.msk.bf16.mxu0 %vm354_vm0, %v1969_v21 }
  0x26   :  { %1755 = vmatmul.mubr.msk.bf16.gmra.mrb[8].mxu1 %vm354_vm0, %v1970_v22 }
  0x27   :  { %1829 = vmatmul.mubr.msk.bf16.gmra.mrb[8].mxu0 %vm354_vm0, %v1971_v23  ;;  %1758 = vmatprep.mubr.msk.bf16.mxu1 %vm354_vm0, %v1972_v24 }
  0x28   :  { %1832 = vmatprep.mubr.msk.bf16.mxu0 %vm354_vm0, %v1973_v25 }
  0x2e   :  { %1759 = vmatmul.mubr.msk.bf16.gmra.mrb[12].mxu1 %vm354_vm0, %v1974_v26 }
  0x2f   :  { %1833 = vmatmul.mubr.msk.bf16.gmra.mrb[12].mxu0 %vm354_vm0, %v1975_v27  ;;  %1762 = vmatprep.mubr.msk.bf16.mxu1 %vm354_vm0, %v1976_v28 }
  0x30   :  { %1836 = vmatprep.mubr.msk.bf16.mxu0 %vm354_vm0, %v1977_v29 }
  0x36   :  { %1763 = vmatmul.mubr.msk.bf16.gmra.mrb[16].mxu1 %vm354_vm0, %v1978_v30 }
  0x37   :  { %1837 = vmatmul.mubr.msk.bf16.gmra.mrb[16].mxu0 %vm354_vm0, %v1979_v31  ;;  %1766 = vmatprep.mubr.msk.bf16.mxu1 %vm354_vm0, %v1980_v32 }
  0x38   :  { %1840 = vmatprep.mubr.msk.bf16.mxu0 %vm354_vm0, %v1981_v33 }
  0x3e   :  { %1767 = vmatmul.mubr.msk.bf16.gmra.mrb[20].mxu1 %vm354_vm0, %v1982_v34 }
  0x3f   :  { %1841 = vmatmul.mubr.msk.bf16.gmra.mrb[20].mxu0 %vm354_vm0, %v1983_v35  ;;  %1770 = vmatprep.mubr.msk.bf16.mxu1 %vm354_vm0, %v1984_v36 }
  0x40   :  { %1844 = vmatprep.mubr.msk.bf16.mxu0 %vm354_vm0, %v1985_v37 }
  0x46   :  { %1771 = vmatmul.mubr.msk.bf16.gmra.mrb[24].mxu1 %vm354_vm0, %v1986_v38 }
  0x47   :  { %1845 = vmatmul.mubr.msk.bf16.gmra.mrb[24].mxu0 %vm354_vm0, %v1987_v39  ;;  %1774 = vmatprep.mubr.msk.bf16.mxu1 %vm354_vm0, %v1988_v40 }
  0x48   :  { %1848 = vmatprep.mubr.msk.bf16.mxu0 %vm354_vm0, %v1989_v41 }
  0x4e   :  { %1775 = vmatmul.mubr.msk.bf16.gmra.mrb[28].mxu1 %vm354_vm0, %v1990_v42 }
  0x4f   :  { %1849 = vmatmul.mubr.msk.bf16.gmra.mrb[28].mxu0 %vm354_vm0, %v1991_v43  ;;  %1778 = vmatprep.mubr.msk.bf16.mxu1 %vm354_vm0, %v1992_v44 }
  0x50   :  { %1852 = vmatprep.mubr.msk.bf16.mxu0 %vm354_vm0, %v1993_v45 }
  0x56   :  { %1779 = vmatmul.mubr.msk.bf16.gmra.mrb[32].mxu1 %vm354_vm0, %v1994_v46 }
  0x57   :  { %1853 = vmatmul.mubr.msk.bf16.gmra.mrb[32].mxu0 %vm354_vm0, %v1995_v47  ;;  %1782 = vmatprep.mubr.msk.bf16.mxu1 %vm354_vm0, %v1996_v48 }
  0x58   :  { %1856 = vmatprep.mubr.msk.bf16.mxu0 %vm354_vm0, %v1997_v49 }
  0x5e   :  { %1783 = vmatmul.mubr.msk.bf16.gmra.mrb[36].mxu1 %vm354_vm0, %v1998_v50 }
  0x5f   :  { %1857 = vmatmul.mubr.msk.bf16.gmra.mrb[36].mxu0 %vm354_vm0, %v1999_v51  ;;  %1786 = vmatprep.mubr.msk.bf16.mxu1 %vm354_vm0, %v2000_v52 }
  0x60   :  { %1860 = vmatprep.mubr.msk.bf16.mxu0 %vm354_vm0, %v2001_v53 }
  0x66   :  { %1787 = vmatmul.mubr.msk.bf16.gmra.mrb[40].mxu1 %vm354_vm0, %v2002_v54 }
  0x67   :  { %1861 = vmatmul.mubr.msk.bf16.gmra.mrb[40].mxu0 %vm354_vm0, %v2003_v55  ;;  %1790 = vmatprep.mubr.msk.bf16.mxu1 %vm354_vm0, %v2004_v56 }
  0x68   :  { %1864 = vmatprep.mubr.msk.bf16.mxu0 %vm354_vm0, %v2005_v57 }
  0x6e   :  { %1791 = vmatmul.mubr.msk.bf16.gmra.mrb[44].mxu1 %vm354_vm0, %v2006_v58 }
  0x6f   :  { %1865 = vmatmul.mubr.msk.bf16.gmra.mrb[44].mxu0 %vm354_vm0, %v2007_v59  ;;  %1794 = vmatprep.mubr.msk.bf16.mxu1 %vm354_vm0, %v2008_v60 }
  0x70   :  { %1868 = vmatprep.mubr.msk.bf16.mxu0 %vm354_vm0, %v2009_v61 }
  0x76   :  { %1795 = vmatmul.mubr.msk.bf16.gmra.mrb[48].mxu1 %vm354_vm0, %v2010_v62 }
  0x77   :  { %1869 = vmatmul.mubr.msk.bf16.gmra.mrb[48].mxu0 %vm354_vm0, %v2011_v63  ;;  %1798 = vmatprep.mubr.msk.bf16.mxu1 %vm354_vm0, %v2012_v0 }
  0x78   :  { %1872 = vmatprep.mubr.msk.bf16.mxu0 %vm354_vm0, %v2013_v1 }
  0x7e   :  { %1799 = vmatmul.mubr.msk.bf16.gmra.mrb[52].mxu1 %vm354_vm0, %v2014_v2 }
  0x7f   :  { %1873 = vmatmul.mubr.msk.bf16.gmra.mrb[52].mxu0 %vm354_vm0, %v2015_v3  ;;  %1802 = vmatprep.mubr.msk.bf16.mxu1 %vm354_vm0, %v2016_v4 }
  0x80   :  { %1876 = vmatprep.mubr.msk.bf16.mxu0 %vm354_vm0, %v2017_v5 }
  0x86   :  { %1803 = vmatmul.mubr.msk.bf16.gmra.mrb[56].mxu1 %vm354_vm0, %v2018_v6 }
  0x87   :  { %1877 = vmatmul.mubr.msk.bf16.gmra.mrb[56].mxu0 %vm354_vm0, %v2019_v7  ;;  %1806 = vmatprep.mubr.msk.bf16.mxu1 %vm354_vm0, %v2020_v8 }
  0x88   :  { %1880 = vmatprep.mubr.msk.bf16.mxu0 %vm354_vm0, %v2021_v9 }
  0x8e   :  { %1807 = vmatmul.mubr.msk.bf16.gmra.mrb[60].mxu1 %vm354_vm0, %v2022_v10 }
  0x8f   :  { %1881 = vmatmul.mubr.msk.bf16.gmra.mrb[60].mxu0 %vm354_vm0, %v2023_v11 }
  0xe9   :  { %v1748_v12 = vpop.f32.mrb[0].mxu1 }
  0xea   :  { %v1822_v13 = vpop.f32.mrb[0].mxu0  ;;  %v489_v15 = vpop.f32.mrb[1].mxu1 }
  0xeb   :  { %v1073_v16 = vadd.f32 %v1822_v13, %v1748_v12  ;;  %v1064_v17 = vpop.f32.mrb[1].mxu0  ;;  %v1749_v18 = vpop.f32.mrb[2].mxu1 }
  0xec   :  { %v1065_v19 = vadd.f32 %v1064_v17, %v489_v15  ;;  %v1823_v20 = vpop.f32.mrb[2].mxu0  ;;  %v492_v21 = vpop.f32.mrb[3].mxu1 }
  0xed   :  { %v1328_v22 = vadd.f32 %v2471_v14, %v1073_v16  ;;  %v1076_v23 = vadd.f32 %v1823_v20, %v1749_v18  ;;  %v1067_v24 = vpop.f32.mrb[3].mxu0 }
  0xee   :  { %v1326_v25 = vadd.f32 %v2471_v14, %v1065_v19  ;;  %v1068_v26 = vadd.f32 %v1067_v24, %v492_v21 }
  0xef   :  { %2024 = vtanh.f32 %v1328_v22  ;;  %v1329_v27 = vadd.f32 %v2471_v14, %v1076_v23 }
  0xf0   :  { %2026 = vtanh.f32 %v1326_v25  ;;  %v1327_v28 = vadd.f32 %v2471_v14, %v1068_v26 }
  0xf1   :  { %2028 = vtanh.f32 %v1329_v27  ;;  %v1752_v29 = vpop.f32.mrb[4].mxu1 }
  0xf2   :  { %2030 = vtanh.f32 %v1327_v28  ;;  %v1826_v30 = vpop.f32.mrb[4].mxu0  ;;  %v505_v31 = vpop.f32.mrb[5].mxu1 }
  0xf3   :  { %v1089_v32 = vadd.f32 %v1826_v30, %v1752_v29  ;;  %v1080_v33 = vpop.f32.mrb[5].mxu0  ;;  %v1753_v34 = vpop.f32.mrb[6].mxu1 }
  0xf4   :  { %v1081_v35 = vadd.f32 %v1080_v33, %v505_v31  ;;  %v1827_v36 = vpop.f32.mrb[6].mxu0  ;;  %v508_v37 = vpop.f32.mrb[7].mxu1 }
  0xf5   :  { %v1332_v38 = vadd.f32 %v2471_v14, %v1089_v32  ;;  %v1092_v39 = vadd.f32 %v1827_v36, %v1753_v34  ;;  %v1083_v40 = vpop.f32.mrb[7].mxu0 }
  0xf6   :  { %v1330_v41 = vadd.f32 %v2471_v14, %v1081_v35  ;;  %v1084_v42 = vadd.f32 %v1083_v40, %v508_v37 }
  0xf7   :  { %2032 = vtanh.f32 %v1332_v38  ;;  %v1333_v43 = vadd.f32 %v2471_v14, %v1092_v39 }
  0xf8   :  { %2034 = vtanh.f32 %v1330_v41  ;;  %v1331_v44 = vadd.f32 %v2471_v14, %v1084_v42 }
  0xf9   :  { %v2025_v45 = vpop.eup %2024  ;;  %2036 = vtanh.f32 %v1333_v43  ;;  %v1756_v46 = vpop.f32.mrb[8].mxu1 }
  0xfa   :  { %v2027_v47 = vpop.eup %2026  ;;  %1457 = vst.msk [vmem:[%s2798_s5 + $0x10] sm:$0xff] %vm1454_vm2, %v2025_v45  ;;  %2038 = vtanh.f32 %v1331_v44  ;;  %v1830_v48 = vpop.f32.mrb[8].mxu0 }
  0xfb   :  { %v521_v49 = vpop.f32.mrb[9].mxu1  ;;  %v2029_v50 = vpop.eup %2028  ;;  %1455 = vst.msk [vmem:[%s2798_s5] sm:$0xff] %vm1454_vm2, %v2027_v47  ;;  %v1105_v51 = vadd.f32 %v1830_v48, %v1756_v46 }
  0xfc   :  { %v1096_v52 = vpop.f32.mrb[9].mxu0  ;;  %v1757_v53 = vpop.f32.mrb[10].mxu1  ;;  %1458 = vst.msk [vmem:[%s2798_s5 + $0x18] sm:$0xff] %vm1454_vm2, %v2029_v50 }
  0xfd   :  { %v2031_v54 = vpop.eup %2030  ;;  %v1097_v55 = vadd.f32 %v1096_v52, %v521_v49  ;;  %v1831_v56 = vpop.f32.mrb[10].mxu0  ;;  %v1336_v58 = vadd.f32 %v2471_v14, %v1105_v51 }
  0xfe   :  { %v524_v57 = vpop.f32.mrb[11].mxu1  ;;  %1456 = vst.msk [vmem:[%s2798_s5 + $0x8] sm:$0xff] %vm1454_vm2, %v2031_v54  ;;  %v1108_v59 = vadd.f32 %v1831_v56, %v1757_v53  ;;  %v1099_v60 = vpop.f32.mrb[11].mxu0 }
  0xff   :  { %v1334_v61 = vadd.f32 %v2471_v14, %v1097_v55  ;;  %v1100_v62 = vadd.f32 %v1099_v60, %v524_v57  ;;  %2040 = vtanh.f32 %v1336_v58 }
 0x100   :  { %v1337_v63 = vadd.f32 %v2471_v14, %v1108_v59 }
 0x101   :  { %2042 = vtanh.f32 %v1334_v61  ;;  %v1335_v0 = vadd.f32 %v2471_v14, %v1100_v62  ;;  %v2033_v1 = vpop.eup %2032  ;;  %v1760_v2 = vpop.f32.mrb[12].mxu1 }
 0x102   :  { %2044 = vtanh.f32 %v1337_v63  ;;  %v2035_v3 = vpop.eup %2034  ;;  %1461 = vst.msk [vmem:[%s2798_s5 + $0x30] sm:$0xff] %vm1454_vm2, %v2033_v1  ;;  %v1834_v4 = vpop.f32.mrb[12].mxu0 }
 0x103   :  { %2046 = vtanh.f32 %v1335_v0  ;;  %v537_v5 = vpop.f32.mrb[13].mxu1  ;;  %v2037_v6 = vpop.eup %2036  ;;  %1459 = vst.msk [vmem:[%s2798_s5 + $0x20] sm:$0xff] %vm1454_vm2, %v2035_v3  ;;  %v1121_v7 = vadd.f32 %v1834_v4, %v1760_v2 }
 0x104   :  { %v1112_v8 = vpop.f32.mrb[13].mxu0  ;;  %v1761_v9 = vpop.f32.mrb[14].mxu1  ;;  %1462 = vst.msk [vmem:[%s2798_s5 + $0x38] sm:$0xff] %vm1454_vm2, %v2037_v6 }
 0x105   :  { %v2039_v10 = vpop.eup %2038  ;;  %v1113_v11 = vadd.f32 %v1112_v8, %v537_v5  ;;  %v1835_v12 = vpop.f32.mrb[14].mxu0  ;;  %v1340_v15 = vadd.f32 %v2471_v14, %v1121_v7 }
 0x106   :  { %v540_v13 = vpop.f32.mrb[15].mxu1  ;;  %1460 = vst.msk [vmem:[%s2798_s5 + $0x28] sm:$0xff] %vm1454_vm2, %v2039_v10  ;;  %v1124_v16 = vadd.f32 %v1835_v12, %v1761_v9  ;;  %v1115_v17 = vpop.f32.mrb[15].mxu0 }
 0x107   :  { %v1338_v18 = vadd.f32 %v2471_v14, %v1113_v11  ;;  %v1116_v19 = vadd.f32 %v1115_v17, %v540_v13  ;;  %2048 = vtanh.f32 %v1340_v15 }
 0x108   :  { %v1341_v20 = vadd.f32 %v2471_v14, %v1124_v16 }
 0x109   :  { %2050 = vtanh.f32 %v1338_v18  ;;  %v1339_v21 = vadd.f32 %v2471_v14, %v1116_v19  ;;  %v2041_v22 = vpop.eup %2040  ;;  %v1764_v23 = vpop.f32.mrb[16].mxu1 }
 0x10a   :  { %2052 = vtanh.f32 %v1341_v20  ;;  %1465 = vst.msk [vmem:[%s2798_s5 + $0x50] sm:$0xff] %vm1454_vm2, %v2041_v22  ;;  %v1838_v25 = vpop.f32.mrb[16].mxu0  ;;  %v553_v26 = vpop.f32.mrb[17].mxu1 }
 0x10b   :  { %v2043_v24 = vpop.eup %2042  ;;  %2054 = vtanh.f32 %v1339_v21  ;;  %v1137_v28 = vadd.f32 %v1838_v25, %v1764_v23  ;;  %v1128_v29 = vpop.f32.mrb[17].mxu0 }
 0x10c   :  { %v2045_v27 = vpop.eup %2044  ;;  %1463 = vst.msk [vmem:[%s2798_s5 + $0x40] sm:$0xff] %vm1454_vm2, %v2043_v24  ;;  %v1765_v30 = vpop.f32.mrb[18].mxu1  ;;  %v1129_v32 = vadd.f32 %v1128_v29, %v553_v26 }
 0x10d   :  { %v2047_v31 = vpop.eup %2046  ;;  %1466 = vst.msk [vmem:[%s2798_s5 + $0x58] sm:$0xff] %vm1454_vm2, %v2045_v27  ;;  %v1839_v33 = vpop.f32.mrb[18].mxu0  ;;  %v1344_v35 = vadd.f32 %v2471_v14, %v1137_v28 }
 0x10e   :  { %v556_v34 = vpop.f32.mrb[19].mxu1  ;;  %1464 = vst.msk [vmem:[%s2798_s5 + $0x48] sm:$0xff] %vm1454_vm2, %v2047_v31  ;;  %v1140_v36 = vadd.f32 %v1839_v33, %v1765_v30  ;;  %v1131_v37 = vpop.f32.mrb[19].mxu0  ;;  %v1342_v38 = vadd.f32 %v2471_v14, %v1129_v32 }
 0x10f   :  { %v1132_v39 = vadd.f32 %v1131_v37, %v556_v34  ;;  %2056 = vtanh.f32 %v1344_v35 }
 0x110   :  { %v1345_v40 = vadd.f32 %v2471_v14, %v1140_v36  ;;  %2058 = vtanh.f32 %v1342_v38 }
 0x111   :  { %v1343_v41 = vadd.f32 %v2471_v14, %v1132_v39  ;;  %v2049_v42 = vpop.eup %2048  ;;  %v1768_v43 = vpop.f32.mrb[20].mxu1 }
 0x112   :  { %2060 = vtanh.f32 %v1345_v40  ;;  %1469 = vst.msk [vmem:[%s2798_s5 + $0x70] sm:$0xff] %vm1454_vm2, %v2049_v42  ;;  %v1842_v45 = vpop.f32.mrb[20].mxu0  ;;  %v569_v46 = vpop.f32.mrb[21].mxu1 }
 0x113   :  { %v2051_v44 = vpop.eup %2050  ;;  %2062 = vtanh.f32 %v1343_v41  ;;  %v1153_v48 = vadd.f32 %v1842_v45, %v1768_v43  ;;  %v1144_v49 = vpop.f32.mrb[21].mxu0 }
 0x114   :  { %v2053_v47 = vpop.eup %2052  ;;  %1467 = vst.msk [vmem:[%s2798_s5 + $0x60] sm:$0xff] %vm1454_vm2, %v2051_v44  ;;  %v1769_v50 = vpop.f32.mrb[22].mxu1  ;;  %v1145_v52 = vadd.f32 %v1144_v49, %v569_v46 }
 0x115   :  { %v2055_v51 = vpop.eup %2054  ;;  %1470 = vst.msk [vmem:[%s2798_s5 + $0x78] sm:$0xff] %vm1454_vm2, %v2053_v47  ;;  %v1843_v53 = vpop.f32.mrb[22].mxu0  ;;  %v1348_v55 = vadd.f32 %v2471_v14, %v1153_v48 }
 0x116   :  { %v572_v54 = vpop.f32.mrb[23].mxu1  ;;  %1468 = vst.msk [vmem:[%s2798_s5 + $0x68] sm:$0xff] %vm1454_vm2, %v2055_v51  ;;  %v1156_v56 = vadd.f32 %v1843_v53, %v1769_v50  ;;  %v1147_v57 = vpop.f32.mrb[23].mxu0  ;;  %v1346_v58 = vadd.f32 %v2471_v14, %v1145_v52 }
 0x117   :  { %v1148_v59 = vadd.f32 %v1147_v57, %v572_v54  ;;  %2064 = vtanh.f32 %v1348_v55 }
 0x118   :  { %v1349_v60 = vadd.f32 %v2471_v14, %v1156_v56  ;;  %2066 = vtanh.f32 %v1346_v58 }
 0x119   :  { %v1347_v61 = vadd.f32 %v2471_v14, %v1148_v59  ;;  %v2057_v62 = vpop.eup %2056  ;;  %v1772_v63 = vpop.f32.mrb[24].mxu1 }
 0x11a   :  { %2068 = vtanh.f32 %v1349_v60  ;;  %v2059_v0 = vpop.eup %2058  ;;  %1473 = vst.msk [vmem:[%s2798_s5 + $0x90] sm:$0xff] %vm1454_vm2, %v2057_v62  ;;  %v1846_v1 = vpop.f32.mrb[24].mxu0 }
 0x11b   :  { %2070 = vtanh.f32 %v1347_v61  ;;  %v585_v2 = vpop.f32.mrb[25].mxu1  ;;  %1471 = vst.msk [vmem:[%s2798_s5 + $0x80] sm:$0xff] %vm1454_vm2, %v2059_v0  ;;  %v1169_v4 = vadd.f32 %v1846_v1, %v1772_v63  ;;  %v1160_v5 = vpop.f32.mrb[25].mxu0 }
 0x11c   :  { %v2061_v3 = vpop.eup %2060  ;;  %v1773_v6 = vpop.f32.mrb[26].mxu1  ;;  %v1161_v8 = vadd.f32 %v1160_v5, %v585_v2 }
 0x11d   :  { %v2063_v7 = vpop.eup %2062  ;;  %1474 = vst.msk [vmem:[%s2798_s5 + $0x98] sm:$0xff] %vm1454_vm2, %v2061_v3  ;;  %v1847_v9 = vpop.f32.mrb[26].mxu0  ;;  %v1352_v11 = vadd.f32 %v2471_v14, %v1169_v4 }
 0x11e   :  { %v588_v10 = vpop.f32.mrb[27].mxu1  ;;  %1472 = vst.msk [vmem:[%s2798_s5 + $0x88] sm:$0xff] %vm1454_vm2, %v2063_v7  ;;  %v1172_v12 = vadd.f32 %v1847_v9, %v1773_v6  ;;  %v1163_v13 = vpop.f32.mrb[27].mxu0  ;;  %v1350_v15 = vadd.f32 %v2471_v14, %v1161_v8 }
 0x11f   :  { %v1164_v16 = vadd.f32 %v1163_v13, %v588_v10  ;;  %2072 = vtanh.f32 %v1352_v11 }
 0x120   :  { %v1353_v17 = vadd.f32 %v2471_v14, %v1172_v12  ;;  %2074 = vtanh.f32 %v1350_v15 }
 0x121   :  { %v1351_v18 = vadd.f32 %v2471_v14, %v1164_v16  ;;  %v2065_v19 = vpop.eup %2064  ;;  %v1776_v20 = vpop.f32.mrb[28].mxu1 }
 0x122   :  { %2076 = vtanh.f32 %v1353_v17  ;;  %v2067_v21 = vpop.eup %2066  ;;  %1477 = vst.msk [vmem:[%s2798_s5 + $0xb0] sm:$0xff] %vm1454_vm2, %v2065_v19  ;;  %v1850_v22 = vpop.f32.mrb[28].mxu0 }
 0x123   :  { %2078 = vtanh.f32 %v1351_v18  ;;  %v601_v23 = vpop.f32.mrb[29].mxu1  ;;  %1475 = vst.msk [vmem:[%s2798_s5 + $0xa0] sm:$0xff] %vm1454_vm2, %v2067_v21  ;;  %v1185_v25 = vadd.f32 %v1850_v22, %v1776_v20  ;;  %v1176_v26 = vpop.f32.mrb[29].mxu0 }
 0x124   :  { %v2069_v24 = vpop.eup %2068  ;;  %v1777_v27 = vpop.f32.mrb[30].mxu1  ;;  %v1177_v29 = vadd.f32 %v1176_v26, %v601_v23 }
 0x125   :  { %v2071_v28 = vpop.eup %2070  ;;  %1478 = vst.msk [vmem:[%s2798_s5 + $0xb8] sm:$0xff] %vm1454_vm2, %v2069_v24  ;;  %v1851_v30 = vpop.f32.mrb[30].mxu0  ;;  %v1356_v32 = vadd.f32 %v2471_v14, %v1185_v25 }
 0x126   :  { %v604_v31 = vpop.f32.mrb[31].mxu1  ;;  %1476 = vst.msk [vmem:[%s2798_s5 + $0xa8] sm:$0xff] %vm1454_vm2, %v2071_v28  ;;  %v1188_v33 = vadd.f32 %v1851_v30, %v1777_v27  ;;  %v1179_v34 = vpop.f32.mrb[31].mxu0  ;;  %v1354_v35 = vadd.f32 %v2471_v14, %v1177_v29 }
 0x127   :  { %v1180_v36 = vadd.f32 %v1179_v34, %v604_v31  ;;  %2080 = vtanh.f32 %v1356_v32 }
 0x128   :  { %v1357_v37 = vadd.f32 %v2471_v14, %v1188_v33  ;;  %2082 = vtanh.f32 %v1354_v35 }
 0x129   :  { %v1355_v38 = vadd.f32 %v2471_v14, %v1180_v36  ;;  %v2073_v39 = vpop.eup %2072  ;;  %v1780_v40 = vpop.f32.mrb[32].mxu1 }
 0x12a   :  { %2084 = vtanh.f32 %v1357_v37  ;;  %v2075_v41 = vpop.eup %2074  ;;  %1481 = vst.msk [vmem:[%s2798_s5 + $0xd0] sm:$0xff] %vm1454_vm2, %v2073_v39  ;;  %v1854_v42 = vpop.f32.mrb[32].mxu0 }
 0x12b   :  { %2086 = vtanh.f32 %v1355_v38  ;;  %v617_v43 = vpop.f32.mrb[33].mxu1  ;;  %1479 = vst.msk [vmem:[%s2798_s5 + $0xc0] sm:$0xff] %vm1454_vm2, %v2075_v41  ;;  %v1201_v45 = vadd.f32 %v1854_v42, %v1780_v40  ;;  %v1192_v46 = vpop.f32.mrb[33].mxu0 }
 0x12c   :  { %v2077_v44 = vpop.eup %2076  ;;  %v1781_v47 = vpop.f32.mrb[34].mxu1  ;;  %v1193_v49 = vadd.f32 %v1192_v46, %v617_v43 }
 0x12d   :  { %v2079_v48 = vpop.eup %2078  ;;  %1482 = vst.msk [vmem:[%s2798_s5 + $0xd8] sm:$0xff] %vm1454_vm2, %v2077_v44  ;;  %v1855_v50 = vpop.f32.mrb[34].mxu0  ;;  %v1360_v52 = vadd.f32 %v2471_v14, %v1201_v45 }
 0x12e   :  { %v620_v51 = vpop.f32.mrb[35].mxu1  ;;  %1480 = vst.msk [vmem:[%s2798_s5 + $0xc8] sm:$0xff] %vm1454_vm2, %v2079_v48  ;;  %v1204_v53 = vadd.f32 %v1855_v50, %v1781_v47  ;;  %v1195_v54 = vpop.f32.mrb[35].mxu0  ;;  %v1358_v55 = vadd.f32 %v2471_v14, %v1193_v49 }
 0x12f   :  { %v1196_v56 = vadd.f32 %v1195_v54, %v620_v51  ;;  %2088 = vtanh.f32 %v1360_v52 }
 0x130   :  { %v1361_v57 = vadd.f32 %v2471_v14, %v1204_v53  ;;  %2090 = vtanh.f32 %v1358_v55 }
 0x131   :  { %v1359_v58 = vadd.f32 %v2471_v14, %v1196_v56  ;;  %v2081_v59 = vpop.eup %2080  ;;  %v1784_v60 = vpop.f32.mrb[36].mxu1 }
 0x132   :  { %2092 = vtanh.f32 %v1361_v57  ;;  %v2083_v61 = vpop.eup %2082  ;;  %1485 = vst.msk [vmem:[%s2798_s5 + $0xf0] sm:$0xff] %vm1454_vm2, %v2081_v59  ;;  %v1858_v62 = vpop.f32.mrb[36].mxu0 }
 0x133   :  { %2094 = vtanh.f32 %v1359_v58  ;;  %v633_v63 = vpop.f32.mrb[37].mxu1  ;;  %1483 = vst.msk [vmem:[%s2798_s5 + $0xe0] sm:$0xff] %vm1454_vm2, %v2083_v61  ;;  %v1217_v1 = vadd.f32 %v1858_v62, %v1784_v60  ;;  %v1208_v2 = vpop.f32.mrb[37].mxu0 }
 0x134   :  { %v2085_v0 = vpop.eup %2084  ;;  %v1785_v3 = vpop.f32.mrb[38].mxu1  ;;  %v1209_v5 = vadd.f32 %v1208_v2, %v633_v63 }
 0x135   :  { %v2087_v4 = vpop.eup %2086  ;;  %1486 = vst.msk [vmem:[%s2798_s5 + $0xf8] sm:$0xff] %vm1454_vm2, %v2085_v0  ;;  %v1859_v6 = vpop.f32.mrb[38].mxu0  ;;  %v1364_v8 = vadd.f32 %v2471_v14, %v1217_v1 }
 0x136   :  { %v636_v7 = vpop.f32.mrb[39].mxu1  ;;  %1484 = vst.msk [vmem:[%s2798_s5 + $0xe8] sm:$0xff] %vm1454_vm2, %v2087_v4  ;;  %v1220_v9 = vadd.f32 %v1859_v6, %v1785_v3  ;;  %v1211_v10 = vpop.f32.mrb[39].mxu0  ;;  %v1362_v11 = vadd.f32 %v2471_v14, %v1209_v5 }
 0x137   :  { %v1212_v12 = vadd.f32 %v1211_v10, %v636_v7  ;;  %2096 = vtanh.f32 %v1364_v8 }
 0x138   :  { %v1365_v13 = vadd.f32 %v2471_v14, %v1220_v9  ;;  %2098 = vtanh.f32 %v1362_v11 }
 0x139   :  { %v1363_v15 = vadd.f32 %v2471_v14, %v1212_v12  ;;  %v2089_v16 = vpop.eup %2088  ;;  %v1788_v17 = vpop.f32.mrb[40].mxu1 }
 0x13a   :  { %2100 = vtanh.f32 %v1365_v13  ;;  %v2091_v18 = vpop.eup %2090  ;;  %1489 = vst.msk [vmem:[%s2798_s5 + $0x110] sm:$0xff] %vm1454_vm2, %v2089_v16  ;;  %v1862_v19 = vpop.f32.mrb[40].mxu0 }
 0x13b   :  { %2102 = vtanh.f32 %v1363_v15  ;;  %v649_v20 = vpop.f32.mrb[41].mxu1  ;;  %1487 = vst.msk [vmem:[%s2798_s5 + $0x100] sm:$0xff] %vm1454_vm2, %v2091_v18  ;;  %v1233_v22 = vadd.f32 %v1862_v19, %v1788_v17  ;;  %v1224_v23 = vpop.f32.mrb[41].mxu0 }
 0x13c   :  { %v2093_v21 = vpop.eup %2092  ;;  %v1789_v24 = vpop.f32.mrb[42].mxu1  ;;  %v1225_v26 = vadd.f32 %v1224_v23, %v649_v20 }
 0x13d   :  { %v2095_v25 = vpop.eup %2094  ;;  %1490 = vst.msk [vmem:[%s2798_s5 + $0x118] sm:$0xff] %vm1454_vm2, %v2093_v21  ;;  %v1863_v27 = vpop.f32.mrb[42].mxu0  ;;  %v1368_v29 = vadd.f32 %v2471_v14, %v1233_v22 }
 0x13e   :  { %v652_v28 = vpop.f32.mrb[43].mxu1  ;;  %1488 = vst.msk [vmem:[%s2798_s5 + $0x108] sm:$0xff] %vm1454_vm2, %v2095_v25  ;;  %v1236_v30 = vadd.f32 %v1863_v27, %v1789_v24  ;;  %v1227_v31 = vpop.f32.mrb[43].mxu0  ;;  %v1366_v32 = vadd.f32 %v2471_v14, %v1225_v26 }
 0x13f   :  { %v1228_v33 = vadd.f32 %v1227_v31, %v652_v28  ;;  %2104 = vtanh.f32 %v1368_v29 }
 0x140   :  { %v1369_v34 = vadd.f32 %v2471_v14, %v1236_v30  ;;  %2106 = vtanh.f32 %v1366_v32 }
 0x141   :  { %v1367_v35 = vadd.f32 %v2471_v14, %v1228_v33  ;;  %v2097_v36 = vpop.eup %2096  ;;  %v1792_v37 = vpop.f32.mrb[44].mxu1 }
 0x142   :  { %2108 = vtanh.f32 %v1369_v34  ;;  %v2099_v38 = vpop.eup %2098  ;;  %1493 = vst.msk [vmem:[%s2798_s5 + $0x130] sm:$0xff] %vm1454_vm2, %v2097_v36  ;;  %v1866_v39 = vpop.f32.mrb[44].mxu0 }
 0x143   :  { %2110 = vtanh.f32 %v1367_v35  ;;  %v665_v40 = vpop.f32.mrb[45].mxu1  ;;  %1491 = vst.msk [vmem:[%s2798_s5 + $0x120] sm:$0xff] %vm1454_vm2, %v2099_v38  ;;  %v1249_v42 = vadd.f32 %v1866_v39, %v1792_v37  ;;  %v1240_v43 = vpop.f32.mrb[45].mxu0 }
 0x144   :  { %v2101_v41 = vpop.eup %2100  ;;  %v1793_v44 = vpop.f32.mrb[46].mxu1  ;;  %v1241_v46 = vadd.f32 %v1240_v43, %v665_v40 }
 0x145   :  { %v2103_v45 = vpop.eup %2102  ;;  %1494 = vst.msk [vmem:[%s2798_s5 + $0x138] sm:$0xff] %vm1454_vm2, %v2101_v41  ;;  %v1867_v47 = vpop.f32.mrb[46].mxu0  ;;  %v1372_v49 = vadd.f32 %v2471_v14, %v1249_v42 }
 0x146   :  { %v668_v48 = vpop.f32.mrb[47].mxu1  ;;  %1492 = vst.msk [vmem:[%s2798_s5 + $0x128] sm:$0xff] %vm1454_vm2, %v2103_v45  ;;  %v1252_v50 = vadd.f32 %v1867_v47, %v1793_v44  ;;  %v1243_v51 = vpop.f32.mrb[47].mxu0  ;;  %v1370_v52 = vadd.f32 %v2471_v14, %v1241_v46 }
 0x147   :  { %v1244_v53 = vadd.f32 %v1243_v51, %v668_v48  ;;  %2112 = vtanh.f32 %v1372_v49 }
 0x148   :  { %v1373_v54 = vadd.f32 %v2471_v14, %v1252_v50  ;;  %2114 = vtanh.f32 %v1370_v52 }
 0x149   :  { %v1371_v55 = vadd.f32 %v2471_v14, %v1244_v53  ;;  %v2105_v56 = vpop.eup %2104  ;;  %v1796_v57 = vpop.f32.mrb[48].mxu1 }
 0x14a   :  { %2116 = vtanh.f32 %v1373_v54  ;;  %v2107_v58 = vpop.eup %2106  ;;  %1497 = vst.msk [vmem:[%s2798_s5 + $0x150] sm:$0xff] %vm1454_vm2, %v2105_v56  ;;  %v1870_v59 = vpop.f32.mrb[48].mxu0 }
 0x14b   :  { %2118 = vtanh.f32 %v1371_v55  ;;  %v681_v60 = vpop.f32.mrb[49].mxu1  ;;  %1495 = vst.msk [vmem:[%s2798_s5 + $0x140] sm:$0xff] %vm1454_vm2, %v2107_v58  ;;  %v1265_v62 = vadd.f32 %v1870_v59, %v1796_v57  ;;  %v1256_v63 = vpop.f32.mrb[49].mxu0 }
 0x14c   :  { %v2109_v61 = vpop.eup %2108  ;;  %v1797_v0 = vpop.f32.mrb[50].mxu1  ;;  %v1257_v2 = vadd.f32 %v1256_v63, %v681_v60 }
 0x14d   :  { %v2111_v1 = vpop.eup %2110  ;;  %1498 = vst.msk [vmem:[%s2798_s5 + $0x158] sm:$0xff] %vm1454_vm2, %v2109_v61  ;;  %v1871_v3 = vpop.f32.mrb[50].mxu0  ;;  %v1376_v5 = vadd.f32 %v2471_v14, %v1265_v62 }
 0x14e   :  { %v684_v4 = vpop.f32.mrb[51].mxu1  ;;  %1496 = vst.msk [vmem:[%s2798_s5 + $0x148] sm:$0xff] %vm1454_vm2, %v2111_v1  ;;  %v1268_v6 = vadd.f32 %v1871_v3, %v1797_v0  ;;  %v1259_v7 = vpop.f32.mrb[51].mxu0  ;;  %v1374_v8 = vadd.f32 %v2471_v14, %v1257_v2 }
 0x14f   :  { %v1260_v9 = vadd.f32 %v1259_v7, %v684_v4  ;;  %2120 = vtanh.f32 %v1376_v5 }
 0x150   :  { %v1377_v10 = vadd.f32 %v2471_v14, %v1268_v6  ;;  %2122 = vtanh.f32 %v1374_v8 }
 0x151   :  { %v1375_v11 = vadd.f32 %v2471_v14, %v1260_v9  ;;  %v2113_v12 = vpop.eup %2112  ;;  %v1800_v13 = vpop.f32.mrb[52].mxu1 }
 0x152   :  { %2124 = vtanh.f32 %v1377_v10  ;;  %v2115_v15 = vpop.eup %2114  ;;  %1501 = vst.msk [vmem:[%s2798_s5 + $0x170] sm:$0xff] %vm1454_vm2, %v2113_v12  ;;  %v1874_v16 = vpop.f32.mrb[52].mxu0 }
 0x153   :  { %2126 = vtanh.f32 %v1375_v11  ;;  %v697_v17 = vpop.f32.mrb[53].mxu1  ;;  %1499 = vst.msk [vmem:[%s2798_s5 + $0x160] sm:$0xff] %vm1454_vm2, %v2115_v15  ;;  %v1281_v19 = vadd.f32 %v1874_v16, %v1800_v13  ;;  %v1272_v20 = vpop.f32.mrb[53].mxu0 }
 0x154   :  { %v2117_v18 = vpop.eup %2116  ;;  %v1801_v21 = vpop.f32.mrb[54].mxu1  ;;  %v1273_v23 = vadd.f32 %v1272_v20, %v697_v17 }
 0x155   :  { %v2119_v22 = vpop.eup %2118  ;;  %1502 = vst.msk [vmem:[%s2798_s5 + $0x178] sm:$0xff] %vm1454_vm2, %v2117_v18  ;;  %v1875_v24 = vpop.f32.mrb[54].mxu0  ;;  %v1380_v26 = vadd.f32 %v2471_v14, %v1281_v19 }
 0x156   :  { %v700_v25 = vpop.f32.mrb[55].mxu1  ;;  %1500 = vst.msk [vmem:[%s2798_s5 + $0x168] sm:$0xff] %vm1454_vm2, %v2119_v22  ;;  %v1284_v27 = vadd.f32 %v1875_v24, %v1801_v21  ;;  %v1275_v28 = vpop.f32.mrb[55].mxu0  ;;  %v1378_v29 = vadd.f32 %v2471_v14, %v1273_v23 }
 0x157   :  { %v1276_v30 = vadd.f32 %v1275_v28, %v700_v25  ;;  %2128 = vtanh.f32 %v1380_v26 }
 0x158   :  { %v1381_v31 = vadd.f32 %v2471_v14, %v1284_v27  ;;  %2130 = vtanh.f32 %v1378_v29 }
 0x159   :  { %v1379_v32 = vadd.f32 %v2471_v14, %v1276_v30  ;;  %v2121_v33 = vpop.eup %2120  ;;  %v1804_v34 = vpop.f32.mrb[56].mxu1 }
 0x15a   :  { %2132 = vtanh.f32 %v1381_v31  ;;  %v2123_v35 = vpop.eup %2122  ;;  %1505 = vst.msk [vmem:[%s2798_s5 + $0x190] sm:$0xff] %vm1454_vm2, %v2121_v33  ;;  %v1878_v36 = vpop.f32.mrb[56].mxu0 }
 0x15b   :  { %2134 = vtanh.f32 %v1379_v32  ;;  %v713_v37 = vpop.f32.mrb[57].mxu1  ;;  %1503 = vst.msk [vmem:[%s2798_s5 + $0x180] sm:$0xff] %vm1454_vm2, %v2123_v35  ;;  %v1297_v39 = vadd.f32 %v1878_v36, %v1804_v34  ;;  %v1288_v40 = vpop.f32.mrb[57].mxu0 }
 0x15c   :  { %v2125_v38 = vpop.eup %2124  ;;  %v1805_v41 = vpop.f32.mrb[58].mxu1  ;;  %v1289_v43 = vadd.f32 %v1288_v40, %v713_v37 }
 0x15d   :  { %v2127_v42 = vpop.eup %2126  ;;  %1506 = vst.msk [vmem:[%s2798_s5 + $0x198] sm:$0xff] %vm1454_vm2, %v2125_v38  ;;  %v1879_v44 = vpop.f32.mrb[58].mxu0  ;;  %v1384_v46 = vadd.f32 %v2471_v14, %v1297_v39 }
 0x15e   :  { %v716_v45 = vpop.f32.mrb[59].mxu1  ;;  %1504 = vst.msk [vmem:[%s2798_s5 + $0x188] sm:$0xff] %vm1454_vm2, %v2127_v42  ;;  %v1300_v47 = vadd.f32 %v1879_v44, %v1805_v41  ;;  %v1291_v48 = vpop.f32.mrb[59].mxu0  ;;  %v1382_v49 = vadd.f32 %v2471_v14, %v1289_v43 }
 0x15f   :  { %v1292_v50 = vadd.f32 %v1291_v48, %v716_v45  ;;  %2136 = vtanh.f32 %v1384_v46 }
 0x160   :  { %v1385_v51 = vadd.f32 %v2471_v14, %v1300_v47  ;;  %2138 = vtanh.f32 %v1382_v49 }
 0x161   :  { %v1383_v52 = vadd.f32 %v2471_v14, %v1292_v50  ;;  %v2129_v53 = vpop.eup %2128  ;;  %v1808_v54 = vpop.f32.mrb[60].mxu1 }
 0x162   :  { %2140 = vtanh.f32 %v1385_v51  ;;  %v2131_v55 = vpop.eup %2130  ;;  %1509 = vst.msk [vmem:[%s2798_s5 + $0x1b0] sm:$0xff] %vm1454_vm2, %v2129_v53  ;;  %v1882_v56 = vpop.f32.mrb[60].mxu0 }
 0x163   :  { %2142 = vtanh.f32 %v1383_v52  ;;  %v729_v57 = vpop.f32.mrb[61].mxu1  ;;  %1507 = vst.msk [vmem:[%s2798_s5 + $0x1a0] sm:$0xff] %vm1454_vm2, %v2131_v55  ;;  %v1313_v59 = vadd.f32 %v1882_v56, %v1808_v54  ;;  %v1304_v60 = vpop.f32.mrb[61].mxu0 }
 0x164   :  { %v2133_v58 = vpop.eup %2132  ;;  %v1809_v61 = vpop.f32.mrb[62].mxu1  ;;  %v1305_v63 = vadd.f32 %v1304_v60, %v729_v57 }
 0x165   :  { %v2135_v62 = vpop.eup %2134  ;;  %1510 = vst.msk [vmem:[%s2798_s5 + $0x1b8] sm:$0xff] %vm1454_vm2, %v2133_v58  ;;  %v1883_v0 = vpop.f32.mrb[62].mxu0  ;;  %v1388_v2 = vadd.f32 %v2471_v14, %v1313_v59 }
 0x166   :  { %v732_v1 = vpop.f32.mrb[63].mxu1  ;;  %1508 = vst.msk [vmem:[%s2798_s5 + $0x1a8] sm:$0xff] %vm1454_vm2, %v2135_v62  ;;  %v1316_v3 = vadd.f32 %v1883_v0, %v1809_v61  ;;  %v1307_v4 = vpop.f32.mrb[63].mxu0  ;;  %v1386_v5 = vadd.f32 %v2471_v14, %v1305_v63 }
 0x167   :  { %v1308_v6 = vadd.f32 %v1307_v4, %v732_v1  ;;  %2144 = vtanh.f32 %v1388_v2 }
 0x168   :  { %v1389_v7 = vadd.f32 %v2471_v14, %v1316_v3  ;;  %2146 = vtanh.f32 %v1386_v5 }
 0x169   :  { %v1387_v8 = vadd.f32 %v2471_v14, %v1308_v6  ;;  %v2137_v9 = vpop.eup %2136 }
 0x16a   :  { %2148 = vtanh.f32 %v1389_v7  ;;  %v2139_v10 = vpop.eup %2138  ;;  %1513 = vst.msk [vmem:[%s2798_s5 + $0x1d0] sm:$0xff] %vm1454_vm2, %v2137_v9 }
 0x16b   :  { %2150 = vtanh.f32 %v1387_v8  ;;  %1511 = vst.msk [vmem:[%s2798_s5 + $0x1c0] sm:$0xff] %vm1454_vm2, %v2139_v10 }
 0x16c   :  { %v2141_v11 = vpop.eup %2140 }
 0x16d   :  { %v2143_v12 = vpop.eup %2142  ;;  %1514 = vst.msk [vmem:[%s2798_s5 + $0x1d8] sm:$0xff] %vm1454_vm2, %v2141_v11 }
 0x16e   :  { %1512 = vst.msk [vmem:[%s2798_s5 + $0x1c8] sm:$0xff] %vm1454_vm2, %v2143_v12 }
 0x171   :  { %v2145_v14 = vpop.eup %2144 }
 0x172   :  { %v2147_v13 = vpop.eup %2146  ;;  %1517 = vst.msk [vmem:[%s2798_s5 + $0x1f0] sm:$0xff] %vm1454_vm2, %v2145_v14 }
 0x173   :  { %1515 = vst.msk [vmem:[%s2798_s5 + $0x1e0] sm:$0xff] %vm1454_vm2, %v2147_v13 }
 0x174   :  { %v2149_v15 = vpop.eup %2148 }
 0x175   :  { %v2151_v16 = vpop.eup %2150  ;;  %1518 = vst.msk [vmem:[%s2798_s5 + $0x1f8] sm:$0xff] %vm1454_vm2, %v2149_v15 }
 0x176   :  { %1516 = vst.msk [vmem:[%s2798_s5 + $0x1e8] sm:$0xff] %vm1454_vm2, %v2151_v16 }

</bundles_post_ra>
